<compile_context>
chip_gen: v6e
topology: v6e:2x2x1
jax: 0.10.0
libtpu: 0.0.40
codegen_flags: <defaults>
</compile_context>

<pallas_src>
import functools

import jax
import jax.numpy as jnp
import numpy as np
from jax.experimental import pallas as pl
from jax.experimental.pallas import tpu as pltpu


def _shift_lanes(a, delta):
    """out[:, i] = a[:, i + delta], zero-filled past the array ends (static)."""
    if delta == 0:
        return a
    c, m = a.shape
    if delta > 0:
        return jnp.concatenate(
            [a[:, delta:], jnp.zeros((c, delta), a.dtype)], axis=1)
    return jnp.concatenate(
        [jnp.zeros((c, -delta), a.dtype), a[:, :m + delta]], axis=1)


def _block_flows_kernel(patches_ref, xb_ref, masks_ref, w1_ref, b1_ref,
                        w2_ref, b2_ref, w3_ref, b3_ref, out_ref, *, H, W):
    """One flow (= one grid step) of the fused Block forward.

    Layout: activations are (channels, M) with M = B*H*W on the lane axis.

    patches_ref : (9*Ca, M)    im2col of the flow-invariant first half
    xb_ref      : (Ca,  M)     second half of the input (read at flow 0 only)
    masks_ref   : (9,   M)     per-tap boundary masks (0/1), flow-invariant
    w1_ref      : (1, F, 9*Ca) conv1 weights (3x3, Ca->F), flow-stacked
    b1_ref      : (1, F, 1)
    w2_ref      : (1, F, F)    conv2 weights (1x1, F->F), [out, in]
    b2_ref      : (1, F, 1)
    w3_ref      : (1, 9*C, F)  conv3 weights (3x3, F->C), row = tap*C + c
    b3_ref      : (1, C, 1)
    out_ref     : (Ca, M)      running out_b, VMEM-resident across all flows
    """
    k = pl.program_id(0)
    Ca, M = out_ref.shape
    C = 2 * Ca

    @pl.when(k == 0)
    def _init():
        out_ref[...] = xb_ref[...]

    # ---- conv1: 3x3 Ca->F as ONE im2col matmul (+bias, ReLU) --------------
    h = jnp.dot(w1_ref[0], patches_ref[...],
                preferred_element_type=jnp.float32)          # (F, M)
    h = jnp.maximum(h + b1_ref[0], 0.0)

    # ---- conv2: 1x1 F->F == plain matmul (+bias, ReLU); FLOP-dominant -----
    h = jnp.dot(w2_ref[0], h, preferred_element_type=jnp.float32)   # (F, M)
    h = jnp.maximum(h + b2_ref[0], 0.0)

    # ---- conv3 (ZeroConv2d, 3x3 "same", F->C) ------------------------------
    # One K=F matmul computes every tap's contribution; the 9 taps are then
    # combined with static lane shifts + precomputed boundary masks.
    tap_out = jnp.dot(w3_ref[0], h, preferred_element_type=jnp.float32)  # (9C, M)

    net = jnp.zeros((C, M), jnp.float32)
    for dh in range(3):
        for dw in range(3):
            tap = dh * 3 + dw
            delta = (dh - 1) * W + (dw - 1)
            contrib = _shift_lanes(tap_out[tap * C:(tap + 1) * C, :], delta)
            net = net + contrib * masks_ref[pl.ds(tap, 1), :]
    net = net + b3_ref[0]                                    # (C, M)

    # ---- affine coupling: out_b <- (out_b + t) * sigmoid(log_s + 2) -------
    log_s = net[:Ca, :]
    t = net[Ca:, :]
    s = jax.nn.sigmoid(log_s + 2.0)
    out_ref[...] = ((out_ref[...] + t) * s).astype(out_ref.dtype)


def _pack_params(params, Ca, C):
    """Stack per-flow conv params into the kernel's transposed layouts."""
    F_ = params[0][0].shape[-1]
    W1, B1, W2, B2, W3, B3 = [], [], [], [], [], []
    for (w1, b1, w2, b2, w3, b3) in params:
        W1.append(jnp.transpose(w1.reshape(9 * Ca, F_)))               # (F, 9Ca)
        B1.append(b1.reshape(F_, 1))
        W2.append(w2)                                                  # (F, F) [out,in]
        B2.append(b2.reshape(F_, 1))
        W3.append(jnp.transpose(w3, (0, 1, 3, 2)).reshape(9 * C, F_))  # (9C, F)
        B3.append(b3.reshape(C, 1))
    return (jnp.stack(W1), jnp.stack(B1), jnp.stack(W2),
            jnp.stack(B2), jnp.stack(W3), jnp.stack(B3))


def _make_tap_masks(B, H, W):
    """Per-tap boundary validity masks in the flattened (M,) lane layout."""
    M = B * H * W
    col = np.arange(M)
    xpos = (col // W) % H            # output row within its image
    ypos = col % W                   # output col within its image
    masks = np.ones((9, M), np.float32)
    for dh in range(3):
        for dw in range(3):
            tap = dh * 3 + dw
            valid = np.ones((M,), bool)
            if dh == 0:
                valid &= xpos >= 1
            if dh == 2:
                valid &= xpos <= H - 2
            if dw == 0:
                valid &= ypos >= 1
            if dw == 2:
                valid &= ypos <= W - 2
            masks[tap] = valid.astype(np.float32)
    return jnp.asarray(masks)


def block_forward(x_nchw, params):
    """Block.forward: n_flow sequential AffineCoupling flows (NCHW in/out)."""
    B, C, H, W = x_nchw.shape
    Ca = C // 2
    M = B * H * W
    n_flow = len(params)
    F_ = params[0][0].shape[-1]

    xa = x_nchw[:, :Ca]                 # pass-through half (flow-invariant)
    xb = x_nchw[:, Ca:]

    # im2col patches for conv1 (built once; xa never changes across flows).
    xa_pad = jnp.pad(xa, ((0, 0), (0, 0), (1, 1), (1, 1)))
    patches = jnp.stack([xa_pad[:, :, dh:dh + H, dw:dw + W]
                         for dh in range(3) for dw in range(3)], axis=0)
    patches = patches.transpose(0, 2, 1, 3, 4).reshape(9 * Ca, M)   # (9Ca, M)
    xb_t = xb.transpose(1, 0, 2, 3).reshape(Ca, M)                  # (Ca,  M)
    masks = _make_tap_masks(B, H, W)                                # (9,   M)

    W1, B1, W2, B2, W3, B3 = _pack_params(params, Ca, C)

    kernel = functools.partial(_block_flows_kernel, H=H, W=W)
    grid_spec = pltpu.PrefetchScalarGridSpec(
        num_scalar_prefetch=0,
        grid=(n_flow,),
        in_specs=[
            pl.BlockSpec((9 * Ca, M), lambda k: (0, 0)),      # VMEM-resident
            pl.BlockSpec((Ca, M), lambda k: (0, 0)),          # VMEM-resident
            pl.BlockSpec((9, M), lambda k: (0, 0)),           # VMEM-resident
            pl.BlockSpec((1, F_, 9 * Ca), lambda k: (k, 0, 0)),
            pl.BlockSpec((1, F_, 1), lambda k: (k, 0, 0)),
            pl.BlockSpec((1, F_, F_), lambda k: (k, 0, 0)),   # streamed per flow
            pl.BlockSpec((1, F_, 1), lambda k: (k, 0, 0)),
            pl.BlockSpec((1, 9 * C, F_), lambda k: (k, 0, 0)),
            pl.BlockSpec((1, C, 1), lambda k: (k, 0, 0)),
        ],
        out_specs=pl.BlockSpec((Ca, M), lambda k: (0, 0)),    # resident accumulator
    )
    out_b_t = pl.pallas_call(
        kernel,
        out_shape=jax.ShapeDtypeStruct((Ca, M), x_nchw.dtype),
        grid_spec=grid_spec,
        compiler_params=pltpu.CompilerParams(
            dimension_semantics=("arbitrary",)),
    )(patches, xb_t, masks, W1, B1, W2, B2, W3, B3)

    out_b = out_b_t.reshape(Ca, B, H, W).transpose(1, 0, 2, 3)
    return jnp.concatenate([xa, out_b], axis=1)               # (B, C, H, W)


def init_block_params(key, in_channel, n_flow, filter_size=512):
    """Deterministic parameter init matching the module's shapes."""
    C = in_channel * 4            # squeeze_dim
    Ca = C // 2
    params = []
    for _ in range(n_flow):
        k1, k2, k3, k4, key = jax.random.split(key, 5)
        # net[0]: Conv2d(C//2, filter, 3, pad=1): weight ~ N(0,0.05), bias 0
        w1 = jax.random.normal(k1, (3, 3, Ca, filter_size), jnp.float32) * 0.05
        b1 = jnp.zeros((filter_size,), jnp.float32)
        # net[2]: Conv2d(filter, filter, 1): weight ~ N(0,0.05), bias 0
        w2 = jax.random.normal(k2, (filter_size, filter_size), jnp.float32) * 0.05
        b2 = jnp.zeros((filter_size,), jnp.float32)
        # net[4]: ZeroConv2d's inner Conv2d(filter, C, 3) — deterministic small init
        w3 = jax.random.normal(k3, (3, 3, filter_size, C), jnp.float32) * 0.02
        b3 = jax.random.normal(k4, (C,), jnp.float32) * 0.02
        params.append((w1, b1, w2, b2, w3, b3))
    return params


# ---------------- pure-JAX reference for verification ------------------------
def _conv_nhwc(x, w_hwio, b, padding):
    y = jax.lax.conv_general_dilated(
        x, w_hwio, window_strides=(1, 1),
        padding=[(padding, padding), (padding, padding)],
        dimension_numbers=("NHWC", "HWIO", "NHWC"))
    return y + b.reshape(1, 1, 1, -1)


def block_ref(x_nchw, params):
    x = jnp.transpose(x_nchw, (0, 2, 3, 1))
    for (w1, b1, w2, b2, w3, b3) in params:
        Ca = x.shape[-1] // 2
        xa, xb = x[..., :Ca], x[..., Ca:]
        h = jax.nn.relu(_conv_nhwc(xa, w1, b1, 1))
        w2_hwio = jnp.transpose(w2).reshape(1, 1, w2.shape[1], w2.shape[0])
        h = jax.nn.relu(_conv_nhwc(h, w2_hwio, b2, 0))
        net = _conv_nhwc(h, w3, b3, 1)
        log_s, t = net[..., :Ca], net[..., Ca:]
        s = jax.nn.sigmoid(log_s + 2.0)
        x = jnp.concatenate([xa, (xb + t) * s], axis=-1)
    return jnp.transpose(x, (0, 3, 1, 2))


if __name__ == "__main__":
    key = jax.random.PRNGKey(0)
    kx, kp = jax.random.split(key)

    in_channel, n_flow = 1, 2
    B, H, W = 2, 16, 16
    C = in_channel * 4                    # squeeze_dim = 4 channels

    # PyTorch-convention NCHW input
    x = jax.random.normal(kx, (B, C, H, W), jnp.float32)
    params = init_block_params(kp, in_channel, n_flow, filter_size=512)

    fwd = jax.jit(block_forward)
    out = jax.block_until_ready(fwd(x, params))
    ref = jax.block_until_ready(block_ref(x, params))

    assert out.shape == (B, C, H, W)
    np.testing.assert_allclose(np.asarray(out), np.asarray(ref),
                               rtol=2e-4, atol=2e-4)
    print("KERNEL_OK")
</pallas_src>

<mosaic_0001>
module attributes {stable_mosaic.version = 11 : i64} {
  func.func @_block_flows_kernel(%arg0: i32, %arg1: memref<18x512xf32, #tpu.memory_space<vmem>>, %arg2: memref<2x512xf32, #tpu.memory_space<vmem>>, %arg3: memref<9x512xf32, #tpu.memory_space<vmem>>, %arg4: memref<1x512x18xf32, #tpu.memory_space<vmem>>, %arg5: memref<1x512x1xf32, #tpu.memory_space<vmem>>, %arg6: memref<1x512x512xf32, #tpu.memory_space<vmem>>, %arg7: memref<1x512x1xf32, #tpu.memory_space<vmem>>, %arg8: memref<1x36x512xf32, #tpu.memory_space<vmem>>, %arg9: memref<1x4x1xf32, #tpu.memory_space<vmem>>, %arg10: memref<2x512xf32, #tpu.memory_space<vmem>>) attributes {dimension_semantics = [#tpu.dimension_semantics<arbitrary>], iteration_bounds = array<i64: 2>, scalar_prefetch = 0 : i64, scratch_operands = 0 : i64, tpu.core_type = #tpu.core_type<tc>, window_params = [{pipeline_mode = #tpu.pipeline_mode<synchronous>, transform_indices = @transform_0, window_bounds = array<i64: 18, 512>}, {pipeline_mode = #tpu.pipeline_mode<synchronous>, transform_indices = @transform_1, window_bounds = array<i64: 2, 512>}, {pipeline_mode = #tpu.pipeline_mode<synchronous>, transform_indices = @transform_2, window_bounds = array<i64: 9, 512>}, {transform_indices = @transform_3, window_bounds = array<i64: 1, 512, 18>}, {transform_indices = @transform_4, window_bounds = array<i64: 1, 512, 1>}, {transform_indices = @transform_5, window_bounds = array<i64: 1, 512, 512>}, {transform_indices = @transform_6, window_bounds = array<i64: 1, 512, 1>}, {transform_indices = @transform_7, window_bounds = array<i64: 1, 36, 512>}, {transform_indices = @transform_8, window_bounds = array<i64: 1, 4, 1>}, {pipeline_mode = #tpu.pipeline_mode<synchronous>, transform_indices = @transform_9, window_bounds = array<i64: 2, 512>}]} {
    %c0_i32 = arith.constant 0 : i32
    %0 = arith.cmpi eq, %arg0, %c0_i32 : i32
    %1 = arith.extui %0 : i1 to i32
    %c0_i32_0 = arith.constant 0 : i32
    %2 = arith.cmpi ne, %1, %c0_i32_0 : i32
    scf.if %2 {
      %c0_49 = arith.constant 0 : index
      %c0_50 = arith.constant 0 : index
      %112 = vector.load %arg2[%c0_49, %c0_50] : memref<2x512xf32, #tpu.memory_space<vmem>>, vector<2x512xf32>
      %c0_51 = arith.constant 0 : index
      %c0_52 = arith.constant 0 : index
      %113 = vector.load %arg10[%c0_51, %c0_52] : memref<2x512xf32, #tpu.memory_space<vmem>>, vector<2x512xf32>
      tpu.vector_store %arg10[%c0_51, %c0_52], %112 {strides = array<i32>} : memref<2x512xf32, #tpu.memory_space<vmem>>, vector<2x512xf32>,
    } else {
    }
    %c0 = arith.constant 0 : index
    %c0_1 = arith.constant 0 : index
    %c0_2 = arith.constant 0 : index
    %3 = vector.load %arg4[%c0, %c0_1, %c0_2] : memref<1x512x18xf32, #tpu.memory_space<vmem>>, vector<1x512x18xf32>
    %4 = vector.shape_cast %3 : vector<1x512x18xf32> to vector<512x18xf32>
    %c0_3 = arith.constant 0 : index
    %c0_4 = arith.constant 0 : index
    %5 = vector.load %arg1[%c0_3, %c0_4] : memref<18x512xf32, #tpu.memory_space<vmem>>, vector<18x512xf32>
    %cst = arith.constant dense<0.000000e+00> : vector<512x512xf32>
    %6 = tpu.matmul %4, %5, %cst {dimension_numbers = #tpu.dot_dimension_numbers<[1], [0], [0], [1], [0, 0, 1, 1], [], []>} : vector<512x18xf32>, vector<18x512xf32>, vector<512x512xf32> -> vector<512x512xf32>
    %c0_5 = arith.constant 0 : index
    %c0_6 = arith.constant 0 : index
    %c0_7 = arith.constant 0 : index
    %7 = vector.load %arg5[%c0_5, %c0_6, %c0_7] : memref<1x512x1xf32, #tpu.memory_space<vmem>>, vector<1x512x1xf32>
    %8 = vector.shape_cast %7 : vector<1x512x1xf32> to vector<512x1xf32>
    %9 = vector.broadcast %8 : vector<512x1xf32> to vector<512x512xf32>
    %10 = arith.addf %6, %9 : vector<512x512xf32>
    %cst_8 = arith.constant 0.000000e+00 : f32
    %11 = vector.broadcast %cst_8 : f32 to vector<512x512xf32>
    %12 = arith.maximumf %10, %11 : vector<512x512xf32>
    %c0_9 = arith.constant 0 : index
    %c0_10 = arith.constant 0 : index
    %c0_11 = arith.constant 0 : index
    %13 = vector.load %arg6[%c0_9, %c0_10, %c0_11] : memref<1x512x512xf32, #tpu.memory_space<vmem>>, vector<1x512x512xf32>
    %14 = vector.shape_cast %13 : vector<1x512x512xf32> to vector<512x512xf32>
    %cst_12 = arith.constant dense<0.000000e+00> : vector<512x512xf32>
    %15 = tpu.matmul %14, %12, %cst_12 {dimension_numbers = #tpu.dot_dimension_numbers<[1], [0], [0], [1], [0, 0, 1, 1], [], []>} : vector<512x512xf32>, vector<512x512xf32>, vector<512x512xf32> -> vector<512x512xf32>
    %c0_13 = arith.constant 0 : index
    %c0_14 = arith.constant 0 : index
    %c0_15 = arith.constant 0 : index
    %16 = vector.load %arg7[%c0_13, %c0_14, %c0_15] : memref<1x512x1xf32, #tpu.memory_space<vmem>>, vector<1x512x1xf32>
    %17 = vector.shape_cast %16 : vector<1x512x1xf32> to vector<512x1xf32>
    %18 = vector.broadcast %17 : vector<512x1xf32> to vector<512x512xf32>
    %19 = arith.addf %15, %18 : vector<512x512xf32>
    %cst_16 = arith.constant 0.000000e+00 : f32
    %20 = vector.broadcast %cst_16 : f32 to vector<512x512xf32>
    %21 = arith.maximumf %19, %20 : vector<512x512xf32>
    %c0_17 = arith.constant 0 : index
    %c0_18 = arith.constant 0 : index
    %c0_19 = arith.constant 0 : index
    %22 = vector.load %arg8[%c0_17, %c0_18, %c0_19] : memref<1x36x512xf32, #tpu.memory_space<vmem>>, vector<1x36x512xf32>
    %23 = vector.shape_cast %22 : vector<1x36x512xf32> to vector<36x512xf32>
    %cst_20 = arith.constant dense<0.000000e+00> : vector<36x512xf32>
    %24 = tpu.matmul %23, %21, %cst_20 {dimension_numbers = #tpu.dot_dimension_numbers<[1], [0], [0], [1], [0, 0, 1, 1], [], []>} : vector<36x512xf32>, vector<512x512xf32>, vector<36x512xf32> -> vector<36x512xf32>
    %cst_21 = arith.constant 0.000000e+00 : f32
    %25 = vector.broadcast %cst_21 : f32 to vector<4x512xf32>
    %26 = vector.extract_strided_slice %24 {offsets = [0, 0], sizes = [4, 512], strides = [1, 1]} : vector<36x512xf32> to vector<4x512xf32>
    %cst_22 = arith.constant 0.000000e+00 : f32
    %27 = vector.broadcast %cst_22 : f32 to vector<4x17xf32>
    %28 = vector.extract_strided_slice %26 {offsets = [0, 0], sizes = [4, 495], strides = [1, 1]} : vector<4x512xf32> to vector<4x495xf32>
    %29 = tpu.concatenate %27, %28 in 1 : vector<4x17xf32>, vector<4x495xf32> -> vector<4x512xf32>
    %c0_23 = arith.constant 0 : index
    %c0_24 = arith.constant 0 : index
    %30 = vector.load %arg3[%c0_23, %c0_24] : memref<9x512xf32, #tpu.memory_space<vmem>>, vector<1x512xf32>
    %31 = vector.broadcast %30 : vector<1x512xf32> to vector<4x512xf32>
    %32 = arith.mulf %29, %31 : vector<4x512xf32>
    %33 = arith.addf %25, %32 : vector<4x512xf32>
    %34 = vector.extract_strided_slice %24 {offsets = [4, 0], sizes = [4, 512], strides = [1, 1]} : vector<36x512xf32> to vector<4x512xf32>
    %cst_25 = arith.constant 0.000000e+00 : f32
    %35 = vector.broadcast %cst_25 : f32 to vector<4x16xf32>
    %36 = vector.extract_strided_slice %34 {offsets = [0, 0], sizes = [4, 496], strides = [1, 1]} : vector<4x512xf32> to vector<4x496xf32>
    %37 = tpu.concatenate %35, %36 in 1 : vector<4x16xf32>, vector<4x496xf32> -> vector<4x512xf32>
    %c1 = arith.constant 1 : index
    %c0_26 = arith.constant 0 : index
    %38 = vector.load %arg3[%c1, %c0_26] : memref<9x512xf32, #tpu.memory_space<vmem>>, vector<1x512xf32>
    %39 = vector.broadcast %38 : vector<1x512xf32> to vector<4x512xf32>
    %40 = arith.mulf %37, %39 : vector<4x512xf32>
    %41 = arith.addf %33, %40 : vector<4x512xf32>
    %42 = vector.extract_strided_slice %24 {offsets = [8, 0], sizes = [4, 512], strides = [1, 1]} : vector<36x512xf32> to vector<4x512xf32>
    %cst_27 = arith.constant 0.000000e+00 : f32
    %43 = vector.broadcast %cst_27 : f32 to vector<4x15xf32>
    %44 = vector.extract_strided_slice %42 {offsets = [0, 0], sizes = [4, 497], strides = [1, 1]} : vector<4x512xf32> to vector<4x497xf32>
    %45 = tpu.concatenate %43, %44 in 1 : vector<4x15xf32>, vector<4x497xf32> -> vector<4x512xf32>
    %c2 = arith.constant 2 : index
    %c0_28 = arith.constant 0 : index
    %46 = vector.load %arg3[%c2, %c0_28] : memref<9x512xf32, #tpu.memory_space<vmem>>, vector<1x512xf32>
    %47 = vector.broadcast %46 : vector<1x512xf32> to vector<4x512xf32>
    %48 = arith.mulf %45, %47 : vector<4x512xf32>
    %49 = arith.addf %41, %48 : vector<4x512xf32>
    %50 = vector.extract_strided_slice %24 {offsets = [12, 0], sizes = [4, 512], strides = [1, 1]} : vector<36x512xf32> to vector<4x512xf32>
    %cst_29 = arith.constant 0.000000e+00 : f32
    %51 = vector.broadcast %cst_29 : f32 to vector<4x1xf32>
    %52 = vector.extract_strided_slice %50 {offsets = [0, 0], sizes = [4, 511], strides = [1, 1]} : vector<4x512xf32> to vector<4x511xf32>
    %53 = tpu.concatenate %51, %52 in 1 : vector<4x1xf32>, vector<4x511xf32> -> vector<4x512xf32>
    %c3 = arith.constant 3 : index
    %c0_30 = arith.constant 0 : index
    %54 = vector.load %arg3[%c3, %c0_30] : memref<9x512xf32, #tpu.memory_space<vmem>>, vector<1x512xf32>
    %55 = vector.broadcast %54 : vector<1x512xf32> to vector<4x512xf32>
    %56 = arith.mulf %53, %55 : vector<4x512xf32>
    %57 = arith.addf %49, %56 : vector<4x512xf32>
    %58 = vector.extract_strided_slice %24 {offsets = [16, 0], sizes = [4, 512], strides = [1, 1]} : vector<36x512xf32> to vector<4x512xf32>
    %c4 = arith.constant 4 : index
    %c0_31 = arith.constant 0 : index
    %59 = vector.load %arg3[%c4, %c0_31] : memref<9x512xf32, #tpu.memory_space<vmem>>, vector<1x512xf32>
    %60 = vector.broadcast %59 : vector<1x512xf32> to vector<4x512xf32>
    %61 = arith.mulf %58, %60 : vector<4x512xf32>
    %62 = arith.addf %57, %61 : vector<4x512xf32>
    %63 = vector.extract_strided_slice %24 {offsets = [20, 0], sizes = [4, 512], strides = [1, 1]} : vector<36x512xf32> to vector<4x512xf32>
    %64 = vector.extract_strided_slice %63 {offsets = [0, 1], sizes = [4, 511], strides = [1, 1]} : vector<4x512xf32> to vector<4x511xf32>
    %cst_32 = arith.constant 0.000000e+00 : f32
    %65 = vector.broadcast %cst_32 : f32 to vector<4x1xf32>
    %66 = tpu.concatenate %64, %65 in 1 : vector<4x511xf32>, vector<4x1xf32> -> vector<4x512xf32>
    %c5 = arith.constant 5 : index
    %c0_33 = arith.constant 0 : index
    %67 = vector.load %arg3[%c5, %c0_33] : memref<9x512xf32, #tpu.memory_space<vmem>>, vector<1x512xf32>
    %68 = vector.broadcast %67 : vector<1x512xf32> to vector<4x512xf32>
    %69 = arith.mulf %66, %68 : vector<4x512xf32>
    %70 = arith.addf %62, %69 : vector<4x512xf32>
    %71 = vector.extract_strided_slice %24 {offsets = [24, 0], sizes = [4, 512], strides = [1, 1]} : vector<36x512xf32> to vector<4x512xf32>
    %72 = vector.extract_strided_slice %71 {offsets = [0, 15], sizes = [4, 497], strides = [1, 1]} : vector<4x512xf32> to vector<4x497xf32>
    %cst_34 = arith.constant 0.000000e+00 : f32
    %73 = vector.broadcast %cst_34 : f32 to vector<4x15xf32>
    %74 = tpu.concatenate %72, %73 in 1 : vector<4x497xf32>, vector<4x15xf32> -> vector<4x512xf32>
    %c6 = arith.constant 6 : index
    %c0_35 = arith.constant 0 : index
    %75 = vector.load %arg3[%c6, %c0_35] : memref<9x512xf32, #tpu.memory_space<vmem>>, vector<1x512xf32>
    %76 = vector.broadcast %75 : vector<1x512xf32> to vector<4x512xf32>
    %77 = arith.mulf %74, %76 : vector<4x512xf32>
    %78 = arith.addf %70, %77 : vector<4x512xf32>
    %79 = vector.extract_strided_slice %24 {offsets = [28, 0], sizes = [4, 512], strides = [1, 1]} : vector<36x512xf32> to vector<4x512xf32>
    %80 = vector.extract_strided_slice %79 {offsets = [0, 16], sizes = [4, 496], strides = [1, 1]} : vector<4x512xf32> to vector<4x496xf32>
    %cst_36 = arith.constant 0.000000e+00 : f32
    %81 = vector.broadcast %cst_36 : f32 to vector<4x16xf32>
    %82 = tpu.concatenate %80, %81 in 1 : vector<4x496xf32>, vector<4x16xf32> -> vector<4x512xf32>
    %c7 = arith.constant 7 : index
    %c0_37 = arith.constant 0 : index
    %83 = vector.load %arg3[%c7, %c0_37] : memref<9x512xf32, #tpu.memory_space<vmem>>, vector<1x512xf32>
    %84 = vector.broadcast %83 : vector<1x512xf32> to vector<4x512xf32>
    %85 = arith.mulf %82, %84 : vector<4x512xf32>
    %86 = arith.addf %78, %85 : vector<4x512xf32>
    %87 = vector.extract_strided_slice %24 {offsets = [32, 0], sizes = [4, 512], strides = [1, 1]} : vector<36x512xf32> to vector<4x512xf32>
    %88 = vector.extract_strided_slice %87 {offsets = [0, 17], sizes = [4, 495], strides = [1, 1]} : vector<4x512xf32> to vector<4x495xf32>
    %cst_38 = arith.constant 0.000000e+00 : f32
    %89 = vector.broadcast %cst_38 : f32 to vector<4x17xf32>
    %90 = tpu.concatenate %88, %89 in 1 : vector<4x495xf32>, vector<4x17xf32> -> vector<4x512xf32>
    %c8 = arith.constant 8 : index
    %c0_39 = arith.constant 0 : index
    %91 = vector.load %arg3[%c8, %c0_39] : memref<9x512xf32, #tpu.memory_space<vmem>>, vector<1x512xf32>
    %92 = vector.broadcast %91 : vector<1x512xf32> to vector<4x512xf32>
    %93 = arith.mulf %90, %92 : vector<4x512xf32>
    %94 = arith.addf %86, %93 : vector<4x512xf32>
    %c0_40 = arith.constant 0 : index
    %c0_41 = arith.constant 0 : index
    %c0_42 = arith.constant 0 : index
    %95 = vector.load %arg9[%c0_40, %c0_41, %c0_42] : memref<1x4x1xf32, #tpu.memory_space<vmem>>, vector<1x4x1xf32>
    %96 = vector.shape_cast %95 : vector<1x4x1xf32> to vector<4x1xf32>
    %97 = vector.broadcast %96 : vector<4x1xf32> to vector<4x512xf32>
    %98 = arith.addf %94, %97 : vector<4x512xf32>
    %99 = vector.extract_strided_slice %98 {offsets = [0, 0], sizes = [2, 512], strides = [1, 1]} : vector<4x512xf32> to vector<2x512xf32>
    %100 = vector.extract_strided_slice %98 {offsets = [2, 0], sizes = [2, 512], strides = [1, 1]} : vector<4x512xf32> to vector<2x512xf32>
    %cst_43 = arith.constant 2.000000e+00 : f32
    %101 = vector.broadcast %cst_43 : f32 to vector<2x512xf32>
    %102 = arith.addf %99, %101 : vector<2x512xf32>
    %103 = arith.negf %102 : vector<2x512xf32>
    %104 = math.exp %103 : vector<2x512xf32>
    %cst_44 = arith.constant 1.000000e+00 : f32
    %105 = vector.broadcast %cst_44 : f32 to vector<2x512xf32>
    %106 = arith.addf %105, %104 : vector<2x512xf32>
    %107 = arith.divf %105, %106 : vector<2x512xf32>
    %c0_45 = arith.constant 0 : index
    %c0_46 = arith.constant 0 : index
    %108 = vector.load %arg10[%c0_45, %c0_46] : memref<2x512xf32, #tpu.memory_space<vmem>>, vector<2x512xf32>
    %109 = arith.addf %108, %100 : vector<2x512xf32>
    %110 = arith.mulf %109, %107 : vector<2x512xf32>
    %c0_47 = arith.constant 0 : index
    %c0_48 = arith.constant 0 : index
    %111 = vector.load %arg10[%c0_47, %c0_48] : memref<2x512xf32, #tpu.memory_space<vmem>>, vector<2x512xf32>
    tpu.vector_store %arg10[%c0_47, %c0_48], %110 {strides = array<i32>} : memref<2x512xf32, #tpu.memory_space<vmem>>, vector<2x512xf32>,
    return
  }
  func.func @transform_0(%arg0: i32) -> (i32, i32) {
    %c0_i32 = arith.constant 0 : i32
    %c0_i32_0 = arith.constant 0 : i32
    %c0_i32_1 = arith.constant 0 : i32
    return %c0_i32, %c0_i32_0 : i32, i32
  }
  func.func @transform_1(%arg0: i32) -> (i32, i32) {
    %c0_i32 = arith.constant 0 : i32
    %c0_i32_0 = arith.constant 0 : i32
    %c0_i32_1 = arith.constant 0 : i32
    return %c0_i32, %c0_i32_0 : i32, i32
  }
  func.func @transform_2(%arg0: i32) -> (i32, i32) {
    %c0_i32 = arith.constant 0 : i32
    %c0_i32_0 = arith.constant 0 : i32
    %c0_i32_1 = arith.constant 0 : i32
    return %c0_i32, %c0_i32_0 : i32, i32
  }
  func.func @transform_3(%arg0: i32) -> (i32, i32, i32) {
    %c0_i32 = arith.constant 0 : i32
    %c0_i32_0 = arith.constant 0 : i32
    %c0_i32_1 = arith.constant 0 : i32
    return %arg0, %c0_i32, %c0_i32_0 : i32, i32, i32
  }
  func.func @transform_4(%arg0: i32) -> (i32, i32, i32) {
    %c0_i32 = arith.constant 0 : i32
    %c0_i32_0 = arith.constant 0 : i32
    %c0_i32_1 = arith.constant 0 : i32
    return %arg0, %c0_i32, %c0_i32_0 : i32, i32, i32
  }
  func.func @transform_5(%arg0: i32) -> (i32, i32, i32) {
    %c0_i32 = arith.constant 0 : i32
    %c0_i32_0 = arith.constant 0 : i32
    %c0_i32_1 = arith.constant 0 : i32
    return %arg0, %c0_i32, %c0_i32_0 : i32, i32, i32
  }
  func.func @transform_6(%arg0: i32) -> (i32, i32, i32) {
    %c0_i32 = arith.constant 0 : i32
    %c0_i32_0 = arith.constant 0 : i32
    %c0_i32_1 = arith.constant 0 : i32
    return %arg0, %c0_i32, %c0_i32_0 : i32, i32, i32
  }
  func.func @transform_7(%arg0: i32) -> (i32, i32, i32) {
    %c0_i32 = arith.constant 0 : i32
    %c0_i32_0 = arith.constant 0 : i32
    %c0_i32_1 = arith.constant 0 : i32
    return %arg0, %c0_i32, %c0_i32_0 : i32, i32, i32
  }
  func.func @transform_8(%arg0: i32) -> (i32, i32, i32) {
    %c0_i32 = arith.constant 0 : i32
    %c0_i32_0 = arith.constant 0 : i32
    %c0_i32_1 = arith.constant 0 : i32
    return %arg0, %c0_i32, %c0_i32_0 : i32, i32, i32
  }
  func.func @transform_9(%arg0: i32) -> (i32, i32) {
    %c0_i32 = arith.constant 0 : i32
    %c0_i32_0 = arith.constant 0 : i32
    %c0_i32_1 = arith.constant 0 : i32
    return %c0_i32, %c0_i32_0 : i32, i32
  }
}

</mosaic_0001>

<bundles_post_ra>
// kernel: block_forward.1
= control target key start
LH: loop header
LB: loop body
LE: loop exit
PB: predicated region body
PF: predicated region fallthrough
CT: control target
= control target key end

     0   :  { %s6511_s30 = smov 0   ;;  %s10653_s0 = inlined_call_operand.vmem [shape: f32[18,512], index: 0, kind: input, shape index: {}]   ;;  %s10654_s1 = inlined_call_operand.vmem [shape: f32[2,512], index: 1, kind: input, shape index: {}]   ;;  %s10655_s2 = inlined_call_operand.vmem [shape: f32[9,512], index: 2, kind: input, shape index: {}]   ;;  %s10656_s3 = inlined_call_operand.vmem [shape: f32[2,512,18], index: 3, kind: input, shape index: {}]   ;;  %s10657_s4 = inlined_call_operand.vmem [shape: f32[2,512,1], index: 4, kind: input, shape index: {}]   ;;  %s10658_s5 = inlined_call_operand.vmem [shape: f32[2,512,512], index: 5, kind: input, shape index: {}]   ;;  %s10659_s6 = inlined_call_operand.vmem [shape: f32[2,512,1], index: 6, kind: input, shape index: {}]   ;;  %s10660_s7 = inlined_call_operand.vmem [shape: f32[2,36,512], index: 7, kind: input, shape index: {}]   ;;  %s10661_s8 = inlined_call_operand.vmem [shape: f32[2,4,1], index: 8, kind: input, shape index: {}]   ;;  %s10662_s9 = inlined_call_operand.vmem [shape: f32[2,512], index: 9, kind: output, shape index: {}]  }
   0x1 LB: > { %s5973_s10 = sadd.s32 4294967295, %s6448_s30   ;;  %p5976_p0 = scmp.ge.s32.totalorder %s6448_s30, 1  ;;  %s6448_s30 = sphi %s6511_s30, %s19_s30  }
   0x2   : > { %p331_p1 = scmp.lt.s32.totalorder %s6448_s30, 3 }
   0x4   : > { %p332_p2 = pnand %p5976_p0, %p331_p1 }
   0x6   : > { %335 = sbr.rel (%p332_p2) target bundleno = 1658 (0x67a), region = 56 }
   0xb   : > { %p386_p3 = scmp.lt.s32.totalorder %s5973_s10, 1  ;;  %p5987_p4 = scmp.ne.s32.totalorder %s5973_s10, 0 }
   0xd   : > { %s387_s11 = scalar_select %p386_p3, %s5973_s10, 1 }
   0xf   : > { %s6134_s12 = sshll.u32 %s387_s11, 9  ;;  %s6136_s13 = sshll.u32 %s387_s11, 11 }
  0x10   : > { %s6522_s16 = scalar_lea.vmem %s10656_s3, %s6134_s12  ;;  %s6527_s19 = scalar_lea.vmem %s10657_s4, %s6134_s12 }
  0x11   : > { %s6532_s22 = scalar_lea.vmem %s10658_s5, %s6136_s13  ;;  %s6537_s25 = scalar_lea.vmem %s10659_s6, %s6134_s12 }
  0x12   : > { %s6138_s26 = smul.u32 160, %s387_s11  ;;  %s5986_s27 = sshll.u32 %s387_s11, 2 }
  0x13   : > { %s6542_s14 = scalar_lea.vmem %s10661_s8, %s5986_s27  ;;  %418 = sbr.rel (%p5987_p4) target bundleno = 26 (0x1a), region = 60 }
  0x14   : > { %s6547_s18 = scalar_lea.vmem %s10660_s7, %s6138_s26 }
  0x18   : > { %v419_v0 = vld [vmem:[%s10654_s1] sm:$0xff] }
  0x19   : > { %420 = vst [vmem:[%s10662_s9] sm:$0xff] %v419_v0 }
  0x1a PF: > { %v494_v1 = vld [vmem:[%s10653_s0 + $0x48] sm:$0x3]  ;;  %vm1074_vm0 = vcmask 1041408   ;;  %v496_v2 = vld [vmem:[%s10653_s0 + $0x58] sm:$0x3]  ;;  %v489_v7 = vld [vmem:[%s10653_s0 + $0x20] sm:$0xff] }
  0x1b   : > { %v490_v3 = vld [vmem:[%s10653_s0 + $0x28] sm:$0xff]  ;;  %5988 = vmatprep.subr.msk.mxu0 %vm1074_vm0, %v494_v1  ;;  %6054 = vmatprep.subr.msk.mxu1 %vm1074_vm0, %v496_v2  ;;  %v493_v4 = vld [vmem:[%s10653_s0 + $0x40] sm:$0x3]  ;;  %v495_v5 = vld [vmem:[%s10653_s0 + $0x50] sm:$0x3]  ;;  %vm881_vm1 = vcmask 146432  }
  0x1c   : > { %v492_v6 = vld [vmem:[%s10653_s0 + $0x38] sm:$0xff]  ;;  %5989 = vmatpush1.msk.msra.mxu0 %vm1074_vm0, %v493_v4  ;;  %6055 = vmatpush1.msk.msra.mxu1 %vm1074_vm0, %v495_v5  ;;  %v491_v8 = vld [vmem:[%s10653_s0 + $0x30] sm:$0xff]  ;;  %v486_v9 = vld [vmem:[%s10653_s0 + $0x8] sm:$0xff]  ;;  %v10668_v14 = vmov 0.0   ;;  %v6451_v18 = vmov 0   ;;  %s6456_s13 = smov 127  }
  0x1d   : > { %1115 = vmatprep.subr.mxu0 %v490_v3  ;;  %1564 = vmatprep.subr.mxu1 %v492_v6  ;;  %v488_v10 = vld [vmem:[%s10653_s0 + $0x18] sm:$0xff]  ;;  %v485_v11 = vld [vmem:[%s10653_s0] sm:$0xff]  ;;  %v487_v12 = vld [vmem:[%s10653_s0 + $0x10] sm:$0xff]  ;;  %s6457_s20 = smov 113   ;;  %s6458_s12 = smov 112   ;;  %vm5345_vm2 = vcmask 138240  }
  0x1e   : > { %1116 = vmatpush1.msra.mxu0 %v489_v7  ;;  %1565 = vmatpush1.msra.mxu1 %v491_v8  ;;  %v421_v13 = vld [vmem:[%s6522_s16] sm:$0xff]  ;;  %v512_v15 = vld [vmem:[%s6527_s19 + $0x78] sm:$0xff]  ;;  %v422_v17 = vld [vmem:[%s6522_s16 + $0x8] sm:$0xff]  ;;  %s6459_s21 = smov 111   ;;  %vm5396_vm3 = vcmask 130048   ;;  %vm5448_vm4 = vcmask 121856  }
  0x1f   : > { %1117 = vmatprep.subr.mxu0 %v486_v9  ;;  %1566 = vmatprep.subr.mxu1 %v488_v10  ;;  %v544_v16 = vld [vmem:[%s6527_s19 + $0x178] sm:$0xff]  ;;  %v511_v19 = vld [vmem:[%s6527_s19 + $0x70] sm:$0xff]  ;;  %v510_v20 = vld [vmem:[%s6527_s19 + $0x68] sm:$0xff]  ;;  %vm5500_vm5 = vcmask 7168   ;;  %vm5583_vm6 = vcmask 1039360   ;;  %vm5647_vm7 = vcmask 924672  }
  0x20   : > { %1118 = vmatpush1.msra.mxu0 %v485_v11  ;;  %1151 = vmatprep.mubr.f32.mxu0 %v10668_v14  ;;  %v423_v21 = vld [vmem:[%s6522_s16 + $0x10] sm:$0xff]  ;;  %v509_v23 = vld [vmem:[%s6527_s19 + $0x60] sm:$0xff]  ;;  %v424_v24 = vld [vmem:[%s6522_s16 + $0x18] sm:$0xff]  ;;  %vm5695_vm8 = vcmask 916480   ;;  %vm5759_vm9 = vcmask 908288  }
  0x21   : > { %1567 = vmatpush1.msra.mxu1 %v487_v12  ;;  %1600 = vmatprep.mubr.f32.mxu1 %v10668_v14  ;;  %v543_v22 = vld [vmem:[%s6527_s19 + $0x170] sm:$0xff]  ;;  %v542_v25 = vld [vmem:[%s6527_s19 + $0x168] sm:$0xff]  ;;  %v508_v26 = vld [vmem:[%s6527_s19 + $0x58] sm:$0xff] }
  0x22   : > { %5990 = vmatmul.mubr.msk.f32.vlgmr.msra.gmra.mxu0 %vm881_vm1, %v421_v13  ;;  %6056 = vmatmul.mubr.msk.f32.vlgmr.msra.gmra.mxu1 %vm881_vm1, %v421_v13  ;;  %v425_v27 = vld [vmem:[%s6522_s16 + $0x20] sm:$0xff]  ;;  %v507_v29 = vld [vmem:[%s6527_s19 + $0x50] sm:$0xff]  ;;  %v426_v30 = vld [vmem:[%s6522_s16 + $0x28] sm:$0xff] }
  0x23   : > { %1157 = vmatprep.mubr.f32.mxu0 %v10668_v14  ;;  %1606 = vmatprep.mubr.f32.mxu1 %v10668_v14  ;;  %v541_v28 = vld [vmem:[%s6527_s19 + $0x160] sm:$0xff]  ;;  %v540_v31 = vld [vmem:[%s6527_s19 + $0x158] sm:$0xff]  ;;  %v506_v32 = vld [vmem:[%s6527_s19 + $0x48] sm:$0xff] }
  0x24   : > { %6158 = vset.pattern.permute.xlu0 %v6451_v18  ;;  %6159 = vset.pattern.permute.xlu1 %v6451_v18  ;;  %v427_v33 = vld [vmem:[%s6522_s16 + $0x30] sm:$0xff]  ;;  %v505_v35 = vld [vmem:[%s6527_s19 + $0x40] sm:$0xff]  ;;  %v428_v36 = vld [vmem:[%s6522_s16 + $0x38] sm:$0xff] }
  0x25   : > { %638 = vperm.xlu0 %6158, %v512_v15   ;;  %798 = vperm.xlu1 %6159, %v544_v16   ;;  %v539_v34 = vld [vmem:[%s6527_s19 + $0x150] sm:$0xff]  ;;  %v538_v37 = vld [vmem:[%s6527_s19 + $0x148] sm:$0xff]  ;;  %v504_v38 = vld [vmem:[%s6527_s19 + $0x38] sm:$0xff] }
  0x26   : > { %5991 = vmatmul.mubr.msk.f32.gmra.mxu0 %vm881_vm1, %v422_v17  ;;  %6057 = vmatmul.mubr.msk.f32.gmra.mxu1 %vm881_vm1, %v422_v17  ;;  %v429_v39 = vld [vmem:[%s6522_s16 + $0x40] sm:$0xff]  ;;  %v503_v41 = vld [vmem:[%s6527_s19 + $0x30] sm:$0xff]  ;;  %v430_v42 = vld [vmem:[%s6522_s16 + $0x48] sm:$0xff] }
  0x27   : > { %1163 = vmatprep.mubr.f32.mxu0 %v10668_v14  ;;  %1612 = vmatprep.mubr.f32.mxu1 %v10668_v14  ;;  %v537_v40 = vld [vmem:[%s6527_s19 + $0x140] sm:$0xff]  ;;  %v536_v43 = vld [vmem:[%s6527_s19 + $0x138] sm:$0xff]  ;;  %v502_v44 = vld [vmem:[%s6527_s19 + $0x28] sm:$0xff] }
  0x28   : > { %v431_v45 = vld [vmem:[%s6522_s16 + $0x50] sm:$0xff]  ;;  %v501_v47 = vld [vmem:[%s6527_s19 + $0x20] sm:$0xff]  ;;  %v432_v48 = vld [vmem:[%s6522_s16 + $0x58] sm:$0xff] }
  0x29   : > { %633 = vperm.xlu0 %6158, %v511_v19   ;;  %628 = vperm.xlu1 %6159, %v510_v20   ;;  %v535_v46 = vld [vmem:[%s6527_s19 + $0x130] sm:$0xff]  ;;  %v534_v49 = vld [vmem:[%s6527_s19 + $0x128] sm:$0xff]  ;;  %v500_v50 = vld [vmem:[%s6527_s19 + $0x18] sm:$0xff] }
  0x2a   : > { %5992 = vmatmul.mubr.msk.f32.gmra.mxu0 %vm881_vm1, %v423_v21  ;;  %6058 = vmatmul.mubr.msk.f32.gmra.mxu1 %vm881_vm1, %v423_v21  ;;  %v433_v51 = vld [vmem:[%s6522_s16 + $0x60] sm:$0xff]  ;;  %v499_v53 = vld [vmem:[%s6527_s19 + $0x10] sm:$0xff]  ;;  %v434_v54 = vld [vmem:[%s6522_s16 + $0x68] sm:$0xff] }
  0x2b   : > { %1169 = vmatprep.mubr.f32.mxu0 %v10668_v14  ;;  %1618 = vmatprep.mubr.f32.mxu1 %v10668_v14  ;;  %v533_v52 = vld [vmem:[%s6527_s19 + $0x120] sm:$0xff]  ;;  %v532_v55 = vld [vmem:[%s6527_s19 + $0x118] sm:$0xff]  ;;  %v498_v56 = vld [vmem:[%s6527_s19 + $0x8] sm:$0xff] }
  0x2c   : > { %v435_v57 = vld [vmem:[%s6522_s16 + $0x70] sm:$0xff]  ;;  %v497_v59 = vld [vmem:[%s6527_s19] sm:$0xff]  ;;  %v436_v60 = vld [vmem:[%s6522_s16 + $0x78] sm:$0xff] }
  0x2d   : > { %793 = vperm.xlu0 %6158, %v543_v22   ;;  %623 = vperm.xlu1 %6159, %v509_v23   ;;  %v531_v58 = vld [vmem:[%s6527_s19 + $0x110] sm:$0xff]  ;;  %v530_v61 = vld [vmem:[%s6527_s19 + $0x108] sm:$0xff]  ;;  %v528_v62 = vld [vmem:[%s6527_s19 + $0xf8] sm:$0xff] }
  0x2e   : > { %5993 = vmatmul.mubr.msk.f32.gmra.mxu0 %vm881_vm1, %v424_v24  ;;  %6059 = vmatmul.mubr.msk.f32.gmra.mxu1 %vm881_vm1, %v424_v24  ;;  %v437_v63 = vld [vmem:[%s6522_s16 + $0x80] sm:$0xff]  ;;  %v527_v1 = vld [vmem:[%s6527_s19 + $0xf0] sm:$0xff]  ;;  %v438_v2 = vld [vmem:[%s6522_s16 + $0x88] sm:$0xff] }
  0x2f   : > { %1175 = vmatprep.mubr.f32.mxu0 %v10668_v14  ;;  %1624 = vmatprep.mubr.f32.mxu1 %v10668_v14  ;;  %v529_v0 = vld [vmem:[%s6527_s19 + $0x100] sm:$0xff]  ;;  %v560_v3 = vld [vmem:[%s6527_s19 + $0x1f8] sm:$0xff]  ;;  %v526_v4 = vld [vmem:[%s6527_s19 + $0xe8] sm:$0xff] }
  0x30   : > { %v439_v5 = vld [vmem:[%s6522_s16 + $0x90] sm:$0xff]  ;;  %v525_v7 = vld [vmem:[%s6527_s19 + $0xe0] sm:$0xff]  ;;  %v440_v8 = vld [vmem:[%s6522_s16 + $0x98] sm:$0xff] }
  0x31   : > { %788 = vperm.xlu0 %6158, %v542_v25   ;;  %618 = vperm.xlu1 %6159, %v508_v26   ;;  %v559_v6 = vld [vmem:[%s6527_s19 + $0x1f0] sm:$0xff]  ;;  %v558_v9 = vld [vmem:[%s6527_s19 + $0x1e8] sm:$0xff]  ;;  %v524_v10 = vld [vmem:[%s6527_s19 + $0xd8] sm:$0xff] }
  0x32   : > { %5994 = vmatmul.mubr.msk.f32.gmra.mxu0 %vm881_vm1, %v425_v27  ;;  %6060 = vmatmul.mubr.msk.f32.gmra.mxu1 %vm881_vm1, %v425_v27  ;;  %v441_v11 = vld [vmem:[%s6522_s16 + $0xa0] sm:$0xff]  ;;  %v523_v13 = vld [vmem:[%s6527_s19 + $0xd0] sm:$0xff]  ;;  %v442_v15 = vld [vmem:[%s6522_s16 + $0xa8] sm:$0xff] }
  0x33   : > { %1181 = vmatprep.mubr.f32.mxu0 %v10668_v14  ;;  %1630 = vmatprep.mubr.f32.mxu1 %v10668_v14  ;;  %v557_v12 = vld [vmem:[%s6527_s19 + $0x1e0] sm:$0xff]  ;;  %v556_v16 = vld [vmem:[%s6527_s19 + $0x1d8] sm:$0xff]  ;;  %v522_v17 = vld [vmem:[%s6527_s19 + $0xc8] sm:$0xff] }
  0x34   : > { %v443_v18 = vld [vmem:[%s6522_s16 + $0xb0] sm:$0xff]  ;;  %v521_v20 = vld [vmem:[%s6527_s19 + $0xc0] sm:$0xff]  ;;  %v444_v21 = vld [vmem:[%s6522_s16 + $0xb8] sm:$0xff] }
  0x35   : > { %783 = vperm.xlu0 %6158, %v541_v28   ;;  %613 = vperm.xlu1 %6159, %v507_v29   ;;  %v555_v19 = vld [vmem:[%s6527_s19 + $0x1d0] sm:$0xff]  ;;  %v554_v22 = vld [vmem:[%s6527_s19 + $0x1c8] sm:$0xff]  ;;  %v520_v23 = vld [vmem:[%s6527_s19 + $0xb8] sm:$0xff] }
  0x36   : > { %5995 = vmatmul.mubr.msk.f32.gmra.mxu0 %vm881_vm1, %v426_v30  ;;  %6061 = vmatmul.mubr.msk.f32.gmra.mxu1 %vm881_vm1, %v426_v30  ;;  %v445_v24 = vld [vmem:[%s6522_s16 + $0xc0] sm:$0xff]  ;;  %v519_v26 = vld [vmem:[%s6527_s19 + $0xb0] sm:$0xff]  ;;  %v446_v27 = vld [vmem:[%s6522_s16 + $0xc8] sm:$0xff] }
  0x37   : > { %1187 = vmatprep.mubr.f32.mxu0 %v10668_v14  ;;  %1636 = vmatprep.mubr.f32.mxu1 %v10668_v14  ;;  %v553_v25 = vld [vmem:[%s6527_s19 + $0x1c0] sm:$0xff]  ;;  %v552_v28 = vld [vmem:[%s6527_s19 + $0x1b8] sm:$0xff]  ;;  %v518_v29 = vld [vmem:[%s6527_s19 + $0xa8] sm:$0xff] }
  0x38   : > { %v447_v30 = vld [vmem:[%s6522_s16 + $0xd0] sm:$0xff] }
  0x39   : > { %778 = vperm.xlu0 %6158, %v540_v31   ;;  %608 = vperm.xlu1 %6159, %v506_v32   ;;  %v551_v31 = vld [vmem:[%s6527_s19 + $0x1b0] sm:$0xff]  ;;  %v517_v32 = vld [vmem:[%s6527_s19 + $0xa0] sm:$0xff] }
  0x3a   : > { %5996 = vmatmul.mubr.msk.f32.gmra.mxu0 %vm881_vm1, %v427_v33  ;;  %6062 = vmatmul.mubr.msk.f32.gmra.mxu1 %vm881_vm1, %v427_v33  ;;  %v448_v33 = vld [vmem:[%s6522_s16 + $0xd8] sm:$0xff] }
  0x3b   : > { %1193 = vmatprep.mubr.f32.mxu0 %v10668_v14  ;;  %1642 = vmatprep.mubr.f32.mxu1 %v10668_v14 }
  0x3d   : > { %773 = vperm.xlu0 %6158, %v539_v34   ;;  %603 = vperm.xlu1 %6159, %v505_v35   ;;  %v550_v34 = vld [vmem:[%s6527_s19 + $0x1a8] sm:$0xff]  ;;  %v516_v35 = vld [vmem:[%s6527_s19 + $0x98] sm:$0xff] }
  0x3e   : > { %5997 = vmatmul.mubr.msk.f32.gmra.mxu0 %vm881_vm1, %v428_v36  ;;  %6063 = vmatmul.mubr.msk.f32.gmra.mxu1 %vm881_vm1, %v428_v36  ;;  %v449_v36 = vld [vmem:[%s6522_s16 + $0xe0] sm:$0xff] }
  0x3f   : > { %1199 = vmatprep.mubr.f32.mxu0 %v10668_v14  ;;  %1648 = vmatprep.mubr.f32.mxu1 %v10668_v14 }
  0x41   : > { %768 = vperm.xlu0 %6158, %v538_v37   ;;  %598 = vperm.xlu1 %6159, %v504_v38   ;;  %v549_v37 = vld [vmem:[%s6527_s19 + $0x1a0] sm:$0xff]  ;;  %v515_v38 = vld [vmem:[%s6527_s19 + $0x90] sm:$0xff] }
  0x42   : > { %5998 = vmatmul.mubr.msk.f32.gmra.mxu0 %vm881_vm1, %v429_v39  ;;  %6064 = vmatmul.mubr.msk.f32.gmra.mxu1 %vm881_vm1, %v429_v39  ;;  %v450_v39 = vld [vmem:[%s6522_s16 + $0xe8] sm:$0xff] }
  0x43   : > { %1205 = vmatprep.mubr.f32.mxu0 %v10668_v14  ;;  %1654 = vmatprep.mubr.f32.mxu1 %v10668_v14 }
  0x45   : > { %763 = vperm.xlu0 %6158, %v537_v40   ;;  %593 = vperm.xlu1 %6159, %v503_v41   ;;  %v548_v40 = vld [vmem:[%s6527_s19 + $0x198] sm:$0xff]  ;;  %v514_v41 = vld [vmem:[%s6527_s19 + $0x88] sm:$0xff] }
  0x46   : > { %5999 = vmatmul.mubr.msk.f32.gmra.mxu0 %vm881_vm1, %v430_v42  ;;  %6065 = vmatmul.mubr.msk.f32.gmra.mxu1 %vm881_vm1, %v430_v42  ;;  %v451_v42 = vld [vmem:[%s6522_s16 + $0xf0] sm:$0xff] }
  0x47   : > { %1211 = vmatprep.mubr.f32.mxu0 %v10668_v14  ;;  %1660 = vmatprep.mubr.f32.mxu1 %v10668_v14 }
  0x49   : > { %758 = vperm.xlu0 %6158, %v536_v43   ;;  %588 = vperm.xlu1 %6159, %v502_v44   ;;  %v547_v43 = vld [vmem:[%s6527_s19 + $0x190] sm:$0xff]  ;;  %v513_v44 = vld [vmem:[%s6527_s19 + $0x80] sm:$0xff] }
  0x4a   : > { %6000 = vmatmul.mubr.msk.f32.gmra.mxu0 %vm881_vm1, %v431_v45  ;;  %6066 = vmatmul.mubr.msk.f32.gmra.mxu1 %vm881_vm1, %v431_v45  ;;  %v452_v45 = vld [vmem:[%s6522_s16 + $0xf8] sm:$0xff] }
  0x4b   : > { %1217 = vmatprep.mubr.f32.mxu0 %v10668_v14  ;;  %1666 = vmatprep.mubr.f32.mxu1 %v10668_v14 }
  0x4d   : > { %753 = vperm.xlu0 %6158, %v535_v46   ;;  %583 = vperm.xlu1 %6159, %v501_v47   ;;  %v546_v46 = vld [vmem:[%s6527_s19 + $0x188] sm:$0xff]  ;;  %v545_v47 = vld [vmem:[%s6527_s19 + $0x180] sm:$0xff]  ;;  %s6453_s19 = smov 16  }
  0x4e   : > { %6001 = vmatmul.mubr.msk.f32.gmra.mxu0 %vm881_vm1, %v432_v48  ;;  %6067 = vmatmul.mubr.msk.f32.gmra.mxu1 %vm881_vm1, %v432_v48  ;;  %v453_v48 = vld [vmem:[%s6522_s16 + $0x100] sm:$0xff] }
  0x4f   : > { %1223 = vmatprep.mubr.f32.mxu0 %v10668_v14  ;;  %1672 = vmatprep.mubr.f32.mxu1 %v10668_v14 }
  0x51   : > { %748 = vperm.xlu0 %6158, %v534_v49   ;;  %578 = vperm.xlu1 %6159, %v500_v50   ;;  %v2512_v49 = vld [vmem:[%s6537_s25 + $0x78] sm:$0xff] }
  0x52   : > { %6002 = vmatmul.mubr.msk.f32.gmra.mxu0 %vm881_vm1, %v433_v51  ;;  %6068 = vmatmul.mubr.msk.f32.gmra.mxu1 %vm881_vm1, %v433_v51  ;;  %v2544_v50 = vld [vmem:[%s6537_s25 + $0x178] sm:$0xff]  ;;  %v454_v51 = vld [vmem:[%s6522_s16 + $0x108] sm:$0xff] }
  0x53   : > { %1229 = vmatprep.mubr.f32.mxu0 %v10668_v14  ;;  %1678 = vmatprep.mubr.f32.mxu1 %v10668_v14 }
  0x55   : > { %743 = vperm.xlu0 %6158, %v533_v52   ;;  %573 = vperm.xlu1 %6159, %v499_v53   ;;  %v2511_v52 = vld [vmem:[%s6537_s25 + $0x70] sm:$0xff] }
  0x56   : > { %6003 = vmatmul.mubr.msk.f32.gmra.mxu0 %vm881_vm1, %v434_v54  ;;  %6069 = vmatmul.mubr.msk.f32.gmra.mxu1 %vm881_vm1, %v434_v54  ;;  %v2543_v53 = vld [vmem:[%s6537_s25 + $0x170] sm:$0xff] }
  0x57   : > { %1235 = vmatprep.mubr.f32.mxu0 %v10668_v14  ;;  %1684 = vmatprep.mubr.f32.mxu1 %v10668_v14  ;;  %v455_v54 = vld [vmem:[%s6522_s16 + $0x110] sm:$0xff] }
  0x59   : > { %738 = vperm.xlu0 %6158, %v532_v55   ;;  %568 = vperm.xlu1 %6159, %v498_v56   ;;  %v2510_v55 = vld [vmem:[%s6537_s25 + $0x68] sm:$0xff] }
  0x5a   : > { %6004 = vmatmul.mubr.msk.f32.gmra.mxu0 %vm881_vm1, %v435_v57  ;;  %6070 = vmatmul.mubr.msk.f32.gmra.mxu1 %vm881_vm1, %v435_v57  ;;  %v2542_v56 = vld [vmem:[%s6537_s25 + $0x168] sm:$0xff]  ;;  %v456_v57 = vld [vmem:[%s6522_s16 + $0x118] sm:$0xff] }
  0x5b   : > { %1241 = vmatprep.mubr.f32.mxu0 %v10668_v14  ;;  %1690 = vmatprep.mubr.f32.mxu1 %v10668_v14 }
  0x5d   : > { %733 = vperm.xlu0 %6158, %v531_v58   ;;  %563 = vperm.xlu1 %6159, %v497_v59   ;;  %v2509_v58 = vld [vmem:[%s6537_s25 + $0x60] sm:$0xff] }
  0x5e   : > { %6005 = vmatmul.mubr.msk.f32.gmra.mxu0 %vm881_vm1, %v436_v60  ;;  %6071 = vmatmul.mubr.msk.f32.gmra.mxu1 %vm881_vm1, %v436_v60  ;;  %v2541_v59 = vld [vmem:[%s6537_s25 + $0x160] sm:$0xff] }
  0x5f   : > { %1247 = vmatprep.mubr.f32.mxu0 %v10668_v14  ;;  %1696 = vmatprep.mubr.f32.mxu1 %v10668_v14  ;;  %v457_v60 = vld [vmem:[%s6522_s16 + $0x120] sm:$0xff] }
  0x61   : > { %728 = vperm.xlu0 %6158, %v530_v61   ;;  %718 = vperm.xlu1 %6159, %v528_v62   ;;  %v2508_v61 = vld [vmem:[%s6537_s25 + $0x58] sm:$0xff] }
  0x62   : > { %6006 = vmatmul.mubr.msk.f32.gmra.mxu0 %vm881_vm1, %v437_v63  ;;  %6072 = vmatmul.mubr.msk.f32.gmra.mxu1 %vm881_vm1, %v437_v63  ;;  %v2540_v62 = vld [vmem:[%s6537_s25 + $0x158] sm:$0xff]  ;;  %v458_v63 = vld [vmem:[%s6522_s16 + $0x128] sm:$0xff] }
  0x63   : > { %1253 = vmatprep.mubr.f32.mxu0 %v10668_v14  ;;  %1702 = vmatprep.mubr.f32.mxu1 %v10668_v14 }
  0x65   : > { %723 = vperm.xlu0 %6158, %v529_v0   ;;  %713 = vperm.xlu1 %6159, %v527_v1   ;;  %v2507_v0 = vld [vmem:[%s6537_s25 + $0x50] sm:$0xff] }
  0x66   : > { %6007 = vmatmul.mubr.msk.f32.gmra.mxu0 %vm881_vm1, %v438_v2  ;;  %6073 = vmatmul.mubr.msk.f32.gmra.mxu1 %vm881_vm1, %v438_v2  ;;  %v2539_v1 = vld [vmem:[%s6537_s25 + $0x150] sm:$0xff] }
  0x67   : > { %1259 = vmatprep.mubr.f32.mxu0 %v10668_v14  ;;  %1708 = vmatprep.mubr.f32.mxu1 %v10668_v14  ;;  %v459_v2 = vld [vmem:[%s6522_s16 + $0x130] sm:$0xff] }
  0x69   : > { %878 = vperm.xlu0 %6158, %v560_v3   ;;  %708 = vperm.xlu1 %6159, %v526_v4   ;;  %v2506_v3 = vld [vmem:[%s6537_s25 + $0x48] sm:$0xff] }
  0x6a   : > { %6008 = vmatmul.mubr.msk.f32.gmra.mxu0 %vm881_vm1, %v439_v5  ;;  %6074 = vmatmul.mubr.msk.f32.gmra.mxu1 %vm881_vm1, %v439_v5  ;;  %v2538_v4 = vld [vmem:[%s6537_s25 + $0x148] sm:$0xff]  ;;  %v460_v5 = vld [vmem:[%s6522_s16 + $0x138] sm:$0xff] }
  0x6b   : > { %1265 = vmatprep.mubr.f32.mxu0 %v10668_v14  ;;  %1714 = vmatprep.mubr.f32.mxu1 %v10668_v14 }
  0x6d   : > { %873 = vperm.xlu0 %6158, %v559_v6   ;;  %703 = vperm.xlu1 %6159, %v525_v7   ;;  %v2505_v6 = vld [vmem:[%s6537_s25 + $0x40] sm:$0xff] }
  0x6e   : > { %6009 = vmatmul.mubr.msk.f32.gmra.mxu0 %vm881_vm1, %v440_v8  ;;  %6075 = vmatmul.mubr.msk.f32.gmra.mxu1 %vm881_vm1, %v440_v8  ;;  %v2537_v7 = vld [vmem:[%s6537_s25 + $0x140] sm:$0xff] }
  0x6f   : > { %1271 = vmatprep.mubr.f32.mxu0 %v10668_v14  ;;  %1720 = vmatprep.mubr.f32.mxu1 %v10668_v14  ;;  %v461_v8 = vld [vmem:[%s6522_s16 + $0x140] sm:$0xff] }
  0x71   : > { %868 = vperm.xlu0 %6158, %v558_v9   ;;  %698 = vperm.xlu1 %6159, %v524_v10   ;;  %v2504_v9 = vld [vmem:[%s6537_s25 + $0x38] sm:$0xff] }
  0x72   : > { %6010 = vmatmul.mubr.msk.f32.gmra.mxu0 %vm881_vm1, %v441_v11  ;;  %6076 = vmatmul.mubr.msk.f32.gmra.mxu1 %vm881_vm1, %v441_v11  ;;  %v2536_v10 = vld [vmem:[%s6537_s25 + $0x138] sm:$0xff]  ;;  %v462_v11 = vld [vmem:[%s6522_s16 + $0x148] sm:$0xff] }
  0x73   : > { %1277 = vmatprep.mubr.f32.mxu0 %v10668_v14  ;;  %1726 = vmatprep.mubr.f32.mxu1 %v10668_v14 }
  0x75   : > { %863 = vperm.xlu0 %6158, %v557_v12   ;;  %693 = vperm.xlu1 %6159, %v523_v13   ;;  %v2503_v12 = vld [vmem:[%s6537_s25 + $0x30] sm:$0xff] }
  0x76   : > { %6011 = vmatmul.mubr.msk.f32.gmra.mxu0 %vm881_vm1, %v442_v15  ;;  %6077 = vmatmul.mubr.msk.f32.gmra.mxu1 %vm881_vm1, %v442_v15  ;;  %v2535_v13 = vld [vmem:[%s6537_s25 + $0x130] sm:$0xff] }
  0x77   : > { %1283 = vmatprep.mubr.f32.mxu0 %v10668_v14  ;;  %1732 = vmatprep.mubr.f32.mxu1 %v10668_v14 }
  0x79   : > { %858 = vperm.xlu0 %6158, %v556_v16   ;;  %688 = vperm.xlu1 %6159, %v522_v17   ;;  %v463_v16 = vld [vmem:[%s6522_s16 + $0x150] sm:$0xff]  ;;  %v2502_v17 = vld [vmem:[%s6537_s25 + $0x28] sm:$0xff] }
  0x7a   : > { %6012 = vmatmul.mubr.msk.f32.gmra.mxu0 %vm881_vm1, %v443_v18  ;;  %6078 = vmatmul.mubr.msk.f32.gmra.mxu1 %vm881_vm1, %v443_v18  ;;  %v2534_v18 = vld [vmem:[%s6537_s25 + $0x128] sm:$0xff] }
  0x7b   : > { %1289 = vmatprep.mubr.f32.mxu0 %v10668_v14  ;;  %1738 = vmatprep.mubr.f32.mxu1 %v10668_v14 }
  0x7d   : > { %853 = vperm.xlu0 %6158, %v555_v19   ;;  %683 = vperm.xlu1 %6159, %v521_v20   ;;  %v464_v19 = vld [vmem:[%s6522_s16 + $0x158] sm:$0xff] }
  0x7e   : > { %6013 = vmatmul.mubr.msk.f32.gmra.mxu0 %vm881_vm1, %v444_v21  ;;  %6079 = vmatmul.mubr.msk.f32.gmra.mxu1 %vm881_vm1, %v444_v21 }
  0x7f   : > { %1295 = vmatprep.mubr.f32.mxu0 %v10668_v14  ;;  %1744 = vmatprep.mubr.f32.mxu1 %v10668_v14 }
  0x81   : > { %848 = vperm.xlu0 %6158, %v554_v22   ;;  %678 = vperm.xlu1 %6159, %v520_v23   ;;  %v2501_v22 = vld [vmem:[%s6537_s25 + $0x20] sm:$0xff] }
  0x82   : > { %6014 = vmatmul.mubr.msk.f32.gmra.mxu0 %vm881_vm1, %v445_v24  ;;  %6080 = vmatmul.mubr.msk.f32.gmra.mxu1 %vm881_vm1, %v445_v24  ;;  %v2533_v23 = vld [vmem:[%s6537_s25 + $0x120] sm:$0xff] }
  0x83   : > { %1301 = vmatprep.mubr.f32.mxu0 %v10668_v14  ;;  %1750 = vmatprep.mubr.f32.mxu1 %v10668_v14  ;;  %v465_v24 = vld [vmem:[%s6522_s16 + $0x160] sm:$0xff] }
  0x85   : > { %843 = vperm.xlu0 %6158, %v553_v25   ;;  %673 = vperm.xlu1 %6159, %v519_v26   ;;  %v2500_v25 = vld [vmem:[%s6537_s25 + $0x18] sm:$0xff] }
  0x86   : > { %6015 = vmatmul.mubr.msk.f32.gmra.mxu0 %vm881_vm1, %v446_v27  ;;  %6081 = vmatmul.mubr.msk.f32.gmra.mxu1 %vm881_vm1, %v446_v27  ;;  %v2532_v26 = vld [vmem:[%s6537_s25 + $0x118] sm:$0xff] }
  0x87   : > { %1307 = vmatprep.mubr.f32.mxu0 %v10668_v14  ;;  %1756 = vmatprep.mubr.f32.mxu1 %v10668_v14 }
  0x89   : > { %838 = vperm.xlu0 %6158, %v552_v28   ;;  %668 = vperm.xlu1 %6159, %v518_v29   ;;  %v466_v29 = vld [vmem:[%s6522_s16 + $0x168] sm:$0xff] }
  0x8a   : > { %6016 = vmatmul.mubr.msk.f32.gmra.mxu0 %vm881_vm1, %v447_v30  ;;  %6082 = vmatmul.mubr.msk.f32.gmra.mxu1 %vm881_vm1, %v447_v30  ;;  %v2499_v30 = vld [vmem:[%s6537_s25 + $0x10] sm:$0xff] }
  0x8b   : > { %1313 = vmatprep.mubr.f32.mxu0 %v10668_v14  ;;  %1762 = vmatprep.mubr.f32.mxu1 %v10668_v14 }
  0x8d   : > { %833 = vperm.xlu0 %6158, %v551_v31   ;;  %663 = vperm.xlu1 %6159, %v517_v32   ;;  %v2531_v31 = vld [vmem:[%s6537_s25 + $0x110] sm:$0xff] }
  0x8e   : > { %6017 = vmatmul.mubr.msk.f32.gmra.mxu0 %vm881_vm1, %v448_v33  ;;  %6083 = vmatmul.mubr.msk.f32.gmra.mxu1 %vm881_vm1, %v448_v33  ;;  %v467_v32 = vld [vmem:[%s6522_s16 + $0x170] sm:$0xff] }
  0x8f   : > { %1319 = vmatprep.mubr.f32.mxu0 %v10668_v14  ;;  %1768 = vmatprep.mubr.f32.mxu1 %v10668_v14 }
  0x91   : > { %828 = vperm.xlu0 %6158, %v550_v34   ;;  %658 = vperm.xlu1 %6159, %v516_v35   ;;  %v2498_v35 = vld [vmem:[%s6537_s25 + $0x8] sm:$0xff] }
  0x92   : > { %6018 = vmatmul.mubr.msk.f32.gmra.mxu0 %vm881_vm1, %v449_v36  ;;  %6084 = vmatmul.mubr.msk.f32.gmra.mxu1 %vm881_vm1, %v449_v36  ;;  %v2530_v36 = vld [vmem:[%s6537_s25 + $0x108] sm:$0xff] }
  0x93   : > { %1325 = vmatprep.mubr.f32.mxu0 %v10668_v14  ;;  %1774 = vmatprep.mubr.f32.mxu1 %v10668_v14 }
  0x95   : > { %823 = vperm.xlu0 %6158, %v549_v37   ;;  %653 = vperm.xlu1 %6159, %v515_v38   ;;  %v468_v37 = vld [vmem:[%s6522_s16 + $0x178] sm:$0xff]  ;;  %v2497_v38 = vld [vmem:[%s6537_s25] sm:$0xff] }
  0x96   : > { %6019 = vmatmul.mubr.msk.f32.gmra.mxu0 %vm881_vm1, %v450_v39  ;;  %6085 = vmatmul.mubr.msk.f32.gmra.mxu1 %vm881_vm1, %v450_v39  ;;  %v2529_v39 = vld [vmem:[%s6537_s25 + $0x100] sm:$0xff] }
  0x97   : > { %1331 = vmatprep.mubr.f32.mxu0 %v10668_v14  ;;  %1780 = vmatprep.mubr.f32.mxu1 %v10668_v14 }
  0x99   : > { %818 = vperm.xlu0 %6158, %v548_v40   ;;  %648 = vperm.xlu1 %6159, %v514_v41  }
  0x9a   : > { %6020 = vmatmul.mubr.msk.f32.gmra.mxu0 %vm881_vm1, %v451_v42  ;;  %6086 = vmatmul.mubr.msk.f32.gmra.mxu1 %vm881_vm1, %v451_v42  ;;  %v469_v42 = vld [vmem:[%s6522_s16 + $0x180] sm:$0xff] }
  0x9b   : > { %1337 = vmatprep.mubr.f32.mxu0 %v10668_v14  ;;  %1786 = vmatprep.mubr.f32.mxu1 %v10668_v14 }
  0x9d   : > { %813 = vperm.xlu0 %6158, %v547_v43   ;;  %643 = vperm.xlu1 %6159, %v513_v44  }
  0x9e   : > { %6021 = vmatmul.mubr.msk.f32.gmra.mxu0 %vm881_vm1, %v452_v45  ;;  %6087 = vmatmul.mubr.msk.f32.gmra.mxu1 %vm881_vm1, %v452_v45  ;;  %v2528_v45 = vld [vmem:[%s6537_s25 + $0xf8] sm:$0xff] }
  0x9f   : > { %1343 = vmatprep.mubr.f32.mxu0 %v10668_v14  ;;  %1792 = vmatprep.mubr.f32.mxu1 %v10668_v14 }
  0xa0   : > { %v6885_v15 = vpop.permute.xlu1 %798  ;;  %v6897_v20 = vpop.permute.xlu0 %638 }
  0xa1   : > { %808 = vperm.xlu0 %6158, %v546_v46   ;;  %803 = vperm.xlu1 %6159, %v545_v47   ;;  %10851 = vst [vmem:[#allocation2_spill] sm:$0xff] %v6885_v15  ;;  %v2560_v46 = vld [vmem:[%s6537_s25 + $0x1f8] sm:$0xff]  ;;  %v470_v47 = vld [vmem:[%s6522_s16 + $0x188] sm:$0xff] }
  0xa2   : > { %6022 = vmatmul.mubr.msk.f32.gmra.mxu0 %vm881_vm1, %v453_v48  ;;  %6088 = vmatmul.mubr.msk.f32.gmra.mxu1 %vm881_vm1, %v453_v48 }
  0xa3   : > { %1349 = vmatprep.mubr.f32.mxu0 %v10668_v14  ;;  %1798 = vmatprep.mubr.f32.mxu1 %v10668_v14 }
  0xa4   : > { %v6899_v21 = vpop.permute.xlu1 %628  ;;  %v6912_v27 = vpop.permute.xlu0 %633 }
  0xa5   : > { %2638 = vperm.xlu0 %6158, %v2512_v49   ;;  %2798 = vperm.xlu1 %6159, %v2544_v50  }
  0xa6   : > { %6023 = vmatmul.mubr.msk.f32.gmra.mxu0 %vm881_vm1, %v454_v51  ;;  %6089 = vmatmul.mubr.msk.f32.gmra.mxu1 %vm881_vm1, %v454_v51 }
  0xa7   : > { %1355 = vmatprep.mubr.f32.mxu0 %v10668_v14  ;;  %1804 = vmatprep.mubr.f32.mxu1 %v10668_v14 }
  0xa8   : > { %v6914_v28 = vpop.permute.xlu1 %623  ;;  %v6926_v33 = vpop.permute.xlu0 %793 }
  0xa9   : > { %2633 = vperm.xlu0 %6158, %v2511_v52   ;;  %2793 = vperm.xlu1 %6159, %v2543_v53   ;;  %10852 = vst [vmem:[#allocation3_spill] sm:$0xff] %v6926_v33 }
  0xaa   : > { %6024 = vmatmul.mubr.msk.f32.gmra.mxu0 %vm881_vm1, %v455_v54  ;;  %6090 = vmatmul.mubr.msk.f32.gmra.mxu1 %vm881_vm1, %v455_v54  ;;  %v2527_v54 = vld [vmem:[%s6537_s25 + $0xf0] sm:$0xff] }
  0xab   : > { %1361 = vmatprep.mubr.f32.mxu0 %v10668_v14  ;;  %1810 = vmatprep.mubr.f32.mxu1 %v10668_v14 }
  0xac   : > { %v6928_v34 = vpop.permute.xlu1 %618  ;;  %v6941_v40 = vpop.permute.xlu0 %788 }
  0xad   : > { %2628 = vperm.xlu0 %6158, %v2510_v55   ;;  %2788 = vperm.xlu1 %6159, %v2542_v56   ;;  %10853 = vst [vmem:[#allocation4_spill] sm:$0xff] %v6941_v40  ;;  %v2559_v55 = vld [vmem:[%s6537_s25 + $0x1f0] sm:$0xff]  ;;  %v10888_v40 = vmov 0.0  }
  0xae   : > { %6025 = vmatmul.mubr.msk.f32.gmra.mxu0 %vm881_vm1, %v456_v57  ;;  %6091 = vmatmul.mubr.msk.f32.gmra.mxu1 %vm881_vm1, %v456_v57  ;;  %v471_v56 = vld [vmem:[%s6522_s16 + $0x190] sm:$0xff] }
  0xaf   : > { %1367 = vmatprep.mubr.f32.mxu0 %v10668_v14  ;;  %1816 = vmatprep.mubr.f32.mxu1 %v10668_v14 }
  0xb0   : > { %v6943_v41 = vpop.permute.xlu1 %613  ;;  %v6963_v50 = vpop.permute.xlu0 %783 }
  0xb1   : > { %2623 = vperm.xlu0 %6158, %v2509_v58   ;;  %2783 = vperm.xlu1 %6159, %v2541_v59   ;;  %10856 = vst [vmem:[#allocation7_spill] sm:$0xff] %v6963_v50  ;;  %v2550_v50 = vld [vmem:[%s6537_s25 + $0x1a8] sm:$0xff] }
  0xb2   : > { %6026 = vmatmul.mubr.msk.f32.gmra.mxu0 %vm881_vm1, %v457_v60  ;;  %6092 = vmatmul.mubr.msk.f32.gmra.mxu1 %vm881_vm1, %v457_v60 }
  0xb3   : > { %1373 = vmatprep.mubr.f32.mxu0 %v10668_v14  ;;  %1822 = vmatprep.mubr.f32.mxu1 %v10668_v14 }
  0xb4   : > { %v6965_v51 = vpop.permute.xlu1 %608 }
  0xb5   : > { %2618 = vperm.xlu0 %6158, %v2508_v61   ;;  %2778 = vperm.xlu1 %6159, %v2540_v62   ;;  %v2526_v61 = vld [vmem:[%s6537_s25 + $0xe8] sm:$0xff] }
  0xb6   : > { %6027 = vmatmul.mubr.msk.f32.gmra.mxu0 %vm881_vm1, %v458_v63  ;;  %6093 = vmatmul.mubr.msk.f32.gmra.mxu1 %vm881_vm1, %v458_v63  ;;  %v2558_v62 = vld [vmem:[%s6537_s25 + $0x1e8] sm:$0xff]  ;;  %v6990_v63 = vpop.permute.xlu0 %778 }
  0xb7   : > { %1379 = vmatprep.mubr.f32.mxu0 %v10668_v14  ;;  %1828 = vmatprep.mubr.f32.mxu1 %v10668_v14  ;;  %10860 = vst [vmem:[#allocation11_spill] sm:$0xff] %v6990_v63 }
  0xb9   : > { %2613 = vperm.xlu0 %6158, %v2507_v0   ;;  %2773 = vperm.xlu1 %6159, %v2539_v1   ;;  %v6992_v0 = vpop.permute.xlu1 %603  ;;  %v472_v1 = vld [vmem:[%s6522_s16 + $0x198] sm:$0xff] }
  0xba   : > { %6028 = vmatmul.mubr.msk.f32.gmra.mxu0 %vm881_vm1, %v459_v2  ;;  %6094 = vmatmul.mubr.msk.f32.gmra.mxu1 %vm881_vm1, %v459_v2  ;;  %10861 = vst [vmem:[#allocation12_spill] sm:$0xff] %v6992_v0 }
  0xbb   : > { %1385 = vmatprep.mubr.f32.mxu0 %v10668_v14  ;;  %1834 = vmatprep.mubr.f32.mxu1 %v10668_v14 }
  0xbd   : > { %2608 = vperm.xlu0 %6158, %v2506_v3   ;;  %2768 = vperm.xlu1 %6159, %v2538_v4  }
  0xbe   : > { %6029 = vmatmul.mubr.msk.f32.gmra.mxu0 %vm881_vm1, %v460_v5  ;;  %6095 = vmatmul.mubr.msk.f32.gmra.mxu1 %vm881_vm1, %v460_v5 }
  0xbf   : > { %1391 = vmatprep.mubr.f32.mxu0 %v10668_v14  ;;  %1840 = vmatprep.mubr.f32.mxu1 %v10668_v14 }
  0xc1   : > { %2603 = vperm.xlu0 %6158, %v2505_v6   ;;  %2763 = vperm.xlu1 %6159, %v2537_v7   ;;  %v2525_v6 = vld [vmem:[%s6537_s25 + $0xe0] sm:$0xff] }
  0xc2   : > { %6030 = vmatmul.mubr.msk.f32.gmra.mxu0 %vm881_vm1, %v461_v8  ;;  %6096 = vmatmul.mubr.msk.f32.gmra.mxu1 %vm881_vm1, %v461_v8  ;;  %v2557_v7 = vld [vmem:[%s6537_s25 + $0x1e0] sm:$0xff] }
  0xc3   : > { %1397 = vmatprep.mubr.f32.mxu0 %v10668_v14  ;;  %1846 = vmatprep.mubr.f32.mxu1 %v10668_v14  ;;  %v473_v8 = vld [vmem:[%s6522_s16 + $0x1a0] sm:$0xff] }
  0xc5   : > { %2598 = vperm.xlu0 %6158, %v2504_v9   ;;  %2758 = vperm.xlu1 %6159, %v2536_v10  }
  0xc6   : > { %6031 = vmatmul.mubr.msk.f32.gmra.mxu0 %vm881_vm1, %v462_v11  ;;  %6097 = vmatmul.mubr.msk.f32.gmra.mxu1 %vm881_vm1, %v462_v11  ;;  %v7016_v11 = vpop.permute.xlu0 %773 }
  0xc7   : > { %1403 = vmatprep.mubr.f32.mxu0 %v10668_v14  ;;  %1852 = vmatprep.mubr.f32.mxu1 %v10668_v14  ;;  %10865 = vst [vmem:[#allocation16_spill] sm:$0xff] %v7016_v11 }
  0xc9   : > { %2593 = vperm.xlu0 %6158, %v2503_v12   ;;  %2753 = vperm.xlu1 %6159, %v2535_v13   ;;  %v7018_v12 = vpop.permute.xlu1 %598 }
  0xca   : > { %6032 = vmatmul.mubr.msk.f32.gmra.mxu0 %vm881_vm1, %v463_v16  ;;  %6098 = vmatmul.mubr.msk.f32.gmra.mxu1 %vm881_vm1, %v463_v16  ;;  %10866 = vst [vmem:[#allocation17_spill] sm:$0xff] %v7018_v12 }
  0xcb   : > { %1409 = vmatprep.mubr.f32.mxu0 %v10668_v14  ;;  %1858 = vmatprep.mubr.f32.mxu1 %v10668_v14 }
  0xcd   : > { %2588 = vperm.xlu0 %6158, %v2502_v17   ;;  %2748 = vperm.xlu1 %6159, %v2534_v18   ;;  %v2524_v17 = vld [vmem:[%s6537_s25 + $0xd8] sm:$0xff] }
  0xce   : > { %6033 = vmatmul.mubr.msk.f32.gmra.mxu0 %vm881_vm1, %v464_v19  ;;  %6099 = vmatmul.mubr.msk.f32.gmra.mxu1 %vm881_vm1, %v464_v19  ;;  %v2556_v18 = vld [vmem:[%s6537_s25 + $0x1d8] sm:$0xff]  ;;  %v474_v19 = vld [vmem:[%s6522_s16 + $0x1a8] sm:$0xff] }
  0xcf   : > { %1415 = vmatprep.mubr.f32.mxu0 %v10668_v14  ;;  %1864 = vmatprep.mubr.f32.mxu1 %v10668_v14 }
  0xd1   : > { %2583 = vperm.xlu0 %6158, %v2501_v22   ;;  %2743 = vperm.xlu1 %6159, %v2533_v23  }
  0xd2   : > { %6034 = vmatmul.mubr.msk.f32.gmra.mxu0 %vm881_vm1, %v465_v24  ;;  %6100 = vmatmul.mubr.msk.f32.gmra.mxu1 %vm881_vm1, %v465_v24 }
  0xd3   : > { %1421 = vmatprep.mubr.f32.mxu0 %v10668_v14  ;;  %1870 = vmatprep.mubr.f32.mxu1 %v10668_v14 }
  0xd5   : > { %2578 = vperm.xlu0 %6158, %v2500_v25   ;;  %2738 = vperm.xlu1 %6159, %v2532_v26   ;;  %v2523_v26 = vld [vmem:[%s6537_s25 + $0xd0] sm:$0xff] }
  0xd6   : > { %6035 = vmatmul.mubr.msk.f32.gmra.mxu0 %vm881_vm1, %v466_v29  ;;  %6101 = vmatmul.mubr.msk.f32.gmra.mxu1 %vm881_vm1, %v466_v29  ;;  %v2555_v29 = vld [vmem:[%s6537_s25 + $0x1d0] sm:$0xff] }
  0xd7   : > { %1427 = vmatprep.mubr.f32.mxu0 %v10668_v14  ;;  %1876 = vmatprep.mubr.f32.mxu1 %v10668_v14 }
  0xd9   : > { %2573 = vperm.xlu0 %6158, %v2499_v30   ;;  %2733 = vperm.xlu1 %6159, %v2531_v31   ;;  %v7043_v30 = vpop.permute.xlu0 %768  ;;  %v7045_v31 = vpop.permute.xlu1 %593 }
  0xda   : > { %6036 = vmatmul.mubr.msk.f32.gmra.mxu0 %vm881_vm1, %v467_v32  ;;  %6102 = vmatmul.mubr.msk.f32.gmra.mxu1 %vm881_vm1, %v467_v32  ;;  %10870 = vst [vmem:[#allocation21_spill] sm:$0xff] %v7043_v30  ;;  %10871 = vst [vmem:[#allocation22_spill] sm:$0xff] %v7045_v31  ;;  %v475_v32 = vld [vmem:[%s6522_s16 + $0x1b0] sm:$0xff] }
  0xdb   : > { %1433 = vmatprep.mubr.f32.mxu0 %v10668_v14  ;;  %1882 = vmatprep.mubr.f32.mxu1 %v10668_v14 }
  0xdd   : > { %2568 = vperm.xlu0 %6158, %v2498_v35   ;;  %2728 = vperm.xlu1 %6159, %v2530_v36  }
  0xde   : > { %6037 = vmatmul.mubr.msk.f32.gmra.mxu0 %vm881_vm1, %v468_v37  ;;  %6103 = vmatmul.mubr.msk.f32.gmra.mxu1 %vm881_vm1, %v468_v37 }
  0xdf   : > { %1439 = vmatprep.mubr.f32.mxu0 %v10668_v14  ;;  %1888 = vmatprep.mubr.f32.mxu1 %v10668_v14 }
  0xe1   : > { %2563 = vperm.xlu0 %6158, %v2497_v38   ;;  %2723 = vperm.xlu1 %6159, %v2529_v39   ;;  %v2522_v39 = vld [vmem:[%s6537_s25 + $0xc8] sm:$0xff] }
  0xe2   : > { %v6948_v43 = vpop.f32.mrf.mxu0  ;;  %6038 = vmatmul.mubr.msk.f32.gmra.mxu0 %vm881_vm1, %v469_v42  ;;  %v6951_v44 = vpop.f32.mrf.mxu1  ;;  %6104 = vmatmul.mubr.msk.f32.gmra.mxu1 %vm881_vm1, %v469_v42  ;;  %v2554_v42 = vld [vmem:[%s6537_s25 + $0x1c8] sm:$0xff] }
  0xe3   : > { %10854 = vst [vmem:[#allocation5_spill] sm:$0xff] %v6951_v44  ;;  %1445 = vmatprep.mubr.f32.mxu0 %v10668_v14  ;;  %1894 = vmatprep.mubr.f32.mxu1 %v10668_v14  ;;  %v2549_v44 = vld [vmem:[%s6537_s25 + $0x1a0] sm:$0xff] }
  0xe4   : > { %v6959_v48 = vpop.f32.mrf.mxu0  ;;  %v6961_v49 = vpop.f32.mrf.mxu1 }
  0xe5   : > { %10855 = vst [vmem:[#allocation6_spill] sm:$0xff] %v6961_v49  ;;  %2718 = vperm.xlu0 %6158, %v2528_v45   ;;  %2878 = vperm.xlu1 %6159, %v2560_v46   ;;  %v476_v45 = vld [vmem:[%s6522_s16 + $0x1b8] sm:$0xff] }
  0xe6   : > { %v6967_v52 = vpop.f32.mrf.mxu0  ;;  %6039 = vmatmul.mubr.msk.f32.gmra.mxu0 %vm881_vm1, %v470_v47  ;;  %v6970_v53 = vpop.f32.mrf.mxu1  ;;  %6105 = vmatmul.mubr.msk.f32.gmra.mxu1 %vm881_vm1, %v470_v47 }
  0xe7   : > { %10857 = vst [vmem:[#allocation8_spill] sm:$0xff] %v6970_v53  ;;  %1451 = vmatprep.mubr.f32.mxu0 %v10668_v14  ;;  %1900 = vmatprep.mubr.f32.mxu1 %v10668_v14 }
  0xe8   : > { %v6978_v57 = vpop.f32.mrf.mxu0  ;;  %v6980_v58 = vpop.f32.mrf.mxu1 }
  0xe9   : > { %10858 = vst [vmem:[#allocation9_spill] sm:$0xff] %v6980_v58  ;;  %2713 = vperm.xlu0 %6158, %v2527_v54   ;;  %2873 = vperm.xlu1 %6159, %v2559_v55   ;;  %v7069_v54 = vpop.permute.xlu0 %763  ;;  %v7071_v55 = vpop.permute.xlu1 %588 }
  0xea   : > { %v6982_v59 = vpop.f32.mrf.mxu0  ;;  %6040 = vmatmul.mubr.msk.f32.gmra.mxu0 %vm881_vm1, %v471_v56  ;;  %v6985_v60 = vpop.f32.mrf.mxu1  ;;  %6106 = vmatmul.mubr.msk.f32.gmra.mxu1 %vm881_vm1, %v471_v56  ;;  %10875 = vst [vmem:[#allocation26_spill] sm:$0xff] %v7069_v54  ;;  %10876 = vst [vmem:[#allocation27_spill] sm:$0xff] %v7071_v55  ;;  %v479_v54 = vld [vmem:[%s6522_s16 + $0x1d0] sm:$0xff] }
  0xeb   : > { %10859 = vst [vmem:[#allocation10_spill] sm:$0xff] %v6985_v60  ;;  %1457 = vmatprep.mubr.f32.mxu0 %v10668_v14  ;;  %1906 = vmatprep.mubr.f32.mxu1 %v10668_v14 }
  0xec   : > { %v6997_v2 = vpop.f32.mrf.mxu0  ;;  %v6999_v3 = vpop.f32.mrf.mxu1 }
  0xed   : > { %10862 = vst [vmem:[#allocation13_spill] sm:$0xff] %v6999_v3  ;;  %2708 = vperm.xlu0 %6158, %v2526_v61   ;;  %2868 = vperm.xlu1 %6159, %v2558_v62   ;;  %v2521_v62 = vld [vmem:[%s6537_s25 + $0xc0] sm:$0xff]  ;;  %v2548_v3 = vld [vmem:[%s6537_s25 + $0x198] sm:$0xff] }
  0xee   : > { %v7001_v4 = vpop.f32.mrf.mxu0  ;;  %6041 = vmatmul.mubr.msk.f32.gmra.mxu0 %vm881_vm1, %v472_v1  ;;  %v7004_v5 = vpop.f32.mrf.mxu1  ;;  %6107 = vmatmul.mubr.msk.f32.gmra.mxu1 %vm881_vm1, %v472_v1  ;;  %v2553_v1 = vld [vmem:[%s6537_s25 + $0x1c0] sm:$0xff] }
  0xef   : > { %10863 = vst [vmem:[#allocation14_spill] sm:$0xff] %v7004_v5  ;;  %1463 = vmatprep.mubr.f32.mxu0 %v10668_v14  ;;  %1912 = vmatprep.mubr.f32.mxu1 %v10668_v14  ;;  %v482_v5 = vld [vmem:[%s6522_s16 + $0x1e8] sm:$0xff] }
  0xf0   : > { %v7012_v9 = vpop.f32.mrf.mxu0  ;;  %v7014_v10 = vpop.f32.mrf.mxu1 }
  0xf1   : > { %10864 = vst [vmem:[#allocation15_spill] sm:$0xff] %v7014_v10  ;;  %2703 = vperm.xlu0 %6158, %v2525_v6   ;;  %2863 = vperm.xlu1 %6159, %v2557_v7   ;;  %v477_v6 = vld [vmem:[%s6522_s16 + $0x1c0] sm:$0xff] }
  0xf2   : > { %v7020_v13 = vpop.f32.mrf.mxu0  ;;  %6042 = vmatmul.mubr.msk.f32.gmra.mxu0 %vm881_vm1, %v473_v8  ;;  %v7023_v16 = vpop.f32.mrf.mxu1  ;;  %6108 = vmatmul.mubr.msk.f32.gmra.mxu1 %vm881_vm1, %v473_v8 }
  0xf3   : > { %10867 = vst [vmem:[#allocation18_spill] sm:$0xff] %v7023_v16  ;;  %1469 = vmatprep.mubr.f32.mxu0 %v10668_v14  ;;  %1918 = vmatprep.mubr.f32.mxu1 %v10668_v14 }
  0xf4   : > { %v7031_v22 = vpop.f32.mrf.mxu0  ;;  %v7033_v23 = vpop.f32.mrf.mxu1 }
  0xf5   : > { %10868 = vst [vmem:[#allocation19_spill] sm:$0xff] %v7033_v23  ;;  %2698 = vperm.xlu0 %6158, %v2524_v17   ;;  %2858 = vperm.xlu1 %6159, %v2556_v18  }
  0xf6   : > { %v7035_v24 = vpop.f32.mrf.mxu0  ;;  %6043 = vmatmul.mubr.msk.f32.gmra.mxu0 %vm881_vm1, %v474_v19  ;;  %v7038_v25 = vpop.f32.mrf.mxu1  ;;  %6109 = vmatmul.mubr.msk.f32.gmra.mxu1 %vm881_vm1, %v474_v19  ;;  %v2520_v19 = vld [vmem:[%s6537_s25 + $0xb8] sm:$0xff] }
  0xf7   : > { %10869 = vst [vmem:[#allocation20_spill] sm:$0xff] %v7038_v25  ;;  %1475 = vmatprep.mubr.f32.mxu0 %v10668_v14  ;;  %1924 = vmatprep.mubr.f32.mxu1 %v10668_v14  ;;  %v2515_v25 = vld [vmem:[%s6537_s25 + $0x90] sm:$0xff] }
  0xf8   : > { %v7050_v35 = vpop.f32.mrf.mxu0  ;;  %v7052_v36 = vpop.f32.mrf.mxu1 }
  0xf9   : > { %10872 = vst [vmem:[#allocation23_spill] sm:$0xff] %v7052_v36  ;;  %2693 = vperm.xlu0 %6158, %v2523_v26   ;;  %2853 = vperm.xlu1 %6159, %v2555_v29   ;;  %v2552_v26 = vld [vmem:[%s6537_s25 + $0x1b8] sm:$0xff]  ;;  %v7096_v29 = vpop.permute.xlu0 %758  ;;  %v2547_v36 = vld [vmem:[%s6537_s25 + $0x190] sm:$0xff] }
  0xfa   : > { %v7054_v37 = vpop.f32.mrf.mxu0  ;;  %6044 = vmatmul.mubr.msk.f32.gmra.mxu0 %vm881_vm1, %v475_v32  ;;  %v7057_v38 = vpop.f32.mrf.mxu1  ;;  %6110 = vmatmul.mubr.msk.f32.gmra.mxu1 %vm881_vm1, %v475_v32  ;;  %10880 = vst [vmem:[#allocation31_spill] sm:$0xff] %v7096_v29  ;;  %v2551_v29 = vld [vmem:[%s6537_s25 + $0x1b0] sm:$0xff] }
  0xfb   : > { %10873 = vst [vmem:[#allocation24_spill] sm:$0xff] %v7057_v38  ;;  %1481 = vmatprep.mubr.f32.mxu0 %v10668_v14  ;;  %1930 = vmatprep.mubr.f32.mxu1 %v10668_v14  ;;  %v7098_v32 = vpop.permute.xlu1 %583 }
  0xfc   : > { %v7065_v46 = vpop.f32.mrf.mxu0  ;;  %v7067_v47 = vpop.f32.mrf.mxu1  ;;  %10881 = vst [vmem:[#allocation32_spill] sm:$0xff] %v7098_v32 }
  0xfd   : > { %10874 = vst [vmem:[#allocation25_spill] sm:$0xff] %v7067_v47  ;;  %2688 = vperm.xlu0 %6158, %v2522_v39   ;;  %2848 = vperm.xlu1 %6159, %v2554_v42   ;;  %v478_v39 = vld [vmem:[%s6522_s16 + $0x1c8] sm:$0xff]  ;;  %v7122_v30 = vpop.permute.xlu0 %753 }
  0xfe   : > { %v7073_v56 = vpop.f32.mrf.mxu0  ;;  %6045 = vmatmul.mubr.msk.f32.gmra.mxu0 %vm881_vm1, %v476_v45  ;;  %v7076_v61 = vpop.f32.mrf.mxu1  ;;  %6111 = vmatmul.mubr.msk.f32.gmra.mxu1 %vm881_vm1, %v476_v45  ;;  %10885 = vst [vmem:[#allocation36_spill] sm:$0xff] %v7122_v30  ;;  %v480_v30 = vld [vmem:[%s6522_s16 + $0x1d8] sm:$0xff] }
  0xff   : > { %10877 = vst [vmem:[#allocation28_spill] sm:$0xff] %v7076_v61  ;;  %1487 = vmatprep.mubr.f32.mxu0 %v10668_v14  ;;  %1936 = vmatprep.mubr.f32.mxu1 %v10668_v14  ;;  %v7124_v11 = vpop.permute.xlu1 %578  ;;  %v2546_v61 = vld [vmem:[%s6537_s25 + $0x188] sm:$0xff] }
 0x100   : > { %v7084_v7 = vpop.f32.mrf.mxu0  ;;  %v7086_v8 = vpop.f32.mrf.mxu1  ;;  %10886 = vst [vmem:[#allocation37_spill] sm:$0xff] %v7124_v11 }
 0x101   : > { %10878 = vst [vmem:[#allocation29_spill] sm:$0xff] %v7086_v8  ;;  %2683 = vperm.xlu0 %6158, %v2521_v62   ;;  %2843 = vperm.xlu1 %6159, %v2553_v1   ;;  %v7149_v49 = vpop.permute.xlu0 %748 }
 0x102   : > { %v7088_v17 = vpop.f32.mrf.mxu0  ;;  %6046 = vmatmul.mubr.msk.f32.gmra.mxu0 %vm881_vm1, %v477_v6  ;;  %v7091_v18 = vpop.f32.mrf.mxu1  ;;  %6112 = vmatmul.mubr.msk.f32.gmra.mxu1 %vm881_vm1, %v477_v6  ;;  %v2519_v6 = vld [vmem:[%s6537_s25 + $0xb0] sm:$0xff]  ;;  %10891 = vst [vmem:[#allocation41_spill] sm:$0xff] %v7149_v49  ;;  %v2516_v49 = vld [vmem:[%s6537_s25 + $0x98] sm:$0xff] }
 0x103   : > { %10879 = vst [vmem:[#allocation30_spill] sm:$0xff] %v7091_v18  ;;  %1493 = vmatprep.mubr.f32.mxu0 %v10668_v14  ;;  %1942 = vmatprep.mubr.f32.mxu1 %v10668_v14  ;;  %v7151_v53 = vpop.permute.xlu1 %573 }
 0x104   : > { %v7103_v42 = vpop.f32.mrf.mxu0  ;;  %v7105_v45 = vpop.f32.mrf.mxu1  ;;  %10892 = vst [vmem:[#allocation42_spill] sm:$0xff] %v7151_v53 }
 0x105   : > { %10882 = vst [vmem:[#allocation33_spill] sm:$0xff] %v7105_v45  ;;  %2678 = vperm.xlu0 %6158, %v2520_v19   ;;  %2838 = vperm.xlu1 %6159, %v2552_v26   ;;  %v7173_v10 = vpop.permute.xlu0 %743 }
 0x106   : > { %v7107_v62 = vpop.f32.mrf.mxu0  ;;  %6047 = vmatmul.mubr.msk.f32.gmra.mxu0 %vm881_vm1, %v478_v39  ;;  %v7110_v1 = vpop.f32.mrf.mxu1  ;;  %6113 = vmatmul.mubr.msk.f32.gmra.mxu1 %vm881_vm1, %v478_v39  ;;  %10896 = vst [vmem:[#allocation46_spill] sm:$0xff] %v7173_v10  ;;  %v483_v10 = vld [vmem:[%s6522_s16 + $0x1f0] sm:$0xff] }
 0x107   : > { %10883 = vst [vmem:[#allocation34_spill] sm:$0xff] %v7110_v1  ;;  %1499 = vmatprep.mubr.f32.mxu0 %v10668_v14  ;;  %1948 = vmatprep.mubr.f32.mxu1 %v10668_v14  ;;  %v2518_v14 = vld [vmem:[%s6537_s25 + $0xa8] sm:$0xff]  ;;  %v7175_v16 = vpop.permute.xlu1 %568 }
 0x108   : > { %v7118_v19 = vpop.f32.mrf.mxu0  ;;  %v7120_v26 = vpop.f32.mrf.mxu1  ;;  %10897 = vst [vmem:[#allocation47_spill] sm:$0xff] %v7175_v16  ;;  %v2242_v1 = vld [vmem:[%s6532_s22 + $0x8] sm:$0xff] }
 0x109   : > { %10884 = vst [vmem:[#allocation35_spill] sm:$0xff] %v7120_v26  ;;  %2673 = vperm.xlu0 %6158, %v2519_v6   ;;  %2833 = vperm.xlu1 %6159, %v2551_v29   ;;  %v7194_v8 = vpop.permute.xlu0 %738 }
 0x10a   : > { %v7126_v39 = vpop.f32.mrf.mxu0  ;;  %6048 = vmatmul.mubr.msk.f32.gmra.mxu0 %vm881_vm1, %v479_v54  ;;  %v7129_v63 = vpop.f32.mrf.mxu1  ;;  %6114 = vmatmul.mubr.msk.f32.gmra.mxu1 %vm881_vm1, %v479_v54  ;;  %v2517_v54 = vld [vmem:[%s6537_s25 + $0xa0] sm:$0xff]  ;;  %10901 = vst [vmem:[#allocation51_spill] sm:$0xff] %v7194_v8 }
 0x10b   : > { %10887 = vst [vmem:[#allocation38_spill] sm:$0xff] %v7129_v63  ;;  %1505 = vmatprep.mubr.f32.mxu0 %v10888_v40  ;;  %1954 = vmatprep.mubr.f32.mxu1 %v10888_v40  ;;  %v7196_v18 = vpop.permute.xlu1 %563  ;;  %v2513_v8 = vld [vmem:[%s6537_s25 + $0x80] sm:$0xff] }
 0x10c   : > { %v7137_v6 = vpop.f32.mrf.mxu0  ;;  %v7139_v29 = vpop.f32.mrf.mxu1  ;;  %10902 = vst [vmem:[#allocation52_spill] sm:$0xff] %v7196_v18  ;;  %v2545_v63 = vld [vmem:[%s6537_s25 + $0x180] sm:$0xff] }
 0x10d   : > { %10889 = vst [vmem:[#allocation39_spill] sm:$0xff] %v7139_v29  ;;  %2668 = vperm.xlu0 %6158, %v2518_v14   ;;  %2828 = vperm.xlu1 %6159, %v2550_v50   ;;  %v481_v14 = vld [vmem:[%s6522_s16 + $0x1e0] sm:$0xff] }
 0x10e   : > { %v7141_v33 = vpop.f32.mrf.mxu0  ;;  %6049 = vmatmul.mubr.msk.f32.gmra.mxu0 %vm881_vm1, %v480_v30  ;;  %v7144_v15 = vpop.f32.mrf.mxu1  ;;  %6115 = vmatmul.mubr.msk.f32.gmra.mxu1 %vm881_vm1, %v480_v30 }
 0x10f   : > { %10890 = vst [vmem:[#allocation40_spill] sm:$0xff] %v7144_v15  ;;  %1511 = vmatprep.mubr.f32.mxu0 %v10888_v40  ;;  %1960 = vmatprep.mubr.f32.mxu1 %v10888_v40 }
 0x110   : > { %v7156_v50 = vpop.f32.mrf.mxu0  ;;  %v7158_v58 = vpop.f32.mrf.mxu1 }
 0x111   : > { %10893 = vst [vmem:[#allocation43_spill] sm:$0xff] %v7158_v58  ;;  %2663 = vperm.xlu0 %6158, %v2517_v54   ;;  %2823 = vperm.xlu1 %6159, %v2549_v44   ;;  %v7213_v58 = vpop.permute.xlu0 %733 }
 0x112   : > { %v7160_v30 = vpop.f32.mrf.mxu0  ;;  %6050 = vmatmul.mubr.msk.f32.gmra.mxu0 %vm881_vm1, %v481_v14  ;;  %v7163_v60 = vpop.f32.mrf.mxu1  ;;  %6116 = vmatmul.mubr.msk.f32.gmra.mxu1 %vm881_vm1, %v481_v14  ;;  %10904 = vst [vmem:[#allocation54_spill] sm:$0xff] %v7213_v58 }
 0x113   : > { %10894 = vst [vmem:[#allocation44_spill] sm:$0xff] %v7163_v60  ;;  %1517 = vmatprep.mubr.f32.mxu0 %v10888_v40  ;;  %1966 = vmatprep.mubr.f32.mxu1 %v10888_v40  ;;  %v7215_v60 = vpop.permute.xlu1 %718 }
 0x114   : > { %v1227_v54 = vpop.f32.mrf.mxu0  ;;  %v7171_v44 = vpop.f32.mrf.mxu1 }
 0x115   : > { %10895 = vst [vmem:[#allocation45_spill] sm:$0xff] %v7171_v44  ;;  %2658 = vperm.xlu0 %6158, %v2516_v49   ;;  %2818 = vperm.xlu1 %6159, %v2548_v3  }
 0x116   : > { %v1231_v14 = vpop.f32.mrf.mxu0  ;;  %6051 = vmatmul.mubr.msk.f32.gmra.mxu0 %vm881_vm1, %v482_v5  ;;  %v7178_v23 = vpop.f32.mrf.mxu1  ;;  %6117 = vmatmul.mubr.msk.f32.gmra.mxu1 %vm881_vm1, %v482_v5  ;;  %v2514_v5 = vld [vmem:[%s6537_s25 + $0x88] sm:$0xff]  ;;  %s6455_s25 = smov 1  }
 0x117   : > { %10898 = vst [vmem:[#allocation48_spill] sm:$0xff] %v7178_v23  ;;  %1523 = vmatprep.mubr.f32.mxu0 %v10888_v40  ;;  %1972 = vmatprep.mubr.f32.mxu1 %v10888_v40 }
 0x118   : > { %v1233_v38 = vpop.f32.mrf.mxu0  ;;  %v7186_v49 = vpop.f32.mrf.mxu1 }
 0x119   : > { %10899 = vst [vmem:[#allocation49_spill] sm:$0xff] %v7186_v49  ;;  %2653 = vperm.xlu0 %6158, %v2515_v25   ;;  %2813 = vperm.xlu1 %6159, %v2547_v36   ;;  %v484_v25 = vld [vmem:[%s6522_s16 + $0x1f8] sm:$0xff]  ;;  %v1232_v49 = vadd.f32 %v1231_v14, %v6899_v21  ;;  %s6452_s16 = smov 17  }
 0x11a   : > { %v1237_v3 = vpop.f32.mrf.mxu0  ;;  %6052 = vmatmul.mubr.msk.f32.gmra.mxu0 %vm881_vm1, %v483_v10  ;;  %v7189_v47 = vpop.f32.mrf.mxu1  ;;  %6118 = vmatmul.mubr.msk.f32.gmra.mxu1 %vm881_vm1, %v483_v10 }
 0x11b   : > { %10900 = vst [vmem:[#allocation50_spill] sm:$0xff] %v7189_v47  ;;  %1529 = vmatprep.mubr.f32.mxu0 %v10888_v40  ;;  %1978 = vmatprep.mubr.f32.mxu1 %v10888_v40 }
 0x11c   : > { %v1239_v36 = vpop.f32.mrf.mxu0  ;;  %v7201_v45 = vpop.f32.mrf.mxu1 }
 0x11d   : > { %10903 = vst [vmem:[#allocation53_spill] sm:$0xff] %v7201_v45  ;;  %2648 = vperm.xlu0 %6158, %v2514_v5   ;;  %2808 = vperm.xlu1 %6159, %v2546_v61   ;;  %v1240_v61 = vadd.f32 %v1239_v36, %v6912_v27  ;;  %v1228_v36 = vadd.f32 %v1227_v54, %v6914_v28 }
 0x11e   : > { %v1243_v10 = vpop.f32.mrf.mxu0  ;;  %6053 = vmatmul.mubr.msk.f32.gmra.mxu0 %vm881_vm1, %v484_v25  ;;  %v7205_v26 = vpop.f32.mrf.mxu1  ;;  %6119 = vmatmul.mubr.msk.f32.gmra.mxu1 %vm881_vm1, %v484_v25  ;;  %v1238_v25 = vadd.f32 %v1237_v3, %v6912_v27  ;;  %v1220_v54 = vadd.f32 %v7141_v33, %v6928_v34  ;;  %v1210_v33 = vadd.f32 %v7118_v19, %v6965_v51 }
 0x11f   : > { %2945 = vmatprep.mubr.f32.mxu0 %v2242_v1  ;;  %v1244_v29 = vadd.f32 %v1243_v10, %v6897_v20  ;;  %v1234_v10 = vadd.f32 %v1233_v38, %v6899_v21  ;;  %v7237_v38 = vpop.permute.xlu1 %713  ;;  %v1202_v19 = vadd.f32 %v7088_v17, %v6992_v0  ;;  %v1192_v17 = vadd.f32 %v7065_v46, %v7045_v31 }
 0x120   : > { %v1245_v40 = vpop.f32.mrf.mxu0  ;;  %v7211_v15 = vpop.f32.mrf.mxu1  ;;  %v2041_v3 = vmax.f32 %v1238_v25, 0.0  ;;  %10908 = vst [vmem:[#allocation58_spill] sm:$0xff] %v7237_v38  ;;  %v1214_v25 = vadd.f32 %v7126_v39, %v6943_v41  ;;  %v1184_v46 = vadd.f32 %v7035_v24, %v7071_v55  ;;  %v1174_v24 = vadd.f32 %v7012_v9, %v7124_v11 }
 0x121   : > { %v1246_v5 = vadd.f32 %v1245_v40, %v6897_v20  ;;  %2643 = vperm.xlu0 %6158, %v2513_v8   ;;  %2803 = vperm.xlu1 %6159, %v2545_v63   ;;  %v2045_v58 = vmax.f32 %v1244_v29, 0.0  ;;  %v2042_v8 = vmax.f32 %v1240_v61, 0.0  ;;  %v1226_v63 = vadd.f32 %v7160_v30, %v6914_v28 }
 0x122   : > { %v7220_v44 = vpop.f32.mrf.mxu0  ;;  %v7222_v1 = vpop.f32.mrf.mxu1  ;;  %v1222_v29 = vadd.f32 %v7156_v50, %v6928_v34  ;;  %v2038_v14 = vmax.f32 %v1234_v10, 0.0  ;;  %v1166_v9 = vadd.f32 %v6982_v59, %v7151_v53  ;;  %v1156_v59 = vadd.f32 %v6959_v48, %v7196_v18 }
 0x123   : > { %10905 = vst [vmem:[#allocation55_spill] sm:$0xff] %v7222_v1  ;;  %v2046_v23 = vmax.f32 %v1246_v5, 0.0  ;;  %v1216_v5 = vadd.f32 %v7137_v6, %v6943_v41  ;;  %v2033_v50 = vmax.f32 %v1226_v63, 0.0  ;;  %v2029_v6 = vmax.f32 %v1220_v54, 0.0  ;;  %v7263_v39 = vpop.permute.xlu1 %708 }
 0x124   : > { %v7226_v47 = vpop.f32.mrf.mxu0  ;;  %v7228_v45 = vpop.f32.mrf.mxu1  ;;  %v1204_v63 = vadd.f32 %v7103_v42, %v6992_v0  ;;  %v1198_v54 = vadd.f32 %v7084_v7, %v7018_v12  ;;  %v2017_v7 = vmax.f32 %v1202_v19, 0.0  ;;  %v1180_v19 = vadd.f32 %v7031_v22, %v7098_v32 }
 0x125   : > { %10906 = vst [vmem:[#allocation56_spill] sm:$0xff] %v7228_v45  ;;  %2881 = vmatprep.subr.mxu0 %v2046_v23  ;;  %v2037_v23 = vmax.f32 %v1232_v49, 0.0  ;;  %v2030_v49 = vmax.f32 %v1222_v29, 0.0  ;;  %v2025_v29 = vmax.f32 %v1214_v25, 0.0  ;;  %v1196_v45 = vadd.f32 %v7073_v56, %v7018_v12 }
 0x126   : > { %v7233_v40 = vpop.f32.mrf.mxu0  ;;  %v7235_v1 = vpop.f32.mrf.mxu1  ;;  %2882 = vmatpush1.msra.mxu0 %v2045_v58  ;;  %v2034_v58 = vmax.f32 %v1228_v36, 0.0  ;;  %v2018_v25 = vmax.f32 %v1204_v63, 0.0  ;;  %v2005_v22 = vmax.f32 %v1184_v46, 0.0  ;;  %v1162_v46 = vadd.f32 %v6978_v57, %v7175_v16 }
 0x127   : > { %10907 = vst [vmem:[#allocation57_spill] sm:$0xff] %v7235_v1  ;;  %2883 = vmatprep.subr.mxu0 %v2042_v8  ;;  %v7289_v56 = vpop.permute.xlu1 %703  ;;  %v2013_v63 = vmax.f32 %v1196_v45, 0.0  ;;  %v1178_v1 = vadd.f32 %v7020_v13, %v7098_v32  ;;  %v1168_v13 = vadd.f32 %v6997_v2, %v7151_v53  ;;  %v1160_v2 = vadd.f32 %v6967_v52, %v7175_v16 }
 0x128   : > { %v7243_v61 = vpop.f32.mrf.mxu0  ;;  %v7245_v30 = vpop.f32.mrf.mxu1  ;;  %2884 = vmatpush1.msra.mxu0 %v2041_v3  ;;  %v1208_v3 = vadd.f32 %v7107_v62, %v6965_v51  ;;  %v1993_v57 = vmax.f32 %v1166_v9, 0.0  ;;  %v1990_v52 = vmax.f32 %v1162_v46, 0.0  ;;  %v1986_v48 = vmax.f32 %v1156_v59, 0.0 }
 0x129   : > { %10909 = vst [vmem:[#allocation59_spill] sm:$0xff] %v7245_v30  ;;  %2885 = vmatprep.subr.mxu0 %v2038_v14 }
 0x12a   : > { %v7251_v10 = vpop.f32.mrf.mxu0  ;;  %v7253_v8 = vpop.f32.mrf.mxu1  ;;  %2886 = vmatpush1.msra.mxu0 %v2037_v23  ;;  %v2026_v23 = vmax.f32 %v1216_v5, 0.0  ;;  %v2021_v42 = vmax.f32 %v1208_v3, 0.0  ;;  %v1186_v3 = vadd.f32 %v7050_v35, %v7071_v55 }
 0x12b   : > { %10910 = vst [vmem:[#allocation60_spill] sm:$0xff] %v7253_v8  ;;  %2887 = vmatprep.subr.mxu0 %v2034_v58  ;;  %v1989_v8 = vmax.f32 %v1160_v2, 0.0 }
 0x12c   : > { %v7259_v36 = vpop.f32.mrf.mxu0  ;;  %v7261_v14 = vpop.f32.mrf.mxu1  ;;  %2888 = vmatpush1.msra.mxu0 %v2033_v50  ;;  %v2022_v50 = vmax.f32 %v1210_v33, 0.0  ;;  %v2006_v45 = vmax.f32 %v1186_v3, 0.0  ;;  %v2001_v3 = vmax.f32 %v1178_v1, 0.0  ;;  %v1994_v1 = vmax.f32 %v1168_v13, 0.0 }
 0x12d   : > { %10911 = vst [vmem:[#allocation61_spill] sm:$0xff] %v7261_v14  ;;  %2889 = vmatprep.subr.mxu0 %v2030_v49 }
 0x12e   : > { %v7269_v58 = vpop.f32.mrf.mxu0  ;;  %v7271_v62 = vpop.f32.mrf.mxu1  ;;  %2890 = vmatpush1.msra.mxu0 %v2029_v6  ;;  %v1190_v6 = vadd.f32 %v7054_v37, %v7045_v31 }
 0x12f   : > { %10912 = vst [vmem:[#allocation62_spill] sm:$0xff] %v7271_v62  ;;  %2891 = vmatprep.subr.mxu0 %v2026_v23 }
 0x130   : > { %v7277_v5 = vpop.f32.mrf.mxu0  ;;  %v7279_v49 = vpop.f32.mrf.mxu1  ;;  %2892 = vmatpush1.msra.mxu0 %v2025_v29  ;;  %v2014_v29 = vmax.f32 %v1198_v54, 0.0  ;;  %v2009_v35 = vmax.f32 %v1190_v6, 0.0 }
 0x131   : > { %10913 = vst [vmem:[#allocation63_spill] sm:$0xff] %v7279_v49  ;;  %2893 = vmatprep.subr.mxu0 %v2022_v50  ;;  %v7317_v6 = vpop.permute.xlu1 %698 }
 0x132   : > { %v7285_v33 = vpop.f32.mrf.mxu0  ;;  %v7287_v23 = vpop.f32.mrf.mxu1  ;;  %2894 = vmatpush1.msra.mxu0 %v2021_v42  ;;  %v2010_v42 = vmax.f32 %v1192_v17, 0.0 }
 0x133   : > { %10914 = vst [vmem:[#allocation64_spill] sm:$0xff] %v7287_v23  ;;  %2895 = vmatprep.subr.mxu0 %v2018_v25 }
 0x134   : > { %v7295_v50 = vpop.f32.mrf.mxu0  ;;  %v7297_v37 = vpop.f32.mrf.mxu1  ;;  %2896 = vmatpush1.msra.mxu0 %v2017_v7  ;;  %v1172_v7 = vadd.f32 %v7001_v4, %v7124_v11 }
 0x135   : > { %10915 = vst [vmem:[#allocation65_spill] sm:$0xff] %v7297_v37  ;;  %2897 = vmatprep.subr.mxu0 %v2014_v29 }
 0x136   : > { %v7303_v54 = vpop.f32.mrf.mxu0  ;;  %v7305_v25 = vpop.f32.mrf.mxu1  ;;  %2898 = vmatpush1.msra.mxu0 %v2013_v63  ;;  %v2002_v63 = vmax.f32 %v1180_v19, 0.0  ;;  %v1997_v30 = vmax.f32 %v1172_v7, 0.0 }
 0x137   : > { %10916 = vst [vmem:[#allocation66_spill] sm:$0xff] %v7305_v25  ;;  %2899 = vmatprep.subr.mxu0 %v2010_v42  ;;  %v7341_v7 = vpop.permute.xlu1 %693 }
 0x138   : > { %v7311_v17 = vpop.f32.mrf.mxu0  ;;  %v7313_v29 = vpop.f32.mrf.mxu1  ;;  %2900 = vmatpush1.msra.mxu0 %v2009_v35  ;;  %v1998_v35 = vmax.f32 %v1174_v24, 0.0 }
 0x139   : > { %10917 = vst [vmem:[#allocation67_spill] sm:$0xff] %v7313_v29  ;;  %2901 = vmatprep.subr.mxu0 %v2006_v45 }
 0x13a   : > { %v7321_v42 = vpop.f32.mrf.mxu0  ;;  %v7323_v4 = vpop.f32.mrf.mxu1  ;;  %2902 = vmatpush1.msra.mxu0 %v2005_v22  ;;  %v1154_v22 = vadd.f32 %v6948_v43, %v7196_v18 }
 0x13b   : > { %10918 = vst [vmem:[#allocation68_spill] sm:$0xff] %v7323_v4  ;;  %2903 = vmatprep.subr.mxu0 %v2002_v63 }
 0x13c   : > { %v7329_v19 = vpop.f32.mrf.mxu0  ;;  %v7331_v45 = vpop.f32.mrf.mxu1  ;;  %2904 = vmatpush1.msra.mxu0 %v2001_v3  ;;  %v1985_v13 = vmax.f32 %v1154_v22, 0.0 }
 0x13d   : > { %10919 = vst [vmem:[#allocation69_spill] sm:$0xff] %v7331_v45  ;;  %2905 = vmatprep.subr.mxu0 %v1998_v35  ;;  %v7355_v35 = vpop.permute.xlu1 %688 }
 0x13e   : > { %v7337_v24 = vpop.f32.mrf.mxu0  ;;  %v7339_v63 = vpop.f32.mrf.mxu1  ;;  %2906 = vmatpush1.msra.mxu0 %v1997_v30 }
 0x13f   : > { %10920 = vst [vmem:[#allocation70_spill] sm:$0xff] %v7339_v63  ;;  %2907 = vmatprep.subr.mxu0 %v1994_v1 }
 0x140   : > { %v7343_v3 = vpop.f32.mrf.mxu0  ;;  %v7345_v14 = vpop.f32.mrf.mxu1  ;;  %2908 = vmatpush1.msra.mxu0 %v1993_v57 }
 0x141   : > { %10921 = vst [vmem:[#allocation71_spill] sm:$0xff] %v7345_v14  ;;  %2909 = vmatprep.subr.mxu0 %v1990_v52 }
 0x142   : > { %v7347_v43 = vpop.f32.mrf.mxu0  ;;  %v7349_v9 = vpop.f32.mrf.mxu1  ;;  %2910 = vmatpush1.msra.mxu0 %v1989_v8 }
 0x143   : > { %10922 = vst [vmem:[#allocation72_spill] sm:$0xff] %v7349_v9  ;;  %2911 = vmatprep.subr.mxu0 %v1986_v48  ;;  %v7367_v8 = vpop.permute.xlu1 %683 }
 0x144   : > { %v7351_v30 = vpop.f32.mrf.mxu0  ;;  %v7353_v46 = vpop.f32.mrf.mxu1  ;;  %2912 = vmatpush1.msra.mxu0 %v1985_v13 }
 0x145   : > { %10923 = vst [vmem:[#allocation73_spill] sm:$0xff] %v7353_v46 }
 0x146   : > { %v7357_v2 = vpop.f32.mrf.mxu0  ;;  %v7359_v1 = vpop.f32.mrf.mxu1 }
 0x147   : > { %10924 = vst [vmem:[#allocation74_spill] sm:$0xff] %v7359_v1  ;;  %v7375_v25 = vpop.permute.xlu1 %678 }
 0x148   : > { %v7361_v59 = vpop.f32.mrf.mxu0  ;;  %v7363_v22 = vpop.f32.mrf.mxu1 }
 0x149   : > { %10925 = vst [vmem:[#allocation75_spill] sm:$0xff] %v7363_v22 }
 0x14a   : > { %v1309_v57 = vpop.f32.mrf.mxu0  ;;  %v7365_v52 = vpop.f32.mrf.mxu1 }
 0x14b   : > { %10926 = vst [vmem:[#allocation76_spill] sm:$0xff] %v7365_v52  ;;  %v7383_v46 = vpop.permute.xlu1 %673 }
 0x14c   : > { %v1311_v48 = vpop.f32.mrf.mxu0  ;;  %v7369_v62 = vpop.f32.mrf.mxu1 }
 0x14d   : > { %10927 = vst [vmem:[#allocation77_spill] sm:$0xff] %v7369_v62 }
 0x14e   : > { %v1315_v49 = vpop.f32.mrf.mxu0  ;;  %v7371_v13 = vpop.f32.mrf.mxu1 }
 0x14f   : > { %10928 = vst [vmem:[#allocation78_spill] sm:$0xff] %v7371_v13  ;;  %v7391_v18 = vpop.permute.xlu1 %668 }
 0x150   : > { %v1317_v23 = vpop.f32.mrf.mxu0  ;;  %v7373_v37 = vpop.f32.mrf.mxu1 }
 0x151   : > { %10929 = vst [vmem:[#allocation79_spill] sm:$0xff] %v7373_v37 }
 0x152   : > { %v1321_v29 = vpop.f32.mrf.mxu0  ;;  %v7377_v4 = vpop.f32.mrf.mxu1 }
 0x153   : > { %10930 = vst [vmem:[#allocation80_spill] sm:$0xff] %v7377_v4 }
 0x154   : > { %v1323_v45 = vpop.f32.mrf.mxu0  ;;  %v7379_v63 = vpop.f32.mrf.mxu1 }
 0x155   : > { %10931 = vst [vmem:[#allocation81_spill] sm:$0xff] %v7379_v63 }
 0x156   : > { %v1327_v14 = vpop.f32.mrf.mxu0  ;;  %v7381_v9 = vpop.f32.mrf.mxu1 }
 0x157   : > { %10932 = vst [vmem:[#allocation82_spill] sm:$0xff] %v7381_v9 }
 0x158   : > { %v1329_v1 = vpop.f32.mrf.mxu0  ;;  %v7385_v22 = vpop.f32.mrf.mxu1 }
 0x159   : > { %10933 = vst [vmem:[#allocation83_spill] sm:$0xff] %v7385_v22  ;;  %v1330_v31 = vadd.f32 %v1329_v1, %v7263_v39  ;;  %v1318_v1 = vadd.f32 %v1317_v23, %v7317_v6 }
 0x15a   : > { %v1333_v52 = vpop.f32.mrf.mxu0  ;;  %v7387_v62 = vpop.f32.mrf.mxu1 }
 0x15b   : > { %10934 = vst [vmem:[#allocation84_spill] sm:$0xff] %v7387_v62  ;;  %v1334_v32 = vadd.f32 %v1333_v52, %v7237_v38  ;;  %v1322_v52 = vadd.f32 %v1321_v29, %v7289_v56 }
 0x15c   : > { %v1335_v13 = vpop.f32.mrf.mxu0  ;;  %v7389_v37 = vpop.f32.mrf.mxu1 }
 0x15d   : > { %10935 = vst [vmem:[#allocation85_spill] sm:$0xff] %v7389_v37  ;;  %v1336_v11 = vadd.f32 %v1335_v13, %v7237_v38  ;;  %v7405_v37 = vpop.permute.xlu1 %663  ;;  %v2097_v29 = vmax.f32 %v1322_v52, 0.0 }
 0x15e   : > { %v1339_v4 = vpop.f32.mrf.mxu0  ;;  %v7393_v16 = vpop.f32.mrf.mxu1 }
 0x15f   : > { %10936 = vst [vmem:[#allocation86_spill] sm:$0xff] %v7393_v16  ;;  %v1340_v63 = vadd.f32 %v1339_v4, %v7215_v60  ;;  %v1328_v4 = vadd.f32 %v1327_v14, %v7263_v39  ;;  %v2106_v13 = vmax.f32 %v1336_v11, 0.0  ;;  %v2102_v14 = vmax.f32 %v1330_v31, 0.0 }
 0x160   : > { %v1341_v53 = vpop.f32.mrf.mxu0  ;;  %v7396_v9 = vpop.f32.mrf.mxu1 }
 0x161   : > { %10937 = vst [vmem:[#allocation87_spill] sm:$0xff] %v7396_v9  ;;  %v1342_v22 = vadd.f32 %v1341_v53, %v7215_v60  ;;  %v2109_v12 = vmax.f32 %v1340_v63, 0.0  ;;  %v1324_v53 = vadd.f32 %v1323_v45, %v7289_v56  ;;  %v1316_v63 = vadd.f32 %v1315_v49, %v7317_v6  ;;  %v7425_v11 = vpop.permute.xlu1 %658 }
 0x162   : > { %v7401_v62 = vpop.f32.mrf.mxu0  ;;  %v7403_v55 = vpop.f32.mrf.mxu1  ;;  %v1306_v49 = vadd.f32 %v7361_v59, %v7355_v35 }
 0x163   : > { %10938 = vst [vmem:[#allocation88_spill] sm:$0xff] %v7401_v62  ;;  %10939 = vst [vmem:[#allocation89_spill] sm:$0xff] %v7403_v55  ;;  %v2110_v16 = vmax.f32 %v1342_v22, 0.0  ;;  %v2105_v62 = vmax.f32 %v1334_v32, 0.0  ;;  %v2101_v22 = vmax.f32 %v1328_v4, 0.0  ;;  %v2098_v32 = vmax.f32 %v1324_v53, 0.0 }
 0x164   : > { %v7409_v0 = vpop.f32.mrf.mxu0  ;;  %v7411_v9 = vpop.f32.mrf.mxu1  ;;  %v2094_v4 = vmax.f32 %v1318_v1, 0.0 }
 0x165   : > { %10940 = vst [vmem:[#allocation90_spill] sm:$0xff] %v7409_v0  ;;  %10941 = vst [vmem:[#allocation91_spill] sm:$0xff] %v7411_v9  ;;  %2913 = vmatprep.subr.mxu0 %v2110_v16  ;;  %v1312_v16 = vadd.f32 %v1311_v48, %v7341_v7  ;;  %v2270_v0 = vld [vmem:[%s6532_s22 + $0xe8] sm:$0xff] }
 0x166   : > { %v7415_v55 = vpop.f32.mrf.mxu0  ;;  %v7417_v38 = vpop.f32.mrf.mxu1  ;;  %2914 = vmatpush2.msra.mxu0 %v2109_v12  ;;  %v1310_v12 = vadd.f32 %v1309_v57, %v7341_v7  ;;  %v1300_v57 = vadd.f32 %v7351_v30, %v7367_v8  ;;  %v1292_v30 = vadd.f32 %v7337_v24, %v7375_v25  ;;  %v1282_v24 = vadd.f32 %v7311_v17, %v7391_v18 }
 0x167   : > { %10942 = vst [vmem:[#allocation92_spill] sm:$0xff] %v7415_v55  ;;  %10943 = vst [vmem:[#allocation93_spill] sm:$0xff] %v7417_v38  ;;  %2915 = vmatprep.subr.mxu0 %v2106_v13  ;;  %v2093_v13 = vmax.f32 %v1316_v63, 0.0  ;;  %v2090_v52 = vmax.f32 %v1312_v16, 0.0  ;;  %v1294_v63 = vadd.f32 %v7343_v3, %v7375_v25  ;;  %v1274_v17 = vadd.f32 %v7285_v33, %v7405_v37 }
 0x168   : > { %v7421_v9 = vpop.f32.mrf.mxu0  ;;  %v7423_v45 = vpop.f32.mrf.mxu1  ;;  %2916 = vmatpush2.msra.mxu0 %v2105_v62  ;;  %v1304_v62 = vadd.f32 %v7357_v2, %v7355_v35  ;;  %v2089_v59 = vmax.f32 %v1310_v12, 0.0  ;;  %v1288_v12 = vadd.f32 %v7329_v19, %v7383_v46  ;;  %v2077_v19 = vmax.f32 %v1292_v30, 0.0 }
 0x169   : > { %10944 = vst [vmem:[#allocation94_spill] sm:$0xff] %v7421_v9  ;;  %10945 = vst [vmem:[#allocation95_spill] sm:$0xff] %v7423_v45  ;;  %2917 = vmatprep.subr.mxu0 %v2102_v14  ;;  %v1298_v14 = vadd.f32 %v7347_v43, %v7367_v8  ;;  %v7449_v2 = vpop.permute.xlu1 %653  ;;  %v1270_v30 = vadd.f32 %v7277_v5, %v7425_v11  ;;  %v1268_v38 = vadd.f32 %v7269_v58, %v7425_v11 }
 0x16a   : > { %v7429_v23 = vpop.f32.mrf.mxu0  ;;  %v7431_v31 = vpop.f32.mrf.mxu1  ;;  %2918 = vmatpush2.msra.mxu0 %v2101_v22  ;;  %v2085_v16 = vmax.f32 %v1304_v62, 0.0  ;;  %v2078_v62 = vmax.f32 %v1294_v63, 0.0  ;;  %v1264_v33 = vadd.f32 %v7259_v36, %v7449_v2  ;;  %v2065_v5 = vmax.f32 %v1274_v17, 0.0 }
 0x16b   : > { %10946 = vst [vmem:[#allocation96_spill] sm:$0xff] %v7431_v31  ;;  %2919 = vmatprep.subr.mxu0 %v2098_v32  ;;  %v2086_v32 = vmax.f32 %v1306_v49, 0.0  ;;  %v2081_v3 = vmax.f32 %v1298_v14, 0.0  ;;  %v1276_v14 = vadd.f32 %v7295_v50, %v7405_v37  ;;  %v1695_v17 = vadd.f32 %v7211_v15, %v6897_v20 }
 0x16c   : > { %v7437_v48 = vpop.f32.mrf.mxu0  ;;  %v7439_v53 = vpop.f32.mrf.mxu1  ;;  %2920 = vmatpush2.msra.mxu0 %v2097_v29  ;;  %v2058_v45 = vmax.f32 %v1264_v33, 0.0 }
 0x16d   : > { %10947 = vst [vmem:[#allocation97_spill] sm:$0xff] %v7439_v53  ;;  %2921 = vmatprep.subr.mxu0 %v2094_v4  ;;  %v2082_v4 = vmax.f32 %v1300_v57, 0.0 }
 0x16e   : > { %v7445_v1 = vpop.f32.mrf.mxu0  ;;  %v7447_v22 = vpop.f32.mrf.mxu1  ;;  %2922 = vmatpush2.msra.mxu0 %v2093_v13  ;;  %v1286_v13 = vadd.f32 %v7321_v42, %v7383_v46 }
 0x16f   : > { %10948 = vst [vmem:[#allocation98_spill] sm:$0xff] %v7447_v22  ;;  %2923 = vmatprep.subr.mxu0 %v2090_v52  ;;  %v7475_v42 = vpop.permute.xlu1 %648  ;;  %v10963_v22 = vld [vmem:[#allocation49_spill] sm:$0xff] }
 0x170   : > { %v7455_v29 = vpop.f32.mrf.mxu0  ;;  %v7457_v43 = vpop.f32.mrf.mxu1  ;;  %2924 = vmatpush2.msra.mxu0 %v2089_v59  ;;  %v1280_v59 = vadd.f32 %v7303_v54, %v7391_v18  ;;  %10952 = vst [vmem:[#allocation102_spill] sm:$0xff] %v7475_v42  ;;  %v2073_v63 = vmax.f32 %v1286_v13, 0.0  ;;  %v2066_v13 = vmax.f32 %v1276_v14, 0.0  ;;  %v1256_v36 = vadd.f32 %v7233_v40, %v7475_v42 }
 0x171   : > { %10949 = vst [vmem:[#allocation99_spill] sm:$0xff] %v7457_v43  ;;  %2925 = vmatprep.subr.mxu0 %v2086_v32  ;;  %v2061_v14 = vmax.f32 %v1268_v38, 0.0 }
 0x172   : > { %v7463_v49 = vpop.f32.mrf.mxu0  ;;  %v7465_v52 = vpop.f32.mrf.mxu1  ;;  %2926 = vmatpush2.msra.mxu0 %v2085_v16  ;;  %v2074_v16 = vmax.f32 %v1288_v12, 0.0  ;;  %v2069_v50 = vmax.f32 %v1280_v59, 0.0  ;;  %v1258_v59 = vadd.f32 %v7243_v61, %v7475_v42  ;;  %v1693_v61 = vadd.f32 %v7205_v26, %v6897_v20  ;;  %v10960_v20 = vld [vmem:[#allocation53_spill] sm:$0xff] }
 0x173   : > { %10950 = vst [vmem:[#allocation100_spill] sm:$0xff] %v7465_v52  ;;  %2927 = vmatprep.subr.mxu0 %v2082_v4  ;;  %v7501_v58 = vpop.permute.xlu1 %643  ;;  %v2053_v15 = vmax.f32 %v1256_v36, 0.0  ;;  %v1689_v26 = vadd.f32 %v10960_v20, %v6912_v27  ;;  %v2241_v36 = vld [vmem:[%s6532_s22] sm:$0xff]  ;;  %v2246_v20 = vld [vmem:[%s6532_s22 + $0x28] sm:$0xff] }
 0x174   : > { %v7471_v57 = vpop.f32.mrf.mxu0  ;;  %v7473_v32 = vpop.f32.mrf.mxu1  ;;  %2928 = vmatpush2.msra.mxu0 %v2081_v3  ;;  %v2070_v3 = vmax.f32 %v1282_v24, 0.0  ;;  %10956 = vst [vmem:[#allocation106_spill] sm:$0xff] %v7501_v58  ;;  %v1250_v40 = vadd.f32 %v7220_v44, %v7501_v58  ;;  %v2048_v44 = vmax.f32 %v1695_v17, 0.0  ;;  %v10964_v17 = vld [vmem:[#allocation48_spill] sm:$0xff] }
 0x175   : > { %10951 = vst [vmem:[#allocation101_spill] sm:$0xff] %v7473_v32  ;;  %2929 = vmatprep.subr.mxu0 %v2078_v62 }
 0x176   : > { %v7481_v4 = vpop.f32.mrf.mxu0  ;;  %v7483_v54 = vpop.f32.mrf.mxu1  ;;  %2930 = vmatpush2.msra.mxu0 %v2077_v19  ;;  %v1262_v19 = vadd.f32 %v7251_v10, %v7449_v2 }
 0x177   : > { %10953 = vst [vmem:[#allocation103_spill] sm:$0xff] %v7483_v54  ;;  %2931 = vmatprep.subr.mxu0 %v2074_v16 }
 0x178   : > { %v7489_v12 = vpop.f32.mrf.mxu0  ;;  %v7491_v62 = vpop.f32.mrf.mxu1  ;;  %2932 = vmatpush2.msra.mxu0 %v2073_v63  ;;  %v2062_v63 = vmax.f32 %v1270_v30, 0.0  ;;  %v2057_v38 = vmax.f32 %v1262_v19, 0.0  ;;  %v10961_v19 = vld [vmem:[#allocation50_spill] sm:$0xff] }
 0x179   : > { %10954 = vst [vmem:[#allocation104_spill] sm:$0xff] %v7491_v62  ;;  %2933 = vmatprep.subr.mxu0 %v2070_v3 }
 0x17a   : > { %v7497_v24 = vpop.f32.mrf.mxu0  ;;  %v7499_v16 = vpop.f32.mrf.mxu1  ;;  %2934 = vmatpush2.msra.mxu0 %v2069_v50  ;;  %v1252_v50 = vadd.f32 %v7226_v47, %v7501_v58 }
 0x17b   : > { %10955 = vst [vmem:[#allocation105_spill] sm:$0xff] %v7499_v16  ;;  %2935 = vmatprep.subr.mxu0 %v2066_v13 }
 0x17c   : > { %v7507_v3 = vpop.f32.mrf.mxu0  ;;  %v7509_v10 = vpop.f32.mrf.mxu1  ;;  %2936 = vmatpush2.msra.mxu0 %v2065_v5  ;;  %v2054_v5 = vmax.f32 %v1258_v59, 0.0  ;;  %v2050_v33 = vmax.f32 %v1252_v50, 0.0  ;;  %v2049_v59 = vmax.f32 %v1250_v40, 0.0  ;;  %v1681_v50 = vadd.f32 %v10964_v17, %v6899_v21  ;;  %v10969_v17 = vld [vmem:[#allocation43_spill] sm:$0xff] }
 0x17d   : > { %10957 = vst [vmem:[#allocation107_spill] sm:$0xff] %v7509_v10  ;;  %2937 = vmatprep.subr.mxu0 %v2062_v63  ;;  %v1687_v63 = vadd.f32 %v10961_v19, %v6912_v27 }
 0x17e   : > { %v7519_v30 = vpop.f32.mrf.mxu0  ;;  %v7521_v13 = vpop.f32.mrf.mxu1  ;;  %2938 = vmatpush2.msra.mxu0 %v2061_v14  ;;  %v2047_v14 = vmax.f32 %v1693_v61, 0.0  ;;  %v10966_v61 = vld [vmem:[#allocation45_spill] sm:$0xff] }
 0x17f   : > { %10958 = vst [vmem:[#allocation108_spill] sm:$0xff] %v7521_v13  ;;  %2939 = vmatprep.subr.mxu0 %v2058_v45  ;;  %v1677_v40 = vadd.f32 %v10966_v61, %v6914_v28  ;;  %v2043_v19 = vmax.f32 %v1687_v63, 0.0  ;;  %v2250_v61 = vld [vmem:[%s6532_s22 + $0x48] sm:$0xff]  ;;  %v10983_v13 = vld [vmem:[#allocation29_spill] sm:$0xff] }
 0x180   : > { %v7523_v31 = vpop.f32.mrf.mxu0  ;;  %v7525_v47 = vpop.f32.mrf.mxu1  ;;  %2940 = vmatpush2.msra.mxu0 %v2057_v38  ;;  %v1683_v38 = vadd.f32 %v10963_v22, %v6899_v21  ;;  %v10967_v22 = vld [vmem:[#allocation44_spill] sm:$0xff]  ;;  %v2245_v21 = vld [vmem:[%s6532_s22 + $0x20] sm:$0xff] }
 0x181   : > { %10959 = vst [vmem:[#allocation109_spill] sm:$0xff] %v7525_v47  ;;  %2941 = vmatprep.subr.mxu0 %v2054_v5 }
 0x182   : > { %v7531_v53 = vpop.f32.mrf.mxu0  ;;  %v7533_v45 = vpop.f32.mrf.mxu1  ;;  %2942 = vmatpush2.msra.mxu0 %v2053_v15  ;;  %v2044_v15 = vmax.f32 %v1689_v26, 0.0  ;;  %v2040_v32 = vmax.f32 %v1683_v38, 0.0  ;;  %v10970_v26 = vld [vmem:[#allocation40_spill] sm:$0xff]  ;;  %v10973_v38 = vld [vmem:[#allocation38_spill] sm:$0xff] }
 0x183   : > { %10962 = vst [vmem:[#allocation53_spill] sm:$0xff] %v7533_v45  ;;  %2943 = vmatprep.subr.mxu0 %v2050_v33  ;;  %v1675_v33 = vadd.f32 %v10967_v22, %v6914_v28  ;;  %v2039_v28 = vmax.f32 %v1681_v50, 0.0  ;;  %v2036_v22 = vmax.f32 %v1677_v40, 0.0  ;;  %v2249_v50 = vld [vmem:[%s6532_s22 + $0x40] sm:$0xff]  ;;  %v2254_v40 = vld [vmem:[%s6532_s22 + $0x68] sm:$0xff] }
 0x184   : > { %v7541_v5 = vpop.f32.mrf.mxu0  ;;  %v7543_v27 = vpop.f32.mrf.mxu1  ;;  %2944 = vmatpush2.msra.mxu0 %v2049_v59  ;;  %v1671_v59 = vadd.f32 %v10969_v17, %v6928_v34 }
 0x185   : > { %10965 = vst [vmem:[#allocation50_spill] sm:$0xff] %v7543_v27  ;;  %2946 = vmatmul.mubr.f32.vlgmr.msra.gmra.mxu0 %v2241_v36  ;;  %3779 = vmatprep.subr.mxu0 %v2048_v44  ;;  %v1669_v44 = vadd.f32 %v10970_v26, %v6928_v34  ;;  %v2035_v17 = vmax.f32 %v1675_v33, 0.0  ;;  %v2244_v26 = vld [vmem:[%s6532_s22 + $0x18] sm:$0xff] }
 0x186   : > { %v7549_v43 = vpop.f32.mrf.mxu0  ;;  %v7551_v52 = vpop.f32.mrf.mxu1  ;;  %3780 = vmatpush1.msra.mxu0 %v2047_v14  ;;  %2951 = vmatprep.mubr.f32.mxu0 %v2246_v20  ;;  %v10972_v14 = vld [vmem:[#allocation39_spill] sm:$0xff]  ;;  %v2032_v16 = vmax.f32 %v1671_v59, 0.0  ;;  %v10980_v59 = vld [vmem:[#allocation30_spill] sm:$0xff] }
 0x187   : > { %10968 = vst [vmem:[#allocation49_spill] sm:$0xff] %v7551_v52  ;;  %3781 = vmatprep.subr.mxu0 %v2044_v15  ;;  %v1665_v20 = vadd.f32 %v10972_v14, %v6943_v41  ;;  %v1663_v15 = vadd.f32 %v10973_v38, %v6943_v41  ;;  %3394 = vmatprep.mubr.f32.mxu1 %v2244_v26  ;;  %v2031_v33 = vmax.f32 %v1669_v44, 0.0  ;;  %v2253_v44 = vld [vmem:[%s6532_s22 + $0x60] sm:$0xff]  ;;  %v10991_v52 = vld [vmem:[#allocation23_spill] sm:$0xff] }
 0x188   : > { %v7559_v63 = vpop.f32.mrf.mxu0  ;;  %v7561_v36 = vpop.f32.mrf.mxu1  ;;  %3782 = vmatpush1.msra.mxu0 %v2043_v19  ;;  %v10975_v19 = vld [vmem:[#allocation35_spill] sm:$0xff] }
 0x189   : > { %10971 = vst [vmem:[#allocation48_spill] sm:$0xff] %v7561_v36  ;;  %2952 = vmatmul.mubr.f32.gmra.mxu0 %v2245_v21  ;;  %3783 = vmatprep.subr.mxu0 %v2040_v32  ;;  %v1659_v62 = vadd.f32 %v10975_v19, %v6965_v51  ;;  %v10976_v32 = vld [vmem:[#allocation34_spill] sm:$0xff]  ;;  %v2028_v10 = vmax.f32 %v1665_v20, 0.0  ;;  %v2027_v26 = vmax.f32 %v1663_v15, 0.0  ;;  %v10984_v20 = vld [vmem:[#allocation28_spill] sm:$0xff] }
 0x18a   : > { %v7567_v54 = vpop.f32.mrf.mxu0  ;;  %v7569_v34 = vpop.f32.mrf.mxu1  ;;  %3784 = vmatpush1.msra.mxu0 %v2039_v28  ;;  %2957 = vmatprep.mubr.f32.mxu0 %v2250_v61  ;;  %v1657_v41 = vadd.f32 %v10976_v32, %v6965_v51  ;;  %v10978_v61 = vld [vmem:[#allocation12_spill] sm:$0xff]  ;;  %v10979_v28 = vld [vmem:[#allocation33_spill] sm:$0xff] }
 0x18b   : > { %10974 = vst [vmem:[#allocation45_spill] sm:$0xff] %v7569_v34  ;;  %3785 = vmatprep.subr.mxu0 %v2036_v22  ;;  %v1653_v38 = vadd.f32 %v10979_v28, %v10978_v61  ;;  %v1651_v22 = vadd.f32 %v10980_v59, %v10978_v61  ;;  %v10982_v32 = vld [vmem:[#allocation17_spill] sm:$0xff]  ;;  %v2024_v47 = vmax.f32 %v1659_v62, 0.0  ;;  %v2258_v28 = vld [vmem:[%s6532_s22 + $0x88] sm:$0xff]  ;;  %v10988_v62 = vld [vmem:[#allocation24_spill] sm:$0xff] }
 0x18c   : > { %v7578_v21 = vpop.f32.mrf.mxu0  ;;  %v7580_v14 = vpop.f32.mrf.mxu1  ;;  %3786 = vmatpush1.msra.mxu0 %v2035_v17  ;;  %v1647_v17 = vadd.f32 %v10983_v13, %v10982_v32 }
 0x18d   : > { %10977 = vst [vmem:[#allocation44_spill] sm:$0xff] %v7580_v14  ;;  %2958 = vmatmul.mubr.f32.gmra.mxu0 %v2249_v50  ;;  %3787 = vmatprep.subr.mxu0 %v2032_v16  ;;  %v1645_v16 = vadd.f32 %v10984_v20, %v10982_v32  ;;  %v2023_v50 = vmax.f32 %v1657_v41, 0.0  ;;  %v2020_v45 = vmax.f32 %v1653_v38, 0.0  ;;  %v2019_v13 = vmax.f32 %v1651_v22, 0.0  ;;  %v2257_v41 = vld [vmem:[%s6532_s22 + $0x80] sm:$0xff]  ;;  %v10990_v20 = vld [vmem:[#allocation27_spill] sm:$0xff] }
 0x18e   : > { %v7586_v19 = vpop.f32.mrf.mxu0  ;;  %v7588_v51 = vpop.f32.mrf.mxu1  ;;  %3788 = vmatpush1.msra.mxu0 %v2031_v33  ;;  %2963 = vmatprep.mubr.f32.mxu0 %v2254_v40  ;;  %v10986_v33 = vld [vmem:[#allocation22_spill] sm:$0xff]  ;;  %v10987_v40 = vld [vmem:[#allocation25_spill] sm:$0xff]  ;;  %v2016_v36 = vmax.f32 %v1647_v17, 0.0  ;;  %v10992_v38 = vld [vmem:[#allocation20_spill] sm:$0xff] }
 0x18f   : > { %10981 = vst [vmem:[#allocation43_spill] sm:$0xff] %v7588_v51  ;;  %3789 = vmatprep.subr.mxu0 %v2028_v10  ;;  %v1641_v59 = vadd.f32 %v10987_v40, %v10986_v33  ;;  %v1639_v10 = vadd.f32 %v10988_v62, %v10986_v33  ;;  %v2262_v40 = vld [vmem:[%s6532_s22 + $0xa8] sm:$0xff] }
 0x190   : > { %v7596_v61 = vpop.f32.mrf.mxu0  ;;  %v7598_v15 = vpop.f32.mrf.mxu1  ;;  %3790 = vmatpush1.msra.mxu0 %v2027_v26  ;;  %v1635_v26 = vadd.f32 %v10991_v52, %v10990_v20  ;;  %v10996_v52 = vld [vmem:[#allocation18_spill] sm:$0xff]  ;;  %v10999_v51 = vld [vmem:[#allocation15_spill] sm:$0xff] }
 0x191   : > { %10985 = vst [vmem:[#allocation40_spill] sm:$0xff] %v7598_v15  ;;  %2964 = vmatmul.mubr.f32.gmra.mxu0 %v2253_v44  ;;  %3791 = vmatprep.subr.mxu0 %v2024_v47  ;;  %v1633_v47 = vadd.f32 %v10992_v38, %v10990_v20  ;;  %v2015_v44 = vmax.f32 %v1645_v16, 0.0  ;;  %v2012_v34 = vmax.f32 %v1641_v59, 0.0  ;;  %v2011_v17 = vmax.f32 %v1639_v10, 0.0  ;;  %v2261_v16 = vld [vmem:[%s6532_s22 + $0xa0] sm:$0xff]  ;;  %v10998_v38 = vld [vmem:[#allocation37_spill] sm:$0xff] }
 0x192   : > { %v7604_v27 = vpop.f32.mrf.mxu0  ;;  %v7606_v32 = vpop.f32.mrf.mxu1  ;;  %3792 = vmatpush1.msra.mxu0 %v2023_v50  ;;  %2969 = vmatprep.mubr.f32.mxu0 %v2258_v28  ;;  %v10994_v50 = vld [vmem:[#allocation32_spill] sm:$0xff]  ;;  %v10995_v28 = vld [vmem:[#allocation19_spill] sm:$0xff]  ;;  %v2008_v15 = vmax.f32 %v1635_v26, 0.0  ;;  %v11000_v59 = vld [vmem:[#allocation14_spill] sm:$0xff] }
 0x193   : > { %10989 = vst [vmem:[#allocation39_spill] sm:$0xff] %v7606_v32  ;;  %3793 = vmatprep.subr.mxu0 %v2020_v45  ;;  %v1629_v62 = vadd.f32 %v10995_v28, %v10994_v50  ;;  %v1627_v45 = vadd.f32 %v10996_v52, %v10994_v50  ;;  %v2266_v28 = vld [vmem:[%s6532_s22 + $0xc8] sm:$0xff]  ;;  %v11004_v52 = vld [vmem:[#allocation13_spill] sm:$0xff] }
 0x194   : > { %v7614_v33 = vpop.f32.mrf.mxu0  ;;  %v7616_v22 = vpop.f32.mrf.mxu1  ;;  %3794 = vmatpush1.msra.mxu0 %v2019_v13  ;;  %v1623_v13 = vadd.f32 %v10999_v51, %v10998_v38 }
 0x195   : > { %10993 = vst [vmem:[#allocation38_spill] sm:$0xff] %v7616_v22  ;;  %2970 = vmatmul.mubr.f32.gmra.mxu0 %v2257_v41  ;;  %3795 = vmatprep.subr.mxu0 %v2016_v36  ;;  %v1621_v36 = vadd.f32 %v11000_v59, %v10998_v38  ;;  %v2007_v41 = vmax.f32 %v1633_v47, 0.0  ;;  %v2004_v51 = vmax.f32 %v1629_v62, 0.0  ;;  %v2003_v38 = vmax.f32 %v1627_v45, 0.0  ;;  %v2265_v22 = vld [vmem:[%s6532_s22 + $0xc0] sm:$0xff]  ;;  %v11009_v62 = vld [vmem:[#allocation8_spill] sm:$0xff] }
 0x196   : > { %v7622_v14 = vpop.f32.mrf.mxu0  ;;  %v7624_v20 = vpop.f32.mrf.mxu1  ;;  %3796 = vmatpush1.msra.mxu0 %v2015_v44  ;;  %2975 = vmatprep.mubr.f32.mxu0 %v2262_v40  ;;  %v11003_v40 = vld [vmem:[#allocation42_spill] sm:$0xff]  ;;  %v2000_v58 = vmax.f32 %v1623_v13, 0.0  ;;  %v11011_v45 = vld [vmem:[#allocation52_spill] sm:$0xff] }
 0x197   : > { %10997 = vst [vmem:[#allocation35_spill] sm:$0xff] %v7624_v20  ;;  %3797 = vmatprep.subr.mxu0 %v2012_v34  ;;  %v7636_v44 = vpop.permute.xlu0 %728  ;;  %v1617_v32 = vadd.f32 %v11004_v52, %v11003_v40  ;;  %v11005_v34 = vld [vmem:[#allocation10_spill] sm:$0xff]  ;;  %v11008_v20 = vld [vmem:[#allocation9_spill] sm:$0xff] }
 0x198   : > { %v7632_v50 = vpop.f32.mrf.mxu0  ;;  %v7634_v10 = vpop.f32.mrf.mxu1  ;;  %3798 = vmatpush1.msra.mxu0 %v2011_v17  ;;  %11002 = vst [vmem:[#allocation12_spill] sm:$0xff] %v7636_v44  ;;  %v1615_v26 = vadd.f32 %v11005_v34, %v11003_v40  ;;  %v11007_v17 = vld [vmem:[#allocation47_spill] sm:$0xff] }
 0x199   : > { %11001 = vst [vmem:[#allocation34_spill] sm:$0xff] %v7634_v10  ;;  %2976 = vmatmul.mubr.f32.gmra.mxu0 %v2261_v16  ;;  %3799 = vmatprep.subr.mxu0 %v2008_v15  ;;  %v1611_v10 = vadd.f32 %v11008_v20, %v11007_v17  ;;  %v1609_v15 = vadd.f32 %v11009_v62, %v11007_v17  ;;  %v1999_v16 = vmax.f32 %v1621_v36, 0.0  ;;  %v1996_v34 = vmax.f32 %v1617_v32, 0.0  ;;  %v11013_v20 = vld [vmem:[#allocation5_spill] sm:$0xff]  ;;  %v2269_v36 = vld [vmem:[%s6532_s22 + $0xe0] sm:$0xff]  ;;  %v11016_v32 = vld [vmem:[#allocation87_spill] sm:$0xff] }
 0x19a   : > { %v1429_v59 = vpop.f32.mrf.mxu0  ;;  %v7642_v47 = vpop.f32.mrf.mxu1  ;;  %3800 = vmatpush1.msra.mxu0 %v2007_v41  ;;  %2981 = vmatprep.mubr.f32.mxu0 %v2266_v28  ;;  %v11012_v41 = vld [vmem:[#allocation6_spill] sm:$0xff]  ;;  %v1603_v13 = vadd.f32 %v11013_v20, %v11011_v45 }
 0x19b   : > { %11006 = vst [vmem:[#allocation33_spill] sm:$0xff] %v7642_v47  ;;  %3801 = vmatprep.subr.mxu0 %v2004_v51  ;;  %v1605_v28 = vadd.f32 %v11012_v41, %v11011_v45  ;;  %v1995_v51 = vmax.f32 %v1615_v26, 0.0  ;;  %v7659_v17 = vpop.permute.xlu0 %723  ;;  %v1992_v62 = vmax.f32 %v1611_v10, 0.0 }
 0x19c   : > { %v1431_v52 = vpop.f32.mrf.mxu0  ;;  %v7650_v40 = vpop.f32.mrf.mxu1  ;;  %3802 = vmatpush1.msra.mxu0 %v2003_v38  ;;  %11015 = vst [vmem:[#allocation29_spill] sm:$0xff] %v7659_v17  ;;  %v2274_v38 = vld [vmem:[%s6532_s22 + $0x108] sm:$0xff] }
 0x19d   : > { %11010 = vst [vmem:[#allocation30_spill] sm:$0xff] %v7650_v40  ;;  %2982 = vmatmul.mubr.f32.gmra.mxu0 %v2265_v22  ;;  %3803 = vmatprep.subr.mxu0 %v2000_v58  ;;  %v1991_v40 = vmax.f32 %v1609_v15, 0.0  ;;  %v1791_v22 = vadd.f32 %v11016_v32, %v7215_v60  ;;  %v11017_v58 = vld [vmem:[#allocation2_spill] sm:$0xff]  ;;  %v1988_v20 = vmax.f32 %v1605_v28, 0.0  ;;  %v1987_v15 = vmax.f32 %v1603_v13, 0.0  ;;  %v11022_v32 = vld [vmem:[#allocation85_spill] sm:$0xff] }
 0x19e   : > { %v1435_v47 = vpop.f32.mrf.mxu0  ;;  %v7656_v55 = vpop.f32.mrf.mxu1  ;;  %3804 = vmatpush1.msra.mxu0 %v1999_v16  ;;  %2987 = vmatprep.mubr.f32.mxu0 %v2270_v0  ;;  %v11019_v0 = vld [vmem:[#allocation86_spill] sm:$0xff]  ;;  %v11025_v13 = vld [vmem:[#allocation4_spill] sm:$0xff] }
 0x19f   : > { %11014 = vst [vmem:[#allocation17_spill] sm:$0xff] %v7656_v55  ;;  %3805 = vmatprep.subr.mxu0 %v1996_v34  ;;  %v1436_v41 = vadd.f32 %v1435_v47, %v11017_v58  ;;  %v1789_v16 = vadd.f32 %v11019_v0, %v7215_v60  ;;  %v11020_v55 = vld [vmem:[#allocation3_spill] sm:$0xff]  ;;  %v11021_v34 = vld [vmem:[#allocation58_spill] sm:$0xff] }
 0x1a0   : > { %v1437_v45 = vpop.f32.mrf.mxu0  ;;  %v7665_v26 = vpop.f32.mrf.mxu1  ;;  %3806 = vmatpush1.msra.mxu0 %v1995_v51  ;;  %v1432_v17 = vadd.f32 %v1431_v52, %v11020_v55  ;;  %v1785_v42 = vadd.f32 %v11022_v32, %v11021_v34  ;;  %v2273_v28 = vld [vmem:[%s6532_s22 + $0x100] sm:$0xff]  ;;  %v11024_v51 = vld [vmem:[#allocation84_spill] sm:$0xff]  ;;  %v1430_v52 = vadd.f32 %v1429_v59, %v11020_v55 }
 0x1a1   : > { %11018 = vst [vmem:[#allocation28_spill] sm:$0xff] %v7665_v26  ;;  %v1438_v10 = vadd.f32 %v1437_v45, %v11017_v58  ;;  %2988 = vmatmul.mubr.f32.gmra.mxu0 %v2269_v36  ;;  %3807 = vmatprep.subr.mxu0 %v1992_v62  ;;  %v1783_v60 = vadd.f32 %v11024_v51, %v11021_v34  ;;  %v2112_v36 = vmax.f32 %v1791_v22, 0.0  ;;  %v2173_v0 = vmax.f32 %v1436_v41, 0.0  ;;  %v2278_v22 = vld [vmem:[%s6532_s22 + $0x128] sm:$0xff] }
 0x1a2   : > { %v7673_v47 = vpop.f32.mrf.mxu0  ;;  %v7675_v9 = vpop.f32.mrf.mxu1  ;;  %3808 = vmatpush1.msra.mxu0 %v1991_v40  ;;  %2993 = vmatprep.mubr.f32.mxu0 %v2274_v38  ;;  %v1426_v62 = vadd.f32 %v7632_v50, %v11025_v13  ;;  %v11027_v40 = vld [vmem:[#allocation83_spill] sm:$0xff]  ;;  %v2111_v26 = vmax.f32 %v1789_v16, 0.0  ;;  %v1424_v34 = vadd.f32 %v7622_v14, %v11025_v13  ;;  %v2170_v59 = vmax.f32 %v1432_v17, 0.0  ;;  %v11028_v50 = vld [vmem:[#allocation82_spill] sm:$0xff]  ;;  %v11031_v14 = vld [vmem:[#allocation81_spill] sm:$0xff] }
 0x1a3   : > { %11023 = vst [vmem:[#allocation22_spill] sm:$0xff] %v7675_v9  ;;  %v2174_v45 = vmax.f32 %v1438_v10, 0.0  ;;  %3809 = vmatprep.subr.mxu0 %v1988_v20  ;;  %v7685_v9 = vpop.permute.xlu0 %878  ;;  %v1779_v38 = vadd.f32 %v11027_v40, %v7263_v39  ;;  %v1777_v41 = vadd.f32 %v11028_v50, %v7263_v39  ;;  %v2108_v20 = vmax.f32 %v1785_v42, 0.0  ;;  %v11029_v10 = vld [vmem:[#allocation7_spill] sm:$0xff]  ;;  %v11032_v39 = vld [vmem:[#allocation80_spill] sm:$0xff] }
 0x1a4   : > { %v7683_v32 = vpop.f32.mrf.mxu0  ;;  %3810 = vmatpush1.msra.mxu0 %v1987_v15  ;;  %11026 = vst [vmem:[#allocation25_spill] sm:$0xff] %v7685_v9  ;;  %v1420_v15 = vadd.f32 %v7614_v33, %v11029_v10  ;;  %v7696_v51 = vpop.f32.mrf.mxu1  ;;  %v1773_v17 = vadd.f32 %v11031_v14, %v7289_v56  ;;  %v2107_v16 = vmax.f32 %v1783_v60, 0.0  ;;  %v1771_v42 = vadd.f32 %v11032_v39, %v7289_v56 }
 0x1a5   : > { %2994 = vmatmul.mubr.f32.gmra.mxu0 %v2273_v28  ;;  %3330 = vmatprep.subr.mxu1 %v2174_v45  ;;  %11030 = vst [vmem:[#allocation24_spill] sm:$0xff] %v7696_v51  ;;  %v2169_v28 = vmax.f32 %v1430_v52, 0.0  ;;  %v2277_v45 = vld [vmem:[%s6532_s22 + $0x120] sm:$0xff]  ;;  %v1418_v33 = vadd.f32 %v7604_v27, %v11029_v10  ;;  %v2166_v50 = vmax.f32 %v1426_v62, 0.0  ;;  %v11033_v51 = vld [vmem:[#allocation11_spill] sm:$0xff]  ;;  %v2165_v52 = vmax.f32 %v1424_v34, 0.0 }
 0x1a6   : > { %3811 = vmatprep.subr.mxu0 %v2112_v36  ;;  %v7698_v40 = vpop.f32.mrf.mxu0  ;;  %3331 = vmatpush1.msra.mxu1 %v2173_v0  ;;  %v2104_v0 = vmax.f32 %v1779_v38, 0.0  ;;  %v1414_v60 = vadd.f32 %v7596_v61, %v11033_v51  ;;  %v2103_v56 = vmax.f32 %v1777_v41, 0.0  ;;  %v1412_v27 = vadd.f32 %v7586_v19, %v11033_v51  ;;  %v11037_v34 = vld [vmem:[#allocation78_spill] sm:$0xff]  ;;  %v11039_v19 = vld [vmem:[#allocation77_spill] sm:$0xff] }
 0x1a7   : > { %3812 = vmatpush2.msra.mxu0 %v2111_v26  ;;  %3332 = vmatprep.subr.mxu1 %v2170_v59  ;;  %v11034_v26 = vld [vmem:[#allocation79_spill] sm:$0xff]  ;;  %v2162_v62 = vmax.f32 %v1420_v15, 0.0  ;;  %v7720_v61 = vpop.permute.xlu0 %873  ;;  %v1765_v14 = vadd.f32 %v11037_v34, %v7317_v6  ;;  %v1761_v15 = vadd.f32 %v11039_v19, %v7341_v7  ;;  %v2161_v39 = vmax.f32 %v1418_v33, 0.0  ;;  %v11045_v34 = vld [vmem:[#allocation26_spill] sm:$0xff] }
 0x1a8   : > { %3813 = vmatprep.subr.mxu0 %v2108_v20  ;;  %v7707_v36 = vpop.f32.mrf.mxu0  ;;  %2999 = vmatprep.mubr.f32.mxu0 %v2278_v22  ;;  %v1767_v59 = vadd.f32 %v11034_v26, %v7317_v6  ;;  %v7715_v20 = vpop.f32.mrf.mxu1  ;;  %v2282_v22 = vld [vmem:[%s6532_s22 + $0x148] sm:$0xff]  ;;  %11036 = vst [vmem:[#allocation23_spill] sm:$0xff] %v7720_v61  ;;  %v2281_v26 = vld [vmem:[%s6532_s22 + $0x140] sm:$0xff]  ;;  %v2157_v33 = vmax.f32 %v1412_v27, 0.0 }
 0x1a9   : > { %3333 = vmatpush1.msra.mxu1 %v2169_v28  ;;  %3814 = vmatpush2.msra.mxu0 %v2107_v16  ;;  %11035 = vst [vmem:[#allocation27_spill] sm:$0xff] %v7715_v20  ;;  %v2100_v16 = vmax.f32 %v1773_v17, 0.0  ;;  %v11038_v28 = vld [vmem:[#allocation16_spill] sm:$0xff]  ;;  %v2158_v17 = vmax.f32 %v1414_v60, 0.0 }
 0x1aa   : > { %3000 = vmatmul.mubr.f32.gmra.mxu0 %v2277_v45  ;;  %3334 = vmatprep.subr.mxu1 %v2166_v50  ;;  %v7717_v38 = vpop.f32.mrf.mxu0  ;;  %v1408_v41 = vadd.f32 %v7578_v21, %v11038_v28  ;;  %v2099_v45 = vmax.f32 %v1771_v42, 0.0  ;;  %v11040_v20 = vld [vmem:[#allocation76_spill] sm:$0xff]  ;;  %v1406_v6 = vadd.f32 %v7567_v54, %v11038_v28  ;;  %v2096_v21 = vmax.f32 %v1767_v59, 0.0  ;;  %v2286_v59 = vld [vmem:[%s6532_s22 + $0x168] sm:$0xff] }
 0x1ab   : > { %3815 = vmatprep.subr.mxu0 %v2104_v0  ;;  %3335 = vmatpush1.msra.mxu1 %v2165_v52  ;;  %v1759_v51 = vadd.f32 %v11040_v20, %v7341_v7  ;;  %v11041_v0 = vld [vmem:[#allocation21_spill] sm:$0xff]  ;;  %v7737_v52 = vpop.f32.mrf.mxu1  ;;  %v11043_v7 = vld [vmem:[#allocation75_spill] sm:$0xff]  ;;  %v2095_v20 = vmax.f32 %v1765_v14, 0.0  ;;  %v7752_v14 = vpop.permute.xlu0 %868 }
 0x1ac   : > { %3816 = vmatpush2.msra.mxu0 %v2103_v56  ;;  %3336 = vmatprep.subr.mxu1 %v2162_v62  ;;  %v7728_v50 = vpop.f32.mrf.mxu0  ;;  %v1402_v42 = vadd.f32 %v7559_v63, %v11041_v0  ;;  %11042 = vst [vmem:[#allocation20_spill] sm:$0xff] %v7737_v52  ;;  %v1755_v62 = vadd.f32 %v11043_v7, %v7355_v35  ;;  %v2154_v60 = vmax.f32 %v1408_v41, 0.0  ;;  %v11044_v63 = vld [vmem:[#allocation74_spill] sm:$0xff]  ;;  %v11069_v52 = vld [vmem:[#allocation60_spill] sm:$0xff] }
 0x1ad   : > { %3817 = vmatprep.subr.mxu0 %v2100_v16  ;;  %3005 = vmatprep.mubr.f32.mxu0 %v2282_v22  ;;  %v1400_v54 = vadd.f32 %v7549_v43, %v11041_v0  ;;  %v1753_v27 = vadd.f32 %v11044_v63, %v7355_v35  ;;  %v2092_v22 = vmax.f32 %v1761_v15, 0.0  ;;  %v1396_v16 = vadd.f32 %v7541_v5, %v11045_v34  ;;  %v11046_v43 = vld [vmem:[#allocation73_spill] sm:$0xff]  ;;  %v11047_v35 = vld [vmem:[#allocation72_spill] sm:$0xff] }
 0x1ae   : > { %3337 = vmatpush1.msra.mxu1 %v2161_v39  ;;  %3818 = vmatpush2.msra.mxu0 %v2099_v45  ;;  %v7739_v56 = vpop.f32.mrf.mxu0  ;;  %v1749_v41 = vadd.f32 %v11046_v43, %v7367_v8  ;;  %v2091_v45 = vmax.f32 %v1759_v51, 0.0  ;;  %v2153_v39 = vmax.f32 %v1406_v6, 0.0  ;;  %v1747_v15 = vadd.f32 %v11047_v35, %v7367_v8  ;;  %v11049_v51 = vld [vmem:[#allocation31_spill] sm:$0xff]  ;;  %v11052_v43 = vld [vmem:[#allocation36_spill] sm:$0xff] }
 0x1af   : > { %3006 = vmatmul.mubr.f32.gmra.mxu0 %v2281_v26  ;;  %3338 = vmatprep.subr.mxu1 %v2158_v17  ;;  %v2285_v26 = vld [vmem:[%s6532_s22 + $0x160] sm:$0xff]  ;;  %v1394_v5 = vadd.f32 %v7531_v53, %v11045_v34  ;;  %v2150_v17 = vmax.f32 %v1402_v42, 0.0  ;;  %v2088_v7 = vmax.f32 %v1755_v62, 0.0  ;;  %v1390_v6 = vadd.f32 %v7523_v31, %v11049_v51  ;;  %v11050_v8 = vld [vmem:[#allocation71_spill] sm:$0xff] }
 0x1b0   : > { %3819 = vmatprep.subr.mxu0 %v2096_v21  ;;  %3339 = vmatpush1.msra.mxu1 %v2157_v33  ;;  %v7750_v19 = vpop.f32.mrf.mxu0  ;;  %v7761_v21 = vpop.f32.mrf.mxu1  ;;  %v2087_v63 = vmax.f32 %v1753_v27, 0.0  ;;  %v1388_v53 = vadd.f32 %v7519_v30, %v11049_v51  ;;  %v2146_v42 = vmax.f32 %v1396_v16, 0.0  ;;  %v2290_v62 = vld [vmem:[%s6532_s22 + $0x188] sm:$0xff]  ;;  %v11053_v27 = vld [vmem:[#allocation69_spill] sm:$0xff]  ;;  %v2083_v30 = vmax.f32 %v1747_v15, 0.0 }
 0x1b1   : > { %3820 = vmatpush2.msra.mxu0 %v2095_v20  ;;  %3340 = vmatprep.subr.mxu1 %v2154_v60  ;;  %11048 = vst [vmem:[#allocation32_spill] sm:$0xff] %v7761_v21  ;;  %v2149_v20 = vmax.f32 %v1400_v54, 0.0  ;;  %v1743_v60 = vadd.f32 %v11050_v8, %v7375_v25  ;;  %v2084_v54 = vmax.f32 %v1749_v41, 0.0  ;;  %v2145_v16 = vmax.f32 %v1394_v5, 0.0  ;;  %v7785_v8 = vpop.permute.xlu0 %863  ;;  %v11056_v5 = vld [vmem:[#allocation41_spill] sm:$0xff] }
 0x1b2   : > { %3821 = vmatprep.subr.mxu0 %v2092_v22  ;;  %3011 = vmatprep.mubr.f32.mxu0 %v2286_v59  ;;  %v7763_v33 = vpop.f32.mrf.mxu0  ;;  %v11051_v22 = vld [vmem:[#allocation70_spill] sm:$0xff]  ;;  %v7780_v35 = vpop.f32.mrf.mxu1  ;;  %v1711_v21 = vadd.f32 %v11069_v52, %v7449_v2  ;;  %v11073_v52 = vld [vmem:[#allocation59_spill] sm:$0xff] }
 0x1b3   : > { %3341 = vmatpush1.msra.mxu1 %v2153_v39  ;;  %3822 = vmatpush2.msra.mxu0 %v2091_v45  ;;  %v1741_v31 = vadd.f32 %v11051_v22, %v7375_v25  ;;  %v1384_v45 = vadd.f32 %v7507_v3, %v11052_v43  ;;  %v1737_v39 = vadd.f32 %v11053_v27, %v7383_v46  ;;  %v11055_v25 = vld [vmem:[#allocation68_spill] sm:$0xff]  ;;  %v2080_v15 = vmax.f32 %v1743_v60, 0.0  ;;  %v11057_v22 = vld [vmem:[#allocation67_spill] sm:$0xff]  ;;  %v11058_v60 = vld [vmem:[#allocation66_spill] sm:$0xff] }
 0x1b4   : > { %3012 = vmatmul.mubr.f32.gmra.mxu0 %v2285_v26  ;;  %3342 = vmatprep.subr.mxu1 %v2150_v17  ;;  %v7771_v59 = vpop.f32.mrf.mxu0  ;;  %11054 = vst [vmem:[#allocation19_spill] sm:$0xff] %v7780_v35  ;;  %v2289_v26 = vld [vmem:[%s6532_s22 + $0x180] sm:$0xff]  ;;  %v1735_v41 = vadd.f32 %v11055_v25, %v7383_v46  ;;  %v1382_v3 = vadd.f32 %v7497_v24, %v11052_v43 }
 0x1b5   : > { %3823 = vmatprep.subr.mxu0 %v2088_v7  ;;  %3343 = vmatpush1.msra.mxu1 %v2149_v20  ;;  %v2142_v7 = vmax.f32 %v1390_v6, 0.0  ;;  %v1378_v20 = vadd.f32 %v7489_v12, %v11056_v5  ;;  %v1731_v27 = vadd.f32 %v11057_v22, %v7391_v18  ;;  %v2079_v46 = vmax.f32 %v1741_v31, 0.0  ;;  %v2294_v6 = vld [vmem:[%s6532_s22 + $0x1a8] sm:$0xff] }
 0x1b6   : > { %3824 = vmatpush2.msra.mxu0 %v2087_v63  ;;  %3344 = vmatprep.subr.mxu1 %v2146_v42  ;;  %v7783_v17 = vpop.f32.mrf.mxu0  ;;  %v2141_v63 = vmax.f32 %v1388_v53, 0.0  ;;  %v1376_v24 = vadd.f32 %v7481_v4, %v11056_v5  ;;  %v2138_v25 = vmax.f32 %v1384_v45, 0.0  ;;  %v1729_v12 = vadd.f32 %v11058_v60, %v7391_v18  ;;  %v11061_v4 = vld [vmem:[#allocation65_spill] sm:$0xff]  ;;  %v11062_v18 = vld [vmem:[#allocation64_spill] sm:$0xff] }
 0x1b7   : > { %3825 = vmatprep.subr.mxu0 %v2084_v54  ;;  %3017 = vmatprep.mubr.f32.mxu0 %v2290_v62  ;;  %v2076_v53 = vmax.f32 %v1737_v39, 0.0  ;;  %v11059_v62 = vld [vmem:[#allocation46_spill] sm:$0xff]  ;;  %v1725_v45 = vadd.f32 %v11061_v4, %v7405_v37  ;;  %v1723_v39 = vadd.f32 %v11062_v18, %v7405_v37  ;;  %v2134_v22 = vmax.f32 %v1378_v20, 0.0  ;;  %v11064_v37 = vld [vmem:[#allocation63_spill] sm:$0xff] }
 0x1b8   : > { %3345 = vmatpush1.msra.mxu1 %v2145_v16  ;;  %3826 = vmatpush2.msra.mxu0 %v2083_v30  ;;  %v7793_v42 = vpop.f32.mrf.mxu0  ;;  %v1372_v54 = vadd.f32 %v7471_v57, %v11059_v62  ;;  %v7804_v30 = vpop.f32.mrf.mxu1  ;;  %v2075_v16 = vmax.f32 %v1735_v41, 0.0  ;;  %v1370_v57 = vadd.f32 %v7463_v49, %v11059_v62  ;;  %v2072_v60 = vmax.f32 %v1731_v27, 0.0  ;;  %v11063_v41 = vld [vmem:[#allocation51_spill] sm:$0xff] }
 0x1b9   : > { %3018 = vmatmul.mubr.f32.gmra.mxu0 %v2289_v26  ;;  %3346 = vmatprep.subr.mxu1 %v2142_v7  ;;  %11060 = vst [vmem:[#allocation18_spill] sm:$0xff] %v7804_v30  ;;  %v2137_v26 = vmax.f32 %v1382_v3, 0.0  ;;  %v2293_v7 = vld [vmem:[%s6532_s22 + $0x1a0] sm:$0xff]  ;;  %v1366_v3 = vadd.f32 %v7455_v29, %v11063_v41  ;;  %v2071_v4 = vmax.f32 %v1729_v12, 0.0  ;;  %v1364_v49 = vadd.f32 %v7445_v1, %v11063_v41  ;;  %v2298_v27 = vld [vmem:[%s6532_s22 + $0x1c8] sm:$0xff]  ;;  %v11068_v1 = vld [vmem:[#allocation61_spill] sm:$0xff] }
 0x1ba   : > { %3827 = vmatprep.subr.mxu0 %v2080_v15  ;;  %3347 = vmatpush1.msra.mxu1 %v2141_v63  ;;  %v7806_v31 = vpop.f32.mrf.mxu0  ;;  %v7817_v63 = vpop.permute.xlu0 %858  ;;  %v2130_v20 = vmax.f32 %v1372_v54, 0.0  ;;  %v11066_v29 = vld [vmem:[#allocation62_spill] sm:$0xff]  ;;  %v1713_v12 = vadd.f32 %v11068_v1, %v7449_v2  ;;  %v2067_v54 = vmax.f32 %v1723_v39, 0.0 }
 0x1bb   : > { %3828 = vmatpush2.msra.mxu0 %v2079_v46  ;;  %3348 = vmatprep.subr.mxu1 %v2138_v25  ;;  %v2133_v46 = vmax.f32 %v1376_v24, 0.0  ;;  %v1719_v25 = vadd.f32 %v11064_v37, %v7425_v11  ;;  %v1717_v24 = vadd.f32 %v11066_v29, %v7425_v11  ;;  %v2129_v37 = vmax.f32 %v1370_v57, 0.0  ;;  %v11072_v2 = vld [vmem:[#allocation102_spill] sm:$0xff]  ;;  %v11074_v29 = vld [vmem:[#allocation92_spill] sm:$0xff] }
 0x1bc   : > { %3829 = vmatprep.subr.mxu0 %v2076_v53  ;;  %3023 = vmatprep.mubr.f32.mxu0 %v2294_v6  ;;  %v7815_v15 = vpop.f32.mrf.mxu0  ;;  %v7825_v6 = vpop.f32.mrf.mxu1  ;;  %v2125_v57 = vmax.f32 %v1364_v49, 0.0  ;;  %v2302_v49 = vld [vmem:[%s6532_s22 + $0x1e8] sm:$0xff] }
 0x1bd   : > { %3349 = vmatpush1.msra.mxu1 %v2137_v26  ;;  %3830 = vmatpush2.msra.mxu0 %v2075_v16  ;;  %11065 = vst [vmem:[#allocation37_spill] sm:$0xff] %v7825_v6  ;;  %v2068_v16 = vmax.f32 %v1725_v45, 0.0  ;;  %v11067_v26 = vld [vmem:[#allocation54_spill] sm:$0xff]  ;;  %v2126_v45 = vmax.f32 %v1366_v3, 0.0  ;;  %v2063_v3 = vmax.f32 %v1717_v24, 0.0 }
 0x1be   : > { %3024 = vmatmul.mubr.f32.gmra.mxu0 %v2293_v7  ;;  %3350 = vmatprep.subr.mxu1 %v2134_v22  ;;  %v7828_v53 = vpop.f32.mrf.mxu0  ;;  %v1360_v18 = vadd.f32 %v7437_v48, %v11067_v26  ;;  %v2297_v7 = vld [vmem:[%s6532_s22 + $0x1c0] sm:$0xff]  ;;  %v1358_v11 = vadd.f32 %v7429_v23, %v11067_v26  ;;  %v2064_v48 = vmax.f32 %v1719_v25, 0.0  ;;  %v1707_v23 = vadd.f32 %v11073_v52, %v11072_v2  ;;  %v11079_v52 = vld [vmem:[#allocation56_spill] sm:$0xff] }
 0x1bf   : > { %3831 = vmatprep.subr.mxu0 %v2072_v60  ;;  %3351 = vmatpush1.msra.mxu1 %v2133_v46  ;;  %v11070_v60 = vld [vmem:[#allocation94_spill] sm:$0xff]  ;;  %v7845_v46 = vpop.f32.mrf.mxu1 }
 0x1c0   : > { %3832 = vmatpush2.msra.mxu0 %v2071_v4  ;;  %3352 = vmatprep.subr.mxu1 %v2130_v20  ;;  %v7837_v22 = vpop.f32.mrf.mxu0  ;;  %v1354_v39 = vadd.f32 %v11070_v60, %v7636_v44  ;;  %11071 = vst [vmem:[#allocation15_spill] sm:$0xff] %v7845_v46  ;;  %v7849_v20 = vpop.permute.xlu0 %853  ;;  %v2122_v25 = vmax.f32 %v1360_v18, 0.0  ;;  %v11077_v60 = vld [vmem:[#allocation90_spill] sm:$0xff]  ;;  %v2121_v46 = vmax.f32 %v1358_v11, 0.0 }
 0x1c1   : > { %3833 = vmatprep.subr.mxu0 %v2068_v16  ;;  %3029 = vmatprep.mubr.f32.mxu0 %v2298_v27  ;;  %v1352_v27 = vadd.f32 %v11074_v29, %v7636_v44  ;;  %v11075_v16 = vld [vmem:[#allocation57_spill] sm:$0xff]  ;;  %v11078_v24 = vld [vmem:[#allocation106_spill] sm:$0xff]  ;;  %v2059_v29 = vmax.f32 %v1711_v21, 0.0 }
 0x1c2   : > { %3353 = vmatpush1.msra.mxu1 %v2129_v37  ;;  %3834 = vmatpush2.msra.mxu0 %v2067_v54  ;;  %v7847_v4 = vpop.f32.mrf.mxu0  ;;  %v1705_v1 = vadd.f32 %v11075_v16, %v11072_v2  ;;  %v2060_v54 = vmax.f32 %v1713_v12, 0.0  ;;  %v11076_v37 = vld [vmem:[#allocation29_spill] sm:$0xff]  ;;  %v1701_v6 = vadd.f32 %v11079_v52, %v11078_v24  ;;  %v2301_v18 = vld [vmem:[%s6532_s22 + $0x1e0] sm:$0xff]  ;;  %v11081_v12 = vld [vmem:[#allocation88_spill] sm:$0xff]  ;;  %v2118_v16 = vmax.f32 %v1354_v39, 0.0 }
 0x1c3   : > { %3030 = vmatmul.mubr.f32.gmra.mxu0 %v2297_v7  ;;  %3354 = vmatprep.subr.mxu1 %v2126_v45  ;;  %v1348_v35 = vadd.f32 %v11077_v60, %v11076_v37  ;;  %v11080_v7 = vld [vmem:[#allocation55_spill] sm:$0xff]  ;;  %v1346_v2 = vadd.f32 %v11081_v12, %v11076_v37  ;;  %v2056_v60 = vmax.f32 %v1707_v23, 0.0  ;;  %v2117_v21 = vmax.f32 %v1352_v27, 0.0 }
 0x1c4   : > { %3835 = vmatprep.subr.mxu0 %v2064_v48  ;;  %3355 = vmatpush1.msra.mxu1 %v2125_v57  ;;  %v7860_v30 = vpop.f32.mrf.mxu0  ;;  %v1699_v45 = vadd.f32 %v11080_v7, %v11078_v24  ;;  %v7869_v48 = vpop.f32.mrf.mxu1  ;;  %v2055_v11 = vmax.f32 %v1705_v1, 0.0  ;;  %v2052_v52 = vmax.f32 %v1701_v6, 0.0  ;;  %v2310_v1 = vld [vmem:[%s6532_s22 + $0x228] sm:$0xff] }
 0x1c5   : > { %3836 = vmatpush2.msra.mxu0 %v2063_v3  ;;  %3356 = vmatprep.subr.mxu1 %v2122_v25  ;;  %11082 = vst [vmem:[#allocation14_spill] sm:$0xff] %v7869_v48  ;;  %v2114_v3 = vmax.f32 %v1348_v35, 0.0  ;;  %v2306_v25 = vld [vmem:[%s6532_s22 + $0x208] sm:$0xff]  ;;  %v7876_v39 = vpop.permute.xlu0 %848  ;;  %v2113_v23 = vmax.f32 %v1346_v2, 0.0  ;;  %v2305_v35 = vld [vmem:[%s6532_s22 + $0x200] sm:$0xff] }
 0x1c6   : > { %3837 = vmatprep.subr.mxu0 %v2060_v54  ;;  %3035 = vmatprep.mubr.f32.mxu0 %v2302_v49  ;;  %v7871_v57 = vpop.f32.mrf.mxu0  ;;  %v2051_v49 = vmax.f32 %v1699_v45, 0.0  ;;  %v7878_v27 = vpop.f32.mrf.mxu1  ;;  %v2314_v45 = vld [vmem:[%s6532_s22 + $0x248] sm:$0xff] }
 0x1c7   : > { %3357 = vmatpush1.msra.mxu1 %v2121_v46  ;;  %3838 = vmatpush2.msra.mxu0 %v2059_v29  ;;  %11083 = vst [vmem:[#allocation42_spill] sm:$0xff] %v7878_v27  ;;  %v2309_v29 = vld [vmem:[%s6532_s22 + $0x220] sm:$0xff]  ;;  %v2326_v48 = vld [vmem:[%s6532_s22 + $0x2a8] sm:$0xff] }
 0x1c8   : > { %3036 = vmatmul.mubr.f32.gmra.mxu0 %v2301_v18  ;;  %3358 = vmatprep.subr.mxu1 %v2118_v16  ;;  %v7874_v24 = vpop.f32.mrf.mxu0  ;;  %v7886_v54 = vpop.f32.mrf.mxu1  ;;  %v2313_v16 = vld [vmem:[%s6532_s22 + $0x240] sm:$0xff] }
 0x1c9   : > { %3839 = vmatprep.subr.mxu0 %v2056_v60  ;;  %3359 = vmatpush1.msra.mxu1 %v2117_v21  ;;  %11084 = vst [vmem:[#allocation13_spill] sm:$0xff] %v7886_v54  ;;  %v7891_v7 = vpop.permute.xlu0 %843  ;;  %v2318_v21 = vld [vmem:[%s6532_s22 + $0x268] sm:$0xff] }
 0x1ca   : > { %3840 = vmatpush2.msra.mxu0 %v2055_v11  ;;  %3360 = vmatprep.subr.mxu1 %v2114_v3  ;;  %v7881_v46 = vpop.f32.mrf.mxu0  ;;  %v7894_v2 = vpop.f32.mrf.mxu1 }
 0x1cb   : > { %3841 = vmatprep.subr.mxu0 %v2052_v52  ;;  %3041 = vmatprep.mubr.f32.mxu0 %v2306_v25  ;;  %11085 = vst [vmem:[#allocation10_spill] sm:$0xff] %v7894_v2  ;;  %v2317_v52 = vld [vmem:[%s6532_s22 + $0x260] sm:$0xff] }
 0x1cc   : > { %3361 = vmatpush1.msra.mxu1 %v2113_v23  ;;  %3842 = vmatpush2.msra.mxu0 %v2051_v49  ;;  %v7884_v6 = vpop.f32.mrf.mxu0  ;;  %v7900_v25 = vpop.f32.mrf.mxu1  ;;  %v2322_v23 = vld [vmem:[%s6532_s22 + $0x288] sm:$0xff] }
 0x1cd   : > { %3042 = vmatmul.mubr.f32.gmra.mxu0 %v2305_v35  ;;  %v7898_v3 = vpop.permute.xlu0 %838  ;;  %11086 = vst [vmem:[#allocation47_spill] sm:$0xff] %v7900_v25  ;;  %v2330_v25 = vld [vmem:[%s6532_s22 + $0x2c8] sm:$0xff] }
 0x1ce   : > { %3047 = vmatprep.mubr.f32.mxu0 %v2310_v1  ;;  %v7889_v18 = vpop.f32.mrf.mxu0  ;;  %v7904_v1 = vpop.f32.mrf.mxu1 }
 0x1cf   : > { %11087 = vst [vmem:[#allocation9_spill] sm:$0xff] %v7904_v1 }
 0x1d0   : > { %v1509_v12 = vpop.f32.mrf.mxu0 }
 0x1d1   : > { %3048 = vmatmul.mubr.f32.gmra.mxu0 %v2309_v29  ;;  %v2321_v29 = vld [vmem:[%s6532_s22 + $0x280] sm:$0xff]  ;;  %v7908_v27 = vpop.permute.xlu0 %833 }
 0x1d2   : > { %3053 = vmatprep.mubr.f32.mxu0 %v2314_v45  ;;  %v1513_v60 = vpop.f32.mrf.mxu0 }
 0x1d4   : > { %v1515_v11 = vpop.f32.mrf.mxu0 }
 0x1d5   : > { %3054 = vmatmul.mubr.f32.gmra.mxu0 %v2313_v16  ;;  %v7910_v16 = vpop.f32.mrf.mxu1  ;;  %v7917_v44 = vpop.permute.xlu0 %828 }
 0x1d6   : > { %3059 = vmatprep.mubr.f32.mxu0 %v2318_v21  ;;  %v1519_v49 = vpop.f32.mrf.mxu0  ;;  %11088 = vst [vmem:[#allocation8_spill] sm:$0xff] %v7910_v16  ;;  %v2325_v21 = vld [vmem:[%s6532_s22 + $0x2a0] sm:$0xff] }
 0x1d7   : > { %v7919_v26 = vpop.f32.mrf.mxu1 }
 0x1d8   : > { %v1521_v35 = vpop.f32.mrf.mxu0  ;;  %11089 = vst [vmem:[#allocation52_spill] sm:$0xff] %v7919_v26 }
 0x1d9   : > { %3060 = vmatmul.mubr.f32.gmra.mxu0 %v2317_v52  ;;  %v1522_v16 = vadd.f32 %v1521_v35, %v7752_v14  ;;  %v1510_v35 = vadd.f32 %v1509_v12, %v7817_v63  ;;  %v1502_v12 = vadd.f32 %v7881_v46, %v7849_v20  ;;  %v1492_v46 = vadd.f32 %v7860_v30, %v7891_v7  ;;  %v2346_v30 = vld [vmem:[%s6532_s22 + $0x348] sm:$0xff] }
 0x1da   : > { %3065 = vmatprep.mubr.f32.mxu0 %v2322_v23  ;;  %v1525_v45 = vpop.f32.mrf.mxu0 }
 0x1dc   : > { %v1527_v54 = vpop.f32.mrf.mxu0 }
 0x1dd   : > { %3066 = vmatmul.mubr.f32.gmra.mxu0 %v2321_v29  ;;  %v1528_v23 = vadd.f32 %v1527_v54, %v7720_v61  ;;  %v1526_v29 = vadd.f32 %v1525_v45, %v7720_v61  ;;  %v1516_v54 = vadd.f32 %v1515_v11, %v7785_v8  ;;  %v1514_v45 = vadd.f32 %v1513_v60, %v7785_v8  ;;  %v2338_v61 = vld [vmem:[%s6532_s22 + $0x308] sm:$0xff] }
 0x1de   : > { %3071 = vmatprep.mubr.f32.mxu0 %v2326_v48  ;;  %v1531_v2 = vpop.f32.mrf.mxu0  ;;  %v2329_v48 = vld [vmem:[%s6532_s22 + $0x2c0] sm:$0xff]  ;;  %v1504_v60 = vadd.f32 %v7884_v6, %v7849_v20  ;;  %v1496_v6 = vadd.f32 %v7871_v57, %v7876_v39  ;;  %v1486_v57 = vadd.f32 %v7837_v22, %v7898_v3 }
 0x1df   : > { %v1532_v52 = vadd.f32 %v1531_v2, %v7685_v9  ;;  %v2334_v2 = vld [vmem:[%s6532_s22 + $0x2e8] sm:$0xff]  ;;  %v2233_v26 = vmax.f32 %v1526_v29, 0.0 }
 0x1e0   : > { %v1533_v37 = vpop.f32.mrf.mxu0  ;;  %v2342_v29 = vld [vmem:[%s6532_s22 + $0x328] sm:$0xff] }
 0x1e1   : > { %3072 = vmatmul.mubr.f32.gmra.mxu0 %v2325_v21  ;;  %v1534_v1 = vadd.f32 %v1533_v37, %v7685_v9  ;;  %v1520_v21 = vadd.f32 %v1519_v49, %v7752_v14  ;;  %v2237_v62 = vmax.f32 %v1532_v52, 0.0  ;;  %v2234_v37 = vmax.f32 %v1528_v23, 0.0  ;;  %v7927_v9 = vpop.f32.mrf.mxu1  ;;  %v7933_v49 = vpop.permute.xlu0 %823  ;;  %v2337_v23 = vld [vmem:[%s6532_s22 + $0x300] sm:$0xff] }
 0x1e2   : > { %3077 = vmatprep.mubr.f32.mxu0 %v2330_v25  ;;  %v2333_v25 = vld [vmem:[%s6532_s22 + $0x2e0] sm:$0xff]  ;;  %v2226_v52 = vmax.f32 %v1516_v54, 0.0  ;;  %v2217_v54 = vmax.f32 %v1502_v12, 0.0  ;;  %v2350_v12 = vld [vmem:[%s6532_s22 + $0x368] sm:$0xff] }
 0x1e3   : > { %v2238_v41 = vmax.f32 %v1534_v1, 0.0  ;;  %v2230_v1 = vmax.f32 %v1522_v16, 0.0  ;;  %v2229_v11 = vmax.f32 %v1520_v21, 0.0  ;;  %v2225_v16 = vmax.f32 %v1514_v45, 0.0 }
 0x1e5   : > { %3078 = vmatmul.mubr.f32.gmra.mxu0 %v2329_v48  ;;  %3362 = vmatprep.subr.mxu1 %v2238_v41  ;;  %v1508_v41 = vadd.f32 %v7889_v18, %v7817_v63  ;;  %v1498_v18 = vadd.f32 %v7874_v24, %v7876_v39  ;;  %v1490_v24 = vadd.f32 %v7847_v4, %v7891_v7 }
 0x1e6   : > { %3083 = vmatprep.mubr.f32.mxu0 %v2334_v2  ;;  %3363 = vmatpush2.msra.mxu1 %v2237_v62  ;;  %v7939_v62 = vpop.f32.mrf.mxu1  ;;  %v2218_v2 = vmax.f32 %v1504_v60, 0.0  ;;  %v1480_v4 = vadd.f32 %v7815_v15, %v7908_v27  ;;  %v2345_v60 = vld [vmem:[%s6532_s22 + $0x340] sm:$0xff] }
 0x1e7   : > { %3364 = vmatprep.subr.mxu1 %v2234_v37  ;;  %v2221_v48 = vmax.f32 %v1508_v41, 0.0  ;;  %v2341_v37 = vld [vmem:[%s6532_s22 + $0x320] sm:$0xff]  ;;  %v2214_v45 = vmax.f32 %v1498_v18, 0.0  ;;  %v1478_v41 = vadd.f32 %v7806_v31, %v7908_v27 }
 0x1e8   : > { %3365 = vmatpush2.msra.mxu1 %v2233_v26  ;;  %v2222_v26 = vmax.f32 %v1510_v35, 0.0  ;;  %v7955_v21 = vpop.f32.mrf.mxu1  ;;  %v2213_v35 = vmax.f32 %v1496_v6, 0.0  ;;  %v2202_v18 = vmax.f32 %v1480_v4, 0.0  ;;  %v2349_v6 = vld [vmem:[%s6532_s22 + $0x360] sm:$0xff] }
 0x1e9   : > { %3084 = vmatmul.mubr.f32.gmra.mxu0 %v2333_v25  ;;  %3366 = vmatprep.subr.mxu1 %v2230_v1  ;;  %v1484_v25 = vadd.f32 %v7828_v53, %v7898_v3  ;;  %v2210_v1 = vmax.f32 %v1492_v46, 0.0  ;;  %v1474_v53 = vadd.f32 %v7793_v42, %v7917_v44  ;;  %v1466_v42 = vadd.f32 %v7763_v33, %v7933_v49  ;;  %v2354_v46 = vld [vmem:[%s6532_s22 + $0x388] sm:$0xff] }
 0x1ea   : > { %3089 = vmatprep.mubr.f32.mxu0 %v2338_v61  ;;  %3367 = vmatpush2.msra.mxu1 %v2229_v11  ;;  %v7951_v61 = vpop.permute.xlu0 %818  ;;  %v2209_v11 = vmax.f32 %v1490_v24, 0.0  ;;  %v7967_v22 = vpop.f32.mrf.mxu1 }
 0x1eb   : > { %3368 = vmatprep.subr.mxu1 %v2226_v52  ;;  %v2206_v52 = vmax.f32 %v1486_v57, 0.0  ;;  %v2205_v31 = vmax.f32 %v1484_v25, 0.0  ;;  %v8001_v25 = vpop.permute.xlu1 %803 }
 0x1ec   : > { %3369 = vmatpush2.msra.mxu1 %v2225_v16  ;;  %v1472_v16 = vadd.f32 %v7783_v17, %v7917_v44  ;;  %v1462_v17 = vadd.f32 %v7750_v19, %v7951_v61  ;;  %v1444_v4 = vadd.f32 %v7683_v32, %v8001_v25 }
 0x1ed   : > { %3090 = vmatmul.mubr.f32.gmra.mxu0 %v2337_v23  ;;  %3370 = vmatprep.subr.mxu1 %v2222_v26  ;;  %v1468_v23 = vadd.f32 %v7771_v59, %v7933_v49  ;;  %v2201_v26 = vmax.f32 %v1478_v41, 0.0  ;;  %v1460_v59 = vadd.f32 %v7739_v56, %v7951_v61 }
 0x1ee   : > { %3095 = vmatprep.mubr.f32.mxu0 %v2342_v29  ;;  %3371 = vmatpush2.msra.mxu1 %v2221_v48  ;;  %v7973_v15 = vpop.permute.xlu0 %813  ;;  %v7981_v29 = vpop.f32.mrf.mxu1  ;;  %v2198_v48 = vmax.f32 %v1474_v53, 0.0 }
 0x1ef   : > { %3372 = vmatprep.subr.mxu1 %v2218_v2  ;;  %v2197_v2 = vmax.f32 %v1472_v16, 0.0  ;;  %v1456_v33 = vadd.f32 %v7728_v50, %v7973_v15  ;;  %v2194_v24 = vmax.f32 %v1468_v23, 0.0  ;;  %v1454_v19 = vadd.f32 %v7717_v38, %v7973_v15  ;;  %v2358_v50 = vld [vmem:[%s6532_s22 + $0x3a8] sm:$0xff]  ;;  %v11091_v16 = vld [vmem:[#allocation17_spill] sm:$0xff]  ;;  %v11092_v23 = vld [vmem:[#allocation30_spill] sm:$0xff] }
 0x1f0   : > { %3373 = vmatpush2.msra.mxu1 %v2217_v54  ;;  %v7995_v57 = vpop.f32.mrf.mxu1  ;;  %v2189_v38 = vmax.f32 %v1460_v59, 0.0  ;;  %v2366_v59 = vld [vmem:[%s6532_s22 + $0x3e8] sm:$0xff] }
 0x1f1   : > { %3096 = vmatmul.mubr.f32.gmra.mxu0 %v2341_v37  ;;  %3374 = vmatprep.subr.mxu1 %v2214_v45  ;;  %v2193_v37 = vmax.f32 %v1466_v42, 0.0  ;;  %v2353_v45 = vld [vmem:[%s6532_s22 + $0x380] sm:$0xff]  ;;  %v2185_v41 = vmax.f32 %v1454_v19, 0.0 }
 0x1f2   : > { %3101 = vmatprep.mubr.f32.mxu0 %v2346_v30  ;;  %3375 = vmatpush2.msra.mxu1 %v2213_v35  ;;  %v7991_v54 = vpop.permute.xlu0 %808  ;;  %v2190_v30 = vmax.f32 %v1462_v17, 0.0  ;;  %v2243_v17 = vld [vmem:[%s6532_s22 + $0x10] sm:$0xff] }
 0x1f3   : > { %3376 = vmatprep.subr.mxu1 %v2210_v1  ;;  %v1450_v56 = vadd.f32 %v7707_v36, %v7991_v54  ;;  %v1448_v35 = vadd.f32 %v7698_v40, %v7991_v54  ;;  %v2186_v1 = vmax.f32 %v1456_v33, 0.0  ;;  %v1442_v36 = vadd.f32 %v7673_v47, %v8001_v25  ;;  %v2362_v40 = vld [vmem:[%s6532_s22 + $0x3c8] sm:$0xff]  ;;  %v11094_v33 = vld [vmem:[#allocation34_spill] sm:$0xff] }
 0x1f4   : > { %3377 = vmatpush2.msra.mxu1 %v2209_v11  ;;  %v8009_v11 = vpop.f32.mrf.mxu1  ;;  %v1885_v47 = vadd.f32 %v11091_v16, %v11017_v58 }
 0x1f5   : > { %3102 = vmatmul.mubr.f32.gmra.mxu0 %v2345_v60  ;;  %3378 = vmatprep.subr.mxu1 %v2206_v52  ;;  %v2357_v60 = vld [vmem:[%s6532_s22 + $0x3a0] sm:$0xff]  ;;  %v2182_v53 = vmax.f32 %v1450_v56, 0.0  ;;  %v11090_v52 = vld [vmem:[#allocation28_spill] sm:$0xff]  ;;  %v2177_v42 = vmax.f32 %v1442_v36, 0.0  ;;  %v11097_v36 = vld [vmem:[#allocation39_spill] sm:$0xff] }
 0x1f6   : > { %3107 = vmatprep.mubr.f32.mxu0 %v2350_v12  ;;  %3379 = vmatpush2.msra.mxu1 %v2205_v31  ;;  %v1887_v32 = vadd.f32 %v11090_v52, %v11017_v58  ;;  %v2181_v12 = vmax.f32 %v1448_v35, 0.0  ;;  %v2178_v31 = vmax.f32 %v1444_v4, 0.0  ;;  %v2175_v19 = vmax.f32 %v1885_v47, 0.0  ;;  %v2370_v4 = vld [vmem:[%s6532_s22 + $0x408] sm:$0xff] }
 0x1f7   : > { %3380 = vmatprep.subr.mxu1 %v2202_v18  ;;  %v1881_v18 = vadd.f32 %v11092_v23, %v11020_v55 }
 0x1f8   : > { %3381 = vmatpush2.msra.mxu1 %v2201_v26  ;;  %v8019_v26 = vpop.f32.mrf.mxu1  ;;  %v2176_v58 = vmax.f32 %v1887_v32, 0.0  ;;  %v11100_v32 = vld [vmem:[#allocation43_spill] sm:$0xff] }
 0x1f9   : > { %3108 = vmatmul.mubr.f32.gmra.mxu0 %v2349_v6  ;;  %3382 = vmatprep.subr.mxu1 %v2198_v48  ;;  %v2361_v6 = vld [vmem:[%s6532_s22 + $0x3c0] sm:$0xff]  ;;  %v11093_v48 = vld [vmem:[#allocation33_spill] sm:$0xff]  ;;  %v2172_v56 = vmax.f32 %v1881_v18, 0.0 }
 0x1fa   : > { %3113 = vmatprep.mubr.f32.mxu0 %v2354_v46  ;;  %3383 = vmatpush2.msra.mxu1 %v2197_v2  ;;  %v1879_v46 = vadd.f32 %v11093_v48, %v11020_v55  ;;  %v2248_v2 = vld [vmem:[%s6532_s22 + $0x38] sm:$0xff]  ;;  %v2365_v55 = vld [vmem:[%s6532_s22 + $0x3e0] sm:$0xff] }
 0x1fb   : > { %3384 = vmatprep.subr.mxu1 %v2194_v24  ;;  %v1875_v24 = vadd.f32 %v11094_v33, %v11025_v13  ;;  %v2256_v33 = vld [vmem:[%s6532_s22 + $0x78] sm:$0xff] }
 0x1fc   : > { %3385 = vmatpush2.msra.mxu1 %v2193_v37  ;;  %v11095_v37 = vld [vmem:[#allocation35_spill] sm:$0xff] }
 0x1fd   : > { %3114 = vmatmul.mubr.f32.gmra.mxu0 %v2353_v45  ;;  %3386 = vmatprep.subr.mxu1 %v2190_v30  ;;  %v1873_v45 = vadd.f32 %v11095_v37, %v11025_v13  ;;  %v8031_v30 = vpop.f32.mrf.mxu1  ;;  %v2252_v13 = vld [vmem:[%s6532_s22 + $0x58] sm:$0xff]  ;;  %v2168_v52 = vmax.f32 %v1875_v24, 0.0 }
 0x1fe   : > { %3119 = vmatprep.mubr.f32.mxu0 %v2358_v50  ;;  %3387 = vmatpush2.msra.mxu1 %v2189_v38  ;;  %v11096_v50 = vld [vmem:[#allocation38_spill] sm:$0xff]  ;;  %v2171_v38 = vmax.f32 %v1879_v46, 0.0  ;;  %v2251_v46 = vld [vmem:[%s6532_s22 + $0x50] sm:$0xff]  ;;  %v11104_v24 = vld [vmem:[#allocation49_spill] sm:$0xff] }
 0x1ff   : > { %3388 = vmatprep.subr.mxu1 %v2186_v1  ;;  %v1869_v35 = vadd.f32 %v11096_v50, %v11029_v10  ;;  %v2247_v1 = vld [vmem:[%s6532_s22 + $0x30] sm:$0xff]  ;;  %v2167_v16 = vmax.f32 %v1873_v45, 0.0  ;;  %v8045_v47 = vpop.f32.mrf.mxu1 }
 0x200   : > { %3389 = vmatpush2.msra.mxu1 %v2185_v41  ;;  %v1867_v41 = vadd.f32 %v11097_v36, %v11029_v10  ;;  %v11101_v10 = vld [vmem:[#allocation44_spill] sm:$0xff]  ;;  %v11107_v36 = vld [vmem:[#allocation109_spill] sm:$0xff] }
 0x201   : > { %3120 = vmatmul.mubr.f32.gmra.mxu0 %v2357_v60  ;;  %3390 = vmatprep.subr.mxu1 %v2182_v53  ;;  %v11098_v60 = vld [vmem:[#allocation11_spill] sm:$0xff]  ;;  %v11099_v53 = vld [vmem:[#allocation40_spill] sm:$0xff]  ;;  %v1857_v23 = vadd.f32 %v11101_v10, %v11038_v28  ;;  %v2164_v18 = vmax.f32 %v1869_v35, 0.0  ;;  %v8059_v45 = vpop.f32.mrf.mxu1 }
 0x202   : > { %3125 = vmatprep.mubr.f32.mxu0 %v2362_v40  ;;  %3391 = vmatpush2.msra.mxu1 %v2181_v12  ;;  %v1863_v40 = vadd.f32 %v11099_v53, %v11098_v60  ;;  %v1861_v12 = vadd.f32 %v11100_v32, %v11098_v60  ;;  %v2163_v48 = vmax.f32 %v1867_v41, 0.0  ;;  %v2378_v35 = vld [vmem:[%s6532_s22 + $0x448] sm:$0xff]  ;;  %v1839_v41 = vadd.f32 %v11107_v36, %v11049_v51  ;;  %v2260_v60 = vld [vmem:[%s6532_s22 + $0x98] sm:$0xff]  ;;  %v11108_v53 = vld [vmem:[#allocation108_spill] sm:$0xff] }
 0x203   : > { %3392 = vmatprep.subr.mxu1 %v2178_v31  ;;  %v2369_v31 = vld [vmem:[%s6532_s22 + $0x400] sm:$0xff]  ;;  %v2156_v50 = vmax.f32 %v1857_v23, 0.0  ;;  %v8073_v32 = vpop.f32.mrf.mxu1  ;;  %v2382_v10 = vld [vmem:[%s6532_s22 + $0x468] sm:$0xff]  ;;  %v11110_v23 = vld [vmem:[#allocation105_spill] sm:$0xff] }
 0x204   : > { %3393 = vmatpush2.msra.mxu1 %v2177_v42  ;;  %v2374_v42 = vld [vmem:[%s6532_s22 + $0x428] sm:$0xff]  ;;  %v2159_v37 = vmax.f32 %v1861_v12, 0.0  ;;  %v2268_v36 = vld [vmem:[%s6532_s22 + $0xd8] sm:$0xff] }
 0x205   : > { %3126 = vmatmul.mubr.f32.gmra.mxu0 %v2361_v6  ;;  %3395 = vmatmul.mubr.f32.vlgmr.msra.gmra.mxu1 %v2243_v17  ;;  %v11102_v6 = vld [vmem:[#allocation45_spill] sm:$0xff]  ;;  %v11109_v12 = vld [vmem:[#allocation107_spill] sm:$0xff] }
 0x206   : > { %3131 = vmatprep.mubr.f32.mxu0 %v2366_v59  ;;  %4228 = vmatprep.subr.mxu1 %v2176_v58  ;;  %v1855_v17 = vadd.f32 %v11102_v6, %v11038_v28  ;;  %v11103_v59 = vld [vmem:[#allocation48_spill] sm:$0xff]  ;;  %v2373_v28 = vld [vmem:[%s6532_s22 + $0x420] sm:$0xff] }
 0x207   : > { %4229 = vmatpush1.msra.mxu1 %v2175_v19  ;;  %3400 = vmatprep.mubr.f32.mxu1 %v2248_v2  ;;  %v1851_v58 = vadd.f32 %v11103_v59, %v11041_v0  ;;  %v2160_v2 = vmax.f32 %v1863_v40, 0.0  ;;  %v1849_v19 = vadd.f32 %v11104_v24, %v11041_v0  ;;  %v2255_v0 = vld [vmem:[%s6532_s22 + $0x70] sm:$0xff]  ;;  %v1837_v40 = vadd.f32 %v11108_v53, %v11049_v51  ;;  %v11112_v59 = vld [vmem:[#allocation103_spill] sm:$0xff]  ;;  %v11113_v24 = vld [vmem:[#allocation46_spill] sm:$0xff] }
 0x208   : > { %4230 = vmatprep.subr.mxu1 %v2172_v56  ;;  %v11105_v56 = vld [vmem:[#allocation50_spill] sm:$0xff]  ;;  %v2259_v51 = vld [vmem:[%s6532_s22 + $0x90] sm:$0xff] }
 0x209   : > { %3132 = vmatmul.mubr.f32.gmra.mxu0 %v2365_v55  ;;  %4231 = vmatpush1.msra.mxu1 %v2171_v38  ;;  %v1845_v55 = vadd.f32 %v11105_v56, %v11045_v34  ;;  %v11106_v38 = vld [vmem:[#allocation53_spill] sm:$0xff]  ;;  %v11111_v6 = vld [vmem:[#allocation104_spill] sm:$0xff]  ;;  %v2386_v56 = vld [vmem:[%s6532_s22 + $0x488] sm:$0xff] }
 0x20a   : > { %3137 = vmatprep.mubr.f32.mxu0 %v2370_v4  ;;  %3401 = vmatmul.mubr.f32.gmra.mxu1 %v2247_v1  ;;  %v1843_v4 = vadd.f32 %v11106_v38, %v11045_v34  ;;  %v2155_v1 = vmax.f32 %v1855_v17, 0.0  ;;  %v2377_v34 = vld [vmem:[%s6532_s22 + $0x440] sm:$0xff]  ;;  %v1827_v17 = vadd.f32 %v11111_v6, %v11056_v5  ;;  %v11116_v38 = vld [vmem:[#allocation51_spill] sm:$0xff] }
 0x20b   : > { %4232 = vmatprep.subr.mxu1 %v2168_v52  ;;  %3406 = vmatprep.mubr.f32.mxu1 %v2252_v13  ;;  %v2152_v13 = vmax.f32 %v1851_v58, 0.0  ;;  %v2151_v52 = vmax.f32 %v1849_v19, 0.0  ;;  %v1825_v58 = vadd.f32 %v11112_v59, %v11056_v5  ;;  %v11114_v19 = vld [vmem:[#allocation101_spill] sm:$0xff]  ;;  %v2263_v5 = vld [vmem:[%s6532_s22 + $0xb0] sm:$0xff]  ;;  %v11123_v6 = vld [vmem:[#allocation95_spill] sm:$0xff] }
 0x20c   : > { %4233 = vmatpush1.msra.mxu1 %v2167_v16  ;;  %v1833_v16 = vadd.f32 %v11109_v12, %v11052_v43  ;;  %v11124_v59 = vld [vmem:[#allocation93_spill] sm:$0xff] }
 0x20d   : > { %3138 = vmatmul.mubr.f32.gmra.mxu0 %v2369_v31  ;;  %4234 = vmatprep.subr.mxu1 %v2164_v18  ;;  %v2148_v31 = vmax.f32 %v1845_v55, 0.0  ;;  %v1831_v18 = vadd.f32 %v11110_v23, %v11052_v43  ;;  %v2381_v43 = vld [vmem:[%s6532_s22 + $0x460] sm:$0xff]  ;;  %v11115_v55 = vld [vmem:[#allocation100_spill] sm:$0xff] }
 0x20e   : > { %3143 = vmatprep.mubr.f32.mxu0 %v2374_v42  ;;  %4235 = vmatpush1.msra.mxu1 %v2163_v48  ;;  %v2147_v42 = vmax.f32 %v1843_v4, 0.0  ;;  %v2144_v48 = vmax.f32 %v1839_v41, 0.0  ;;  %v11117_v4 = vld [vmem:[#allocation99_spill] sm:$0xff]  ;;  %v11118_v41 = vld [vmem:[#allocation98_spill] sm:$0xff] }
 0x20f   : > { %3407 = vmatmul.mubr.f32.gmra.mxu1 %v2251_v46  ;;  %4236 = vmatprep.subr.mxu1 %v2160_v2  ;;  %v2264_v46 = vld [vmem:[%s6532_s22 + $0xb8] sm:$0xff]  ;;  %v2143_v2 = vmax.f32 %v1837_v40, 0.0  ;;  %v2385_v40 = vld [vmem:[%s6532_s22 + $0x480] sm:$0xff] }
 0x210   : > { %4237 = vmatpush1.msra.mxu1 %v2159_v37  ;;  %3412 = vmatprep.mubr.f32.mxu1 %v2256_v33  ;;  %v8087_v33 = vpop.f32.mrf.mxu1  ;;  %v1821_v37 = vadd.f32 %v11114_v19, %v11113_v24  ;;  %v11125_v19 = vld [vmem:[#allocation29_spill] sm:$0xff] }
 0x211   : > { %3144 = vmatmul.mubr.f32.gmra.mxu0 %v2373_v28  ;;  %4238 = vmatprep.subr.mxu1 %v2156_v50  ;;  %v2140_v28 = vmax.f32 %v1833_v16, 0.0  ;;  %v1819_v50 = vadd.f32 %v11115_v55, %v11113_v24  ;;  %v2389_v24 = vld [vmem:[%s6532_s22 + $0x4a0] sm:$0xff]  ;;  %v2394_v55 = vld [vmem:[%s6532_s22 + $0x4c8] sm:$0xff] }
 0x212   : > { %3149 = vmatprep.mubr.f32.mxu0 %v2378_v35  ;;  %4239 = vmatpush1.msra.mxu1 %v2155_v1  ;;  %v2139_v35 = vmax.f32 %v1831_v18, 0.0  ;;  %v1815_v1 = vadd.f32 %v11117_v4, %v11116_v38  ;;  %v1980_v53 = vpop.f32.mrf.mxu1  ;;  %v2132_v16 = vmax.f32 %v1821_v37, 0.0  ;;  %v11126_v37 = vld [vmem:[#allocation91_spill] sm:$0xff] }
 0x213   : > { %3413 = vmatmul.mubr.f32.gmra.mxu1 %v2255_v0  ;;  %4240 = vmatprep.subr.mxu1 %v2152_v13  ;;  %v2136_v0 = vmax.f32 %v1827_v17, 0.0  ;;  %v1813_v13 = vadd.f32 %v11118_v41, %v11116_v38  ;;  %v2131_v18 = vmax.f32 %v1819_v50, 0.0  ;;  %v11127_v50 = vld [vmem:[#allocation89_spill] sm:$0xff]  ;;  %v2271_v38 = vld [vmem:[%s6532_s22 + $0xf0] sm:$0xff] }
 0x214   : > { %4241 = vmatpush1.msra.mxu1 %v2151_v52  ;;  %3418 = vmatprep.mubr.f32.mxu1 %v2260_v60  ;;  %v2135_v60 = vmax.f32 %v1825_v58, 0.0  ;;  %v11119_v52 = vld [vmem:[#allocation54_spill] sm:$0xff] }
 0x215   : > { %3150 = vmatmul.mubr.f32.gmra.mxu0 %v2377_v34  ;;  %4242 = vmatprep.subr.mxu1 %v2148_v31  ;;  %v11120_v34 = vld [vmem:[#allocation97_spill] sm:$0xff]  ;;  %v2390_v31 = vld [vmem:[%s6532_s22 + $0x4a8] sm:$0xff] }
 0x216   : > { %3155 = vmatprep.mubr.f32.mxu0 %v2382_v10  ;;  %4243 = vmatpush1.msra.mxu1 %v2147_v42  ;;  %v1809_v12 = vadd.f32 %v11120_v34, %v11119_v52  ;;  %v11121_v10 = vld [vmem:[#allocation96_spill] sm:$0xff] }
 0x217   : > { %3419 = vmatmul.mubr.f32.gmra.mxu1 %v2259_v51  ;;  %4244 = vmatprep.subr.mxu1 %v2144_v48  ;;  %v1807_v23 = vadd.f32 %v11121_v10, %v11119_v52  ;;  %v2267_v42 = vld [vmem:[%s6532_s22 + $0xd0] sm:$0xff]  ;;  %v2128_v48 = vmax.f32 %v1815_v1, 0.0  ;;  %v11128_v1 = vld [vmem:[#allocation25_spill] sm:$0xff]  ;;  %v11129_v52 = vld [vmem:[#allocation23_spill] sm:$0xff]  ;;  %v1971_v10 = vadd.f32 %v8059_v45, %v7752_v14  ;;  %v1963_v45 = vadd.f32 %v8019_v26, %v7785_v8 }
 0x218   : > { %4245 = vmatpush1.msra.mxu1 %v2143_v2  ;;  %3424 = vmatprep.mubr.f32.mxu1 %v2264_v46  ;;  %v11122_v51 = vld [vmem:[#allocation12_spill] sm:$0xff]  ;;  %v2272_v46 = vld [vmem:[%s6532_s22 + $0xf8] sm:$0xff]  ;;  %v2127_v2 = vmax.f32 %v1813_v13, 0.0  ;;  %v1981_v13 = vadd.f32 %v1980_v53, %v11128_v1  ;;  %v1977_v34 = vadd.f32 %v8087_v33, %v11129_v52 }
 0x219   : > { %3156 = vmatmul.mubr.f32.gmra.mxu0 %v2381_v43  ;;  %4246 = vmatprep.subr.mxu1 %v2140_v28  ;;  %v1803_v17 = vadd.f32 %v11123_v6, %v11122_v51  ;;  %v1801_v58 = vadd.f32 %v11124_v59, %v11122_v51  ;;  %v1982_v43 = vpop.f32.mrf.mxu1  ;;  %v1797_v28 = vadd.f32 %v11126_v37, %v11125_v19  ;;  %v2275_v53 = vld [vmem:[%s6532_s22 + $0x110] sm:$0xff]  ;;  %v2280_v33 = vld [vmem:[%s6532_s22 + $0x138] sm:$0xff]  ;;  %v2397_v51 = vld [vmem:[%s6532_s22 + $0x4e0] sm:$0xff] }
 0x21a   : > { %3161 = vmatprep.mubr.f32.mxu0 %v2386_v56  ;;  %4247 = vmatpush1.msra.mxu1 %v2139_v35  ;;  %v2124_v56 = vmax.f32 %v1809_v12, 0.0  ;;  %v1795_v35 = vadd.f32 %v11127_v50, %v11125_v19  ;;  %v2398_v12 = vld [vmem:[%s6532_s22 + $0x4e8] sm:$0xff]  ;;  %v2236_v6 = vmax.f32 %v1977_v34, 0.0  ;;  %v1957_v59 = vadd.f32 %v7995_v57, %v7817_v63 }
 0x21b   : > { %3425 = vmatmul.mubr.f32.gmra.mxu1 %v2263_v5  ;;  %4248 = vmatprep.subr.mxu1 %v2136_v0  ;;  %v2123_v5 = vmax.f32 %v1807_v23, 0.0  ;;  %v2120_v4 = vmax.f32 %v1803_v17, 0.0  ;;  %v1983_v0 = vadd.f32 %v1982_v43, %v11128_v1  ;;  %v2119_v41 = vmax.f32 %v1801_v58, 0.0  ;;  %v2402_v17 = vld [vmem:[%s6532_s22 + $0x508] sm:$0xff] }
 0x21c   : > { %4249 = vmatpush1.msra.mxu1 %v2135_v60  ;;  %3430 = vmatprep.mubr.f32.mxu1 %v2268_v36  ;;  %v2276_v36 = vld [vmem:[%s6532_s22 + $0x118] sm:$0xff]  ;;  %v2393_v60 = vld [vmem:[%s6532_s22 + $0x4c0] sm:$0xff]  ;;  %v2406_v43 = vld [vmem:[%s6532_s22 + $0x528] sm:$0xff]  ;;  %v1947_v57 = vadd.f32 %v7955_v21, %v7876_v39  ;;  %v1945_v37 = vadd.f32 %v7939_v62, %v7876_v39 }
 0x21d   : > { %3162 = vmatmul.mubr.f32.gmra.mxu0 %v2385_v40  ;;  %4250 = vmatprep.subr.mxu1 %v2132_v16  ;;  %v2116_v40 = vmax.f32 %v1797_v28, 0.0  ;;  %v2115_v16 = vmax.f32 %v1795_v35, 0.0  ;;  %v2240_v23 = vmax.f32 %v1983_v0, 0.0  ;;  %v2223_v28 = vmax.f32 %v1957_v59, 0.0  ;;  %v11130_v21 = vld [vmem:[#allocation52_spill] sm:$0xff] }
 0x21e   : > { %3167 = vmatprep.mubr.f32.mxu0 %v2390_v31  ;;  %4251 = vmatpush1.msra.mxu1 %v2131_v18  ;;  %v1975_v31 = vadd.f32 %v8073_v32, %v11129_v52  ;;  %v1969_v18 = vadd.f32 %v8045_v47, %v7752_v14  ;;  %v1965_v32 = vadd.f32 %v8031_v30, %v7785_v8  ;;  %v2279_v14 = vld [vmem:[%s6532_s22 + $0x130] sm:$0xff]  ;;  %v2284_v30 = vld [vmem:[%s6532_s22 + $0x158] sm:$0xff]  ;;  %v2215_v0 = vmax.f32 %v1945_v37, 0.0 }
 0x21f   : > { %3431 = vmatmul.mubr.f32.gmra.mxu1 %v2267_v42  ;;  %4252 = vmatprep.subr.mxu1 %v2128_v48  ;;  %v2239_v42 = vmax.f32 %v1981_v13, 0.0  ;;  %v1959_v47 = vadd.f32 %v8009_v11, %v7817_v63  ;;  %v1953_v8 = vadd.f32 %v7981_v29, %v7849_v20  ;;  %v1951_v11 = vadd.f32 %v7967_v22, %v7849_v20  ;;  %v2283_v63 = vld [vmem:[%s6532_s22 + $0x150] sm:$0xff]  ;;  %v2288_v29 = vld [vmem:[%s6532_s22 + $0x178] sm:$0xff] }
 0x220   : > { %4253 = vmatpush1.msra.mxu1 %v2127_v2  ;;  %3436 = vmatprep.mubr.f32.mxu1 %v2272_v46  ;;  %v2235_v48 = vmax.f32 %v1975_v31, 0.0  ;;  %v2232_v46 = vmax.f32 %v1971_v10, 0.0  ;;  %v2231_v58 = vmax.f32 %v1969_v18, 0.0  ;;  %v2401_v2 = vld [vmem:[%s6532_s22 + $0x500] sm:$0xff]  ;;  %v2228_v26 = vmax.f32 %v1965_v32, 0.0  ;;  %v2287_v39 = vld [vmem:[%s6532_s22 + $0x170] sm:$0xff] }
 0x221   : > { %3168 = vmatmul.mubr.f32.gmra.mxu0 %v2389_v24  ;;  %4254 = vmatprep.subr.mxu1 %v2124_v56  ;;  %v2227_v24 = vmax.f32 %v1963_v45, 0.0  ;;  %v2224_v19 = vmax.f32 %v1959_v47, 0.0  ;;  %v2405_v56 = vld [vmem:[%s6532_s22 + $0x520] sm:$0xff]  ;;  %v1941_v20 = vadd.f32 %v7927_v9, %v7891_v7  ;;  %v2220_v22 = vmax.f32 %v1953_v8, 0.0  ;;  %v11131_v62 = vld [vmem:[#allocation8_spill] sm:$0xff]  ;;  %v2292_v9 = vld [vmem:[%s6532_s22 + $0x198] sm:$0xff] }
 0x222   : > { %3173 = vmatprep.mubr.f32.mxu0 %v2394_v55  ;;  %4255 = vmatpush1.msra.mxu1 %v2123_v5  ;;  %v2410_v55 = vld [vmem:[%s6532_s22 + $0x548] sm:$0xff]  ;;  %v1939_v50 = vadd.f32 %v11130_v21, %v7891_v7  ;;  %v2219_v35 = vmax.f32 %v1951_v11, 0.0  ;;  %v1935_v5 = vadd.f32 %v11131_v62, %v7898_v3  ;;  %v11136_v10 = vld [vmem:[#allocation42_spill] sm:$0xff]  ;;  %v11142_v11 = vld [vmem:[#allocation32_spill] sm:$0xff] }
 0x223   : > { %3437 = vmatmul.mubr.f32.gmra.mxu1 %v2271_v38  ;;  %4256 = vmatprep.subr.mxu1 %v2120_v4  ;;  %v2216_v38 = vmax.f32 %v1947_v57, 0.0  ;;  %v11132_v4 = vld [vmem:[#allocation9_spill] sm:$0xff]  ;;  %v11133_v7 = vld [vmem:[#allocation47_spill] sm:$0xff]  ;;  %v2212_v13 = vmax.f32 %v1941_v20, 0.0  ;;  %v2413_v18 = vld [vmem:[%s6532_s22 + $0x560] sm:$0xff] }
 0x224   : > { %4257 = vmatpush1.msra.mxu1 %v2119_v41  ;;  %3442 = vmatprep.mubr.f32.mxu1 %v2276_v36  ;;  %v1933_v1 = vadd.f32 %v11132_v4, %v7898_v3  ;;  %v2409_v36 = vld [vmem:[%s6532_s22 + $0x540] sm:$0xff]  ;;  %v1929_v41 = vadd.f32 %v11133_v7, %v7908_v27  ;;  %v2211_v34 = vmax.f32 %v1939_v50, 0.0  ;;  %v2291_v3 = vld [vmem:[%s6532_s22 + $0x190] sm:$0xff]  ;;  %v2208_v31 = vmax.f32 %v1935_v5, 0.0  ;;  %v2418_v32 = vld [vmem:[%s6532_s22 + $0x588] sm:$0xff] }
 0x225   : > { %3174 = vmatmul.mubr.f32.gmra.mxu0 %v2393_v60  ;;  %4258 = vmatprep.subr.mxu1 %v2116_v40  ;;  %v2414_v60 = vld [vmem:[%s6532_s22 + $0x568] sm:$0xff]  ;;  %v11134_v40 = vld [vmem:[#allocation10_spill] sm:$0xff]  ;;  %v11143_v57 = vld [vmem:[#allocation20_spill] sm:$0xff] }
 0x226   : > { %3179 = vmatprep.mubr.f32.mxu0 %v2398_v12  ;;  %4259 = vmatpush1.msra.mxu1 %v2115_v16  ;;  %v1927_v52 = vadd.f32 %v11134_v40, %v7908_v27  ;;  %v11135_v12 = vld [vmem:[#allocation13_spill] sm:$0xff]  ;;  %v11137_v27 = vld [vmem:[#allocation14_spill] sm:$0xff]  ;;  %v2426_v50 = vld [vmem:[%s6532_s22 + $0x5c8] sm:$0xff] }
 0x227   : > { %3443 = vmatmul.mubr.f32.gmra.mxu1 %v2275_v53  ;;  %4260 = vmatprep.subr.mxu1 %v2240_v23  ;;  %v1923_v16 = vadd.f32 %v11135_v12, %v7917_v44  ;;  %v2296_v53 = vld [vmem:[%s6532_s22 + $0x1b8] sm:$0xff]  ;;  %v1921_v23 = vadd.f32 %v11136_v10, %v7917_v44  ;;  %v2295_v44 = vld [vmem:[%s6532_s22 + $0x1b0] sm:$0xff]  ;;  %v2425_v4 = vld [vmem:[%s6532_s22 + $0x5c0] sm:$0xff]  ;;  %v8229_v12 = vpop.permute.xlu0 %2638 }
 0x228   : > { %4261 = vmatpush2.msra.mxu1 %v2239_v42  ;;  %3448 = vmatprep.mubr.f32.mxu1 %v2280_v33  ;;  %v2207_v33 = vmax.f32 %v1933_v1, 0.0  ;;  %v1917_v42 = vadd.f32 %v11137_v27, %v7933_v49  ;;  %v2203_v45 = vmax.f32 %v1927_v52, 0.0  ;;  %v2304_v37 = vld [vmem:[%s6532_s22 + $0x1f8] sm:$0xff]  ;;  %v2311_v52 = vld [vmem:[%s6532_s22 + $0x230] sm:$0xff]  ;;  %11147 = vst [vmem:[#allocation6_spill] sm:$0xff] %v8229_v12  ;;  %v2442_v27 = vld [vmem:[%s6532_s22 + $0x648] sm:$0xff] }
 0x229   : > { %3180 = vmatmul.mubr.f32.gmra.mxu0 %v2397_v51  ;;  %4262 = vmatprep.subr.mxu1 %v2236_v6  ;;  %v2204_v51 = vmax.f32 %v1929_v41, 0.0  ;;  %v11138_v6 = vld [vmem:[#allocation15_spill] sm:$0xff]  ;;  %v2200_v47 = vmax.f32 %v1923_v16, 0.0  ;;  %v2312_v41 = vld [vmem:[%s6532_s22 + $0x238] sm:$0xff]  ;;  %v2433_v16 = vld [vmem:[%s6532_s22 + $0x600] sm:$0xff] }
 0x22a   : > { %3185 = vmatprep.mubr.f32.mxu0 %v2402_v17  ;;  %4263 = vmatpush2.msra.mxu1 %v2235_v48  ;;  %v1915_v17 = vadd.f32 %v11138_v6, %v7933_v49  ;;  %v11139_v48 = vld [vmem:[#allocation37_spill] sm:$0xff]  ;;  %v11141_v49 = vld [vmem:[#allocation19_spill] sm:$0xff]  ;;  %v2315_v10 = vld [vmem:[%s6532_s22 + $0x250] sm:$0xff] }
 0x22b   : > { %3449 = vmatmul.mubr.f32.gmra.mxu1 %v2279_v14  ;;  %4264 = vmatprep.subr.mxu1 %v2232_v46  ;;  %v1911_v14 = vadd.f32 %v11139_v48, %v7951_v61  ;;  %v2300_v46 = vld [vmem:[%s6532_s22 + $0x1d8] sm:$0xff]  ;;  %v1905_v8 = vadd.f32 %v11141_v49, %v7973_v15  ;;  %v2327_v49 = vld [vmem:[%s6532_s22 + $0x2b0] sm:$0xff] }
 0x22c   : > { %4265 = vmatpush2.msra.mxu1 %v2231_v58  ;;  %3454 = vmatprep.mubr.f32.mxu1 %v2284_v30  ;;  %v11140_v30 = vld [vmem:[#allocation18_spill] sm:$0xff]  ;;  %v2199_v58 = vmax.f32 %v1921_v23, 0.0 }
 0x22d   : > { %3186 = vmatmul.mubr.f32.gmra.mxu0 %v2401_v2  ;;  %4266 = vmatprep.subr.mxu1 %v2228_v26  ;;  %v1909_v59 = vadd.f32 %v11140_v30, %v7951_v61  ;;  %v2417_v2 = vld [vmem:[%s6532_s22 + $0x580] sm:$0xff]  ;;  %v2196_v26 = vmax.f32 %v1917_v42, 0.0  ;;  %v2299_v61 = vld [vmem:[%s6532_s22 + $0x1d0] sm:$0xff]  ;;  %v2188_v21 = vmax.f32 %v1905_v8, 0.0 }
 0x22e   : > { %3191 = vmatprep.mubr.f32.mxu0 %v2406_v43  ;;  %4267 = vmatpush2.msra.mxu1 %v2227_v24  ;;  %v2422_v43 = vld [vmem:[%s6532_s22 + $0x5a8] sm:$0xff]  ;;  %v1903_v24 = vadd.f32 %v11142_v11, %v7973_v15  ;;  %v2421_v15 = vld [vmem:[%s6532_s22 + $0x5a0] sm:$0xff] }
 0x22f   : > { %3455 = vmatmul.mubr.f32.gmra.mxu1 %v2283_v63  ;;  %4268 = vmatprep.subr.mxu1 %v2224_v19  ;;  %v2195_v63 = vmax.f32 %v1915_v17, 0.0  ;;  %v1899_v19 = vadd.f32 %v11143_v57, %v7991_v54  ;;  %v2191_v20 = vmax.f32 %v1909_v59, 0.0  ;;  %v2324_v17 = vld [vmem:[%s6532_s22 + $0x298] sm:$0xff]  ;;  %v2445_v59 = vld [vmem:[%s6532_s22 + $0x660] sm:$0xff]  ;;  %v2454_v11 = vld [vmem:[%s6532_s22 + $0x6a8] sm:$0xff] }
 0x230   : > { %4269 = vmatpush2.msra.mxu1 %v2223_v28  ;;  %3460 = vmatprep.mubr.f32.mxu1 %v2288_v29  ;;  %v2192_v29 = vmax.f32 %v1911_v14, 0.0  ;;  %v11144_v28 = vld [vmem:[#allocation27_spill] sm:$0xff]  ;;  %v2187_v62 = vmax.f32 %v1903_v24, 0.0  ;;  %v2323_v14 = vld [vmem:[%s6532_s22 + $0x290] sm:$0xff] }
 0x231   : > { %3192 = vmatmul.mubr.f32.gmra.mxu0 %v2405_v56  ;;  %4270 = vmatprep.subr.mxu1 %v2220_v22  ;;  %v1897_v56 = vadd.f32 %v11144_v28, %v7991_v54  ;;  %v11145_v22 = vld [vmem:[#allocation24_spill] sm:$0xff]  ;;  %v2184_v5 = vmax.f32 %v1899_v19, 0.0  ;;  %v2336_v19 = vld [vmem:[%s6532_s22 + $0x2f8] sm:$0xff] }
 0x232   : > { %3197 = vmatprep.mubr.f32.mxu0 %v2410_v55  ;;  %4271 = vmatpush2.msra.mxu1 %v2219_v35  ;;  %v1893_v55 = vadd.f32 %v11145_v22, %v8001_v25  ;;  %v11146_v35 = vld [vmem:[#allocation22_spill] sm:$0xff]  ;;  %v2303_v54 = vld [vmem:[%s6532_s22 + $0x1f0] sm:$0xff] }
 0x233   : > { %3461 = vmatmul.mubr.f32.gmra.mxu1 %v2287_v39  ;;  %4272 = vmatprep.subr.mxu1 %v2216_v38  ;;  %v1891_v39 = vadd.f32 %v11146_v35, %v8001_v25  ;;  %v2308_v38 = vld [vmem:[%s6532_s22 + $0x218] sm:$0xff]  ;;  %v2339_v35 = vld [vmem:[%s6532_s22 + $0x310] sm:$0xff] }
 0x234   : > { %4273 = vmatpush2.msra.mxu1 %v2215_v0  ;;  %3466 = vmatprep.mubr.f32.mxu1 %v2292_v9  ;;  %v2183_v9 = vmax.f32 %v1897_v56, 0.0  ;;  %v2180_v1 = vmax.f32 %v1893_v55, 0.0  ;;  %v2430_v0 = vld [vmem:[%s6532_s22 + $0x5e8] sm:$0xff]  ;;  %v2335_v56 = vld [vmem:[%s6532_s22 + $0x2f0] sm:$0xff]  ;;  %v2457_v55 = vld [vmem:[%s6532_s22 + $0x6c0] sm:$0xff] }
 0x235   : > { %3198 = vmatmul.mubr.f32.gmra.mxu0 %v2409_v36  ;;  %4274 = vmatprep.subr.mxu1 %v2212_v13  ;;  %v2179_v25 = vmax.f32 %v1891_v39, 0.0  ;;  %v2307_v36 = vld [vmem:[%s6532_s22 + $0x210] sm:$0xff]  ;;  %v2429_v13 = vld [vmem:[%s6532_s22 + $0x5e0] sm:$0xff] }
 0x236   : > { %3203 = vmatprep.mubr.f32.mxu0 %v2414_v60  ;;  %4275 = vmatpush2.msra.mxu1 %v2211_v34  ;;  %v2434_v60 = vld [vmem:[%s6532_s22 + $0x608] sm:$0xff] }
 0x237   : > { %3467 = vmatmul.mubr.f32.gmra.mxu1 %v2291_v3  ;;  %4276 = vmatprep.subr.mxu1 %v2208_v31  ;;  %v2316_v3 = vld [vmem:[%s6532_s22 + $0x258] sm:$0xff]  ;;  %v2438_v31 = vld [vmem:[%s6532_s22 + $0x628] sm:$0xff] }
 0x238   : > { %4277 = vmatpush2.msra.mxu1 %v2207_v33  ;;  %3472 = vmatprep.mubr.f32.mxu1 %v2296_v53  ;;  %v2320_v33 = vld [vmem:[%s6532_s22 + $0x278] sm:$0xff] }
 0x239   : > { %3204 = vmatmul.mubr.f32.gmra.mxu0 %v2413_v18  ;;  %4278 = vmatprep.subr.mxu1 %v2204_v51  ;;  %v2437_v18 = vld [vmem:[%s6532_s22 + $0x620] sm:$0xff]  ;;  %v8243_v51 = vpop.permute.xlu0 %2633 }
 0x23a   : > { %3209 = vmatprep.mubr.f32.mxu0 %v2418_v32  ;;  %4279 = vmatpush2.msra.mxu1 %v2203_v45  ;;  %11148 = vst [vmem:[#allocation5_spill] sm:$0xff] %v8243_v51  ;;  %v2319_v32 = vld [vmem:[%s6532_s22 + $0x270] sm:$0xff]  ;;  %v2441_v45 = vld [vmem:[%s6532_s22 + $0x640] sm:$0xff] }
 0x23b   : > { %3473 = vmatmul.mubr.f32.gmra.mxu1 %v2295_v44  ;;  %4280 = vmatprep.subr.mxu1 %v2200_v47  ;;  %v2446_v44 = vld [vmem:[%s6532_s22 + $0x668] sm:$0xff] }
 0x23c   : > { %4281 = vmatpush2.msra.mxu1 %v2199_v58  ;;  %3478 = vmatprep.mubr.f32.mxu1 %v2300_v46  ;;  %v2328_v46 = vld [vmem:[%s6532_s22 + $0x2b8] sm:$0xff]  ;;  %v2450_v58 = vld [vmem:[%s6532_s22 + $0x688] sm:$0xff] }
 0x23d   : > { %3210 = vmatmul.mubr.f32.gmra.mxu0 %v2417_v2  ;;  %4282 = vmatprep.subr.mxu1 %v2196_v26  ;;  %v8257_v30 = vpop.permute.xlu0 %2628  ;;  %v2332_v26 = vld [vmem:[%s6532_s22 + $0x2d8] sm:$0xff] }
 0x23e   : > { %3215 = vmatprep.mubr.f32.mxu0 %v2422_v43  ;;  %4283 = vmatpush2.msra.mxu1 %v2195_v63  ;;  %11149 = vst [vmem:[#allocation87_spill] sm:$0xff] %v8257_v30  ;;  %v2449_v43 = vld [vmem:[%s6532_s22 + $0x680] sm:$0xff] }
 0x23f   : > { %3479 = vmatmul.mubr.f32.gmra.mxu1 %v2299_v61  ;;  %4284 = vmatprep.subr.mxu1 %v2192_v29  ;;  %v2331_v61 = vld [vmem:[%s6532_s22 + $0x2d0] sm:$0xff]  ;;  %v2453_v29 = vld [vmem:[%s6532_s22 + $0x6a0] sm:$0xff] }
 0x240   : > { %4285 = vmatpush2.msra.mxu1 %v2191_v20  ;;  %3484 = vmatprep.mubr.f32.mxu1 %v2304_v37  ;;  %v2458_v37 = vld [vmem:[%s6532_s22 + $0x6c8] sm:$0xff] }
 0x241   : > { %3216 = vmatmul.mubr.f32.gmra.mxu0 %v2421_v15  ;;  %4286 = vmatprep.subr.mxu1 %v2188_v21  ;;  %v8271_v63 = vpop.permute.xlu0 %2623  ;;  %v2340_v15 = vld [vmem:[%s6532_s22 + $0x318] sm:$0xff]  ;;  %v2462_v21 = vld [vmem:[%s6532_s22 + $0x6e8] sm:$0xff] }
 0x242   : > { %3221 = vmatprep.mubr.f32.mxu0 %v2426_v50  ;;  %4287 = vmatpush2.msra.mxu1 %v2187_v62  ;;  %11151 = vst [vmem:[#allocation86_spill] sm:$0xff] %v8271_v63  ;;  %v2344_v62 = vld [vmem:[%s6532_s22 + $0x338] sm:$0xff] }
 0x243   : > { %3485 = vmatmul.mubr.f32.gmra.mxu1 %v2303_v54  ;;  %4288 = vmatprep.subr.mxu1 %v2184_v5  ;;  %v2461_v54 = vld [vmem:[%s6532_s22 + $0x6e0] sm:$0xff]  ;;  %v2466_v5 = vld [vmem:[%s6532_s22 + $0x708] sm:$0xff] }
 0x244   : > { %4289 = vmatpush2.msra.mxu1 %v2183_v9  ;;  %3490 = vmatprep.mubr.f32.mxu1 %v2308_v38 }
 0x245   : > { %3222 = vmatmul.mubr.f32.gmra.mxu0 %v2425_v4  ;;  %4290 = vmatprep.subr.mxu1 %v2180_v1  ;;  %v8218_v7 = vpop.f32.mrf.mxu0  ;;  %v8285_v22 = vpop.permute.xlu0 %2618  ;;  %v2343_v4 = vld [vmem:[%s6532_s22 + $0x330] sm:$0xff]  ;;  %v2348_v1 = vld [vmem:[%s6532_s22 + $0x358] sm:$0xff] }
 0x246   : > { %3227 = vmatprep.mubr.f32.mxu0 %v2430_v0  ;;  %4291 = vmatpush2.msra.mxu1 %v2179_v25  ;;  %11154 = vst [vmem:[#allocation85_spill] sm:$0xff] %v8285_v22  ;;  %v2465_v0 = vld [vmem:[%s6532_s22 + $0x700] sm:$0xff] }
 0x247   : > { %3491 = vmatmul.mubr.f32.gmra.mxu1 %v2307_v36  ;;  %v8223_v40 = vpop.f32.mrf.mxu0  ;;  %v2470_v36 = vld [vmem:[%s6532_s22 + $0x728] sm:$0xff] }
 0x248   : > { %3496 = vmatprep.mubr.f32.mxu1 %v2312_v41 }
 0x249   : > { %3228 = vmatmul.mubr.f32.gmra.mxu0 %v2429_v13  ;;  %v8226_v34 = vpop.f32.mrf.mxu0  ;;  %v8299_v9 = vpop.permute.xlu0 %2613  ;;  %v2347_v13 = vld [vmem:[%s6532_s22 + $0x350] sm:$0xff] }
 0x24a   : > { %3233 = vmatprep.mubr.f32.mxu0 %v2434_v60  ;;  %11155 = vst [vmem:[#allocation84_spill] sm:$0xff] %v8299_v9  ;;  %v2352_v60 = vld [vmem:[%s6532_s22 + $0x378] sm:$0xff] }
 0x24b   : > { %3497 = vmatmul.mubr.f32.gmra.mxu1 %v2311_v52  ;;  %v8233_v53 = vpop.f32.mrf.mxu0 }
 0x24c   : > { %3502 = vmatprep.mubr.f32.mxu1 %v2316_v3  ;;  %v2469_v3 = vld [vmem:[%s6532_s22 + $0x720] sm:$0xff] }
 0x24d   : > { %3234 = vmatmul.mubr.f32.gmra.mxu0 %v2433_v16  ;;  %v8236_v23 = vpop.f32.mrf.mxu0  ;;  %v8311_v52 = vpop.permute.xlu0 %2608  ;;  %v2474_v16 = vld [vmem:[%s6532_s22 + $0x748] sm:$0xff] }
 0x24e   : > { %3239 = vmatprep.mubr.f32.mxu0 %v2438_v31  ;;  %11156 = vst [vmem:[#allocation4_spill] sm:$0xff] %v8311_v52 }
 0x24f   : > { %3503 = vmatmul.mubr.f32.gmra.mxu1 %v2315_v10  ;;  %v8241_v42 = vpop.f32.mrf.mxu0  ;;  %v2351_v10 = vld [vmem:[%s6532_s22 + $0x370] sm:$0xff] }
 0x250   : > { %3508 = vmatprep.mubr.f32.mxu1 %v2320_v33 }
 0x251   : > { %3240 = vmatmul.mubr.f32.gmra.mxu0 %v2437_v18  ;;  %v8246_v6 = vpop.f32.mrf.mxu0  ;;  %v2356_v18 = vld [vmem:[%s6532_s22 + $0x398] sm:$0xff] }
 0x252   : > { %3245 = vmatprep.mubr.f32.mxu0 %v2442_v27  ;;  %v2473_v27 = vld [vmem:[%s6532_s22 + $0x740] sm:$0xff] }
 0x253   : > { %3509 = vmatmul.mubr.f32.gmra.mxu1 %v2319_v32  ;;  %v8251_v48 = vpop.f32.mrf.mxu0  ;;  %v2478_v32 = vld [vmem:[%s6532_s22 + $0x768] sm:$0xff] }
 0x254   : > { %3514 = vmatprep.mubr.f32.mxu1 %v2324_v17  ;;  %v8323_v17 = vpop.permute.xlu0 %2603 }
 0x255   : > { %3246 = vmatmul.mubr.f32.gmra.mxu0 %v2441_v45  ;;  %v8254_v47 = vpop.f32.mrf.mxu0  ;;  %11157 = vst [vmem:[#allocation83_spill] sm:$0xff] %v8323_v17 }
 0x256   : > { %3251 = vmatprep.mubr.f32.mxu0 %v2446_v44  ;;  %v2355_v44 = vld [vmem:[%s6532_s22 + $0x390] sm:$0xff] }
 0x257   : > { %3515 = vmatmul.mubr.f32.gmra.mxu1 %v2323_v14  ;;  %v8261_v2 = vpop.f32.mrf.mxu0  ;;  %v2360_v14 = vld [vmem:[%s6532_s22 + $0x3b8] sm:$0xff] }
 0x258   : > { %3520 = vmatprep.mubr.f32.mxu1 %v2328_v46  ;;  %v2477_v46 = vld [vmem:[%s6532_s22 + $0x760] sm:$0xff] }
 0x259   : > { %3252 = vmatmul.mubr.f32.gmra.mxu0 %v2445_v59  ;;  %v8264_v8 = vpop.f32.mrf.mxu0 }
 0x25a   : > { %3257 = vmatprep.mubr.f32.mxu0 %v2450_v58  ;;  %v2482_v58 = vld [vmem:[%s6532_s22 + $0x788] sm:$0xff] }
 0x25b   : > { %3521 = vmatmul.mubr.f32.gmra.mxu1 %v2327_v49  ;;  %v8269_v24 = vpop.f32.mrf.mxu0  ;;  %v2359_v49 = vld [vmem:[%s6532_s22 + $0x3b0] sm:$0xff] }
 0x25c   : > { %11150 = vst [vmem:[#allocation2_spill] sm:$0xff] %v8269_v24  ;;  %3526 = vmatprep.mubr.f32.mxu1 %v2332_v26  ;;  %v2404_v24 = vld [vmem:[%s6532_s22 + $0x518] sm:$0xff] }
 0x25d   : > { %3258 = vmatmul.mubr.f32.gmra.mxu0 %v2449_v43  ;;  %v8274_v57 = vpop.f32.mrf.mxu0  ;;  %v2364_v43 = vld [vmem:[%s6532_s22 + $0x3d8] sm:$0xff] }
 0x25e   : > { %11152 = vst [vmem:[#allocation3_spill] sm:$0xff] %v8274_v57  ;;  %3263 = vmatprep.mubr.f32.mxu0 %v2454_v11  ;;  %v8337_v11 = vpop.permute.xlu0 %2598 }
 0x25f   : > { %3527 = vmatmul.mubr.f32.gmra.mxu1 %v2331_v61  ;;  %v8279_v28 = vpop.f32.mrf.mxu0  ;;  %11158 = vst [vmem:[#allocation82_spill] sm:$0xff] %v8337_v11  ;;  %v2481_v61 = vld [vmem:[%s6532_s22 + $0x780] sm:$0xff] }
 0x260   : > { %11153 = vst [vmem:[#allocation58_spill] sm:$0xff] %v8279_v28  ;;  %3532 = vmatprep.mubr.f32.mxu1 %v2336_v19 }
 0x261   : > { %3264 = vmatmul.mubr.f32.gmra.mxu0 %v2453_v29  ;;  %v8282_v20 = vpop.f32.mrf.mxu0  ;;  %v2486_v29 = vld [vmem:[%s6532_s22 + $0x7a8] sm:$0xff] }
 0x262   : > { %3269 = vmatprep.mubr.f32.mxu0 %v2458_v37  ;;  %v2363_v37 = vld [vmem:[%s6532_s22 + $0x3d0] sm:$0xff] }
 0x263   : > { %3533 = vmatmul.mubr.f32.gmra.mxu1 %v2335_v56  ;;  %v8289_v50 = vpop.f32.mrf.mxu0  ;;  %v2368_v56 = vld [vmem:[%s6532_s22 + $0x3f8] sm:$0xff] }
 0x264   : > { %3538 = vmatprep.mubr.f32.mxu1 %v2340_v15 }
 0x265   : > { %3270 = vmatmul.mubr.f32.gmra.mxu0 %v2457_v55  ;;  %v8292_v39 = vpop.f32.mrf.mxu0  ;;  %v2485_v55 = vld [vmem:[%s6532_s22 + $0x7a0] sm:$0xff] }
 0x266   : > { %3275 = vmatprep.mubr.f32.mxu0 %v2462_v21  ;;  %v2490_v21 = vld [vmem:[%s6532_s22 + $0x7c8] sm:$0xff] }
 0x267   : > { %3539 = vmatmul.mubr.f32.gmra.mxu1 %v2339_v35  ;;  %v8297_v38 = vpop.f32.mrf.mxu0  ;;  %v8349_v35 = vpop.permute.xlu0 %2593 }
 0x268   : > { %3544 = vmatprep.mubr.f32.mxu1 %v2344_v62  ;;  %11159 = vst [vmem:[#allocation7_spill] sm:$0xff] %v8349_v35 }
 0x269   : > { %3276 = vmatmul.mubr.f32.gmra.mxu0 %v2461_v54  ;;  %v2367_v54 = vld [vmem:[%s6532_s22 + $0x3f0] sm:$0xff] }
 0x26a   : > { %3281 = vmatprep.mubr.f32.mxu0 %v2466_v5  ;;  %v8304_v25 = vpop.f32.mrf.mxu0  ;;  %v2372_v5 = vld [vmem:[%s6532_s22 + $0x418] sm:$0xff] }
 0x26b   : > { %3545 = vmatmul.mubr.f32.gmra.mxu1 %v2343_v4  ;;  %v2489_v4 = vld [vmem:[%s6532_s22 + $0x7c0] sm:$0xff] }
 0x26c   : > { %v8307_v41 = vpop.f32.mrf.mxu0  ;;  %3550 = vmatprep.mubr.f32.mxu1 %v2348_v1 }
 0x26d   : > { %3282 = vmatmul.mubr.f32.gmra.mxu0 %v2465_v0  ;;  %v2494_v0 = vld [vmem:[%s6532_s22 + $0x7e8] sm:$0xff] }
 0x26e   : > { %3287 = vmatprep.mubr.f32.mxu0 %v2470_v36  ;;  %v2371_v36 = vld [vmem:[%s6532_s22 + $0x410] sm:$0xff] }
 0x26f   : > { %v8315_v31 = vpop.f32.mrf.mxu0  ;;  %3551 = vmatmul.mubr.f32.gmra.mxu1 %v2347_v13 }
 0x270   : > { %3556 = vmatprep.mubr.f32.mxu1 %v2352_v60  ;;  %v2376_v60 = vld [vmem:[%s6532_s22 + $0x438] sm:$0xff] }
 0x271   : > { %3288 = vmatmul.mubr.f32.gmra.mxu0 %v2469_v3  ;;  %v8318_v33 = vpop.f32.mrf.mxu0  ;;  %v8363_v3 = vpop.permute.xlu0 %2588 }
 0x272   : > { %3293 = vmatprep.mubr.f32.mxu0 %v2474_v16  ;;  %11160 = vst [vmem:[#allocation81_spill] sm:$0xff] %v8363_v3  ;;  %v2493_v16 = vld [vmem:[%s6532_s22 + $0x7e0] sm:$0xff] }
 0x273   : > { %3557 = vmatmul.mubr.f32.gmra.mxu1 %v2351_v10 }
 0x274   : > { %v8325_v45 = vpop.f32.mrf.mxu0  ;;  %3562 = vmatprep.mubr.f32.mxu1 %v2356_v18  ;;  %v2375_v18 = vld [vmem:[%s6532_s22 + $0x430] sm:$0xff] }
 0x275   : > { %3294 = vmatmul.mubr.f32.gmra.mxu0 %v2473_v27  ;;  %v2380_v27 = vld [vmem:[%s6532_s22 + $0x458] sm:$0xff] }
 0x276   : > { %3299 = vmatprep.mubr.f32.mxu0 %v2478_v32  ;;  %v8330_v59 = vpop.f32.mrf.mxu0 }
 0x277   : > { %3563 = vmatmul.mubr.f32.gmra.mxu1 %v2355_v44  ;;  %v6176_v44 = vld [vmem:[%s6532_s22 + $0x8] sm:$0xff] }
 0x278   : > { %3568 = vmatprep.mubr.f32.mxu1 %v2360_v14  ;;  %v8373_v14 = vpop.permute.xlu0 %2583 }
 0x279   : > { %3300 = vmatmul.mubr.f32.gmra.mxu0 %v2477_v46  ;;  %v8334_v26 = vpop.f32.mrf.mxu0  ;;  %11161 = vst [vmem:[#allocation80_spill] sm:$0xff] %v8373_v14  ;;  %v2379_v46 = vld [vmem:[%s6532_s22 + $0x450] sm:$0xff] }
 0x27a   : > { %3305 = vmatprep.mubr.f32.mxu0 %v2482_v58 }
 0x27b   : > { %v8340_v19 = vpop.f32.mrf.mxu0  ;;  %3569 = vmatmul.mubr.f32.gmra.mxu1 %v2359_v49  ;;  %v6177_v49 = vld [vmem:[%s6532_s22] sm:$0xff] }
 0x27c   : > { %3574 = vmatprep.mubr.f32.mxu1 %v2364_v43  ;;  %v2384_v43 = vld [vmem:[%s6532_s22 + $0x478] sm:$0xff] }
 0x27d   : > { %3306 = vmatmul.mubr.f32.gmra.mxu0 %v2481_v61  ;;  %v6178_v61 = vld [vmem:[%s6532_s22 + $0x28] sm:$0xff] }
 0x27e   : > { %3311 = vmatprep.mubr.f32.mxu0 %v2486_v29  ;;  %v8345_v15 = vpop.f32.mrf.mxu0 }
 0x27f   : > { %3575 = vmatmul.mubr.f32.gmra.mxu1 %v2363_v37  ;;  %v2383_v37 = vld [vmem:[%s6532_s22 + $0x470] sm:$0xff] }
 0x280   : > { %v8351_v62 = vpop.f32.mrf.mxu0  ;;  %3580 = vmatprep.mubr.f32.mxu1 %v2368_v56 }
 0x281   : > { %3312 = vmatmul.mubr.f32.gmra.mxu0 %v2485_v55  ;;  %v6179_v55 = vld [vmem:[%s6532_s22 + $0x20] sm:$0xff] }
 0x282   : > { %3317 = vmatprep.mubr.f32.mxu0 %v2490_v21  ;;  %v2388_v21 = vld [vmem:[%s6532_s22 + $0x498] sm:$0xff] }
 0x283   : > { %v8356_v1 = vpop.f32.mrf.mxu0  ;;  %3581 = vmatmul.mubr.f32.gmra.mxu1 %v2367_v54  ;;  %v8388_v54 = vpop.permute.xlu0 %2578 }
 0x284   : > { %3586 = vmatprep.mubr.f32.mxu1 %v2372_v5  ;;  %11162 = vst [vmem:[#allocation79_spill] sm:$0xff] %v8388_v54  ;;  %v6180_v5 = vld [vmem:[%s6532_s22 + $0x48] sm:$0xff] }
 0x285   : > { %3318 = vmatmul.mubr.f32.gmra.mxu0 %v2489_v4  ;;  %v8360_v13 = vpop.f32.mrf.mxu0 }
 0x286   : > { %3323 = vmatprep.mubr.f32.mxu0 %v2494_v0  ;;  %v2387_v0 = vld [vmem:[%s6532_s22 + $0x490] sm:$0xff] }
 0x287   : > { %3587 = vmatmul.mubr.f32.gmra.mxu1 %v2371_v36 }
 0x288   : > { %v8366_v10 = vpop.f32.mrf.mxu0  ;;  %3592 = vmatprep.mubr.f32.mxu1 %v2376_v60  ;;  %v6181_v60 = vld [vmem:[%s6532_s22 + $0x40] sm:$0xff] }
 0x289   : > { %3324 = vmatmul.mubr.f32.gmra.mxu0 %v2493_v16  ;;  %v2392_v16 = vld [vmem:[%s6532_s22 + $0x4b8] sm:$0xff] }
 0x28a   : > { %v8370_v32 = vpop.f32.mrf.mxu0  ;;  %3843 = vmatprep.mubr.f32.mxu0 %v6176_v44  ;;  %v8401_v44 = vpop.permute.xlu0 %2573 }
 0x28b   : > { %3593 = vmatmul.mubr.f32.gmra.mxu1 %v2375_v18  ;;  %v6182_v18 = vld [vmem:[%s6532_s22 + $0x68] sm:$0xff]  ;;  %11163 = vst [vmem:[#allocation78_spill] sm:$0xff] %v8401_v44 }
 0x28c   : > { %3598 = vmatprep.mubr.f32.mxu1 %v2380_v27 }
 0x28d   : > { %v8376_v58 = vpop.f32.mrf.mxu0  ;;  %3844 = vmatmul.mubr.f32.vlgmr.msra.gmra.mxu0 %v6177_v49 }
 0x28e   : > { %3849 = vmatprep.mubr.f32.mxu0 %v6178_v61  ;;  %v2396_v61 = vld [vmem:[%s6532_s22 + $0x4d8] sm:$0xff] }
 0x28f   : > { %v8381_v29 = vpop.f32.mrf.mxu0  ;;  %3599 = vmatmul.mubr.f32.gmra.mxu1 %v2379_v46  ;;  %v2391_v46 = vld [vmem:[%s6532_s22 + $0x4b0] sm:$0xff] }
 0x290   : > { %3604 = vmatprep.mubr.f32.mxu1 %v2384_v43  ;;  %v6183_v43 = vld [vmem:[%s6532_s22 + $0x60] sm:$0xff] }
 0x291   : > { %v8384_v56 = vpop.f32.mrf.mxu0  ;;  %3850 = vmatmul.mubr.f32.gmra.mxu0 %v6179_v55 }
 0x292   : > { %3855 = vmatprep.mubr.f32.mxu0 %v6180_v5 }
 0x293   : > { %v8391_v4 = vpop.f32.mrf.mxu0  ;;  %3605 = vmatmul.mubr.f32.gmra.mxu1 %v2383_v37  ;;  %v6184_v37 = vld [vmem:[%s6532_s22 + $0x88] sm:$0xff] }
 0x294   : > { %3610 = vmatprep.mubr.f32.mxu1 %v2388_v21  ;;  %v2395_v21 = vld [vmem:[%s6532_s22 + $0x4d0] sm:$0xff] }
 0x295   : > { %v8394_v36 = vpop.f32.mrf.mxu0  ;;  %3856 = vmatmul.mubr.f32.gmra.mxu0 %v6181_v60  ;;  %v2400_v60 = vld [vmem:[%s6532_s22 + $0x4f8] sm:$0xff] }
 0x296   : > { %3861 = vmatprep.mubr.f32.mxu0 %v6182_v18  ;;  %v6186_v18 = vld [vmem:[%s6532_s22 + $0xa8] sm:$0xff] }
 0x297   : > { %v8399_v27 = vpop.f32.mrf.mxu0  ;;  %3611 = vmatmul.mubr.f32.gmra.mxu1 %v2387_v0  ;;  %v6185_v0 = vld [vmem:[%s6532_s22 + $0x80] sm:$0xff] }
 0x298   : > { %3616 = vmatprep.mubr.f32.mxu1 %v2392_v16  ;;  %v8416_v16 = vpop.permute.xlu0 %2568 }
 0x299   : > { %v8404_v49 = vpop.f32.mrf.mxu0  ;;  %3862 = vmatmul.mubr.f32.gmra.mxu0 %v6183_v43  ;;  %11165 = vst [vmem:[#allocation77_spill] sm:$0xff] %v8416_v16  ;;  %v2954_v35 = vadd.f32 %v8226_v34, %v8416_v16 }
 0x29a   : > { %3867 = vmatprep.mubr.f32.mxu0 %v6184_v37  ;;  %v6187_v37 = vld [vmem:[%s6532_s22 + $0xa0] sm:$0xff] }
 0x29b   : > { %v8409_v55 = vpop.f32.mrf.mxu0  ;;  %3617 = vmatmul.mubr.f32.gmra.mxu1 %v2391_v46  ;;  %v2399_v46 = vld [vmem:[%s6532_s22 + $0x4f0] sm:$0xff] }
 0x29c   : > { %3622 = vmatprep.mubr.f32.mxu1 %v2396_v61 }
 0x29d   : > { %v8412_v5 = vpop.f32.mrf.mxu0  ;;  %3868 = vmatmul.mubr.f32.gmra.mxu0 %v6185_v0  ;;  %v6188_v0 = vld [vmem:[%s6532_s22 + $0xc8] sm:$0xff] }
 0x29e   : > { %11164 = vst [vmem:[#allocation16_spill] sm:$0xff] %v8412_v5  ;;  %3873 = vmatprep.mubr.f32.mxu0 %v6186_v18  ;;  %v8429_v18 = vpop.permute.xlu0 %2563 }
 0x29f   : > { %v8419_v43 = vpop.f32.mrf.mxu0  ;;  %3623 = vmatmul.mubr.f32.gmra.mxu1 %v2395_v21  ;;  %11169 = vst [vmem:[#allocation74_spill] sm:$0xff] %v8429_v18  ;;  %v2403_v21 = vld [vmem:[%s6532_s22 + $0x510] sm:$0xff] }
 0x2a0   : > { %11166 = vst [vmem:[#allocation76_spill] sm:$0xff] %v8419_v43  ;;  %3628 = vmatprep.mubr.f32.mxu1 %v2400_v60  ;;  %v6189_v43 = vld [vmem:[%s6532_s22 + $0xc0] sm:$0xff] }
 0x2a1   : > { %v8422_v61 = vpop.f32.mrf.mxu0  ;;  %3874 = vmatmul.mubr.f32.gmra.mxu0 %v6187_v37  ;;  %v6190_v37 = vld [vmem:[%s6532_s22 + $0xe8] sm:$0xff] }
 0x2a2   : > { %11167 = vst [vmem:[#allocation21_spill] sm:$0xff] %v8422_v61  ;;  %3879 = vmatprep.mubr.f32.mxu0 %v6188_v0  ;;  %v2408_v61 = vld [vmem:[%s6532_s22 + $0x538] sm:$0xff] }
 0x2a3   : > { %v8427_v5 = vpop.f32.mrf.mxu0  ;;  %3629 = vmatmul.mubr.f32.gmra.mxu1 %v2399_v46  ;;  %v2407_v46 = vld [vmem:[%s6532_s22 + $0x530] sm:$0xff] }
 0x2a4   : > { %11168 = vst [vmem:[#allocation75_spill] sm:$0xff] %v8427_v5  ;;  %3634 = vmatprep.mubr.f32.mxu1 %v2404_v24  ;;  %v6191_v24 = vld [vmem:[%s6532_s22 + $0xe0] sm:$0xff]  ;;  %v2412_v5 = vld [vmem:[%s6532_s22 + $0x558] sm:$0xff] }
 0x2a5   : > { %v8432_v60 = vpop.f32.mrf.mxu0  ;;  %3880 = vmatmul.mubr.f32.gmra.mxu0 %v6189_v43  ;;  %v6192_v43 = vld [vmem:[%s6532_s22 + $0x108] sm:$0xff] }
 0x2a6   : > { %11170 = vst [vmem:[#allocation26_spill] sm:$0xff] %v8432_v60  ;;  %3885 = vmatprep.mubr.f32.mxu0 %v6190_v37  ;;  %v8444_v60 = vpop.permute.xlu0 %2718  ;;  %v6193_v37 = vld [vmem:[%s6532_s22 + $0x100] sm:$0xff] }
 0x2a7   : > { %v8437_v28 = vpop.f32.mrf.mxu0  ;;  %3635 = vmatmul.mubr.f32.gmra.mxu1 %v2403_v21  ;;  %11173 = vst [vmem:[#allocation31_spill] sm:$0xff] %v8444_v60 }
 0x2a8   : > { %11171 = vst [vmem:[#allocation73_spill] sm:$0xff] %v8437_v28  ;;  %3640 = vmatprep.mubr.f32.mxu1 %v2408_v61  ;;  %v2411_v61 = vld [vmem:[%s6532_s22 + $0x550] sm:$0xff]  ;;  %v2416_v28 = vld [vmem:[%s6532_s22 + $0x578] sm:$0xff] }
 0x2a9   : > { %v8440_v0 = vpop.f32.mrf.mxu0  ;;  %3886 = vmatmul.mubr.f32.gmra.mxu0 %v6191_v24  ;;  %v6194_v24 = vld [vmem:[%s6532_s22 + $0x128] sm:$0xff] }
 0x2aa   : > { %11172 = vst [vmem:[#allocation72_spill] sm:$0xff] %v8440_v0  ;;  %3891 = vmatprep.mubr.f32.mxu0 %v6192_v43  ;;  %v8457_v43 = vpop.permute.xlu0 %2713 }
 0x2ab   : > { %v8447_v57 = vpop.f32.mrf.mxu0  ;;  %3641 = vmatmul.mubr.f32.gmra.mxu1 %v2407_v46  ;;  %11177 = vst [vmem:[#allocation69_spill] sm:$0xff] %v8457_v43 }
 0x2ac   : > { %11174 = vst [vmem:[#allocation71_spill] sm:$0xff] %v8447_v57  ;;  %3646 = vmatprep.mubr.f32.mxu1 %v2412_v5  ;;  %v2415_v5 = vld [vmem:[%s6532_s22 + $0x570] sm:$0xff]  ;;  %v6195_v57 = vld [vmem:[%s6532_s22 + $0x120] sm:$0xff] }
 0x2ad   : > { %v8450_v21 = vpop.f32.mrf.mxu0  ;;  %3892 = vmatmul.mubr.f32.gmra.mxu0 %v6193_v37  ;;  %v6196_v37 = vld [vmem:[%s6532_s22 + $0x148] sm:$0xff] }
 0x2ae   : > { %11175 = vst [vmem:[#allocation70_spill] sm:$0xff] %v8450_v21  ;;  %3897 = vmatprep.mubr.f32.mxu0 %v6194_v24  ;;  %v2420_v21 = vld [vmem:[%s6532_s22 + $0x598] sm:$0xff] }
 0x2af   : > { %v8455_v0 = vpop.f32.mrf.mxu0  ;;  %3647 = vmatmul.mubr.f32.gmra.mxu1 %v2411_v61  ;;  %v2419_v61 = vld [vmem:[%s6532_s22 + $0x590] sm:$0xff] }
 0x2b0   : > { %11176 = vst [vmem:[#allocation36_spill] sm:$0xff] %v8455_v0  ;;  %3652 = vmatprep.mubr.f32.mxu1 %v2416_v28  ;;  %v6197_v28 = vld [vmem:[%s6532_s22 + $0x140] sm:$0xff]  ;;  %v2424_v0 = vld [vmem:[%s6532_s22 + $0x5b8] sm:$0xff] }
 0x2b1   : > { %v8460_v46 = vpop.f32.mrf.mxu0  ;;  %3898 = vmatmul.mubr.f32.gmra.mxu0 %v6195_v57  ;;  %v6198_v57 = vld [vmem:[%s6532_s22 + $0x168] sm:$0xff] }
 0x2b2   : > { %11178 = vst [vmem:[#allocation68_spill] sm:$0xff] %v8460_v46  ;;  %3903 = vmatprep.mubr.f32.mxu0 %v6196_v37  ;;  %v8472_v46 = vpop.permute.xlu0 %2708  ;;  %v6199_v37 = vld [vmem:[%s6532_s22 + $0x160] sm:$0xff] }
 0x2b3   : > { %v8465_v60 = vpop.f32.mrf.mxu0  ;;  %3653 = vmatmul.mubr.f32.gmra.mxu1 %v2415_v5  ;;  %11181 = vst [vmem:[#allocation66_spill] sm:$0xff] %v8472_v46 }
 0x2b4   : > { %11179 = vst [vmem:[#allocation41_spill] sm:$0xff] %v8465_v60  ;;  %3658 = vmatprep.mubr.f32.mxu1 %v2420_v21  ;;  %v2423_v21 = vld [vmem:[%s6532_s22 + $0x5b0] sm:$0xff]  ;;  %v2428_v60 = vld [vmem:[%s6532_s22 + $0x5d8] sm:$0xff] }
 0x2b5   : > { %v8468_v24 = vpop.f32.mrf.mxu0  ;;  %3904 = vmatmul.mubr.f32.gmra.mxu0 %v6197_v28  ;;  %v6200_v28 = vld [vmem:[%s6532_s22 + $0x188] sm:$0xff] }
 0x2b6   : > { %11180 = vst [vmem:[#allocation67_spill] sm:$0xff] %v8468_v24  ;;  %3909 = vmatprep.mubr.f32.mxu0 %v6198_v57  ;;  %v8485_v57 = vpop.permute.xlu0 %2703 }
 0x2b7   : > { %v8475_v43 = vpop.f32.mrf.mxu0  ;;  %3659 = vmatmul.mubr.f32.gmra.mxu1 %v2419_v61  ;;  %11185 = vst [vmem:[#allocation62_spill] sm:$0xff] %v8485_v57 }
 0x2b8   : > { %11182 = vst [vmem:[#allocation65_spill] sm:$0xff] %v8475_v43  ;;  %3664 = vmatprep.mubr.f32.mxu1 %v2424_v0  ;;  %v2427_v0 = vld [vmem:[%s6532_s22 + $0x5d0] sm:$0xff]  ;;  %v6201_v43 = vld [vmem:[%s6532_s22 + $0x180] sm:$0xff] }
 0x2b9   : > { %v8478_v5 = vpop.f32.mrf.mxu0  ;;  %3910 = vmatmul.mubr.f32.gmra.mxu0 %v6199_v37  ;;  %v6202_v37 = vld [vmem:[%s6532_s22 + $0x1a8] sm:$0xff] }
 0x2ba   : > { %11183 = vst [vmem:[#allocation64_spill] sm:$0xff] %v8478_v5  ;;  %3915 = vmatprep.mubr.f32.mxu0 %v6200_v28  ;;  %v2432_v5 = vld [vmem:[%s6532_s22 + $0x5f8] sm:$0xff] }
 0x2bb   : > { %v8483_v24 = vpop.f32.mrf.mxu0  ;;  %3665 = vmatmul.mubr.f32.gmra.mxu1 %v2423_v21  ;;  %v2431_v21 = vld [vmem:[%s6532_s22 + $0x5f0] sm:$0xff] }
 0x2bc   : > { %11184 = vst [vmem:[#allocation63_spill] sm:$0xff] %v8483_v24  ;;  %3670 = vmatprep.mubr.f32.mxu1 %v2428_v60  ;;  %v6203_v60 = vld [vmem:[%s6532_s22 + $0x1a0] sm:$0xff]  ;;  %v2436_v24 = vld [vmem:[%s6532_s22 + $0x618] sm:$0xff] }
 0x2bd   : > { %v8488_v61 = vpop.f32.mrf.mxu0  ;;  %3916 = vmatmul.mubr.f32.gmra.mxu0 %v6201_v43  ;;  %v6204_v43 = vld [vmem:[%s6532_s22 + $0x1c8] sm:$0xff] }
 0x2be   : > { %11186 = vst [vmem:[#allocation61_spill] sm:$0xff] %v8488_v61  ;;  %3921 = vmatprep.mubr.f32.mxu0 %v6202_v37  ;;  %v8500_v61 = vpop.permute.xlu0 %2698 }
 0x2bf   : > { %v8493_v46 = vpop.f32.mrf.mxu0  ;;  %3671 = vmatmul.mubr.f32.gmra.mxu1 %v2427_v0  ;;  %11189 = vst [vmem:[#allocation102_spill] sm:$0xff] %v8500_v61  ;;  %v2948_v0 = vadd.f32 %v8218_v7, %v8429_v18  ;;  %v6206_v61 = vld [vmem:[%s6532_s22 + $0x1e8] sm:$0xff] }
 0x2c0   : > { %11187 = vst [vmem:[#allocation60_spill] sm:$0xff] %v8493_v46  ;;  %3676 = vmatprep.mubr.f32.mxu1 %v2432_v5  ;;  %v2435_v5 = vld [vmem:[%s6532_s22 + $0x610] sm:$0xff]  ;;  %v6205_v46 = vld [vmem:[%s6532_s22 + $0x1c0] sm:$0xff] }
 0x2c1   : > { %v8496_v28 = vpop.f32.mrf.mxu0  ;;  %3922 = vmatmul.mubr.f32.gmra.mxu0 %v6203_v60 }
 0x2c2   : > { %11188 = vst [vmem:[#allocation94_spill] sm:$0xff] %v8496_v28  ;;  %3927 = vmatprep.mubr.f32.mxu0 %v6204_v43  ;;  %v2440_v28 = vld [vmem:[%s6532_s22 + $0x638] sm:$0xff]  ;;  %v2950_v43 = vadd.f32 %v8223_v40, %v8429_v18 }
 0x2c3   : > { %v8503_v57 = vpop.f32.mrf.mxu0  ;;  %3677 = vmatmul.mubr.f32.gmra.mxu1 %v2431_v21 }
 0x2c4   : > { %11190 = vst [vmem:[#allocation59_spill] sm:$0xff] %v8503_v57  ;;  %3682 = vmatprep.mubr.f32.mxu1 %v2436_v24  ;;  %v8519_v57 = vpop.permute.xlu0 %2693 }
 0x2c5   : > { %v8508_v37 = vpop.f32.mrf.mxu0  ;;  %3928 = vmatmul.mubr.f32.gmra.mxu0 %v6205_v46  ;;  %v3396_v60 = vpop.f32.mrf.mxu1  ;;  %11194 = vst [vmem:[#allocation106_spill] sm:$0xff] %v8519_v57  ;;  %v2439_v46 = vld [vmem:[%s6532_s22 + $0x630] sm:$0xff] }
 0x2c6   : > { %11191 = vst [vmem:[#allocation92_spill] sm:$0xff] %v8508_v37  ;;  %3933 = vmatprep.mubr.f32.mxu0 %v6206_v61  ;;  %v8515_v21 = vadd.f32 %v3396_v60, %v2948_v0  ;;  %v6207_v61 = vld [vmem:[%s6532_s22 + $0x1e0] sm:$0xff]  ;;  %v2444_v0 = vld [vmem:[%s6532_s22 + $0x658] sm:$0xff]  ;;  %v8530_v60 = vpop.permute.xlu1 %2798  ;;  %v2443_v57 = vld [vmem:[%s6532_s22 + $0x650] sm:$0xff] }
 0x2c7   : > { %v8517_v7 = vpop.f32.mrf.mxu0  ;;  %3683 = vmatmul.mubr.f32.gmra.mxu1 %v2435_v5  ;;  %v3398_v24 = vpop.f32.mrf.mxu1  ;;  %11197 = vst [vmem:[#allocation88_spill] sm:$0xff] %v8530_v60  ;;  %v6208_v5 = vld [vmem:[%s6532_s22 + $0x208] sm:$0xff]  ;;  %v2448_v60 = vld [vmem:[%s6532_s22 + $0x678] sm:$0xff] }
 0x2c8   : > { %11192 = vst [vmem:[#allocation57_spill] sm:$0xff] %v8515_v21  ;;  %11193 = vst [vmem:[#allocation90_spill] sm:$0xff] %v8517_v7  ;;  %v8521_v37 = vadd.f32 %v3398_v24, %v2950_v43  ;;  %3688 = vmatprep.mubr.f32.mxu1 %v2440_v28  ;;  %v2956_v28 = vadd.f32 %v8233_v53, %v8416_v16  ;;  %v6209_v7 = vld [vmem:[%s6532_s22 + $0x200] sm:$0xff]  ;;  %v2960_v53 = vadd.f32 %v8236_v23, %v8401_v44 }
 0x2c9   : > { %v8526_v40 = vpop.f32.mrf.mxu0  ;;  %3934 = vmatmul.mubr.f32.gmra.mxu0 %v6207_v61  ;;  %v6211_v23 = vld [vmem:[%s6532_s22 + $0x220] sm:$0xff] }
 0x2ca   : > { %11195 = vst [vmem:[#allocation56_spill] sm:$0xff] %v8521_v37  ;;  %11196 = vst [vmem:[#allocation55_spill] sm:$0xff] %v8526_v40  ;;  %3939 = vmatprep.mubr.f32.mxu0 %v6208_v5  ;;  %v3402_v43 = vpop.f32.mrf.mxu1  ;;  %v8546_v40 = vpop.permute.xlu0 %2688 }
 0x2cb   : > { %v8535_v24 = vpop.f32.mrf.mxu0  ;;  %v8537_v18 = vadd.f32 %v3402_v43, %v2954_v35  ;;  %3689 = vmatmul.mubr.f32.gmra.mxu1 %v2439_v46  ;;  %11202 = vst [vmem:[#allocation34_spill] sm:$0xff] %v8546_v40  ;;  %v6210_v35 = vld [vmem:[%s6532_s22 + $0x228] sm:$0xff]  ;;  %v8553_v43 = vpop.permute.xlu1 %2793  ;;  %v2452_v40 = vld [vmem:[%s6532_s22 + $0x698] sm:$0xff] }
 0x2cc   : > { %11198 = vst [vmem:[#allocation28_spill] sm:$0xff] %v8535_v24  ;;  %v3404_v34 = vpop.f32.mrf.mxu1  ;;  %3694 = vmatprep.mubr.f32.mxu1 %v2444_v0  ;;  %11204 = vst [vmem:[#allocation38_spill] sm:$0xff] %v8553_v43  ;;  %v6212_v43 = vld [vmem:[%s6532_s22 + $0x248] sm:$0xff] }
 0x2cd   : > { %11199 = vst [vmem:[#allocation17_spill] sm:$0xff] %v8537_v18  ;;  %v8540_v61 = vpop.f32.mrf.mxu0  ;;  %3940 = vmatmul.mubr.f32.gmra.mxu0 %v6209_v7  ;;  %v8543_v5 = vadd.f32 %v3404_v34, %v2956_v28  ;;  %v2962_v7 = vadd.f32 %v8241_v42, %v8401_v44  ;;  %v2447_v34 = vld [vmem:[%s6532_s22 + $0x670] sm:$0xff]  ;;  %v6224_v24 = vld [vmem:[%s6532_s22 + $0x308] sm:$0xff] }
 0x2ce   : > { %11200 = vst [vmem:[#allocation30_spill] sm:$0xff] %v8540_v61  ;;  %3945 = vmatprep.mubr.f32.mxu0 %v6210_v35  ;;  %v2451_v44 = vld [vmem:[%s6532_s22 + $0x690] sm:$0xff] }
 0x2cf   : > { %11201 = vst [vmem:[#allocation33_spill] sm:$0xff] %v8543_v5  ;;  %v8551_v46 = vpop.f32.mrf.mxu0  ;;  %v3408_v0 = vpop.f32.mrf.mxu1  ;;  %3695 = vmatmul.mubr.f32.gmra.mxu1 %v2443_v57  ;;  %v2966_v57 = vadd.f32 %v8246_v6, %v8388_v54 }
 0x2d0   : > { %11203 = vst [vmem:[#allocation35_spill] sm:$0xff] %v8551_v46  ;;  %v8557_v28 = vadd.f32 %v3408_v0, %v2960_v53  ;;  %3700 = vmatprep.mubr.f32.mxu1 %v2448_v60  ;;  %v8571_v53 = vpop.permute.xlu0 %2683  ;;  %v2968_v0 = vadd.f32 %v8251_v48, %v8388_v54  ;;  %v2455_v54 = vld [vmem:[%s6532_s22 + $0x6b0] sm:$0xff] }
 0x2d1   : > { %v8560_v16 = vpop.f32.mrf.mxu0  ;;  %3946 = vmatmul.mubr.f32.gmra.mxu0 %v6211_v23  ;;  %v3410_v35 = vpop.f32.mrf.mxu1  ;;  %11209 = vst [vmem:[#allocation44_spill] sm:$0xff] %v8571_v53  ;;  %v6214_v53 = vld [vmem:[%s6532_s22 + $0x268] sm:$0xff] }
 0x2d2   : > { %11205 = vst [vmem:[#allocation39_spill] sm:$0xff] %v8557_v28  ;;  %11206 = vst [vmem:[#allocation11_spill] sm:$0xff] %v8560_v16  ;;  %3951 = vmatprep.mubr.f32.mxu0 %v6212_v43  ;;  %v8567_v46 = vadd.f32 %v3410_v35, %v2962_v7  ;;  %v6213_v43 = vld [vmem:[%s6532_s22 + $0x240] sm:$0xff]  ;;  %v2456_v35 = vld [vmem:[%s6532_s22 + $0x6b8] sm:$0xff] }
 0x2d3   : > { %v8569_v42 = vpop.f32.mrf.mxu0  ;;  %v3414_v60 = vpop.f32.mrf.mxu1  ;;  %3701 = vmatmul.mubr.f32.gmra.mxu1 %v2447_v34  ;;  %v2972_v34 = vadd.f32 %v8254_v47, %v8373_v14  ;;  %v6215_v47 = vld [vmem:[%s6532_s22 + $0x260] sm:$0xff] }
 0x2d4   : > { %11207 = vst [vmem:[#allocation40_spill] sm:$0xff] %v8567_v46  ;;  %11208 = vst [vmem:[#allocation43_spill] sm:$0xff] %v8569_v42  ;;  %v8575_v23 = vadd.f32 %v3414_v60, %v2966_v57  ;;  %3706 = vmatprep.mubr.f32.mxu1 %v2452_v40  ;;  %v8582_v42 = vpop.permute.xlu1 %2788  ;;  %v2974_v60 = vadd.f32 %v8261_v2, %v8373_v14  ;;  %v6216_v2 = vld [vmem:[%s6532_s22 + $0x288] sm:$0xff]  ;;  %v6223_v16 = vld [vmem:[%s6532_s22 + $0x2e0] sm:$0xff] }
 0x2d5   : > { %v8578_v6 = vpop.f32.mrf.mxu0  ;;  %3952 = vmatmul.mubr.f32.gmra.mxu0 %v6213_v43  ;;  %v3416_v7 = vpop.f32.mrf.mxu1  ;;  %11212 = vst [vmem:[#allocation49_spill] sm:$0xff] %v8582_v42  ;;  %v6229_v46 = vld [vmem:[%s6532_s22 + $0x340] sm:$0xff] }
 0x2d6   : > { %11210 = vst [vmem:[#allocation45_spill] sm:$0xff] %v8575_v23  ;;  %11211 = vst [vmem:[#allocation48_spill] sm:$0xff] %v8578_v6  ;;  %3957 = vmatprep.mubr.f32.mxu0 %v6214_v53  ;;  %v8587_v48 = vadd.f32 %v3416_v7, %v2968_v0  ;;  %v2460_v0 = vld [vmem:[%s6532_s22 + $0x6d8] sm:$0xff]  ;;  %v8600_v7 = vpop.permute.xlu0 %2678 }
 0x2d7   : > { %v8589_v40 = vpop.f32.mrf.mxu0  ;;  %v3420_v57 = vpop.f32.mrf.mxu1  ;;  %3707 = vmatmul.mubr.f32.gmra.mxu1 %v2451_v44  ;;  %11217 = vst [vmem:[#allocation107_spill] sm:$0xff] %v8600_v7  ;;  %v2978_v44 = vadd.f32 %v8264_v8, %v8363_v3  ;;  %v2459_v7 = vld [vmem:[%s6532_s22 + $0x6d0] sm:$0xff]  ;;  %v6217_v8 = vld [vmem:[%s6532_s22 + $0x280] sm:$0xff]  ;;  %v6236_v3 = vld [vmem:[%s6532_s22 + $0x3c8] sm:$0xff] }
 0x2d8   : > { %11213 = vst [vmem:[#allocation50_spill] sm:$0xff] %v8587_v48  ;;  %11214 = vst [vmem:[#allocation53_spill] sm:$0xff] %v8589_v40  ;;  %v8593_v43 = vadd.f32 %v3420_v57, %v2972_v34  ;;  %3712 = vmatprep.mubr.f32.mxu1 %v2456_v35  ;;  %v8609_v14 = vpop.permute.xlu1 %2783  ;;  %v6230_v48 = vld [vmem:[%s6532_s22 + $0x368] sm:$0xff] }
 0x2d9   : > { %v8596_v42 = vpop.f32.mrf.mxu0  ;;  %3958 = vmatmul.mubr.f32.gmra.mxu0 %v6215_v47  ;;  %v3422_v53 = vpop.f32.mrf.mxu1  ;;  %11220 = vst [vmem:[#allocation103_spill] sm:$0xff] %v8609_v14 }
 0x2da   : > { %11215 = vst [vmem:[#allocation109_spill] sm:$0xff] %v8593_v43  ;;  %11216 = vst [vmem:[#allocation108_spill] sm:$0xff] %v8596_v42  ;;  %3963 = vmatprep.mubr.f32.mxu0 %v6216_v2  ;;  %v8605_v34 = vadd.f32 %v3422_v53, %v2974_v60  ;;  %v2464_v60 = vld [vmem:[%s6532_s22 + $0x6f8] sm:$0xff]  ;;  %v6218_v53 = vld [vmem:[%s6532_s22 + $0x2a8] sm:$0xff] }
 0x2db   : > { %v8607_v35 = vpop.f32.mrf.mxu0  ;;  %v3426_v57 = vpop.f32.mrf.mxu1  ;;  %3713 = vmatmul.mubr.f32.gmra.mxu1 %v2455_v54 }
 0x2dc   : > { %11218 = vst [vmem:[#allocation105_spill] sm:$0xff] %v8605_v34  ;;  %11219 = vst [vmem:[#allocation104_spill] sm:$0xff] %v8607_v35  ;;  %v8611_v47 = vadd.f32 %v3426_v57, %v2978_v44  ;;  %3718 = vmatprep.mubr.f32.mxu1 %v2460_v0  ;;  %v8625_v0 = vpop.permute.xlu0 %2673  ;;  %v2463_v44 = vld [vmem:[%s6532_s22 + $0x6f0] sm:$0xff]  ;;  %v8634_v35 = vpop.permute.xlu1 %2778 }
 0x2dd   : > { %v8614_v42 = vpop.f32.mrf.mxu0  ;;  %3964 = vmatmul.mubr.f32.gmra.mxu0 %v6217_v8  ;;  %v8617_v2 = vpop.f32.mrf.mxu1  ;;  %11226 = vst [vmem:[#allocation98_spill] sm:$0xff] %v8625_v0  ;;  %v6219_v8 = vld [vmem:[%s6532_s22 + $0x2a0] sm:$0xff]  ;;  %11229 = vst [vmem:[#allocation96_spill] sm:$0xff] %v8634_v35  ;;  %v2472_v35 = vld [vmem:[%s6532_s22 + $0x738] sm:$0xff] }
 0x2de   : > { %11221 = vst [vmem:[#allocation46_spill] sm:$0xff] %v8611_v47  ;;  %11222 = vst [vmem:[#allocation101_spill] sm:$0xff] %v8614_v42  ;;  %3969 = vmatprep.mubr.f32.mxu0 %v6218_v53  ;;  %v2468_v53 = vld [vmem:[%s6532_s22 + $0x718] sm:$0xff] }
 0x2df   : > { %11223 = vst [vmem:[#allocation100_spill] sm:$0xff] %v8617_v2  ;;  %v8621_v54 = vpop.f32.mrf.mxu0  ;;  %v8623_v14 = vpop.f32.mrf.mxu1  ;;  %3719 = vmatmul.mubr.f32.gmra.mxu1 %v2459_v7  ;;  %v2496_v2 = vld [vmem:[%s6532_s22 + $0x7f8] sm:$0xff] }
 0x2e0   : > { %11224 = vst [vmem:[#allocation51_spill] sm:$0xff] %v8621_v54  ;;  %11225 = vst [vmem:[#allocation99_spill] sm:$0xff] %v8623_v14  ;;  %3724 = vmatprep.mubr.f32.mxu1 %v2464_v60  ;;  %v6220_v54 = vld [vmem:[%s6532_s22 + $0x2c8] sm:$0xff]  ;;  %v2467_v60 = vld [vmem:[%s6532_s22 + $0x710] sm:$0xff]  ;;  %v8648_v6 = vpop.permute.xlu0 %2668 }
 0x2e1   : > { %v8628_v57 = vpop.f32.mrf.mxu0  ;;  %3970 = vmatmul.mubr.f32.gmra.mxu0 %v6219_v8  ;;  %v8631_v42 = vpop.f32.mrf.mxu1  ;;  %v6221_v8 = vld [vmem:[%s6532_s22 + $0x2c0] sm:$0xff]  ;;  %11234 = vst [vmem:[#allocation91_spill] sm:$0xff] %v8648_v6 }
 0x2e2   : > { %11227 = vst [vmem:[#allocation54_spill] sm:$0xff] %v8628_v57  ;;  %11228 = vst [vmem:[#allocation97_spill] sm:$0xff] %v8631_v42  ;;  %3975 = vmatprep.mubr.f32.mxu0 %v6220_v54  ;;  %v6222_v54 = vld [vmem:[%s6532_s22 + $0x2e8] sm:$0xff] }
 0x2e3   : > { %v8637_v7 = vpop.f32.mrf.mxu0  ;;  %v8639_v40 = vpop.f32.mrf.mxu1  ;;  %3725 = vmatmul.mubr.f32.gmra.mxu1 %v2463_v44 }
 0x2e4   : > { %11230 = vst [vmem:[#allocation12_spill] sm:$0xff] %v8637_v7  ;;  %11231 = vst [vmem:[#allocation95_spill] sm:$0xff] %v8639_v40  ;;  %3730 = vmatprep.mubr.f32.mxu1 %v2468_v53  ;;  %v8655_v53 = vpop.permute.xlu1 %2773 }
 0x2e5   : > { %v8642_v57 = vpop.f32.mrf.mxu0  ;;  %3976 = vmatmul.mubr.f32.gmra.mxu0 %v6221_v8  ;;  %v8645_v0 = vpop.f32.mrf.mxu1  ;;  %11236 = vst [vmem:[#allocation25_spill] sm:$0xff] %v8655_v53  ;;  %v2471_v8 = vld [vmem:[%s6532_s22 + $0x730] sm:$0xff] }
 0x2e6   : > { %11232 = vst [vmem:[#allocation93_spill] sm:$0xff] %v8642_v57  ;;  %11233 = vst [vmem:[#allocation29_spill] sm:$0xff] %v8645_v0  ;;  %3981 = vmatprep.mubr.f32.mxu0 %v6222_v54  ;;  %v2476_v54 = vld [vmem:[%s6532_s22 + $0x758] sm:$0xff] }
 0x2e7   : > { %v8651_v7 = vpop.f32.mrf.mxu0  ;;  %v8653_v44 = vpop.f32.mrf.mxu1  ;;  %3731 = vmatmul.mubr.f32.gmra.mxu1 %v2467_v60 }
 0x2e8   : > { %11235 = vst [vmem:[#allocation89_spill] sm:$0xff] %v8651_v7  ;;  %3736 = vmatprep.mubr.f32.mxu1 %v2472_v35  ;;  %v8669_v35 = vpop.permute.xlu0 %2663  ;;  %v8678_v37 = vpop.permute.xlu1 %2768 }
 0x2e9   : > { %v8658_v57 = vpop.f32.mrf.mxu0  ;;  %3982 = vmatmul.mubr.f32.gmra.mxu0 %v6223_v16  ;;  %v8661_v61 = vpop.f32.mrf.mxu1  ;;  %11239 = vst [vmem:[#allocation8_spill] sm:$0xff] %v8669_v35  ;;  %v6225_v16 = vld [vmem:[%s6532_s22 + $0x300] sm:$0xff]  ;;  %11241 = vst [vmem:[#allocation47_spill] sm:$0xff] %v8678_v37  ;;  %v2484_v37 = vld [vmem:[%s6532_s22 + $0x798] sm:$0xff] }
 0x2ea   : > { %11237 = vst [vmem:[#allocation23_spill] sm:$0xff] %v8658_v57  ;;  %3987 = vmatprep.mubr.f32.mxu0 %v6224_v24  ;;  %v2475_v57 = vld [vmem:[%s6532_s22 + $0x750] sm:$0xff]  ;;  %v2480_v24 = vld [vmem:[%s6532_s22 + $0x778] sm:$0xff] }
 0x2eb   : > { %v8665_v7 = vpop.f32.mrf.mxu0  ;;  %v8667_v60 = vpop.f32.mrf.mxu1  ;;  %3737 = vmatmul.mubr.f32.gmra.mxu1 %v2471_v8 }
 0x2ec   : > { %11238 = vst [vmem:[#allocation52_spill] sm:$0xff] %v8665_v7  ;;  %3742 = vmatprep.mubr.f32.mxu1 %v2476_v54  ;;  %v6226_v7 = vld [vmem:[%s6532_s22 + $0x328] sm:$0xff]  ;;  %v2479_v54 = vld [vmem:[%s6532_s22 + $0x770] sm:$0xff]  ;;  %v8692_v28 = vpop.permute.xlu0 %2658 }
 0x2ed   : > { %v8672_v53 = vpop.f32.mrf.mxu0  ;;  %3988 = vmatmul.mubr.f32.gmra.mxu0 %v6225_v16  ;;  %v8675_v21 = vpop.f32.mrf.mxu1  ;;  %v6227_v16 = vld [vmem:[%s6532_s22 + $0x320] sm:$0xff]  ;;  %11244 = vst [vmem:[#allocation42_spill] sm:$0xff] %v8692_v28 }
 0x2ee   : > { %11240 = vst [vmem:[#allocation9_spill] sm:$0xff] %v8672_v53  ;;  %3993 = vmatprep.mubr.f32.mxu0 %v6226_v7  ;;  %v6228_v7 = vld [vmem:[%s6532_s22 + $0x348] sm:$0xff] }
 0x2ef   : > { %v8681_v8 = vpop.f32.mrf.mxu0  ;;  %v8683_v18 = vpop.f32.mrf.mxu1  ;;  %3743 = vmatmul.mubr.f32.gmra.mxu1 %v2475_v57 }
 0x2f0   : > { %11242 = vst [vmem:[#allocation10_spill] sm:$0xff] %v8681_v8  ;;  %3748 = vmatprep.mubr.f32.mxu1 %v2480_v24  ;;  %v8699_v24 = vpop.permute.xlu1 %2763 }
 0x2f1   : > { %v8686_v53 = vpop.f32.mrf.mxu0  ;;  %3994 = vmatmul.mubr.f32.gmra.mxu0 %v6227_v16  ;;  %v8689_v5 = vpop.f32.mrf.mxu1  ;;  %11246 = vst [vmem:[#allocation15_spill] sm:$0xff] %v8699_v24  ;;  %v2483_v16 = vld [vmem:[%s6532_s22 + $0x790] sm:$0xff] }
 0x2f2   : > { %11243 = vst [vmem:[#allocation13_spill] sm:$0xff] %v8686_v53  ;;  %3999 = vmatprep.mubr.f32.mxu0 %v6228_v7  ;;  %v2488_v7 = vld [vmem:[%s6532_s22 + $0x7b8] sm:$0xff]  ;;  %v2487_v24 = vld [vmem:[%s6532_s22 + $0x7b0] sm:$0xff] }
 0x2f3   : > { %v8695_v8 = vpop.f32.mrf.mxu0  ;;  %v8697_v57 = vpop.f32.mrf.mxu1  ;;  %3749 = vmatmul.mubr.f32.gmra.mxu1 %v2479_v54 }
 0x2f4   : > { %11245 = vst [vmem:[#allocation14_spill] sm:$0xff] %v8695_v8  ;;  %3754 = vmatprep.mubr.f32.mxu1 %v2484_v37  ;;  %v8713_v37 = vpop.permute.xlu0 %2653  ;;  %v8722_v34 = vpop.permute.xlu1 %2758 }
 0x2f5   : > { %v8702_v53 = vpop.f32.mrf.mxu0  ;;  %4000 = vmatmul.mubr.f32.gmra.mxu0 %v6229_v46  ;;  %v8705_v23 = vpop.f32.mrf.mxu1  ;;  %11249 = vst [vmem:[#allocation19_spill] sm:$0xff] %v8713_v37  ;;  %v6231_v46 = vld [vmem:[%s6532_s22 + $0x360] sm:$0xff]  ;;  %11251 = vst [vmem:[#allocation20_spill] sm:$0xff] %v8722_v34  ;;  %v6234_v34 = vld [vmem:[%s6532_s22 + $0x3a8] sm:$0xff] }
 0x2f6   : > { %11247 = vst [vmem:[#allocation37_spill] sm:$0xff] %v8702_v53  ;;  %4005 = vmatprep.mubr.f32.mxu0 %v6230_v48  ;;  %v2492_v48 = vld [vmem:[%s6532_s22 + $0x7d8] sm:$0xff] }
 0x2f7   : > { %v8709_v8 = vpop.f32.mrf.mxu0  ;;  %v8711_v54 = vpop.f32.mrf.mxu1  ;;  %3755 = vmatmul.mubr.f32.gmra.mxu1 %v2483_v16 }
 0x2f8   : > { %11248 = vst [vmem:[#allocation18_spill] sm:$0xff] %v8709_v8  ;;  %3760 = vmatprep.mubr.f32.mxu1 %v2488_v7  ;;  %v6232_v8 = vld [vmem:[%s6532_s22 + $0x388] sm:$0xff]  ;;  %v2491_v7 = vld [vmem:[%s6532_s22 + $0x7d0] sm:$0xff]  ;;  %v8734_v14 = vpop.permute.xlu0 %2648 }
 0x2f9   : > { %v8716_v53 = vpop.f32.mrf.mxu0  ;;  %4006 = vmatmul.mubr.f32.gmra.mxu0 %v6231_v46  ;;  %v8719_v43 = vpop.f32.mrf.mxu1  ;;  %v6233_v46 = vld [vmem:[%s6532_s22 + $0x380] sm:$0xff]  ;;  %11254 = vst [vmem:[#allocation22_spill] sm:$0xff] %v8734_v14 }
 0x2fa   : > { %11250 = vst [vmem:[#allocation32_spill] sm:$0xff] %v8716_v53  ;;  %4011 = vmatprep.mubr.f32.mxu0 %v6232_v8 }
 0x2fb   : > { %v8725_v16 = vpop.f32.mrf.mxu0  ;;  %v8727_v47 = vpop.f32.mrf.mxu1  ;;  %3761 = vmatmul.mubr.f32.gmra.mxu1 %v2487_v24 }
 0x2fc   : > { %11252 = vst [vmem:[#allocation27_spill] sm:$0xff] %v8725_v16  ;;  %3766 = vmatprep.mubr.f32.mxu1 %v2492_v48  ;;  %v8739_v24 = vpop.permute.xlu1 %2753  ;;  %v2495_v48 = vld [vmem:[%s6532_s22 + $0x7f0] sm:$0xff] }
 0x2fd   : > { %v8730_v53 = vpop.f32.mrf.mxu0  ;;  %4012 = vmatmul.mubr.f32.gmra.mxu0 %v6233_v46  ;;  %v3476_v6 = vpop.f32.mrf.mxu1  ;;  %11256 = vst [vmem:[#allocation111_spill] sm:$0xff] %v8739_v24  ;;  %v6235_v46 = vld [vmem:[%s6532_s22 + $0x3a0] sm:$0xff]  ;;  %v3040_v24 = vadd.f32 %v8370_v32, %v8229_v12  ;;  %v6239_v32 = vld [vmem:[%s6532_s22 + $0x3e8] sm:$0xff] }
 0x2fe   : > { %11253 = vst [vmem:[#allocation24_spill] sm:$0xff] %v8730_v53  ;;  %4017 = vmatprep.mubr.f32.mxu0 %v6234_v34  ;;  %v3038_v34 = vadd.f32 %v8366_v10, %v8229_v12  ;;  %v3026_v12 = vadd.f32 %v8345_v15, %v8257_v30  ;;  %v3020_v15 = vadd.f32 %v8334_v26, %v8271_v63 }
 0x2ff   : > { %v8737_v8 = vpop.f32.mrf.mxu0  ;;  %v3480_v16 = vpop.f32.mrf.mxu1  ;;  %3767 = vmatmul.mubr.f32.gmra.mxu1 %v2491_v7 }
 0x300   : > { %11255 = vst [vmem:[#allocation110_spill] sm:$0xff] %v8737_v8  ;;  %3772 = vmatprep.mubr.f32.mxu1 %v2496_v2  ;;  %v8750_v7 = vpop.permute.xlu0 %2643  ;;  %v3034_v2 = vadd.f32 %v8360_v13, %v8243_v51  ;;  %v8760_v35 = vpop.permute.xlu1 %2748 }
 0x301   : > { %v8742_v42 = vpop.f32.mrf.mxu0  ;;  %4018 = vmatmul.mubr.f32.gmra.mxu0 %v6235_v46  ;;  %v3482_v53 = vpop.f32.mrf.mxu1  ;;  %11259 = vst [vmem:[#allocation114_spill] sm:$0xff] %v8750_v7  ;;  %v6237_v46 = vld [vmem:[%s6532_s22 + $0x18] sm:$0xff]  ;;  %11261 = vst [vmem:[#allocation116_spill] sm:$0xff] %v8760_v35  ;;  %v3044_v13 = vadd.f32 %v8376_v58, %v8750_v7 }
 0x302   : > { %11257 = vst [vmem:[#allocation112_spill] sm:$0xff] %v8742_v42  ;;  %4023 = vmatprep.mubr.f32.mxu0 %v6236_v3  ;;  %v6238_v3 = vld [vmem:[%s6532_s22 + $0x3c0] sm:$0xff]  ;;  %v3483_v0 = vadd.f32 %v3482_v53, %v3034_v2 }
 0x303   : > { %v8748_v40 = vpop.f32.mrf.mxu0  ;;  %v3486_v8 = vpop.f32.mrf.mxu1  ;;  %3773 = vmatmul.mubr.f32.gmra.mxu1 %v2495_v48  ;;  %v3032_v48 = vadd.f32 %v8356_v1, %v8243_v51  ;;  %v3046_v1 = vadd.f32 %v8381_v29, %v8750_v7 }
 0x304   : > { %11258 = vst [vmem:[#allocation113_spill] sm:$0xff] %v8748_v40  ;;  %4292 = vmatprep.mubr.f32.mxu1 %v6237_v46  ;;  %v3487_v10 = vadd.f32 %v3486_v8, %v3038_v34  ;;  %v3028_v8 = vadd.f32 %v8351_v62, %v8257_v30  ;;  %v3022_v62 = vadd.f32 %v8340_v19, %v8271_v63  ;;  %v6242_v30 = vld [vmem:[%s6532_s22 + $0x3e0] sm:$0xff] }
 0x305   : > { %v8757_v42 = vpop.f32.mrf.mxu0  ;;  %4024 = vmatmul.mubr.f32.gmra.mxu0 %v6238_v3  ;;  %v3488_v40 = vpop.f32.mrf.mxu1  ;;  %v3481_v58 = vadd.f32 %v3480_v16, %v3032_v48  ;;  %v3050_v16 = vadd.f32 %v8384_v56, %v8734_v14  ;;  %v3475_v48 = vadd.f32 %v8727_v47, %v3026_v12  ;;  %v3014_v19 = vadd.f32 %v8325_v45, %v8285_v22 }
 0x306   : > { %11260 = vst [vmem:[#allocation115_spill] sm:$0xff] %v8757_v42  ;;  %4029 = vmatprep.mubr.f32.mxu0 %v6239_v32  ;;  %v3489_v46 = vadd.f32 %v3488_v40, %v3040_v24  ;;  %v6240_v42 = vld [vmem:[%s6532_s22 + $0x10] sm:$0xff]  ;;  %v6241_v40 = vld [vmem:[%s6532_s22 + $0x38] sm:$0xff]  ;;  %v3477_v24 = vadd.f32 %v3476_v6, %v3028_v8  ;;  %v3016_v6 = vadd.f32 %v8330_v59, %v8285_v22  ;;  %v8800_v12 = vpop.permute.xlu1 %2743  ;;  %v6286_v22 = vld [vmem:[%s6532_s22 + $0x540] sm:$0xff] }
 0x307   : > { %v8771_v34 = vpop.f32.mrf.mxu0  ;;  %v3492_v3 = vpop.f32.mrf.mxu1  ;;  %4293 = vmatmul.mubr.f32.vlgmr.msra.gmra.mxu1 %v6240_v42  ;;  %v4737_v42 = vmax.f32 %v3487_v10, 0.0  ;;  %v6244_v8 = vld [vmem:[%s6532_s22 + $0x30] sm:$0xff]  ;;  %11262 = vst [vmem:[#allocation117_spill] sm:$0xff] %v8800_v12  ;;  %v3052_v47 = vadd.f32 %v8391_v4, %v8734_v14  ;;  %v4733_v45 = vmax.f32 %v3481_v58, 0.0  ;;  %v6245_v59 = vld [vmem:[%s6532_s22 + $0x58] sm:$0xff]  ;;  %v6246_v4 = vld [vmem:[%s6532_s22 + $0x400] sm:$0xff]  ;;  %v3056_v58 = vadd.f32 %v8394_v36, %v8713_v37 }
 0x308   : > { %v4738_v53 = vmax.f32 %v3489_v46, 0.0  ;;  %v8776_v2 = vadd.f32 %v3492_v3, %v3044_v13  ;;  %4298 = vmatprep.mubr.f32.mxu1 %v6241_v40  ;;  %v4734_v13 = vmax.f32 %v3483_v0, 0.0  ;;  %v6243_v46 = vld [vmem:[%s6532_s22 + $0x408] sm:$0xff]  ;;  %v3469_v0 = vadd.f32 %v8711_v54, %v3020_v15  ;;  %v6285_v14 = vld [vmem:[%s6532_s22 + $0x198] sm:$0xff] }
 0x309   : > { %v8783_v32 = vpop.f32.mrf.mxu0  ;;  %4030 = vmatmul.mubr.f32.gmra.mxu0 %v6242_v30  ;;  %v3494_v29 = vpop.f32.mrf.mxu1  ;;  %v3471_v30 = vadd.f32 %v8719_v43, %v3022_v62  ;;  %v3008_v43 = vadd.f32 %v8315_v31, %v8299_v9  ;;  %v4730_v40 = vmax.f32 %v3477_v24, 0.0  ;;  %v3463_v15 = vadd.f32 %v8697_v57, %v3014_v19  ;;  %v6248_v57 = vld [vmem:[%s6532_s22 + $0x50] sm:$0xff] }
 0x30a   : > { %4035 = vmatprep.mubr.f32.mxu0 %v6243_v46  ;;  %v8790_v26 = vadd.f32 %v3494_v29, %v3046_v1  ;;  %4953 = vmatprep.subr.mxu0 %v4738_v53  ;;  %v3010_v1 = vadd.f32 %v8318_v33, %v8299_v9  ;;  %v3465_v53 = vadd.f32 %v8705_v23, %v3016_v6  ;;  %v6247_v29 = vld [vmem:[%s6532_s22 + $0x428] sm:$0xff]  ;;  %v4725_v19 = vmax.f32 %v3469_v0, 0.0 }
 0x30b   : > { %v8797_v10 = vpop.f32.mrf.mxu0  ;;  %v3498_v56 = vpop.f32.mrf.mxu1  ;;  %4299 = vmatmul.mubr.f32.gmra.mxu1 %v6244_v8  ;;  %4954 = vmatpush1.msra.mxu0 %v4737_v42  ;;  %v4729_v42 = vmax.f32 %v3475_v48, 0.0  ;;  %v3002_v33 = vadd.f32 %v8304_v25, %v8311_v52  ;;  %v3004_v23 = vadd.f32 %v8307_v41, %v8311_v52  ;;  %v3058_v48 = vadd.f32 %v8399_v27, %v8713_v37  ;;  %v6249_v41 = vld [vmem:[%s6532_s22 + $0x78] sm:$0xff]  ;;  %v6250_v27 = vld [vmem:[%s6532_s22 + $0x420] sm:$0xff] }
 0x30c   : > { %v8805_v3 = vadd.f32 %v3498_v56, %v3050_v16  ;;  %4955 = vmatprep.subr.mxu0 %v4734_v13  ;;  %4304 = vmatprep.mubr.f32.mxu1 %v6245_v59  ;;  %v3459_v24 = vadd.f32 %v8689_v5, %v3010_v1  ;;  %v4726_v16 = vmax.f32 %v3471_v30, 0.0  ;;  %v3457_v46 = vadd.f32 %v8683_v18, %v3008_v43  ;;  %v6251_v59 = vld [vmem:[%s6532_s22 + $0x448] sm:$0xff] }
 0x30d   : > { %v8813_v62 = vpop.f32.mrf.mxu0  ;;  %4036 = vmatmul.mubr.f32.gmra.mxu0 %v6246_v4  ;;  %v3500_v54 = vpop.f32.mrf.mxu1  ;;  %v2996_v5 = vadd.f32 %v8292_v39, %v8323_v17  ;;  %v2998_v6 = vadd.f32 %v8297_v38, %v8323_v17  ;;  %v3453_v30 = vadd.f32 %v8675_v21, %v3004_v23  ;;  %v4722_v56 = vmax.f32 %v3465_v53, 0.0  ;;  %v11269_v23 = vld [vmem:[#allocation29_spill] sm:$0xff] }
 0x30e   : > { %4041 = vmatprep.mubr.f32.mxu0 %v6247_v29  ;;  %v8820_v31 = vadd.f32 %v3500_v54, %v3052_v47  ;;  %4956 = vmatpush1.msra.mxu0 %v4733_v45  ;;  %v8844_v47 = vpop.permute.xlu1 %2738  ;;  %v3062_v0 = vadd.f32 %v8404_v49, %v8692_v28  ;;  %v3451_v39 = vadd.f32 %v8667_v60, %v3002_v33  ;;  %v4721_v45 = vmax.f32 %v3463_v15, 0.0  ;;  %v6252_v60 = vld [vmem:[%s6532_s22 + $0x70] sm:$0xff]  ;;  %v11267_v15 = vld [vmem:[#allocation3_spill] sm:$0xff]  ;;  %v11268_v29 = vld [vmem:[#allocation58_spill] sm:$0xff] }
 0x30f   : > { %v8827_v13 = vpop.f32.mrf.mxu0  ;;  %4957 = vmatprep.subr.mxu0 %v4730_v40  ;;  %v3504_v36 = vpop.f32.mrf.mxu1  ;;  %4305 = vmatmul.mubr.f32.gmra.mxu1 %v6248_v57  ;;  %11264 = vst [vmem:[#allocation119_spill] sm:$0xff] %v8844_v47  ;;  %v2990_v21 = vadd.f32 %v8282_v20, %v8337_v11  ;;  %v2992_v43 = vadd.f32 %v8289_v50, %v8337_v11  ;;  %v4718_v53 = vmax.f32 %v3459_v24, 0.0  ;;  %v6253_v50 = vld [vmem:[%s6532_s22 + $0x98] sm:$0xff]  ;;  %v11271_v57 = vld [vmem:[#allocation8_spill] sm:$0xff] }
 0x310   : > { %v8833_v25 = vadd.f32 %v3504_v36, %v3056_v58  ;;  %4958 = vmatpush1.msra.mxu0 %v4729_v42  ;;  %4310 = vmatprep.mubr.f32.mxu1 %v6249_v41  ;;  %v3447_v1 = vadd.f32 %v8661_v61, %v2998_v6  ;;  %v3064_v4 = vadd.f32 %v8409_v55, %v8692_v28  ;;  %v4717_v58 = vmax.f32 %v3457_v46, 0.0  ;;  %v11266_v61 = vld [vmem:[#allocation7_spill] sm:$0xff]  ;;  %v6254_v55 = vld [vmem:[%s6532_s22 + $0x440] sm:$0xff]  ;;  %v6280_v11 = vld [vmem:[%s6532_s22 + $0x150] sm:$0xff] }
 0x311   : > { %v8841_v8 = vpop.f32.mrf.mxu0  ;;  %4042 = vmatmul.mubr.f32.gmra.mxu0 %v6250_v27  ;;  %4959 = vmatprep.subr.mxu0 %v4726_v16  ;;  %v3506_v18 = vpop.f32.mrf.mxu1  ;;  %v3445_v54 = vadd.f32 %v8653_v44, %v2996_v5  ;;  %v2984_v42 = vadd.f32 %v11267_v15, %v11266_v61  ;;  %v2986_v33 = vadd.f32 %v11268_v29, %v11266_v61  ;;  %v4714_v16 = vmax.f32 %v3453_v30, 0.0  ;;  %v6255_v6 = vld [vmem:[%s6532_s22 + $0x468] sm:$0xff]  ;;  %v11274_v30 = vld [vmem:[#allocation81_spill] sm:$0xff]  ;;  %v11275_v27 = vld [vmem:[#allocation2_spill] sm:$0xff] }
 0x312   : > { %11263 = vst [vmem:[#allocation118_spill] sm:$0xff] %v8841_v8  ;;  %4047 = vmatprep.mubr.f32.mxu0 %v6251_v59  ;;  %v8850_v38 = vadd.f32 %v3506_v18, %v3058_v48  ;;  %4960 = vmatpush1.msra.mxu0 %v4725_v19  ;;  %v3441_v24 = vadd.f32 %v11269_v23, %v2992_v43  ;;  %v11272_v48 = vld [vmem:[#allocation16_spill] sm:$0xff]  ;;  %v11273_v19 = vld [vmem:[#allocation95_spill] sm:$0xff]  ;;  %v4713_v5 = vmax.f32 %v3451_v39, 0.0  ;;  %v4710_v59 = vmax.f32 %v3447_v1, 0.0  ;;  %v8886_v39 = vpop.permute.xlu1 %2733  ;;  %v6257_v1 = vld [vmem:[%s6532_s22 + $0xb8] sm:$0xff] }
 0x313   : > { %v8857_v40 = vpop.f32.mrf.mxu0  ;;  %4961 = vmatprep.subr.mxu0 %v4722_v56  ;;  %v3510_v49 = vpop.f32.mrf.mxu1  ;;  %4311 = vmatmul.mubr.f32.gmra.mxu1 %v6252_v60  ;;  %v3068_v46 = vadd.f32 %v11272_v48, %v11271_v57  ;;  %v3439_v41 = vadd.f32 %v11273_v19, %v2990_v21  ;;  %v2980_v18 = vadd.f32 %v11275_v27, %v11274_v30  ;;  %v11279_v21 = vld [vmem:[#allocation76_spill] sm:$0xff]  ;;  %v11283_v48 = vld [vmem:[#allocation91_spill] sm:$0xff]  ;;  %v11284_v19 = vld [vmem:[#allocation21_spill] sm:$0xff] }
 0x314   : > { %11265 = vst [vmem:[#allocation120_spill] sm:$0xff] %v8857_v40  ;;  %v8863_v20 = vadd.f32 %v3510_v49, %v3062_v0  ;;  %4962 = vmatpush1.msra.mxu0 %v4721_v45  ;;  %4316 = vmatprep.mubr.f32.mxu1 %v6253_v50  ;;  %v11276_v0 = vld [vmem:[#allocation97_spill] sm:$0xff]  ;;  %v6256_v49 = vld [vmem:[%s6532_s22 + $0x90] sm:$0xff]  ;;  %11278 = vst [vmem:[#allocation29_spill] sm:$0xff] %v8886_v39  ;;  %v3070_v60 = vadd.f32 %v11279_v21, %v11271_v57  ;;  %v4709_v50 = vmax.f32 %v3445_v54, 0.0 }
 0x315   : > { %v8871_v36 = vpop.f32.mrf.mxu0  ;;  %4048 = vmatmul.mubr.f32.gmra.mxu0 %v6254_v55  ;;  %4963 = vmatprep.subr.mxu0 %v4718_v53  ;;  %v3512_v44 = vpop.f32.mrf.mxu1  ;;  %v3435_v45 = vadd.f32 %v11276_v0, %v2986_v33  ;;  %v11281_v29 = vld [vmem:[#allocation100_spill] sm:$0xff]  ;;  %v4706_v23 = vmax.f32 %v3441_v24, 0.0  ;;  %v6258_v55 = vld [vmem:[%s6532_s22 + $0x460] sm:$0xff]  ;;  %v4705_v54 = vmax.f32 %v3439_v41, 0.0  ;;  %v6273_v30 = vld [vmem:[%s6532_s22 + $0x138] sm:$0xff] }
 0x316   : > { %11270 = vst [vmem:[#allocation3_spill] sm:$0xff] %v8871_v36  ;;  %4053 = vmatprep.mubr.f32.mxu0 %v6255_v6  ;;  %v8878_v56 = vadd.f32 %v3512_v44, %v3064_v4  ;;  %4964 = vmatpush1.msra.mxu0 %v4717_v58  ;;  %v11280_v4 = vld [vmem:[#allocation99_spill] sm:$0xff]  ;;  %v3429_v33 = vadd.f32 %v11281_v29, %v2980_v18  ;;  %v6260_v18 = vld [vmem:[%s6532_s22 + $0xb0] sm:$0xff]  ;;  %v6262_v21 = vld [vmem:[%s6532_s22 + $0x480] sm:$0xff] }
 0x317   : > { %v8883_v43 = vpop.f32.mrf.mxu0  ;;  %4965 = vmatprep.subr.mxu0 %v4714_v16  ;;  %v3516_v53 = vpop.f32.mrf.mxu1  ;;  %4317 = vmatmul.mubr.f32.gmra.mxu1 %v6256_v49  ;;  %v3433_v58 = vadd.f32 %v11280_v4, %v2984_v42  ;;  %v3074_v42 = vadd.f32 %v11284_v19, %v11283_v48  ;;  %v4702_v6 = vmax.f32 %v3435_v45, 0.0  ;;  %v11288_v4 = vld [vmem:[#allocation46_spill] sm:$0xff]  ;;  %v6272_v57 = vld [vmem:[%s6532_s22 + $0x110] sm:$0xff] }
 0x318   : > { %11277 = vst [vmem:[#allocation58_spill] sm:$0xff] %v8883_v43  ;;  %v8891_v15 = vadd.f32 %v3516_v53, %v3068_v46  ;;  %4966 = vmatpush1.msra.mxu0 %v4713_v5  ;;  %4322 = vmatprep.mubr.f32.mxu1 %v6257_v1  ;;  %v6259_v46 = vld [vmem:[%s6532_s22 + $0x488] sm:$0xff]  ;;  %v6261_v53 = vld [vmem:[%s6532_s22 + $0xd8] sm:$0xff]  ;;  %v4698_v41 = vmax.f32 %v3429_v33, 0.0  ;;  %v6306_v8 = vld [vmem:[%s6532_s22 + $0x5e0] sm:$0xff] }
 0x319   : > { %v8895_v16 = vpop.f32.mrf.mxu0  ;;  %4054 = vmatmul.mubr.f32.gmra.mxu0 %v6258_v55  ;;  %4967 = vmatprep.subr.mxu0 %v4710_v59  ;;  %v3518_v44 = vpop.f32.mrf.mxu1  ;;  %v4701_v0 = vmax.f32 %v3433_v58, 0.0  ;;  %v6263_v58 = vld [vmem:[%s6532_s22 + $0x4a8] sm:$0xff]  ;;  %v11289_v1 = vld [vmem:[#allocation105_spill] sm:$0xff]  ;;  %v6264_v55 = vld [vmem:[%s6532_s22 + $0xd0] sm:$0xff] }
 0x31a   : > { %11282 = vst [vmem:[#allocation16_spill] sm:$0xff] %v8895_v16  ;;  %4059 = vmatprep.mubr.f32.mxu0 %v6259_v46  ;;  %v8901_v5 = vadd.f32 %v3518_v44, %v3070_v60  ;;  %4968 = vmatpush1.msra.mxu0 %v4709_v50  ;;  %v8914_v60 = vpop.permute.xlu1 %2728  ;;  %v4697_v50 = vmax.f32 %v11288_v4, 0.0  ;;  %v4694_v29 = vmax.f32 %v11289_v1, 0.0  ;;  %v11291_v44 = vld [vmem:[#allocation109_spill] sm:$0xff]  ;;  %v6268_v1 = vld [vmem:[%s6532_s22 + $0xf0] sm:$0xff]  ;;  %v6303_v16 = vld [vmem:[%s6532_s22 + $0x5e8] sm:$0xff] }
 0x31b   : > { %v8903_v24 = vpop.f32.mrf.mxu0  ;;  %4969 = vmatprep.subr.mxu0 %v4706_v23  ;;  %v3522_v27 = vpop.f32.mrf.mxu1  ;;  %4323 = vmatmul.mubr.f32.gmra.mxu1 %v6260_v18  ;;  %11287 = vst [vmem:[#allocation97_spill] sm:$0xff] %v8914_v60  ;;  %v4693_v19 = vmax.f32 %v11291_v44, 0.0 }
 0x31c   : > { %11285 = vst [vmem:[#allocation95_spill] sm:$0xff] %v8903_v24  ;;  %v8906_v59 = vadd.f32 %v3522_v27, %v3074_v42  ;;  %4970 = vmatpush1.msra.mxu0 %v4705_v54  ;;  %4328 = vmatprep.mubr.f32.mxu1 %v6261_v53  ;;  %v6265_v42 = vld [vmem:[%s6532_s22 + $0xf8] sm:$0xff]  ;;  %v11292_v54 = vld [vmem:[#allocation50_spill] sm:$0xff] }
 0x31d   : > { %v8909_v49 = vpop.f32.mrf.mxu0  ;;  %4060 = vmatmul.mubr.f32.gmra.mxu0 %v6262_v21  ;;  %4971 = vmatprep.subr.mxu0 %v4702_v6  ;;  %v8912_v45 = vpop.f32.mrf.mxu1  ;;  %v4690_v46 = vmax.f32 %v11292_v54, 0.0  ;;  %v6266_v27 = vld [vmem:[%s6532_s22 + $0x4a0] sm:$0xff]  ;;  %v11295_v21 = vld [vmem:[#allocation40_spill] sm:$0xff]  ;;  %v11299_v54 = vld [vmem:[#allocation33_spill] sm:$0xff] }
 0x31e   : > { %11286 = vst [vmem:[#allocation2_spill] sm:$0xff] %v8909_v49  ;;  %4065 = vmatprep.mubr.f32.mxu0 %v6263_v58  ;;  %4972 = vmatpush1.msra.mxu0 %v4701_v0  ;;  %v11294_v0 = vld [vmem:[#allocation45_spill] sm:$0xff]  ;;  %v4686_v4 = vmax.f32 %v11295_v21, 0.0 }
 0x31f   : > { %v8919_v23 = vpop.f32.mrf.mxu0  ;;  %4973 = vmatprep.subr.mxu0 %v4698_v41  ;;  %v8921_v33 = vpop.f32.mrf.mxu1  ;;  %4329 = vmatmul.mubr.f32.gmra.mxu1 %v6264_v55  ;;  %v4689_v53 = vmax.f32 %v11294_v0, 0.0  ;;  %v6267_v41 = vld [vmem:[%s6532_s22 + $0x4c8] sm:$0xff]  ;;  %v6270_v0 = vld [vmem:[%s6532_s22 + $0x4c0] sm:$0xff] }
 0x320   : > { %11290 = vst [vmem:[#allocation76_spill] sm:$0xff] %v8919_v23  ;;  %4974 = vmatpush1.msra.mxu0 %v4697_v50  ;;  %4334 = vmatprep.mubr.f32.mxu1 %v6265_v42  ;;  %v8940_v55 = vpop.permute.xlu1 %2723  ;;  %v6269_v42 = vld [vmem:[%s6532_s22 + $0x118] sm:$0xff] }
 0x321   : > { %v8927_v6 = vpop.f32.mrf.mxu0  ;;  %4066 = vmatmul.mubr.f32.gmra.mxu0 %v6266_v27  ;;  %4975 = vmatprep.subr.mxu0 %v4694_v29  ;;  %v8930_v18 = vpop.f32.mrf.mxu1  ;;  %11297 = vst [vmem:[#allocation21_spill] sm:$0xff] %v8940_v55  ;;  %v11298_v29 = vld [vmem:[#allocation39_spill] sm:$0xff] }
 0x322   : > { %11293 = vst [vmem:[#allocation99_spill] sm:$0xff] %v8927_v6  ;;  %4071 = vmatprep.mubr.f32.mxu0 %v6267_v41  ;;  %4976 = vmatpush1.msra.mxu0 %v4693_v19  ;;  %v4685_v44 = vmax.f32 %v11298_v29, 0.0  ;;  %v4682_v19 = vmax.f32 %v11299_v54, 0.0  ;;  %v11301_v41 = vld [vmem:[#allocation17_spill] sm:$0xff] }
 0x323   : > { %v8935_v50 = vpop.f32.mrf.mxu0  ;;  %4977 = vmatprep.subr.mxu0 %v4690_v46  ;;  %v8937_v58 = vpop.f32.mrf.mxu1  ;;  %4335 = vmatmul.mubr.f32.gmra.mxu1 %v6268_v1  ;;  %v4681_v21 = vmax.f32 %v11301_v41, 0.0  ;;  %v6271_v1 = vld [vmem:[%s6532_s22 + $0x4e8] sm:$0xff]  ;;  %v6301_v6 = vld [vmem:[%s6532_s22 + $0x218] sm:$0xff] }
 0x324   : > { %11296 = vst [vmem:[#allocation100_spill] sm:$0xff] %v8935_v50  ;;  %4978 = vmatpush1.msra.mxu0 %v4689_v53  ;;  %4340 = vmatprep.mubr.f32.mxu1 %v6269_v42  ;;  %v11302_v53 = vld [vmem:[#allocation56_spill] sm:$0xff] }
 0x325   : > { %v8945_v27 = vpop.f32.mrf.mxu0  ;;  %4072 = vmatmul.mubr.f32.gmra.mxu0 %v6270_v0  ;;  %4979 = vmatprep.subr.mxu0 %v4686_v4  ;;  %v8948_v46 = vpop.f32.mrf.mxu1  ;;  %v4678_v29 = vmax.f32 %v11302_v53, 0.0  ;;  %v11304_v0 = vld [vmem:[#allocation57_spill] sm:$0xff]  ;;  %v6275_v53 = vld [vmem:[%s6532_s22 + $0x508] sm:$0xff] }
 0x326   : > { %11300 = vst [vmem:[#allocation46_spill] sm:$0xff] %v8945_v27  ;;  %4077 = vmatprep.mubr.f32.mxu0 %v6271_v1  ;;  %4980 = vmatpush1.msra.mxu0 %v4685_v44  ;;  %v4677_v4 = vmax.f32 %v11304_v0, 0.0  ;;  %v6274_v44 = vld [vmem:[%s6532_s22 + $0x4e0] sm:$0xff]  ;;  %v6277_v0 = vld [vmem:[%s6532_s22 + $0x158] sm:$0xff]  ;;  %v6291_v27 = vld [vmem:[%s6532_s22 + $0x588] sm:$0xff] }
 0x327   : > { %v8953_v42 = vpop.f32.mrf.mxu0  ;;  %4981 = vmatprep.subr.mxu0 %v4682_v19  ;;  %v8955_v54 = vpop.f32.mrf.mxu1  ;;  %4341 = vmatmul.mubr.f32.gmra.mxu1 %v6272_v57 }
 0x328   : > { %11303 = vst [vmem:[#allocation105_spill] sm:$0xff] %v8953_v42  ;;  %4982 = vmatpush1.msra.mxu0 %v4681_v21  ;;  %4346 = vmatprep.mubr.f32.mxu1 %v6273_v30  ;;  %v8965_v19 = vpop.permute.xlu1 %2878  ;;  %v6276_v30 = vld [vmem:[%s6532_s22 + $0x130] sm:$0xff] }
 0x329   : > { %v8960_v41 = vpop.f32.mrf.mxu0  ;;  %4078 = vmatmul.mubr.f32.gmra.mxu0 %v6274_v44  ;;  %4983 = vmatprep.subr.mxu0 %v4678_v29  ;;  %v8963_v1 = vpop.f32.mrf.mxu1  ;;  %11306 = vst [vmem:[#allocation50_spill] sm:$0xff] %v8965_v19  ;;  %v6278_v44 = vld [vmem:[%s6532_s22 + $0x500] sm:$0xff]  ;;  %v11328_v19 = vld [vmem:[#allocation28_spill] sm:$0xff] }
 0x32a   : > { %11305 = vst [vmem:[#allocation109_spill] sm:$0xff] %v8960_v41  ;;  %4083 = vmatprep.mubr.f32.mxu0 %v6275_v53  ;;  %4984 = vmatpush1.msra.mxu0 %v4677_v4  ;;  %v6279_v53 = vld [vmem:[%s6532_s22 + $0x528] sm:$0xff]  ;;  %v6292_v41 = vld [vmem:[%s6532_s22 + $0x1b0] sm:$0xff] }
 0x32b   : > { %v8968_v57 = vpop.f32.mrf.mxu0  ;;  %v8970_v21 = vpop.f32.mrf.mxu1  ;;  %4347 = vmatmul.mubr.f32.gmra.mxu1 %v6276_v30 }
 0x32c   : > { %11307 = vst [vmem:[#allocation45_spill] sm:$0xff] %v8968_v57  ;;  %4352 = vmatprep.mubr.f32.mxu1 %v6277_v0  ;;  %v8985_v30 = vpop.permute.xlu1 %2873  ;;  %v6281_v0 = vld [vmem:[%s6532_s22 + $0x178] sm:$0xff] }
 0x32d   : > { %v8974_v29 = vpop.f32.mrf.mxu0  ;;  %4084 = vmatmul.mubr.f32.gmra.mxu0 %v6278_v44  ;;  %v8977_v61 = vpop.f32.mrf.mxu1  ;;  %11310 = vst [vmem:[#allocation33_spill] sm:$0xff] %v8985_v30  ;;  %v6282_v44 = vld [vmem:[%s6532_s22 + $0x520] sm:$0xff] }
 0x32e   : > { %11308 = vst [vmem:[#allocation40_spill] sm:$0xff] %v8974_v29  ;;  %4089 = vmatprep.mubr.f32.mxu0 %v6279_v53  ;;  %v6283_v53 = vld [vmem:[%s6532_s22 + $0x548] sm:$0xff]  ;;  %v11327_v30 = vld [vmem:[#allocation90_spill] sm:$0xff] }
 0x32f   : > { %v8980_v4 = vpop.f32.mrf.mxu0  ;;  %v8982_v28 = vpop.f32.mrf.mxu1  ;;  %4353 = vmatmul.mubr.f32.gmra.mxu1 %v6280_v11  ;;  %v6284_v11 = vld [vmem:[%s6532_s22 + $0x170] sm:$0xff] }
 0x330   : > { %11309 = vst [vmem:[#allocation39_spill] sm:$0xff] %v8980_v4  ;;  %4358 = vmatprep.mubr.f32.mxu1 %v6281_v0  ;;  %v9005_v63 = vpop.permute.xlu1 %2868 }
 0x331   : > { %v8988_v17 = vpop.f32.mrf.mxu0  ;;  %4090 = vmatmul.mubr.f32.gmra.mxu0 %v6282_v44  ;;  %v8991_v37 = vpop.f32.mrf.mxu1  ;;  %11314 = vst [vmem:[#allocation121_spill] sm:$0xff] %v9005_v63  ;;  %v6300_v63 = vld [vmem:[%s6532_s22 + $0x1f0] sm:$0xff] }
 0x332   : > { %11311 = vst [vmem:[#allocation17_spill] sm:$0xff] %v8988_v17  ;;  %4095 = vmatprep.mubr.f32.mxu0 %v6283_v53  ;;  %v6287_v53 = vld [vmem:[%s6532_s22 + $0x568] sm:$0xff] }
 0x333   : > { %v8994_v52 = vpop.f32.mrf.mxu0  ;;  %v8996_v9 = vpop.f32.mrf.mxu1  ;;  %4359 = vmatmul.mubr.f32.gmra.mxu1 %v6284_v11  ;;  %v6288_v11 = vld [vmem:[%s6532_s22 + $0x190] sm:$0xff] }
 0x334   : > { %11312 = vst [vmem:[#allocation56_spill] sm:$0xff] %v8994_v52  ;;  %4364 = vmatprep.mubr.f32.mxu1 %v6285_v14  ;;  %v6289_v14 = vld [vmem:[%s6532_s22 + $0x1b8] sm:$0xff] }
 0x335   : > { %v9000_v0 = vpop.f32.mrf.mxu0  ;;  %4096 = vmatmul.mubr.f32.gmra.mxu0 %v6286_v22  ;;  %v9003_v44 = vpop.f32.mrf.mxu1  ;;  %v6290_v22 = vld [vmem:[%s6532_s22 + $0x560] sm:$0xff] }
 0x336   : > { %11313 = vst [vmem:[#allocation57_spill] sm:$0xff] %v9000_v0  ;;  %4101 = vmatprep.mubr.f32.mxu0 %v6287_v53 }
 0x337   : > { %v9008_v7 = vpop.f32.mrf.mxu0  ;;  %v9010_v51 = vpop.f32.mrf.mxu1  ;;  %4365 = vmatmul.mubr.f32.gmra.mxu1 %v6288_v11 }
 0x338   : > { %11315 = vst [vmem:[#allocation122_spill] sm:$0xff] %v9008_v7  ;;  %4370 = vmatprep.mubr.f32.mxu1 %v6289_v14  ;;  %v9025_v11 = vpop.permute.xlu1 %2863  ;;  %v6293_v14 = vld [vmem:[%s6532_s22 + $0x1d8] sm:$0xff]  ;;  %v6296_v7 = vld [vmem:[%s6532_s22 + $0x1d0] sm:$0xff] }
 0x339   : > { %v9014_v50 = vpop.f32.mrf.mxu0  ;;  %4102 = vmatmul.mubr.f32.gmra.mxu0 %v6290_v22  ;;  %v9017_v42 = vpop.f32.mrf.mxu1  ;;  %11318 = vst [vmem:[#allocation125_spill] sm:$0xff] %v9025_v11  ;;  %v6294_v22 = vld [vmem:[%s6532_s22 + $0x580] sm:$0xff] }
 0x33a   : > { %11316 = vst [vmem:[#allocation123_spill] sm:$0xff] %v9014_v50  ;;  %4107 = vmatprep.mubr.f32.mxu0 %v6291_v27  ;;  %v6295_v27 = vld [vmem:[%s6532_s22 + $0x5a8] sm:$0xff] }
 0x33b   : > { %v9020_v53 = vpop.f32.mrf.mxu0  ;;  %v9022_v57 = vpop.f32.mrf.mxu1  ;;  %4371 = vmatmul.mubr.f32.gmra.mxu1 %v6292_v41  ;;  %v6297_v41 = vld [vmem:[%s6532_s22 + $0x1f8] sm:$0xff] }
 0x33c   : > { %11317 = vst [vmem:[#allocation124_spill] sm:$0xff] %v9020_v53  ;;  %4376 = vmatprep.mubr.f32.mxu1 %v6293_v14  ;;  %v6298_v14 = vld [vmem:[%s6532_s22 + $0x5a0] sm:$0xff]  ;;  %v9039_v50 = vpop.permute.xlu1 %2858 }
 0x33d   : > { %v9028_v4 = vpop.f32.mrf.mxu0  ;;  %4108 = vmatmul.mubr.f32.gmra.mxu0 %v6294_v22  ;;  %v3572_v29 = vpop.f32.mrf.mxu1  ;;  %11322 = vst [vmem:[#allocation129_spill] sm:$0xff] %v9039_v50  ;;  %v6299_v22 = vld [vmem:[%s6532_s22 + $0x5c8] sm:$0xff] }
 0x33e   : > { %11319 = vst [vmem:[#allocation126_spill] sm:$0xff] %v9028_v4  ;;  %4113 = vmatprep.mubr.f32.mxu0 %v6295_v27  ;;  %v11323_v27 = vld [vmem:[#allocation31_spill] sm:$0xff] }
 0x33f   : > { %v9032_v52 = vpop.f32.mrf.mxu0  ;;  %v3576_v17 = vpop.f32.mrf.mxu1  ;;  %4377 = vmatmul.mubr.f32.gmra.mxu1 %v6296_v7  ;;  %v11324_v4 = vld [vmem:[#allocation55_spill] sm:$0xff] }
 0x340   : > { %11320 = vst [vmem:[#allocation127_spill] sm:$0xff] %v9032_v52  ;;  %4382 = vmatprep.mubr.f32.mxu1 %v6297_v41  ;;  %v3134_v52 = vadd.f32 %v11324_v4, %v11323_v27  ;;  %v11326_v41 = vld [vmem:[#allocation69_spill] sm:$0xff] }
 0x341   : > { %v9036_v0 = vpop.f32.mrf.mxu0  ;;  %4114 = vmatmul.mubr.f32.gmra.mxu0 %v6298_v14  ;;  %v3578_v53 = vpop.f32.mrf.mxu1  ;;  %v3136_v14 = vadd.f32 %v11328_v19, %v11323_v27  ;;  %v11332_v27 = vld [vmem:[#allocation66_spill] sm:$0xff] }
 0x342   : > { %11321 = vst [vmem:[#allocation128_spill] sm:$0xff] %v9036_v0  ;;  %4119 = vmatprep.mubr.f32.mxu0 %v6299_v22  ;;  %v3130_v0 = vadd.f32 %v11327_v30, %v11326_v41  ;;  %v6302_v22 = vld [vmem:[%s6532_s22 + $0x5c0] sm:$0xff] }
 0x343   : > { %v9044_v11 = vpop.f32.mrf.mxu0  ;;  %v3582_v7 = vpop.f32.mrf.mxu1  ;;  %4383 = vmatmul.mubr.f32.gmra.mxu1 %v6300_v63  ;;  %v11331_v63 = vld [vmem:[#allocation30_spill] sm:$0xff] }
 0x344   : > { %11325 = vst [vmem:[#allocation55_spill] sm:$0xff] %v9044_v11  ;;  %4388 = vmatprep.mubr.f32.mxu1 %v6301_v6  ;;  %v3583_v4 = vadd.f32 %v3582_v7, %v3134_v52  ;;  %v11330_v11 = vld [vmem:[#allocation92_spill] sm:$0xff]  ;;  %v3140_v24 = vadd.f32 %v11331_v63, %v8940_v55  ;;  %v3579_v30 = vadd.f32 %v3578_v53, %v3130_v0  ;;  %v11333_v6 = vld [vmem:[#allocation94_spill] sm:$0xff]  ;;  %v11337_v63 = vld [vmem:[#allocation35_spill] sm:$0xff] }
 0x345   : > { %v9052_v50 = vpop.f32.mrf.mxu0  ;;  %4120 = vmatmul.mubr.f32.gmra.mxu0 %v6302_v22  ;;  %v3584_v23 = vpop.f32.mrf.mxu1  ;;  %v3128_v49 = vadd.f32 %v11330_v11, %v11326_v41  ;;  %v3122_v43 = vadd.f32 %v11333_v6, %v11332_v27  ;;  %v6304_v7 = vld [vmem:[%s6532_s22 + $0x210] sm:$0xff]  ;;  %v3142_v0 = vadd.f32 %v11337_v63, %v8940_v55  ;;  %v11338_v6 = vld [vmem:[#allocation62_spill] sm:$0xff]  ;;  %v6307_v63 = vld [vmem:[%s6532_s22 + $0x608] sm:$0xff] }
 0x346   : > { %11329 = vst [vmem:[#allocation90_spill] sm:$0xff] %v9052_v50  ;;  %4125 = vmatprep.mubr.f32.mxu0 %v6303_v16  ;;  %v3585_v19 = vadd.f32 %v3584_v23, %v3136_v14  ;;  %v11334_v50 = vld [vmem:[#allocation59_spill] sm:$0xff]  ;;  %v9067_v11 = vpop.permute.xlu1 %2853  ;;  %v6305_v14 = vld [vmem:[%s6532_s22 + $0x238] sm:$0xff]  ;;  %v11340_v41 = vld [vmem:[#allocation60_spill] sm:$0xff] }
 0x347   : > { %v3124_v36 = vadd.f32 %v11334_v50, %v11332_v27  ;;  %v9064_v22 = vpop.f32.mrf.mxu0  ;;  %v3588_v52 = vpop.f32.mrf.mxu1  ;;  %4389 = vmatmul.mubr.f32.gmra.mxu1 %v6304_v7  ;;  %11336 = vst [vmem:[#allocation92_spill] sm:$0xff] %v9067_v11  ;;  %v3577_v53 = vadd.f32 %v3576_v17, %v3128_v49  ;;  %v11339_v50 = vld [vmem:[#allocation61_spill] sm:$0xff]  ;;  %v4801_v11 = vmax.f32 %v3583_v4, 0.0  ;;  %v11341_v49 = vld [vmem:[#allocation11_spill] sm:$0xff] }
 0x348   : > { %11335 = vst [vmem:[#allocation28_spill] sm:$0xff] %v9064_v22  ;;  %v4802_v16 = vmax.f32 %v3585_v19, 0.0  ;;  %v9071_v23 = vadd.f32 %v3588_v52, %v3140_v24  ;;  %4394 = vmatprep.mubr.f32.mxu1 %v6305_v14  ;;  %v3116_v27 = vadd.f32 %v11339_v50, %v11338_v6  ;;  %v3118_v22 = vadd.f32 %v11340_v41, %v11338_v6  ;;  %v11344_v4 = vld [vmem:[#allocation63_spill] sm:$0xff] }
 0x349   : > { %v3573_v40 = vadd.f32 %v3572_v29, %v3124_v36  ;;  %v9078_v7 = vpop.f32.mrf.mxu0  ;;  %4126 = vmatmul.mubr.f32.gmra.mxu0 %v6306_v8  ;;  %v3590_v17 = vpop.f32.mrf.mxu1  ;;  %v3146_v24 = vadd.f32 %v11341_v49, %v8914_v60  ;;  %v3571_v19 = vadd.f32 %v9022_v57, %v3122_v43  ;;  %v4798_v52 = vmax.f32 %v3579_v30, 0.0  ;;  %v11342_v36 = vld [vmem:[#allocation102_spill] sm:$0xff]  ;;  %v11343_v29 = vld [vmem:[#allocation64_spill] sm:$0xff]  ;;  %v11345_v57 = vld [vmem:[#allocation43_spill] sm:$0xff] }
 0x34a   : > { %4131 = vmatprep.mubr.f32.mxu0 %v6307_v63  ;;  %v9085_v14 = vadd.f32 %v3590_v17, %v3142_v0  ;;  %4985 = vmatprep.subr.mxu0 %v4802_v16  ;;  %v3110_v41 = vadd.f32 %v11343_v29, %v11342_v36  ;;  %v3112_v50 = vadd.f32 %v11344_v4, %v11342_v36  ;;  %v6308_v43 = vld [vmem:[%s6532_s22 + $0x230] sm:$0xff]  ;;  %v4797_v16 = vmax.f32 %v3577_v53, 0.0  ;;  %v6309_v63 = vld [vmem:[%s6532_s22 + $0x258] sm:$0xff] }
 0x34b   : > { %v3567_v8 = vadd.f32 %v9017_v42, %v3118_v22  ;;  %v9092_v6 = vpop.f32.mrf.mxu0  ;;  %v3594_v49 = vpop.f32.mrf.mxu1  ;;  %4395 = vmatmul.mubr.f32.gmra.mxu1 %v6308_v43  ;;  %4986 = vmatpush2.msra.mxu0 %v4801_v11  ;;  %v3148_v30 = vadd.f32 %v11345_v57, %v8914_v60  ;;  %v3565_v0 = vadd.f32 %v9010_v51, %v3116_v27  ;;  %v11346_v42 = vld [vmem:[#allocation106_spill] sm:$0xff]  ;;  %v11347_v22 = vld [vmem:[#allocation67_spill] sm:$0xff]  ;;  %v11348_v4 = vld [vmem:[#allocation65_spill] sm:$0xff]  ;;  %v4794_v43 = vmax.f32 %v3573_v40, 0.0 }
 0x34c   : > { %v9098_v17 = vadd.f32 %v3594_v49, %v3146_v24  ;;  %4987 = vmatprep.subr.mxu0 %v4798_v52  ;;  %4400 = vmatprep.mubr.f32.mxu1 %v6309_v63  ;;  %v3104_v29 = vadd.f32 %v11347_v22, %v11346_v42  ;;  %v3106_v36 = vadd.f32 %v11348_v4, %v11346_v42  ;;  %v6310_v57 = vld [vmem:[%s6532_s22 + $0x600] sm:$0xff]  ;;  %v9109_v27 = vpop.permute.xlu1 %2848  ;;  %v11350_v53 = vld [vmem:[#allocation48_spill] sm:$0xff]  ;;  %v4793_v49 = vmax.f32 %v3571_v19, 0.0  ;;  %v6311_v63 = vld [vmem:[%s6532_s22 + $0x628] sm:$0xff] }
 0x34d   : > { %v3561_v11 = vadd.f32 %v9003_v44, %v3112_v50  ;;  %v9106_v55 = vpop.f32.mrf.mxu0  ;;  %4132 = vmatmul.mubr.f32.gmra.mxu0 %v6310_v57  ;;  %v3596_v51 = vpop.f32.mrf.mxu1  ;;  %11349 = vst [vmem:[#allocation30_spill] sm:$0xff] %v9109_v27  ;;  %v3152_v24 = vadd.f32 %v11350_v53, %v8886_v39  ;;  %v3559_v52 = vadd.f32 %v8996_v9, %v3110_v41  ;;  %v11351_v40 = vld [vmem:[#allocation34_spill] sm:$0xff]  ;;  %v11352_v44 = vld [vmem:[#allocation68_spill] sm:$0xff]  ;;  %v11353_v4 = vld [vmem:[#allocation41_spill] sm:$0xff]  ;;  %v4790_v60 = vmax.f32 %v3567_v8, 0.0 }
 0x34e   : > { %4137 = vmatprep.mubr.f32.mxu0 %v6311_v63  ;;  %v9115_v22 = vadd.f32 %v3596_v51, %v3148_v30  ;;  %4988 = vmatpush2.msra.mxu0 %v4797_v16  ;;  %v3098_v50 = vadd.f32 %v11352_v44, %v11351_v40  ;;  %v3100_v57 = vadd.f32 %v11353_v4, %v11351_v40  ;;  %v6312_v19 = vld [vmem:[%s6532_s22 + $0x250] sm:$0xff]  ;;  %v11354_v41 = vld [vmem:[#allocation53_spill] sm:$0xff]  ;;  %v4789_v51 = vmax.f32 %v3565_v0, 0.0 }
 0x34f   : > { %v3555_v42 = vadd.f32 %v8991_v37, %v3106_v36  ;;  %v9122_v27 = vpop.f32.mrf.mxu0  ;;  %4989 = vmatprep.subr.mxu0 %v4794_v43  ;;  %v3600_v9 = vpop.f32.mrf.mxu1  ;;  %4401 = vmatmul.mubr.f32.gmra.mxu1 %v6312_v19  ;;  %v3154_v30 = vadd.f32 %v11354_v41, %v8886_v39  ;;  %v3553_v16 = vadd.f32 %v8982_v28, %v3104_v29  ;;  %v6313_v63 = vld [vmem:[%s6532_s22 + $0x278] sm:$0xff]  ;;  %v11355_v37 = vld [vmem:[#allocation44_spill] sm:$0xff]  ;;  %v11356_v36 = vld [vmem:[#allocation70_spill] sm:$0xff]  ;;  %v4786_v19 = vmax.f32 %v3561_v11, 0.0 }
 0x350   : > { %v9128_v53 = vadd.f32 %v3600_v9, %v3152_v24  ;;  %4990 = vmatpush2.msra.mxu0 %v4793_v49  ;;  %4406 = vmatprep.mubr.f32.mxu1 %v6313_v63  ;;  %v3092_v8 = vadd.f32 %v11356_v36, %v11355_v37  ;;  %v11357_v43 = vld [vmem:[#allocation36_spill] sm:$0xff]  ;;  %v3549_v4 = vadd.f32 %v8977_v61, %v3100_v57  ;;  %v6314_v41 = vld [vmem:[%s6532_s22 + $0x620] sm:$0xff]  ;;  %v4785_v49 = vmax.f32 %v3559_v52, 0.0  ;;  %v6315_v9 = vld [vmem:[%s6532_s22 + $0x648] sm:$0xff] }
 0x351   : > { %v3094_v44 = vadd.f32 %v11357_v43, %v11355_v37  ;;  %v9136_v40 = vpop.f32.mrf.mxu0  ;;  %4138 = vmatmul.mubr.f32.gmra.mxu0 %v6314_v41  ;;  %4991 = vmatprep.subr.mxu0 %v4790_v60  ;;  %v3602_v28 = vpop.f32.mrf.mxu1  ;;  %v11358_v0 = vld [vmem:[#allocation108_spill] sm:$0xff]  ;;  %v3547_v24 = vadd.f32 %v8970_v21, %v3098_v50  ;;  %v11359_v61 = vld [vmem:[#allocation107_spill] sm:$0xff]  ;;  %v4782_v41 = vmax.f32 %v3555_v42, 0.0  ;;  %v11365_v42 = vld [vmem:[#allocation98_spill] sm:$0xff] }
 0x352   : > { %v3158_v29 = vadd.f32 %v11358_v0, %v8844_v47  ;;  %4143 = vmatprep.mubr.f32.mxu0 %v6315_v9  ;;  %v9143_v63 = vadd.f32 %v3602_v28, %v3154_v30  ;;  %4992 = vmatpush2.msra.mxu0 %v4789_v51  ;;  %v11360_v11 = vld [vmem:[#allocation72_spill] sm:$0xff]  ;;  %v11361_v36 = vld [vmem:[#allocation71_spill] sm:$0xff]  ;;  %v9153_v50 = vpop.permute.xlu1 %2843  ;;  %v3541_v28 = vadd.f32 %v8955_v54, %v3092_v8  ;;  %v4781_v0 = vmax.f32 %v3553_v16, 0.0  ;;  %v11369_v16 = vld [vmem:[#allocation101_spill] sm:$0xff] }
 0x353   : > { %v3086_v57 = vadd.f32 %v11360_v11, %v11359_v61  ;;  %v3088_v60 = vadd.f32 %v11361_v36, %v11359_v61  ;;  %v3543_v43 = vadd.f32 %v8963_v1, %v3094_v44  ;;  %v9150_v37 = vpop.f32.mrf.mxu0  ;;  %4993 = vmatprep.subr.mxu0 %v4786_v19  ;;  %v3606_v21 = vpop.f32.mrf.mxu1  ;;  %v6316_v52 = vld [vmem:[%s6532_s22 + $0x270] sm:$0xff]  ;;  %11363 = vst [vmem:[#allocation59_spill] sm:$0xff] %v9153_v50  ;;  %v6317_v1 = vld [vmem:[%s6532_s22 + $0x298] sm:$0xff]  ;;  %v11366_v44 = vld [vmem:[#allocation26_spill] sm:$0xff]  ;;  %v4778_v61 = vmax.f32 %v3549_v4, 0.0 }
 0x354   : > { %11362 = vst [vmem:[#allocation94_spill] sm:$0xff] %v9150_v37  ;;  %4407 = vmatmul.mubr.f32.gmra.mxu1 %v6316_v52  ;;  %v11364_v30 = vld [vmem:[#allocation104_spill] sm:$0xff]  ;;  %v9158_v9 = vadd.f32 %v3606_v21, %v3158_v29  ;;  %4994 = vmatpush2.msra.mxu0 %v4785_v49  ;;  %v3080_v19 = vadd.f32 %v11366_v44, %v11365_v42  ;;  %v11367_v11 = vld [vmem:[#allocation73_spill] sm:$0xff]  ;;  %v4777_v49 = vmax.f32 %v3547_v24, 0.0  ;;  %v6319_v21 = vld [vmem:[%s6532_s22 + $0x668] sm:$0xff] }
 0x355   : > { %v3160_v51 = vadd.f32 %v11364_v30, %v8844_v47  ;;  %4412 = vmatprep.mubr.f32.mxu1 %v6317_v1  ;;  %v3082_v36 = vadd.f32 %v11367_v11, %v11365_v42  ;;  %v3537_v52 = vadd.f32 %v8948_v46, %v3088_v60  ;;  %v9166_v39 = vpop.f32.mrf.mxu0  ;;  %v6318_v30 = vld [vmem:[%s6532_s22 + $0x640] sm:$0xff]  ;;  %4995 = vmatprep.subr.mxu0 %v4782_v41  ;;  %v3608_v54 = vpop.f32.mrf.mxu1  ;;  %v11370_v46 = vld [vmem:[#allocation75_spill] sm:$0xff]  ;;  %v4774_v44 = vmax.f32 %v3543_v43, 0.0  ;;  %v11409_v50 = vld [vmem:[#allocation112_spill] sm:$0xff] }
 0x356   : > { %11368 = vst [vmem:[#allocation35_spill] sm:$0xff] %v9166_v39  ;;  %4144 = vmatmul.mubr.f32.gmra.mxu0 %v6318_v30  ;;  %v3164_v8 = vadd.f32 %v11369_v16, %v8800_v12  ;;  %v3535_v29 = vadd.f32 %v8937_v58, %v3086_v57  ;;  %v3076_v4 = vadd.f32 %v11370_v46, %v11283_v48  ;;  %v6320_v30 = vld [vmem:[%s6532_s22 + $0x290] sm:$0xff]  ;;  %v11372_v58 = vld [vmem:[#allocation51_spill] sm:$0xff] }
 0x357   : > { %4149 = vmatprep.mubr.f32.mxu0 %v6319_v21  ;;  %v9173_v1 = vadd.f32 %v3608_v54, %v3160_v51  ;;  %4996 = vmatpush2.msra.mxu0 %v4781_v0  ;;  %v3531_v60 = vadd.f32 %v8930_v18, %v3082_v36  ;;  %v9178_v41 = vpop.f32.mrf.mxu0  ;;  %v3612_v11 = vpop.f32.mrf.mxu1  ;;  %v3166_v24 = vadd.f32 %v11372_v58, %v8800_v12  ;;  %v4773_v51 = vmax.f32 %v3541_v28, 0.0  ;;  %v6321_v54 = vld [vmem:[%s6532_s22 + $0x2b8] sm:$0xff]  ;;  %v6351_v47 = vld [vmem:[%s6532_s22 + $0x768] sm:$0xff] }
 0x358   : > { %11371 = vst [vmem:[#allocation61_spill] sm:$0xff] %v9178_v41  ;;  %4997 = vmatprep.subr.mxu0 %v4778_v61  ;;  %4413 = vmatmul.mubr.f32.gmra.mxu1 %v6320_v30  ;;  %v3529_v57 = vadd.f32 %v8921_v33, %v3080_v19  ;;  %v9184_v0 = vadd.f32 %v3612_v11, %v3164_v8  ;;  %v4770_v43 = vmax.f32 %v3537_v52, 0.0  ;;  %v6322_v61 = vld [vmem:[%s6532_s22 + $0x660] sm:$0xff]  ;;  %v9191_v21 = vpop.permute.xlu1 %2838  ;;  %v4769_v19 = vmax.f32 %v3535_v29, 0.0  ;;  %v6323_v8 = vld [vmem:[%s6532_s22 + $0x688] sm:$0xff]  ;;  %v6325_v30 = vld [vmem:[%s6532_s22 + $0x2d8] sm:$0xff] }
 0x359   : > { %4998 = vmatpush2.msra.mxu0 %v4777_v49  ;;  %4418 = vmatprep.mubr.f32.mxu1 %v6321_v54  ;;  %v3525_v18 = vadd.f32 %v8912_v45, %v3076_v4  ;;  %v9188_v36 = vpop.f32.mrf.mxu0  ;;  %v3614_v16 = vpop.f32.mrf.mxu1  ;;  %11374 = vst [vmem:[#allocation11_spill] sm:$0xff] %v9191_v21  ;;  %v11375_v33 = vld [vmem:[#allocation54_spill] sm:$0xff]  ;;  %v4766_v45 = vmax.f32 %v3531_v60, 0.0  ;;  %v6324_v4 = vld [vmem:[%s6532_s22 + $0x2b0] sm:$0xff]  ;;  %v6327_v54 = vld [vmem:[%s6532_s22 + $0x6a8] sm:$0xff] }
 0x35a   : > { %11373 = vst [vmem:[#allocation60_spill] sm:$0xff] %v9188_v36  ;;  %4150 = vmatmul.mubr.f32.gmra.mxu0 %v6322_v61  ;;  %4999 = vmatprep.subr.mxu0 %v4774_v44  ;;  %v3170_v28 = vadd.f32 %v11375_v33, %v8760_v35  ;;  %v9196_v49 = vadd.f32 %v3614_v16, %v3166_v24  ;;  %v4765_v44 = vmax.f32 %v3529_v57, 0.0  ;;  %v6326_v24 = vld [vmem:[%s6532_s22 + $0x680] sm:$0xff]  ;;  %v4758_v57 = vmax.f32 %v8901_v5, 0.0  ;;  %v6328_v61 = vld [vmem:[%s6532_s22 + $0x2d0] sm:$0xff]  ;;  %v6367_v36 = vld [vmem:[%s6532_s22 + $0x7e8] sm:$0xff] }
 0x35b   : > { %4155 = vmatprep.mubr.f32.mxu0 %v6323_v8  ;;  %5000 = vmatpush2.msra.mxu0 %v4773_v51  ;;  %v9198_v52 = vpop.f32.mrf.mxu0  ;;  %v3618_v46 = vpop.f32.mrf.mxu1  ;;  %v4762_v29 = vmax.f32 %v3525_v18, 0.0  ;;  %v4761_v51 = vmax.f32 %v8906_v59, 0.0  ;;  %v4757_v33 = vmax.f32 %v8891_v15, 0.0  ;;  %v6329_v59 = vld [vmem:[%s6532_s22 + $0x2f8] sm:$0xff]  ;;  %v6330_v5 = vld [vmem:[%s6532_s22 + $0x6a0] sm:$0xff]  ;;  %v4750_v15 = vmax.f32 %v8850_v38, 0.0 }
 0x35c   : > { %11376 = vst [vmem:[#allocation64_spill] sm:$0xff] %v9198_v52  ;;  %5001 = vmatprep.subr.mxu0 %v4770_v43  ;;  %4419 = vmatmul.mubr.f32.gmra.mxu1 %v6324_v4  ;;  %v9201_v11 = vadd.f32 %v3618_v46, %v3170_v28  ;;  %v9217_v16 = vpop.permute.xlu1 %2833  ;;  %v4754_v28 = vmax.f32 %v8878_v56, 0.0  ;;  %v6331_v46 = vld [vmem:[%s6532_s22 + $0x6c8] sm:$0xff]  ;;  %v11410_v41 = vld [vmem:[#allocation113_spill] sm:$0xff] }
 0x35d   : > { %5002 = vmatpush2.msra.mxu0 %v4769_v19  ;;  %4424 = vmatprep.mubr.f32.mxu1 %v6325_v30  ;;  %v9204_v58 = vpop.f32.mrf.mxu0  ;;  %v9207_v60 = vpop.f32.mrf.mxu1  ;;  %11379 = vst [vmem:[#allocation67_spill] sm:$0xff] %v9217_v16  ;;  %v4749_v30 = vmax.f32 %v8833_v25, 0.0  ;;  %v6335_v25 = vld [vmem:[%s6532_s22 + $0x6e8] sm:$0xff] }
 0x35e   : > { %11377 = vst [vmem:[#allocation63_spill] sm:$0xff] %v9204_v58  ;;  %4156 = vmatmul.mubr.f32.gmra.mxu0 %v6326_v24  ;;  %5003 = vmatprep.subr.mxu0 %v4766_v45  ;;  %v4753_v45 = vmax.f32 %v8863_v20, 0.0  ;;  %v4746_v20 = vmax.f32 %v8820_v31, 0.0 }
 0x35f   : > { %4161 = vmatprep.mubr.f32.mxu0 %v6327_v54  ;;  %5004 = vmatpush2.msra.mxu0 %v4765_v44  ;;  %v9212_v43 = vpop.f32.mrf.mxu0  ;;  %v9214_v18 = vpop.f32.mrf.mxu1  ;;  %v6332_v44 = vld [vmem:[%s6532_s22 + $0x2f0] sm:$0xff] }
 0x360   : > { %11378 = vst [vmem:[#allocation43_spill] sm:$0xff] %v9212_v43  ;;  %5005 = vmatprep.subr.mxu0 %v4762_v29  ;;  %4425 = vmatmul.mubr.f32.gmra.mxu1 %v6328_v61  ;;  %v6333_v29 = vld [vmem:[%s6532_s22 + $0x318] sm:$0xff]  ;;  %v9243_v54 = vpop.permute.xlu1 %2828  ;;  %v4742_v61 = vmax.f32 %v8790_v26, 0.0  ;;  %v6364_v43 = vld [vmem:[%s6532_s22 + $0x3f0] sm:$0xff] }
 0x361   : > { %5006 = vmatpush2.msra.mxu0 %v4761_v51  ;;  %4430 = vmatprep.mubr.f32.mxu1 %v6329_v59  ;;  %v9222_v19 = vpop.f32.mrf.mxu0  ;;  %v9225_v8 = vpop.f32.mrf.mxu1  ;;  %v6334_v51 = vld [vmem:[%s6532_s22 + $0x6c0] sm:$0xff]  ;;  %11383 = vst [vmem:[#allocation41_spill] sm:$0xff] %v9243_v54  ;;  %v6336_v59 = vld [vmem:[%s6532_s22 + $0x310] sm:$0xff] }
 0x362   : > { %11380 = vst [vmem:[#allocation65_spill] sm:$0xff] %v9222_v19  ;;  %4162 = vmatmul.mubr.f32.gmra.mxu0 %v6330_v5  ;;  %5007 = vmatprep.subr.mxu0 %v4758_v57  ;;  %v4745_v57 = vmax.f32 %v8805_v3, 0.0  ;;  %v6337_v5 = vld [vmem:[%s6532_s22 + $0x338] sm:$0xff] }
 0x363   : > { %4167 = vmatprep.mubr.f32.mxu0 %v6331_v46  ;;  %5008 = vmatpush2.msra.mxu0 %v4757_v33  ;;  %v9230_v4 = vpop.f32.mrf.mxu0  ;;  %v9232_v56 = vpop.f32.mrf.mxu1  ;;  %v6339_v46 = vld [vmem:[%s6532_s22 + $0x708] sm:$0xff] }
 0x364   : > { %11381 = vst [vmem:[#allocation48_spill] sm:$0xff] %v9230_v4  ;;  %5009 = vmatprep.subr.mxu0 %v4754_v28  ;;  %4431 = vmatmul.mubr.f32.gmra.mxu1 %v6332_v44  ;;  %v4741_v28 = vmax.f32 %v8776_v2, 0.0  ;;  %v6340_v44 = vld [vmem:[%s6532_s22 + $0x330] sm:$0xff] }
 0x365   : > { %5010 = vmatpush2.msra.mxu0 %v4753_v45  ;;  %4436 = vmatprep.mubr.f32.mxu1 %v6333_v29  ;;  %v9238_v24 = vpop.f32.mrf.mxu0  ;;  %v9241_v38 = vpop.f32.mrf.mxu1  ;;  %v6338_v45 = vld [vmem:[%s6532_s22 + $0x6e0] sm:$0xff]  ;;  %v6341_v29 = vld [vmem:[%s6532_s22 + $0x358] sm:$0xff] }
 0x366   : > { %11382 = vst [vmem:[#allocation68_spill] sm:$0xff] %v9238_v24  ;;  %4168 = vmatmul.mubr.f32.gmra.mxu0 %v6334_v51  ;;  %5011 = vmatprep.subr.mxu0 %v4750_v15  ;;  %v6342_v51 = vld [vmem:[%s6532_s22 + $0x700] sm:$0xff]  ;;  %v6352_v24 = vld [vmem:[%s6532_s22 + $0x390] sm:$0xff] }
 0x367   : > { %4173 = vmatprep.mubr.f32.mxu0 %v6335_v25  ;;  %5012 = vmatpush2.msra.mxu0 %v4749_v30  ;;  %v9248_v31 = vpop.f32.mrf.mxu0  ;;  %v9250_v33 = vpop.f32.mrf.mxu1  ;;  %v6343_v25 = vld [vmem:[%s6532_s22 + $0x728] sm:$0xff] }
 0x368   : > { %11384 = vst [vmem:[#allocation53_spill] sm:$0xff] %v9248_v31  ;;  %5013 = vmatprep.subr.mxu0 %v4746_v20  ;;  %4437 = vmatmul.mubr.f32.gmra.mxu1 %v6336_v59  ;;  %v9266_v30 = vpop.permute.xlu1 %2823 }
 0x369   : > { %5014 = vmatpush2.msra.mxu0 %v4745_v57  ;;  %4442 = vmatprep.mubr.f32.mxu1 %v6337_v5  ;;  %v9255_v3 = vpop.f32.mrf.mxu0  ;;  %v9258_v26 = vpop.f32.mrf.mxu1  ;;  %11387 = vst [vmem:[#allocation108_spill] sm:$0xff] %v9266_v30  ;;  %v6345_v5 = vld [vmem:[%s6532_s22 + $0x378] sm:$0xff] }
 0x36a   : > { %11385 = vst [vmem:[#allocation70_spill] sm:$0xff] %v9255_v3  ;;  %4174 = vmatmul.mubr.f32.gmra.mxu0 %v6338_v45  ;;  %5015 = vmatprep.subr.mxu0 %v4742_v61 }
 0x36b   : > { %4179 = vmatprep.mubr.f32.mxu0 %v6339_v46  ;;  %5016 = vmatpush2.msra.mxu0 %v4741_v28  ;;  %v9261_v15 = vpop.f32.mrf.mxu0  ;;  %v9263_v2 = vpop.f32.mrf.mxu1  ;;  %v6344_v28 = vld [vmem:[%s6532_s22 + $0x350] sm:$0xff]  ;;  %v6346_v46 = vld [vmem:[%s6532_s22 + $0x720] sm:$0xff] }
 0x36c   : > { %11386 = vst [vmem:[#allocation36_spill] sm:$0xff] %v9261_v15  ;;  %4443 = vmatmul.mubr.f32.gmra.mxu1 %v6340_v44  ;;  %v6357_v15 = vld [vmem:[%s6532_s22 + $0x3d8] sm:$0xff] }
 0x36d   : > { %4448 = vmatprep.mubr.f32.mxu1 %v6341_v29  ;;  %v9269_v20 = vpop.f32.mrf.mxu0  ;;  %v9272_v57 = vpop.f32.mrf.mxu1 }
 0x36e   : > { %11388 = vst [vmem:[#allocation72_spill] sm:$0xff] %v9269_v20  ;;  %4180 = vmatmul.mubr.f32.gmra.mxu0 %v6342_v51  ;;  %v9286_v29 = vpop.permute.xlu1 %2818  ;;  %v6347_v51 = vld [vmem:[%s6532_s22 + $0x748] sm:$0xff] }
 0x36f   : > { %4185 = vmatprep.mubr.f32.mxu0 %v6343_v25  ;;  %v9275_v61 = vpop.f32.mrf.mxu0  ;;  %v9277_v59 = vpop.f32.mrf.mxu1  ;;  %11391 = vst [vmem:[#allocation26_spill] sm:$0xff] %v9286_v29 }
 0x370   : > { %11389 = vst [vmem:[#allocation71_spill] sm:$0xff] %v9275_v61  ;;  %4449 = vmatmul.mubr.f32.gmra.mxu1 %v6344_v28  ;;  %v6348_v28 = vld [vmem:[%s6532_s22 + $0x370] sm:$0xff] }
 0x371   : > { %4454 = vmatprep.mubr.f32.mxu1 %v6345_v5  ;;  %v9281_v45 = vpop.f32.mrf.mxu0  ;;  %v9284_v44 = vpop.f32.mrf.mxu1  ;;  %v6349_v5 = vld [vmem:[%s6532_s22 + $0x398] sm:$0xff] }
 0x372   : > { %11390 = vst [vmem:[#allocation104_spill] sm:$0xff] %v9281_v45  ;;  %4186 = vmatmul.mubr.f32.gmra.mxu0 %v6346_v46  ;;  %v6350_v46 = vld [vmem:[%s6532_s22 + $0x740] sm:$0xff] }
 0x373   : > { %4191 = vmatprep.mubr.f32.mxu0 %v6347_v51  ;;  %v9289_v25 = vpop.f32.mrf.mxu0  ;;  %v9291_v12 = vpop.f32.mrf.mxu1  ;;  %v6358_v45 = vld [vmem:[%s6532_s22 + $0x780] sm:$0xff] }
 0x374   : > { %11392 = vst [vmem:[#allocation73_spill] sm:$0xff] %v9289_v25  ;;  %4455 = vmatmul.mubr.f32.gmra.mxu1 %v6348_v28  ;;  %v9306_v28 = vpop.permute.xlu1 %2813 }
 0x375   : > { %4460 = vmatprep.mubr.f32.mxu1 %v6349_v5  ;;  %v9295_v48 = vpop.f32.mrf.mxu0  ;;  %v9298_v42 = vpop.f32.mrf.mxu1  ;;  %11395 = vst [vmem:[#allocation51_spill] sm:$0xff] %v9306_v28  ;;  %v6353_v5 = vld [vmem:[%s6532_s22 + $0x3b8] sm:$0xff] }
 0x376   : > { %11393 = vst [vmem:[#allocation101_spill] sm:$0xff] %v9295_v48  ;;  %4192 = vmatmul.mubr.f32.gmra.mxu0 %v6350_v46  ;;  %v6354_v46 = vld [vmem:[%s6532_s22 + $0x760] sm:$0xff] }
 0x377   : > { %4197 = vmatprep.mubr.f32.mxu0 %v6351_v47  ;;  %v9301_v51 = vpop.f32.mrf.mxu0  ;;  %v9303_v19 = vpop.f32.mrf.mxu1  ;;  %v6355_v47 = vld [vmem:[%s6532_s22 + $0x788] sm:$0xff] }
 0x378   : > { %11394 = vst [vmem:[#allocation75_spill] sm:$0xff] %v9301_v51  ;;  %4461 = vmatmul.mubr.f32.gmra.mxu1 %v6352_v24  ;;  %v6356_v24 = vld [vmem:[%s6532_s22 + $0x3b0] sm:$0xff]  ;;  %v9324_v61 = vpop.permute.xlu1 %2808 }
 0x379   : > { %4466 = vmatprep.mubr.f32.mxu1 %v6353_v5  ;;  %v9309_v4 = vpop.f32.mrf.mxu0  ;;  %v9312_v3 = vpop.f32.mrf.mxu1  ;;  %11399 = vst [vmem:[#allocation132_spill] sm:$0xff] %v9324_v61  ;;  %v6360_v51 = vld [vmem:[%s6532_s22 + $0x3d0] sm:$0xff] }
 0x37a   : > { %11396 = vst [vmem:[#allocation54_spill] sm:$0xff] %v9309_v4  ;;  %4198 = vmatmul.mubr.f32.gmra.mxu0 %v6354_v46  ;;  %v6362_v4 = vld [vmem:[%s6532_s22 + $0x7a0] sm:$0xff] }
 0x37b   : > { %4203 = vmatprep.mubr.f32.mxu0 %v6355_v47  ;;  %v9315_v31 = vpop.f32.mrf.mxu0  ;;  %v9317_v20 = vpop.f32.mrf.mxu1  ;;  %v6359_v47 = vld [vmem:[%s6532_s22 + $0x7a8] sm:$0xff] }
 0x37c   : > { %11397 = vst [vmem:[#allocation130_spill] sm:$0xff] %v9315_v31  ;;  %4467 = vmatmul.mubr.f32.gmra.mxu1 %v6356_v24  ;;  %v6361_v24 = vld [vmem:[%s6532_s22 + $0x3f8] sm:$0xff]  ;;  %v6363_v31 = vld [vmem:[%s6532_s22 + $0x7c8] sm:$0xff] }
 0x37d   : > { %4472 = vmatprep.mubr.f32.mxu1 %v6357_v15  ;;  %v9321_v5 = vpop.f32.mrf.mxu0  ;;  %v3668_v46 = vpop.f32.mrf.mxu1 }
 0x37e   : > { %11398 = vst [vmem:[#allocation131_spill] sm:$0xff] %v9321_v5  ;;  %4204 = vmatmul.mubr.f32.gmra.mxu0 %v6358_v45 }
 0x37f   : > { %4209 = vmatprep.mubr.f32.mxu0 %v6359_v47  ;;  %v9327_v25 = vpop.f32.mrf.mxu0  ;;  %v3672_v48 = vpop.f32.mrf.mxu1 }
 0x380   : > { %11400 = vst [vmem:[#allocation133_spill] sm:$0xff] %v9327_v25  ;;  %4473 = vmatmul.mubr.f32.gmra.mxu1 %v6360_v51  ;;  %v9338_v25 = vpop.permute.xlu1 %2803  ;;  %v11404_v51 = vld [vmem:[#allocation88_spill] sm:$0xff] }
 0x381   : > { %4478 = vmatprep.mubr.f32.mxu1 %v6361_v24  ;;  %v9331_v15 = vpop.f32.mrf.mxu0  ;;  %v3674_v45 = vpop.f32.mrf.mxu1  ;;  %11403 = vst [vmem:[#allocation136_spill] sm:$0xff] %v9338_v25  ;;  %v3230_v58 = vadd.f32 %v8783_v32, %v11404_v51  ;;  %v3232_v24 = vadd.f32 %v8797_v10, %v11404_v51  ;;  %v3236_v32 = vadd.f32 %v8813_v62, %v9338_v25  ;;  %v11408_v51 = vld [vmem:[#allocation49_spill] sm:$0xff] }
 0x382   : > { %11401 = vst [vmem:[#allocation134_spill] sm:$0xff] %v9331_v15  ;;  %4210 = vmatmul.mubr.f32.gmra.mxu0 %v6362_v4  ;;  %v6365_v15 = vld [vmem:[%s6532_s22 + $0x418] sm:$0xff]  ;;  %v11405_v4 = vld [vmem:[#allocation38_spill] sm:$0xff]  ;;  %v3238_v62 = vadd.f32 %v8827_v13, %v9338_v25 }
 0x383   : > { %4215 = vmatprep.mubr.f32.mxu0 %v6363_v31  ;;  %v9335_v5 = vpop.f32.mrf.mxu0  ;;  %v3678_v47 = vpop.f32.mrf.mxu1  ;;  %v3226_v16 = vadd.f32 %v8771_v34, %v11405_v4  ;;  %v3218_v34 = vadd.f32 %v11409_v50, %v11408_v51  ;;  %v11412_v50 = vld [vmem:[#allocation103_spill] sm:$0xff]  ;;  %v11415_v13 = vld [vmem:[#allocation118_spill] sm:$0xff] }
 0x384   : > { %11402 = vst [vmem:[#allocation135_spill] sm:$0xff] %v9335_v5  ;;  %4479 = vmatmul.mubr.f32.gmra.mxu1 %v6364_v43  ;;  %v6366_v5 = vld [vmem:[%s6532_s22 + $0x7c0] sm:$0xff]  ;;  %v11407_v43 = vld [vmem:[#allocation115_spill] sm:$0xff]  ;;  %v3679_v10 = vadd.f32 %v3678_v47, %v3230_v58  ;;  %v11413_v47 = vld [vmem:[#allocation24_spill] sm:$0xff] }
 0x385   : > { %4484 = vmatprep.mubr.f32.mxu1 %v6365_v15  ;;  %v9347_v31 = vpop.f32.mrf.mxu0  ;;  %v3680_v52 = vpop.f32.mrf.mxu1  ;;  %v3224_v21 = vadd.f32 %v11407_v43, %v11405_v4  ;;  %v6368_v43 = vld [vmem:[%s6532_s22 + $0x410] sm:$0xff] }
 0x386   : > { %11406 = vst [vmem:[#allocation137_spill] sm:$0xff] %v9347_v31  ;;  %4216 = vmatmul.mubr.f32.gmra.mxu0 %v6366_v5  ;;  %v3681_v15 = vadd.f32 %v3680_v52, %v3232_v24  ;;  %v3220_v31 = vadd.f32 %v11410_v41, %v11408_v51  ;;  %v3675_v5 = vadd.f32 %v3674_v45, %v3226_v16  ;;  %v6369_v52 = vld [vmem:[%s6532_s22 + $0x438] sm:$0xff]  ;;  %v11414_v41 = vld [vmem:[#allocation110_spill] sm:$0xff] }
 0x387   : > { %4221 = vmatprep.mubr.f32.mxu0 %v6367_v36  ;;  %v9359_v39 = vpop.f32.mrf.mxu0  ;;  %v3684_v37 = vpop.f32.mrf.mxu1  ;;  %v3673_v4 = vadd.f32 %v3672_v48, %v3224_v21  ;;  %v3212_v24 = vadd.f32 %v11413_v47, %v11412_v50  ;;  %v3214_v16 = vadd.f32 %v11414_v41, %v11412_v50  ;;  %v3242_v48 = vadd.f32 %v11415_v13, %v9324_v61  ;;  %v6371_v13 = vld [vmem:[%s6532_s22 + $0x430] sm:$0xff] }
 0x388   : > { %11411 = vst [vmem:[#allocation115_spill] sm:$0xff] %v9359_v39  ;;  %4485 = vmatmul.mubr.f32.gmra.mxu1 %v6368_v43  ;;  %v4866_v36 = vmax.f32 %v3681_v15, 0.0  ;;  %v9364_v58 = vadd.f32 %v3684_v37, %v3236_v32  ;;  %v3669_v45 = vadd.f32 %v3668_v46, %v3220_v31  ;;  %v6370_v43 = vld [vmem:[%s6532_s22 + $0x7e0] sm:$0xff]  ;;  %v3667_v37 = vadd.f32 %v9317_v20, %v3218_v34  ;;  %v11416_v15 = vld [vmem:[#allocation96_spill] sm:$0xff]  ;;  %v11418_v46 = vld [vmem:[#allocation27_spill] sm:$0xff] }
 0x389   : > { %4490 = vmatprep.mubr.f32.mxu1 %v6369_v52  ;;  %v9371_v51 = vpop.f32.mrf.mxu0  ;;  %v3686_v39 = vpop.f32.mrf.mxu1  ;;  %v4865_v21 = vmax.f32 %v3679_v10, 0.0  ;;  %v11417_v52 = vld [vmem:[#allocation32_spill] sm:$0xff]  ;;  %v3208_v31 = vadd.f32 %v11418_v46, %v11416_v15  ;;  %v3663_v41 = vadd.f32 %v9312_v3, %v3214_v16  ;;  %v4861_v34 = vmax.f32 %v3673_v4, 0.0  ;;  %v11422_v46 = vld [vmem:[#allocation37_spill] sm:$0xff] }
 0x38a   : > { %4222 = vmatmul.mubr.f32.gmra.mxu0 %v6370_v43  ;;  %v9377_v32 = vadd.f32 %v3686_v39, %v3238_v62  ;;  %5048 = vmatprep.subr.mxu1 %v4866_v36  ;;  %v3206_v47 = vadd.f32 %v11417_v52, %v11416_v15  ;;  %v4862_v43 = vmax.f32 %v3675_v5, 0.0  ;;  %v11420_v20 = vld [vmem:[#allocation120_spill] sm:$0xff]  ;;  %v3661_v39 = vadd.f32 %v9303_v19, %v3212_v24  ;;  %v6372_v36 = vld [vmem:[%s6532_s22 + $0x458] sm:$0xff]  ;;  %v11423_v5 = vld [vmem:[#allocation18_spill] sm:$0xff] }
 0x38b   : > { %v9384_v50 = vpop.f32.mrf.mxu0  ;;  %v3690_v25 = vpop.f32.mrf.mxu1  ;;  %v3244_v10 = vadd.f32 %v11420_v20, %v9324_v61  ;;  %5049 = vmatpush1.msra.mxu1 %v4865_v21  ;;  %v11421_v52 = vld [vmem:[#allocation25_spill] sm:$0xff]  ;;  %v3657_v15 = vadd.f32 %v9298_v42, %v3208_v31  ;;  %v11425_v20 = vld [vmem:[#allocation47_spill] sm:$0xff]  ;;  %v11427_v42 = vld [vmem:[#allocation14_spill] sm:$0xff] }
 0x38c   : > { %11419 = vst [vmem:[#allocation112_spill] sm:$0xff] %v9384_v50  ;;  %4491 = vmatmul.mubr.f32.gmra.mxu1 %v6371_v13  ;;  %v9390_v62 = vadd.f32 %v3690_v25, %v3242_v48  ;;  %v3200_v3 = vadd.f32 %v11422_v46, %v11421_v52  ;;  %v3202_v16 = vadd.f32 %v11423_v5, %v11421_v52  ;;  %v4858_v13 = vmax.f32 %v3669_v45, 0.0  ;;  %v11424_v25 = vld [vmem:[#allocation3_spill] sm:$0xff] }
 0x38d   : > { %4496 = vmatprep.mubr.f32.mxu1 %v6372_v36  ;;  %v9398_v50 = vpop.f32.mrf.mxu0  ;;  %5050 = vmatprep.subr.mxu1 %v4862_v43  ;;  %v3692_v19 = vpop.f32.mrf.mxu1  ;;  %v3248_v4 = vadd.f32 %v11424_v25, %v9306_v28  ;;  %v3655_v24 = vadd.f32 %v9291_v12, %v3206_v47  ;;  %v4857_v48 = vmax.f32 %v3667_v37, 0.0  ;;  %v11426_v36 = vld [vmem:[#allocation13_spill] sm:$0xff]  ;;  %v3196_v45 = vadd.f32 %v11427_v42, %v11425_v20  ;;  %v6373_v12 = vld [vmem:[%s6532_s22 + $0x450] sm:$0xff]  ;;  %v11429_v37 = vld [vmem:[#allocation58_spill] sm:$0xff] }
 0x38e   : > { %v9403_v21 = vadd.f32 %v3692_v19, %v3244_v10  ;;  %5051 = vmatpush1.msra.mxu1 %v4861_v34  ;;  %v3194_v46 = vadd.f32 %v11426_v36, %v11425_v20  ;;  %v3651_v31 = vadd.f32 %v9284_v44, %v3202_v16  ;;  %v4854_v43 = vmax.f32 %v3663_v41, 0.0  ;;  %v6374_v36 = vld [vmem:[%s6532_s22 + $0x478] sm:$0xff]  ;;  %v9420_v44 = vld [vmem:[%s6547_s18 + $0x8] sm:$0xff]  ;;  %v11432_v42 = vld [vmem:[#allocation10_spill] sm:$0xff] }
 0x38f   : > { %v9410_v5 = vpop.f32.mrf.mxu0  ;;  %5052 = vmatprep.subr.mxu1 %v4858_v13  ;;  %v3696_v25 = vpop.f32.mrf.mxu1  ;;  %v3250_v47 = vadd.f32 %v11429_v37, %v9306_v28  ;;  %v3649_v10 = vadd.f32 %v9277_v59, %v3200_v3  ;;  %v4853_v34 = vmax.f32 %v3661_v39, 0.0  ;;  %v11430_v41 = vld [vmem:[#allocation15_spill] sm:$0xff]  ;;  %v11431_v16 = vld [vmem:[#allocation9_spill] sm:$0xff]  ;;  %v3645_v20 = vadd.f32 %v9272_v57, %v3196_v45  ;;  %5017 = vmatprep.mubr.f32.mxu0 %v9420_v44  ;;  %v4933_v39 = vld [vmem:[%s6547_s18] sm:$0xff] }
 0x390   : > { %11428 = vst [vmem:[#allocation113_spill] sm:$0xff] %v9410_v5  ;;  %4497 = vmatmul.mubr.f32.gmra.mxu1 %v6373_v12  ;;  %v9416_v19 = vadd.f32 %v3696_v25, %v3248_v4  ;;  %v3188_v13 = vadd.f32 %v11431_v16, %v11430_v41  ;;  %v3190_v12 = vadd.f32 %v11432_v42, %v11430_v41  ;;  %v4850_v37 = vmax.f32 %v3657_v15, 0.0  ;;  %v11433_v3 = vld [vmem:[#allocation16_spill] sm:$0xff]  ;;  %v11435_v15 = vld [vmem:[#allocation23_spill] sm:$0xff] }
 0x391   : > { %5053 = vmatpush1.msra.mxu1 %v4857_v48  ;;  %4502 = vmatprep.mubr.f32.mxu1 %v6374_v36  ;;  %v9427_v28 = vpop.f32.mrf.mxu0  ;;  %v3698_v59 = vpop.f32.mrf.mxu1  ;;  %v3254_v4 = vadd.f32 %v11433_v3, %v9286_v29  ;;  %v3643_v48 = vadd.f32 %v9263_v2, %v3194_v46  ;;  %v4849_v25 = vmax.f32 %v3655_v24, 0.0  ;;  %v11434_v57 = vld [vmem:[#allocation20_spill] sm:$0xff]  ;;  %v4846_v41 = vmax.f32 %v3651_v31, 0.0  ;;  %v11438_v24 = vld [vmem:[#allocation95_spill] sm:$0xff] }
 0x392   : > { %5054 = vmatprep.subr.mxu1 %v4854_v43  ;;  %v9434_v36 = vadd.f32 %v3698_v59, %v3250_v47  ;;  %5018 = vmatmul.mubr.f32.vlgmr.msra.gmra.mxu0 %v4933_v39  ;;  %v3182_v45 = vadd.f32 %v11435_v15, %v11434_v57  ;;  %v11436_v43 = vld [vmem:[#allocation52_spill] sm:$0xff]  ;;  %v3639_v42 = vadd.f32 %v9258_v26, %v3190_v12  ;;  %v6376_v39 = vld [vmem:[%s6532_s22 + $0x498] sm:$0xff]  ;;  %v11439_v15 = vld [vmem:[#allocation111_spill] sm:$0xff] }
 0x393   : > { %5055 = vmatpush1.msra.mxu1 %v4853_v34  ;;  %v3184_v16 = vadd.f32 %v11436_v43, %v11434_v57  ;;  %v9441_v52 = vpop.f32.mrf.mxu0  ;;  %v3702_v3 = vpop.f32.mrf.mxu1  ;;  %v6375_v2 = vld [vmem:[%s6532_s22 + $0x470] sm:$0xff]  ;;  %v3256_v46 = vadd.f32 %v11438_v24, %v9286_v29  ;;  %v3637_v47 = vadd.f32 %v9250_v33, %v3188_v13  ;;  %v4845_v34 = vmax.f32 %v3649_v10, 0.0  ;;  %v11440_v26 = vld [vmem:[#allocation93_spill] sm:$0xff]  ;;  %v11442_v10 = vld [vmem:[#allocation2_spill] sm:$0xff] }
 0x394   : > { %11437 = vst [vmem:[#allocation24_spill] sm:$0xff] %v9441_v52  ;;  %5056 = vmatprep.subr.mxu1 %v4850_v37  ;;  %4503 = vmatmul.mubr.f32.gmra.mxu1 %v6375_v2  ;;  %v9447_v59 = vadd.f32 %v3702_v3, %v3254_v4  ;;  %v3176_v31 = vadd.f32 %v11440_v26, %v11439_v15  ;;  %v11441_v12 = vld [vmem:[#allocation89_spill] sm:$0xff]  ;;  %v4842_v2 = vmax.f32 %v3645_v20, 0.0  ;;  %v11443_v24 = vld [vmem:[#allocation12_spill] sm:$0xff]  ;;  %v4838_v20 = vmax.f32 %v3639_v42, 0.0 }
 0x395   : > { %5057 = vmatpush1.msra.mxu1 %v4849_v25  ;;  %4508 = vmatprep.mubr.f32.mxu1 %v6376_v39  ;;  %v3178_v37 = vadd.f32 %v11441_v12, %v11439_v15  ;;  %v3633_v43 = vadd.f32 %v9241_v38, %v3184_v16  ;;  %v9455_v57 = vpop.f32.mrf.mxu0  ;;  %v3704_v33 = vpop.f32.mrf.mxu1  ;;  %v3260_v13 = vadd.f32 %v11442_v10, %v9266_v30  ;;  %v4841_v25 = vmax.f32 %v3643_v48, 0.0  ;;  %v6377_v26 = vld [vmem:[%s6532_s22 + $0x490] sm:$0xff]  ;;  %v6396_v29 = vld [vmem:[%s6532_s22 + $0x5d8] sm:$0xff] }
 0x396   : > { %5058 = vmatprep.subr.mxu1 %v4846_v41  ;;  %v3631_v4 = vadd.f32 %v9232_v56, %v3182_v45  ;;  %v9460_v3 = vadd.f32 %v3704_v33, %v3256_v46  ;;  %v3172_v39 = vadd.f32 %v11443_v24, %v8760_v35  ;;  %v11444_v12 = vld [vmem:[#allocation76_spill] sm:$0xff]  ;;  %v3625_v48 = vadd.f32 %v9214_v18, %v3176_v31  ;;  %v11445_v33 = vld [vmem:[#allocation99_spill] sm:$0xff] }
 0x397   : > { %5059 = vmatpush1.msra.mxu1 %v4845_v34  ;;  %v3627_v38 = vadd.f32 %v9225_v8, %v3178_v37  ;;  %v9465_v16 = vpop.f32.mrf.mxu0  ;;  %v3708_v41 = vpop.f32.mrf.mxu1  ;;  %v3262_v56 = vadd.f32 %v11444_v12, %v9266_v30  ;;  %v4837_v45 = vmax.f32 %v3637_v47, 0.0  ;;  %v6378_v34 = vld [vmem:[%s6532_s22 + $0x4b8] sm:$0xff]  ;;  %v4834_v42 = vmax.f32 %v3633_v43, 0.0  ;;  %v6395_v15 = vld [vmem:[%s6532_s22 + $0x5b0] sm:$0xff] }
 0x398   : > { %5060 = vmatprep.subr.mxu1 %v4842_v2  ;;  %4509 = vmatmul.mubr.f32.gmra.mxu1 %v6377_v26  ;;  %v9471_v46 = vadd.f32 %v3708_v41, %v3260_v13  ;;  %v3621_v8 = vadd.f32 %v9207_v60, %v3172_v39  ;;  %v3266_v10 = vadd.f32 %v11445_v33, %v9243_v54  ;;  %v4833_v24 = vmax.f32 %v3631_v4, 0.0  ;;  %v6380_v39 = vld [vmem:[%s6532_s22 + $0x4d8] sm:$0xff] }
 0x399   : > { %5061 = vmatpush1.msra.mxu1 %v4841_v25  ;;  %4514 = vmatprep.mubr.f32.mxu1 %v6378_v34  ;;  %v9475_v37 = vpop.f32.mrf.mxu0  ;;  %v3710_v2 = vpop.f32.mrf.mxu1  ;;  %v4830_v47 = vmax.f32 %v3627_v38, 0.0  ;;  %v6379_v25 = vld [vmem:[%s6532_s22 + $0x4b0] sm:$0xff]  ;;  %v4829_v60 = vmax.f32 %v3625_v48, 0.0  ;;  %v4825_v38 = vmax.f32 %v9201_v11, 0.0  ;;  %v4822_v26 = vmax.f32 %v9196_v49, 0.0  ;;  %v6382_v34 = vld [vmem:[%s6532_s22 + $0x4f8] sm:$0xff] }
 0x39a   : > { %5062 = vmatprep.subr.mxu1 %v4838_v20  ;;  %v9479_v18 = vadd.f32 %v3710_v2, %v3262_v56  ;;  %v4826_v20 = vmax.f32 %v3621_v8, 0.0  ;;  %v6381_v48 = vld [vmem:[%s6532_s22 + $0x4d0] sm:$0xff]  ;;  %v4818_v8 = vmax.f32 %v9173_v1, 0.0  ;;  %v4814_v2 = vmax.f32 %v9143_v63, 0.0 }
 0x39b   : > { %5063 = vmatpush1.msra.mxu1 %v4837_v45  ;;  %v9481_v31 = vpop.f32.mrf.mxu0  ;;  %v3714_v13 = vpop.f32.mrf.mxu1  ;;  %v4821_v45 = vmax.f32 %v9184_v0, 0.0  ;;  %v4813_v1 = vmax.f32 %v9128_v53, 0.0 }
 0x39c   : > { %5064 = vmatprep.subr.mxu1 %v4834_v42  ;;  %4515 = vmatmul.mubr.f32.gmra.mxu1 %v6379_v25  ;;  %v9484_v43 = vadd.f32 %v3714_v13, %v3266_v10  ;;  %v4817_v42 = vmax.f32 %v9158_v9, 0.0  ;;  %v6383_v10 = vld [vmem:[%s6532_s22 + $0x4f0] sm:$0xff]  ;;  %v4809_v13 = vmax.f32 %v9098_v17, 0.0  ;;  %v4806_v25 = vmax.f32 %v9085_v14, 0.0 }
 0x39d   : > { %5065 = vmatpush1.msra.mxu1 %v4833_v24  ;;  %4520 = vmatprep.mubr.f32.mxu1 %v6380_v39  ;;  %v9487_v4 = vpop.f32.mrf.mxu0  ;;  %v9489_v41 = vpop.f32.mrf.mxu1  ;;  %v6384_v24 = vld [vmem:[%s6532_s22 + $0x518] sm:$0xff]  ;;  %v6385_v39 = vld [vmem:[%s6532_s22 + $0x510] sm:$0xff] }
 0x39e   : > { %11446 = vst [vmem:[#allocation110_spill] sm:$0xff] %v9487_v4  ;;  %5066 = vmatprep.subr.mxu1 %v4830_v47  ;;  %v4810_v47 = vmax.f32 %v9115_v22, 0.0  ;;  %v4805_v22 = vmax.f32 %v9071_v23, 0.0 }
 0x39f   : > { %5067 = vmatpush1.msra.mxu1 %v4829_v60  ;;  %v9493_v12 = vpop.f32.mrf.mxu0  ;;  %v9495_v56 = vpop.f32.mrf.mxu1 }
 0x3a0   : > { %11447 = vst [vmem:[#allocation118_spill] sm:$0xff] %v9493_v12  ;;  %5068 = vmatprep.subr.mxu1 %v4826_v20  ;;  %4521 = vmatmul.mubr.f32.gmra.mxu1 %v6381_v48  ;;  %v6386_v20 = vld [vmem:[%s6532_s22 + $0x538] sm:$0xff]  ;;  %v6387_v48 = vld [vmem:[%s6532_s22 + $0x530] sm:$0xff] }
 0x3a1   : > { %5069 = vmatpush1.msra.mxu1 %v4825_v38  ;;  %4526 = vmatprep.mubr.f32.mxu1 %v6382_v34  ;;  %v9501_v11 = vpop.f32.mrf.mxu0  ;;  %v9503_v49 = vpop.f32.mrf.mxu1  ;;  %v6401_v12 = vld [vmem:[%s6532_s22 + $0x610] sm:$0xff] }
 0x3a2   : > { %11448 = vst [vmem:[#allocation32_spill] sm:$0xff] %v9501_v11  ;;  %5070 = vmatprep.subr.mxu1 %v4822_v26  ;;  %v6397_v11 = vld [vmem:[%s6532_s22 + $0x5d0] sm:$0xff] }
 0x3a3   : > { %5071 = vmatpush1.msra.mxu1 %v4821_v45  ;;  %v9507_v33 = vpop.f32.mrf.mxu0  ;;  %v9509_v0 = vpop.f32.mrf.mxu1  ;;  %v6388_v45 = vld [vmem:[%s6532_s22 + $0x558] sm:$0xff] }
 0x3a4   : > { %11449 = vst [vmem:[#allocation27_spill] sm:$0xff] %v9507_v33  ;;  %5072 = vmatprep.subr.mxu1 %v4818_v8  ;;  %4527 = vmatmul.mubr.f32.gmra.mxu1 %v6383_v10  ;;  %v6390_v10 = vld [vmem:[%s6532_s22 + $0x578] sm:$0xff] }
 0x3a5   : > { %5073 = vmatpush1.msra.mxu1 %v4817_v42  ;;  %4532 = vmatprep.mubr.f32.mxu1 %v6384_v24  ;;  %v9515_v9 = vpop.f32.mrf.mxu0  ;;  %v9517_v63 = vpop.f32.mrf.mxu1 }
 0x3a6   : > { %11450 = vst [vmem:[#allocation120_spill] sm:$0xff] %v9515_v9  ;;  %5074 = vmatprep.subr.mxu1 %v4814_v2  ;;  %v6389_v2 = vld [vmem:[%s6532_s22 + $0x550] sm:$0xff] }
 0x3a7   : > { %5075 = vmatpush1.msra.mxu1 %v4813_v1  ;;  %v9521_v60 = vpop.f32.mrf.mxu0  ;;  %v9523_v53 = vpop.f32.mrf.mxu1 }
 0x3a8   : > { %11451 = vst [vmem:[#allocation37_spill] sm:$0xff] %v9521_v60  ;;  %5076 = vmatprep.subr.mxu1 %v4810_v47  ;;  %4533 = vmatmul.mubr.f32.gmra.mxu1 %v6385_v39  ;;  %v6392_v39 = vld [vmem:[%s6532_s22 + $0x598] sm:$0xff] }
 0x3a9   : > { %5077 = vmatpush1.msra.mxu1 %v4809_v13  ;;  %4538 = vmatprep.mubr.f32.mxu1 %v6386_v20  ;;  %v9528_v38 = vpop.f32.mrf.mxu0  ;;  %v9530_v14 = vpop.f32.mrf.mxu1 }
 0x3aa   : > { %11452 = vst [vmem:[#allocation18_spill] sm:$0xff] %v9528_v38  ;;  %5078 = vmatprep.subr.mxu1 %v4806_v25  ;;  %v6391_v25 = vld [vmem:[%s6532_s22 + $0x570] sm:$0xff] }
 0x3ab   : > { %5079 = vmatpush1.msra.mxu1 %v4805_v22  ;;  %v9532_v17 = vpop.f32.mrf.mxu0  ;;  %v9534_v26 = vpop.f32.mrf.mxu1 }
 0x3ac   : > { %11453 = vst [vmem:[#allocation3_spill] sm:$0xff] %v9532_v17  ;;  %4539 = vmatmul.mubr.f32.gmra.mxu1 %v6387_v48 }
 0x3ad   : > { %4544 = vmatprep.mubr.f32.mxu1 %v6388_v45  ;;  %v9538_v23 = vpop.f32.mrf.mxu0  ;;  %v9540_v34 = vpop.f32.mrf.mxu1 }
 0x3ae   : > { %11454 = vst [vmem:[#allocation13_spill] sm:$0xff] %v9538_v23 }
 0x3af   : > { %v9542_v8 = vpop.f32.mrf.mxu0  ;;  %v9544_v42 = vpop.f32.mrf.mxu1 }
 0x3b0   : > { %11455 = vst [vmem:[#allocation14_spill] sm:$0xff] %v9542_v8  ;;  %4545 = vmatmul.mubr.f32.gmra.mxu1 %v6389_v2  ;;  %v6393_v2 = vld [vmem:[%s6532_s22 + $0x590] sm:$0xff] }
 0x3b1   : > { %4550 = vmatprep.mubr.f32.mxu1 %v6390_v10  ;;  %v9548_v1 = vpop.f32.mrf.mxu0  ;;  %v9550_v24 = vpop.f32.mrf.mxu1  ;;  %v6394_v10 = vld [vmem:[%s6532_s22 + $0x5b8] sm:$0xff]  ;;  %v11468_v8 = vld [vmem:[#allocation28_spill] sm:$0xff] }
 0x3b2   : > { %11456 = vst [vmem:[#allocation58_spill] sm:$0xff] %v9548_v1  ;;  %v6400_v1 = vld [vmem:[%s6532_s22 + $0x618] sm:$0xff] }
 0x3b3   : > { %v9552_v47 = vpop.f32.mrf.mxu0  ;;  %v9554_v13 = vpop.f32.mrf.mxu1 }
 0x3b4   : > { %11457 = vst [vmem:[#allocation9_spill] sm:$0xff] %v9552_v47  ;;  %4551 = vmatmul.mubr.f32.gmra.mxu1 %v6391_v25 }
 0x3b5   : > { %4556 = vmatprep.mubr.f32.mxu1 %v6392_v39  ;;  %v9558_v22 = vpop.f32.mrf.mxu0  ;;  %v9560_v20 = vpop.f32.mrf.mxu1 }
 0x3b6   : > { %11458 = vst [vmem:[#allocation10_spill] sm:$0xff] %v9558_v22 }
 0x3b7   : > { %v9562_v48 = vpop.f32.mrf.mxu0  ;;  %v9564_v45 = vpop.f32.mrf.mxu1 }
 0x3b8   : > { %11459 = vst [vmem:[#allocation16_spill] sm:$0xff] %v9562_v48  ;;  %4557 = vmatmul.mubr.f32.gmra.mxu1 %v6393_v2 }
 0x3b9   : > { %4562 = vmatprep.mubr.f32.mxu1 %v6394_v10  ;;  %v9568_v30 = vpop.f32.mrf.mxu0  ;;  %v3758_v25 = vpop.f32.mrf.mxu1  ;;  %v6398_v10 = vld [vmem:[%s6532_s22 + $0x5f8] sm:$0xff] }
 0x3ba   : > { %11460 = vst [vmem:[#allocation23_spill] sm:$0xff] %v9568_v30  ;;  %v11470_v30 = vld [vmem:[#allocation90_spill] sm:$0xff] }
 0x3bb   : > { %v9570_v35 = vpop.f32.mrf.mxu0  ;;  %v3762_v39 = vpop.f32.mrf.mxu1 }
 0x3bc   : > { %11461 = vst [vmem:[#allocation52_spill] sm:$0xff] %v9570_v35  ;;  %4563 = vmatmul.mubr.f32.gmra.mxu1 %v6395_v15  ;;  %v6399_v15 = vld [vmem:[%s6532_s22 + $0x5f0] sm:$0xff] }
 0x3bd   : > { %4568 = vmatprep.mubr.f32.mxu1 %v6396_v29  ;;  %v9574_v61 = vpop.f32.mrf.mxu0  ;;  %v3764_v5 = vpop.f32.mrf.mxu1  ;;  %v11466_v29 = vld [vmem:[#allocation50_spill] sm:$0xff] }
 0x3be   : > { %11462 = vst [vmem:[#allocation95_spill] sm:$0xff] %v9574_v61  ;;  %v3326_v23 = vadd.f32 %v9078_v7, %v11466_v29  ;;  %v3328_v17 = vadd.f32 %v9092_v6, %v11466_v29 }
 0x3bf   : > { %v9576_v52 = vpop.f32.mrf.mxu0  ;;  %v3768_v2 = vpop.f32.mrf.mxu1 }
 0x3c0   : > { %11463 = vst [vmem:[#allocation93_spill] sm:$0xff] %v9576_v52  ;;  %4569 = vmatmul.mubr.f32.gmra.mxu1 %v6397_v11  ;;  %v11467_v11 = vld [vmem:[#allocation33_spill] sm:$0xff]  ;;  %v11473_v52 = vld [vmem:[#allocation128_spill] sm:$0xff] }
 0x3c1   : > { %4574 = vmatprep.mubr.f32.mxu1 %v6398_v10  ;;  %v9580_v9 = vpop.f32.mrf.mxu0  ;;  %v3770_v33 = vpop.f32.mrf.mxu1  ;;  %v3322_v10 = vadd.f32 %v11468_v8, %v11467_v11  ;;  %v3320_v48 = vadd.f32 %v11470_v30, %v11467_v11 }
 0x3c2   : > { %11464 = vst [vmem:[#allocation89_spill] sm:$0xff] %v9580_v9  ;;  %v11472_v9 = vld [vmem:[#allocation121_spill] sm:$0xff] }
 0x3c3   : > { %v9582_v38 = vpop.f32.mrf.mxu0  ;;  %v3774_v60 = vpop.f32.mrf.mxu1  ;;  %v3314_v6 = vadd.f32 %v11473_v52, %v11472_v9  ;;  %v3769_v11 = vadd.f32 %v3768_v2, %v3320_v48  ;;  %v11477_v52 = vld [vmem:[#allocation126_spill] sm:$0xff]  ;;  %v11481_v2 = vld [vmem:[#allocation123_spill] sm:$0xff] }
 0x3c4   : > { %11465 = vst [vmem:[#allocation2_spill] sm:$0xff] %v9582_v38  ;;  %4575 = vmatmul.mubr.f32.gmra.mxu1 %v6399_v15  ;;  %v11471_v15 = vld [vmem:[#allocation74_spill] sm:$0xff]  ;;  %v3775_v7 = vadd.f32 %v3774_v60, %v3326_v23  ;;  %v3771_v38 = vadd.f32 %v3770_v33, %v3322_v10  ;;  %v6402_v60 = vld [vmem:[%s6532_s22 + $0x638] sm:$0xff] }
 0x3c5   : > { %4580 = vmatprep.mubr.f32.mxu1 %v6400_v1  ;;  %v9592_v22 = vpop.f32.mrf.mxu0  ;;  %v3776_v47 = vpop.f32.mrf.mxu1  ;;  %v3846_v61 = vadd.f32 %v9106_v55, %v11471_v15  ;;  %v11474_v1 = vld [vmem:[#allocation55_spill] sm:$0xff]  ;;  %v3848_v30 = vadd.f32 %v9122_v27, %v11471_v15  ;;  %v3763_v48 = vadd.f32 %v3762_v39, %v3314_v6  ;;  %v4925_v6 = vmax.f32 %v3769_v11, 0.0 }
 0x3c6   : > { %11469 = vst [vmem:[#allocation12_spill] sm:$0xff] %v9592_v22  ;;  %v3777_v35 = vadd.f32 %v3776_v47, %v3328_v17  ;;  %v3316_v29 = vadd.f32 %v11474_v1, %v11472_v9  ;;  %v11476_v17 = vld [vmem:[#allocation125_spill] sm:$0xff]  ;;  %v11478_v47 = vld [vmem:[#allocation127_spill] sm:$0xff] }
 0x3c7   : > { %v9602_v8 = vpop.f32.mrf.mxu0  ;;  %v4294_v22 = vpop.f32.mrf.mxu1  ;;  %v3308_v23 = vadd.f32 %v11477_v52, %v11476_v17  ;;  %v3310_v33 = vadd.f32 %v11478_v47, %v11476_v17  ;;  %v11479_v9 = vld [vmem:[#allocation77_spill] sm:$0xff]  ;;  %v11488_v11 = vld [vmem:[#allocation35_spill] sm:$0xff] }
 0x3c8   : > { %11475 = vst [vmem:[#allocation76_spill] sm:$0xff] %v9602_v8  ;;  %4581 = vmatmul.mubr.f32.gmra.mxu1 %v6401_v12  ;;  %v4930_v4 = vmax.f32 %v3777_v35, 0.0  ;;  %v9607_v55 = vadd.f32 %v4294_v22, %v3846_v61  ;;  %v3765_v10 = vadd.f32 %v3764_v5, %v3316_v29  ;;  %v3852_v27 = vadd.f32 %v9136_v40, %v11479_v9  ;;  %v11480_v22 = vld [vmem:[#allocation129_spill] sm:$0xff]  ;;  %v6403_v8 = vld [vmem:[%s6532_s22 + $0x630] sm:$0xff]  ;;  %v11483_v40 = vld [vmem:[#allocation94_spill] sm:$0xff] }
 0x3c9   : > { %4586 = vmatprep.mubr.f32.mxu1 %v6402_v60  ;;  %v9614_v1 = vpop.f32.mrf.mxu0  ;;  %v4296_v12 = vpop.f32.mrf.mxu1  ;;  %v4929_v35 = vmax.f32 %v3775_v7, 0.0  ;;  %v3302_v15 = vadd.f32 %v11481_v2, %v11480_v22  ;;  %v11482_v60 = vld [vmem:[#allocation124_spill] sm:$0xff]  ;;  %v3759_v47 = vadd.f32 %v3758_v25, %v3310_v33  ;;  %v4926_v5 = vmax.f32 %v3771_v38, 0.0  ;;  %v11485_v2 = vld [vmem:[#allocation57_spill] sm:$0xff]  ;;  %v11486_v38 = vld [vmem:[#allocation122_spill] sm:$0xff] }
 0x3ca   : > { %v9618_v61 = vadd.f32 %v4296_v12, %v3848_v30  ;;  %5080 = vmatprep.subr.mxu1 %v4930_v4  ;;  %v3304_v52 = vadd.f32 %v11482_v60, %v11480_v22  ;;  %v3854_v39 = vadd.f32 %v11483_v40, %v11479_v9  ;;  %v3757_v7 = vadd.f32 %v9564_v45, %v3308_v23  ;;  %v6404_v30 = vld [vmem:[%s6532_s22 + $0x658] sm:$0xff]  ;;  %v11484_v12 = vld [vmem:[#allocation92_spill] sm:$0xff]  ;;  %v11487_v45 = vld [vmem:[#allocation78_spill] sm:$0xff] }
 0x3cb   : > { %v9624_v29 = vpop.f32.mrf.mxu0  ;;  %v4300_v17 = vpop.f32.mrf.mxu1  ;;  %5081 = vmatpush2.msra.mxu1 %v4929_v35  ;;  %v3296_v25 = vadd.f32 %v11485_v2, %v11484_v12  ;;  %v3298_v33 = vadd.f32 %v11486_v38, %v11484_v12  ;;  %v3751_v23 = vadd.f32 %v9554_v13, %v3302_v15  ;;  %v11489_v40 = vld [vmem:[#allocation30_spill] sm:$0xff]  ;;  %v6405_v12 = vld [vmem:[%s6532_s22 + $0x650] sm:$0xff]  ;;  %v11493_v13 = vld [vmem:[#allocation61_spill] sm:$0xff] }
 0x3cc   : > { %4587 = vmatmul.mubr.f32.gmra.mxu1 %v6403_v8  ;;  %v9630_v4 = vadd.f32 %v4300_v17, %v3852_v27  ;;  %v3753_v60 = vadd.f32 %v9560_v20, %v3304_v52  ;;  %v4922_v8 = vmax.f32 %v3765_v10, 0.0  ;;  %5082 = vmatprep.subr.mxu1 %v4926_v5  ;;  %v3858_v17 = vadd.f32 %v11488_v11, %v11487_v45  ;;  %v11491_v20 = vld [vmem:[#allocation56_spill] sm:$0xff] }
 0x3cd   : > { %4592 = vmatprep.mubr.f32.mxu1 %v6404_v30  ;;  %v9638_v22 = vpop.f32.mrf.mxu0  ;;  %v4302_v9 = vpop.f32.mrf.mxu1  ;;  %v4921_v27 = vmax.f32 %v3763_v48, 0.0  ;;  %5083 = vmatpush2.msra.mxu1 %v4925_v6  ;;  %v11490_v30 = vld [vmem:[#allocation17_spill] sm:$0xff]  ;;  %v3292_v10 = vadd.f32 %v11491_v20, %v11489_v40  ;;  %v3747_v52 = vadd.f32 %v9550_v24, %v3298_v33  ;;  %v4918_v5 = vmax.f32 %v3759_v47, 0.0  ;;  %v11495_v24 = vld [vmem:[#allocation40_spill] sm:$0xff]  ;;  %v11496_v33 = vld [vmem:[#allocation39_spill] sm:$0xff] }
 0x3ce   : > { %v9643_v35 = vadd.f32 %v4302_v9, %v3854_v39  ;;  %v3290_v2 = vadd.f32 %v11490_v30, %v11489_v40  ;;  %5084 = vmatprep.subr.mxu1 %v4922_v8  ;;  %v3860_v48 = vadd.f32 %v11493_v13, %v11487_v45  ;;  %v3745_v15 = vadd.f32 %v9544_v42, %v3296_v25  ;;  %v6406_v9 = vld [vmem:[%s6532_s22 + $0x678] sm:$0xff]  ;;  %v11494_v30 = vld [vmem:[#allocation59_spill] sm:$0xff]  ;;  %v11499_v25 = vld [vmem:[#allocation60_spill] sm:$0xff] }
 0x3cf   : > { %v9650_v38 = vpop.f32.mrf.mxu0  ;;  %v4306_v11 = vpop.f32.mrf.mxu1  ;;  %v4917_v39 = vmax.f32 %v3757_v7, 0.0  ;;  %5085 = vmatpush2.msra.mxu1 %v4921_v27  ;;  %v3284_v47 = vadd.f32 %v11495_v24, %v11494_v30  ;;  %v3286_v8 = vadd.f32 %v11496_v33, %v11494_v30  ;;  %v3741_v20 = vadd.f32 %v9540_v34, %v3292_v10  ;;  %v11498_v7 = vld [vmem:[#allocation79_spill] sm:$0xff]  ;;  %v11502_v34 = vld [vmem:[#allocation45_spill] sm:$0xff]  ;;  %v6407_v30 = vld [vmem:[%s6532_s22 + $0x670] sm:$0xff] }
 0x3d0   : > { %11492 = vst [vmem:[#allocation99_spill] sm:$0xff] %v9650_v38  ;;  %4593 = vmatmul.mubr.f32.gmra.mxu1 %v6405_v12  ;;  %v9656_v6 = vadd.f32 %v4306_v11, %v3858_v17  ;;  %v4914_v12 = vmax.f32 %v3753_v60, 0.0  ;;  %5086 = vmatprep.subr.mxu1 %v4918_v5  ;;  %v3864_v45 = vadd.f32 %v11499_v25, %v11498_v7  ;;  %v4913_v27 = vmax.f32 %v3751_v23, 0.0  ;;  %v11500_v13 = vld [vmem:[#allocation11_spill] sm:$0xff] }
 0x3d1   : > { %4598 = vmatprep.mubr.f32.mxu1 %v6406_v9  ;;  %v9664_v40 = vpop.f32.mrf.mxu0  ;;  %v4308_v42 = vpop.f32.mrf.mxu1  ;;  %v3739_v17 = vadd.f32 %v9534_v26, %v3290_v2  ;;  %5087 = vmatpush2.msra.mxu1 %v4917_v39  ;;  %v11501_v9 = vld [vmem:[#allocation109_spill] sm:$0xff]  ;;  %v3280_v60 = vadd.f32 %v11502_v34, %v11500_v13  ;;  %v3735_v10 = vadd.f32 %v9530_v14, %v3286_v8  ;;  %v4910_v5 = vmax.f32 %v3747_v52, 0.0  ;;  %v11504_v26 = vld [vmem:[#allocation64_spill] sm:$0xff]  ;;  %v11506_v14 = vld [vmem:[#allocation46_spill] sm:$0xff] }
 0x3d2   : > { %11497 = vst [vmem:[#allocation28_spill] sm:$0xff] %v9664_v40  ;;  %v9669_v11 = vadd.f32 %v4308_v42, %v3860_v48  ;;  %v3278_v24 = vadd.f32 %v11501_v9, %v11500_v13  ;;  %5088 = vmatprep.subr.mxu1 %v4914_v12  ;;  %v3866_v23 = vadd.f32 %v11504_v26, %v11498_v7  ;;  %v4909_v48 = vmax.f32 %v3745_v15, 0.0  ;;  %v6408_v42 = vld [vmem:[%s6532_s22 + $0x698] sm:$0xff]  ;;  %v11505_v9 = vld [vmem:[#allocation67_spill] sm:$0xff]  ;;  %v11509_v15 = vld [vmem:[#allocation80_spill] sm:$0xff] }
 0x3d3   : > { %v9676_v33 = vpop.f32.mrf.mxu0  ;;  %v4312_v25 = vpop.f32.mrf.mxu1  ;;  %v3733_v2 = vadd.f32 %v9523_v53, %v3284_v47  ;;  %5089 = vmatpush2.msra.mxu1 %v4913_v27  ;;  %v3272_v52 = vadd.f32 %v11506_v14, %v11505_v9  ;;  %v11507_v8 = vld [vmem:[#allocation105_spill] sm:$0xff]  ;;  %v3729_v34 = vadd.f32 %v9517_v63, %v3280_v60  ;;  %v11510_v47 = vld [vmem:[#allocation63_spill] sm:$0xff]  ;;  %v4905_v27 = vmax.f32 %v3739_v17, 0.0  ;;  %v11511_v26 = vld [vmem:[#allocation100_spill] sm:$0xff] }
 0x3d4   : > { %11503 = vst [vmem:[#allocation90_spill] sm:$0xff] %v9676_v33  ;;  %4599 = vmatmul.mubr.f32.gmra.mxu1 %v6407_v30  ;;  %v9682_v39 = vadd.f32 %v4312_v25, %v3864_v45  ;;  %v3274_v12 = vadd.f32 %v11507_v8, %v11505_v9  ;;  %v4906_v30 = vmax.f32 %v3741_v20, 0.0  ;;  %5090 = vmatprep.subr.mxu1 %v4910_v5  ;;  %v4902_v20 = vmax.f32 %v3735_v10, 0.0  ;;  %v6409_v14 = vld [vmem:[%s6532_s22 + $0x690] sm:$0xff]  ;;  %v11513_v8 = vld [vmem:[#allocation43_spill] sm:$0xff] }
 0x3d5   : > { %4604 = vmatprep.mubr.f32.mxu1 %v6408_v42  ;;  %v9690_v13 = vpop.f32.mrf.mxu0  ;;  %v4314_v53 = vpop.f32.mrf.mxu1  ;;  %v3870_v7 = vadd.f32 %v11510_v47, %v11509_v15  ;;  %v3727_v45 = vadd.f32 %v9509_v0, %v3278_v24  ;;  %5091 = vmatpush2.msra.mxu1 %v4909_v48  ;;  %v3268_v42 = vadd.f32 %v11511_v26, %v9243_v54  ;;  %v4901_v24 = vmax.f32 %v3733_v2, 0.0  ;;  %v6410_v48 = vld [vmem:[%s6532_s22 + $0x6b8] sm:$0xff]  ;;  %v9726_v26 = vld [vmem:[%s6547_s18 + $0x20] sm:$0xff]  ;;  %v6427_v9 = vld [vmem:[%s6532_s22 + $0x7b0] sm:$0xff] }
 0x3d6   : > { %11508 = vst [vmem:[#allocation74_spill] sm:$0xff] %v9690_v13  ;;  %v9695_v25 = vadd.f32 %v4314_v53, %v3866_v23  ;;  %v3723_v63 = vadd.f32 %v9503_v49, %v3274_v12  ;;  %5092 = vmatprep.subr.mxu1 %v4906_v30  ;;  %v3872_v0 = vadd.f32 %v11513_v8, %v11509_v15  ;;  %v4898_v10 = vmax.f32 %v3729_v34, 0.0  ;;  %v6414_v8 = vld [vmem:[%s6532_s22 + $0x6f8] sm:$0xff] }
 0x3d7   : > { %v9700_v60 = vpop.f32.mrf.mxu0  ;;  %v4318_v5 = vpop.f32.mrf.mxu1  ;;  %v3721_v17 = vadd.f32 %v9495_v56, %v3272_v52  ;;  %5093 = vmatpush2.msra.mxu1 %v4905_v27  ;;  %v3717_v49 = vadd.f32 %v9489_v41, %v3268_v42  ;;  %v4897_v30 = vmax.f32 %v3727_v45, 0.0  ;;  %v6411_v52 = vld [vmem:[%s6532_s22 + $0x6b0] sm:$0xff]  ;;  %v6412_v41 = vld [vmem:[%s6532_s22 + $0x6d8] sm:$0xff]  ;;  %v9721_v45 = vld [vmem:[%s6547_s18 + $0x28] sm:$0xff]  ;;  %v4889_v27 = vmax.f32 %v9484_v43, 0.0  ;;  %11516 = vst [vmem:[#allocation127_spill] sm:$0xff] %v9726_v26 }
 0x3d8   : > { %11512 = vst [vmem:[#allocation128_spill] sm:$0xff] %v9700_v60  ;;  %4605 = vmatmul.mubr.f32.gmra.mxu1 %v6409_v14  ;;  %v9706_v23 = vadd.f32 %v4318_v5, %v3870_v7  ;;  %5094 = vmatprep.subr.mxu1 %v4902_v20  ;;  %v4894_v15 = vmax.f32 %v3723_v63, 0.0  ;;  %11515 = vst [vmem:[#allocation126_spill] sm:$0xff] %v9721_v45  ;;  %v4886_v42 = vmax.f32 %v9479_v18, 0.0  ;;  %v6413_v5 = vld [vmem:[%s6532_s22 + $0x6d0] sm:$0xff]  ;;  %v4885_v14 = vmax.f32 %v9471_v46, 0.0 }
 0x3d9   : > { %4610 = vmatprep.mubr.f32.mxu1 %v6410_v48  ;;  %v4320_v12 = vpop.f32.mrf.mxu1  ;;  %5095 = vmatpush2.msra.mxu1 %v4901_v24  ;;  %v9712_v56 = vpop.f32.mrf.mxu0  ;;  %v4893_v47 = vmax.f32 %v3721_v17, 0.0  ;;  %v4890_v34 = vmax.f32 %v3717_v49, 0.0  ;;  %v4882_v43 = vmax.f32 %v9460_v3, 0.0  ;;  %v4881_v18 = vmax.f32 %v9447_v59, 0.0  ;;  %v6415_v48 = vld [vmem:[%s6532_s22 + $0x6f0] sm:$0xff]  ;;  %v6416_v49 = vld [vmem:[%s6532_s22 + $0x718] sm:$0xff] }
 0x3da   : > { %v9710_v53 = vadd.f32 %v4320_v12, %v3872_v0  ;;  %11514 = vst [vmem:[#allocation55_spill] sm:$0xff] %v9712_v56  ;;  %5096 = vmatprep.subr.mxu1 %v4898_v10  ;;  %5023 = vmatprep.mubr.f32.mxu0 %v9721_v45  ;;  %v4878_v17 = vmax.f32 %v9434_v36, 0.0  ;;  %v4877_v3 = vmax.f32 %v9416_v19, 0.0  ;;  %v4874_v10 = vmax.f32 %v9403_v21, 0.0  ;;  %v9753_v36 = vld [vmem:[%s6547_s18 + $0x48] sm:$0xff] }
 0x3db   : > { %v9714_v2 = vpop.f32.mrf.mxu1  ;;  %5097 = vmatpush2.msra.mxu1 %v4897_v30  ;;  %v9729_v63 = vpop.f32.mrf.mxu0  ;;  %5024 = vmatmul.mubr.f32.gmra.mxu0 %v9726_v26  ;;  %11519 = vst [vmem:[#allocation124_spill] sm:$0xff] %v9753_v36  ;;  %v4873_v12 = vmax.f32 %v9390_v62, 0.0  ;;  %v9758_v30 = vld [vmem:[%s6547_s18 + $0x40] sm:$0xff]  ;;  %v4870_v19 = vmax.f32 %v9377_v32, 0.0  ;;  %v4869_v62 = vmax.f32 %v9364_v58, 0.0  ;;  %v9772_v32 = vld [vmem:[%s6547_s18 + $0x68] sm:$0xff] }
 0x3dc   : > { %4611 = vmatmul.mubr.f32.gmra.mxu1 %v6411_v52  ;;  %5098 = vmatprep.subr.mxu1 %v4894_v15  ;;  %11517 = vst [vmem:[#allocation77_spill] sm:$0xff] %v9729_v63  ;;  %11520 = vst [vmem:[#allocation94_spill] sm:$0xff] %v9758_v30  ;;  %v6417_v52 = vld [vmem:[%s6532_s22 + $0x710] sm:$0xff] }
 0x3dd   : > { %4616 = vmatprep.mubr.f32.mxu1 %v6412_v41  ;;  %v9718_v7 = vpop.f32.mrf.mxu1  ;;  %5099 = vmatpush2.msra.mxu1 %v4893_v47  ;;  %v9742_v24 = vpop.f32.mrf.mxu0  ;;  %v6418_v47 = vld [vmem:[%s6532_s22 + $0x738] sm:$0xff]  ;;  %11522 = vst [vmem:[#allocation122_spill] sm:$0xff] %v9772_v32 }
 0x3de   : > { %5100 = vmatprep.subr.mxu1 %v4890_v34  ;;  %11518 = vst [vmem:[#allocation123_spill] sm:$0xff] %v9742_v24  ;;  %5029 = vmatprep.mubr.f32.mxu0 %v9753_v36  ;;  %v9776_v34 = vld [vmem:[%s6547_s18 + $0x60] sm:$0xff]  ;;  %v11537_v36 = vld [vmem:[#allocation137_spill] sm:$0xff]  ;;  %v11539_v24 = vld [vmem:[#allocation135_spill] sm:$0xff] }
 0x3df   : > { %v9731_v20 = vpop.f32.mrf.mxu1  ;;  %5101 = vmatpush2.msra.mxu1 %v4889_v27  ;;  %v9761_v15 = vpop.f32.mrf.mxu0  ;;  %5030 = vmatmul.mubr.f32.gmra.mxu0 %v9758_v30  ;;  %11523 = vst [vmem:[#allocation78_spill] sm:$0xff] %v9776_v34  ;;  %v11536_v30 = vld [vmem:[#allocation112_spill] sm:$0xff] }
 0x3e0   : > { %4617 = vmatmul.mubr.f32.gmra.mxu1 %v6413_v5  ;;  %5102 = vmatprep.subr.mxu1 %v4886_v42  ;;  %11521 = vst [vmem:[#allocation57_spill] sm:$0xff] %v9761_v15  ;;  %v6419_v42 = vld [vmem:[%s6532_s22 + $0x730] sm:$0xff]  ;;  %v6420_v5 = vld [vmem:[%s6532_s22 + $0x758] sm:$0xff] }
 0x3e1   : > { %4622 = vmatprep.mubr.f32.mxu1 %v6414_v8  ;;  %v9737_v0 = vpop.f32.mrf.mxu1  ;;  %5103 = vmatpush2.msra.mxu1 %v4885_v14  ;;  %v9778_v27 = vpop.f32.mrf.mxu0 }
 0x3e2   : > { %5104 = vmatprep.subr.mxu1 %v4882_v43  ;;  %5035 = vmatprep.mubr.f32.mxu0 %v9772_v32  ;;  %11524 = vst [vmem:[#allocation35_spill] sm:$0xff] %v9778_v27 }
 0x3e3   : > { %v9744_v46 = vpop.f32.mrf.mxu1  ;;  %5105 = vmatpush2.msra.mxu1 %v4881_v18  ;;  %5036 = vmatmul.mubr.f32.gmra.mxu0 %v9776_v34  ;;  %v9787_v8 = vpop.f32.mrf.mxu0  ;;  %v6421_v18 = vld [vmem:[%s6532_s22 + $0x750] sm:$0xff]  ;;  %v11534_v34 = vld [vmem:[#allocation5_spill] sm:$0xff] }
 0x3e4   : > { %4623 = vmatmul.mubr.f32.gmra.mxu1 %v6415_v48  ;;  %5106 = vmatprep.subr.mxu1 %v4878_v17  ;;  %11525 = vst [vmem:[#allocation17_spill] sm:$0xff] %v9787_v8  ;;  %v6422_v17 = vld [vmem:[%s6532_s22 + $0x778] sm:$0xff]  ;;  %v6429_v8 = vld [vmem:[%s6532_s22 + $0x7d0] sm:$0xff]  ;;  %v3930_v26 = vadd.f32 %v11537_v36, %v11534_v34 }
 0x3e5   : > { %4628 = vmatprep.mubr.f32.mxu1 %v6416_v49  ;;  %v9750_v59 = vpop.f32.mrf.mxu1  ;;  %5107 = vmatpush2.msra.mxu1 %v4877_v3  ;;  %v9796_v3 = vld [vmem:[%s6547_s18 + $0x88] sm:$0xf]  ;;  %v9800_v49 = vld [vmem:[%s6547_s18 + $0x80] sm:$0xf] }
 0x3e6   : > { %5108 = vmatprep.subr.mxu1 %v4874_v10  ;;  %11526 = vst [vmem:[#allocation56_spill] sm:$0xff] %v9796_v3  ;;  %5041 = vmatprep.mubr.f32.mxu0 %v9796_v3  ;;  %11527 = vst [vmem:[#allocation61_spill] sm:$0xff] %v9800_v49  ;;  %v9802_v10 = vpop.f32.mrf.mxu0 }
 0x3e7   : > { %v9763_v21 = vpop.f32.mrf.mxu1  ;;  %5109 = vmatpush2.msra.mxu1 %v4873_v12  ;;  %11528 = vst [vmem:[#allocation40_spill] sm:$0xff] %v9802_v10  ;;  %5042 = vmatmul.mubr.f32.gmra.mxu0 %v9800_v49 }
 0x3e8   : > { %4629 = vmatmul.mubr.f32.gmra.mxu1 %v6417_v52  ;;  %5110 = vmatprep.subr.mxu1 %v4870_v19  ;;  %v6423_v19 = vld [vmem:[%s6532_s22 + $0x770] sm:$0xff]  ;;  %v6424_v52 = vld [vmem:[%s6532_s22 + $0x798] sm:$0xff] }
 0x3e9   : > { %4634 = vmatprep.mubr.f32.mxu1 %v6418_v47  ;;  %v9768_v41 = vpop.f32.mrf.mxu1  ;;  %5111 = vmatpush2.msra.mxu1 %v4869_v62  ;;  %v9812_v47 = vpop.f32.mrf.mxu0 }
 0x3ea   : > { %5207 = vmatprep.mubr.f32.mxu0 %v9420_v44  ;;  %11529 = vst [vmem:[#allocation39_spill] sm:$0xff] %v9812_v47  ;;  %v6428_v44 = vld [vmem:[%s6532_s22 + $0x7d8] sm:$0xff] }
 0x3eb   : > { %v9780_v58 = vpop.f32.mrf.mxu1  ;;  %v9825_v47 = vld [vmem:[%s6547_s18 + $0x18] sm:$0xff] }
 0x3ec   : > { %4635 = vmatmul.mubr.f32.gmra.mxu1 %v6419_v42 }
 0x3ed   : > { %4640 = vmatprep.mubr.f32.mxu1 %v6420_v5  ;;  %v9784_v14 = vpop.f32.mrf.mxu1  ;;  %v6425_v5 = vld [vmem:[%s6532_s22 + $0x790] sm:$0xff] }
 0x3ef   : > { %v9789_v43 = vpop.f32.mrf.mxu1 }
 0x3f0   : > { %4641 = vmatmul.mubr.f32.gmra.mxu1 %v6421_v18  ;;  %v6426_v18 = vld [vmem:[%s6532_s22 + $0x7b8] sm:$0xff] }
 0x3f1   : > { %4646 = vmatprep.mubr.f32.mxu1 %v6422_v17  ;;  %v9793_v48 = vpop.f32.mrf.mxu1 }
 0x3f3   : > { %v9804_v12 = vpop.f32.mrf.mxu1 }
 0x3f4   : > { %4647 = vmatmul.mubr.f32.gmra.mxu1 %v6423_v19  ;;  %v9816_v19 = vpop.f32.mrf.mxu0 }
 0x3f5   : > { %4652 = vmatprep.mubr.f32.mxu1 %v6424_v52  ;;  %v9810_v62 = vpop.f32.mrf.mxu1  ;;  %11530 = vst [vmem:[#allocation79_spill] sm:$0xff] %v9816_v19  ;;  %v11532_v19 = vld [vmem:[#allocation6_spill] sm:$0xff] }
 0x3f6   : > { %v9820_v27 = vpop.f32.mrf.mxu0  ;;  %v3936_v49 = vadd.f32 %v9371_v51, %v11532_v19  ;;  %v4940_v51 = vld [vmem:[%s6547_s18 + $0x38] sm:$0xff] }
 0x3f7   : > { %v4366_v42 = vpop.f32.mrf.mxu1  ;;  %11531 = vst [vmem:[#allocation60_spill] sm:$0xff] %v9820_v27  ;;  %v11535_v27 = vld [vmem:[#allocation115_spill] sm:$0xff] }
 0x3f8   : > { %4653 = vmatmul.mubr.f32.gmra.mxu1 %v6425_v5  ;;  %v6430_v5 = vld [vmem:[%s6532_s22 + $0x7f8] sm:$0xff]  ;;  %v9829_v3 = vpop.f32.mrf.mxu0  ;;  %v3932_v32 = vadd.f32 %v11535_v27, %v11534_v34  ;;  %v11543_v34 = vld [vmem:[#allocation86_spill] sm:$0xff] }
 0x3f9   : > { %4658 = vmatprep.mubr.f32.mxu1 %v6426_v18  ;;  %v4368_v17 = vpop.f32.mrf.mxu1  ;;  %11533 = vst [vmem:[#allocation109_spill] sm:$0xff] %v9829_v3  ;;  %v11538_v3 = vld [vmem:[#allocation87_spill] sm:$0xff] }
 0x3fa   : > { %v3926_v63 = vadd.f32 %v11539_v24, %v11538_v3  ;;  %v9847_v13 = vpop.f32.mrf.mxu0 }
 0x3fb   : > { %v4372_v54 = vpop.f32.mrf.mxu1  ;;  %11542 = vst [vmem:[#allocation45_spill] sm:$0xff] %v9847_v13  ;;  %v11548_v13 = vld [vmem:[#allocation22_spill] sm:$0xff] }
 0x3fc   : > { %4659 = vmatmul.mubr.f32.gmra.mxu1 %v6427_v9 }
 0x3fd   : > { %4664 = vmatprep.mubr.f32.mxu1 %v6428_v44  ;;  %v4374_v52 = vpop.f32.mrf.mxu1  ;;  %v6431_v44 = vld [vmem:[%s6532_s22 + $0x7f0] sm:$0xff]  ;;  %s6454_s22 = smov 15  }
 0x3fe   : > { %v4375_v40 = vadd.f32 %v4374_v52, %v3926_v63 }
 0x3ff   : > { %v4378_v10 = vpop.f32.mrf.mxu1 }
 0x400   : > { %4665 = vmatmul.mubr.f32.gmra.mxu1 %v6429_v8  ;;  %v3938_v8 = vadd.f32 %v11536_v30, %v11532_v19  ;;  %v11541_v30 = vld [vmem:[#allocation134_spill] sm:$0xff]  ;;  %v4379_v33 = vadd.f32 %v4378_v10, %v3930_v26  ;;  %v11546_v26 = vld [vmem:[#allocation85_spill] sm:$0xff] }
 0x401   : > { %4670 = vmatprep.mubr.f32.mxu1 %v6430_v5  ;;  %v4380_v18 = vpop.f32.mrf.mxu1  ;;  %v4935_v5 = vld [vmem:[%s6547_s18 + $0x10] sm:$0xff]  ;;  %v3924_v19 = vadd.f32 %v11541_v30, %v11538_v3  ;;  %v4944_v30 = vld [vmem:[%s6547_s18 + $0x58] sm:$0xff]  ;;  %v11547_v10 = vld [vmem:[#allocation130_spill] sm:$0xff] }
 0x402   : > { %v4381_v27 = vadd.f32 %v4380_v18, %v3932_v32 }
 0x403   : > { %v4384_v9 = vpop.f32.mrf.mxu1  ;;  %v4373_v18 = vadd.f32 %v4372_v54, %v3924_v19 }
 0x404   : > { %4671 = vmatmul.mubr.f32.gmra.mxu1 %v6431_v44  ;;  %v4385_v45 = vadd.f32 %v4384_v9, %v3936_v49  ;;  %v11540_v44 = vld [vmem:[#allocation114_spill] sm:$0xff]  ;;  %v11544_v49 = vld [vmem:[#allocation133_spill] sm:$0xff] }
 0x405   : > { %5112 = vmatprep.mubr.f32.mxu1 %v9825_v47  ;;  %v4386_v15 = vpop.f32.mrf.mxu1  ;;  %v3942_v56 = vadd.f32 %v9398_v50, %v11540_v44  ;;  %v3920_v9 = vadd.f32 %v11544_v49, %v11543_v34  ;;  %v4939_v50 = vld [vmem:[%s6547_s18 + $0x30] sm:$0xff]  ;;  %v3948_v49 = vadd.f32 %v9427_v28, %v11548_v13 }
 0x406   : > { %v4387_v60 = vadd.f32 %v4386_v15, %v3938_v8  ;;  %v11545_v15 = vld [vmem:[#allocation131_spill] sm:$0xff]  ;;  %v4739_v8 = vmax.f32 %v4385_v45, 0.0  ;;  %v4735_v45 = vmax.f32 %v4379_v33, 0.0 }
 0x407   : > { %v4390_v36 = vpop.f32.mrf.mxu1  ;;  %v3918_v32 = vadd.f32 %v11545_v15, %v11543_v34  ;;  %v4369_v63 = vadd.f32 %v4368_v17, %v3920_v9  ;;  %v11552_v34 = vld [vmem:[#allocation75_spill] sm:$0xff]  ;;  %v4732_v17 = vmax.f32 %v4375_v40, 0.0 }
 0x408   : > { %5113 = vmatmul.mubr.f32.vlgmr.msra.gmra.mxu1 %v4935_v5  ;;  %v4740_v38 = vmax.f32 %v4387_v60, 0.0  ;;  %v9851_v24 = vadd.f32 %v4390_v36, %v3942_v56  ;;  %v3914_v5 = vadd.f32 %v11547_v10, %v11546_v26  ;;  %v4736_v60 = vmax.f32 %v4381_v27, 0.0  ;;  %v11549_v56 = vld [vmem:[#allocation54_spill] sm:$0xff]  ;;  %v11551_v36 = vld [vmem:[#allocation84_spill] sm:$0xff]  ;;  %v11553_v27 = vld [vmem:[#allocation101_spill] sm:$0xff] }
 0x409   : > { %5118 = vmatprep.mubr.f32.mxu1 %v4940_v51  ;;  %v9856_v3 = vpop.f32.mrf.mxu1  ;;  %v3912_v52 = vadd.f32 %v11549_v56, %v11546_v26  ;;  %v9865_v51 = vpop.f32.mrf.mxu0  ;;  %v4367_v54 = vadd.f32 %v4366_v42, %v3918_v32  ;;  %v3908_v15 = vadd.f32 %v11552_v34, %v11551_v36  ;;  %v3906_v26 = vadd.f32 %v11553_v27, %v11551_v36  ;;  %v11555_v10 = vld [vmem:[#allocation73_spill] sm:$0xff]  ;;  %v11561_v27 = vld [vmem:[#allocation82_spill] sm:$0xff] }
 0x40a   : > { %5143 = vmatprep.subr.mxu0 %v4740_v38  ;;  %11550 = vst [vmem:[#allocation64_spill] sm:$0xff] %v9865_v51  ;;  %v4363_v28 = vadd.f32 %v9810_v62, %v3914_v5  ;;  %v4943_v38 = vld [vmem:[%s6547_s18 + $0x50] sm:$0xff]  ;;  %v4731_v42 = vmax.f32 %v4373_v18, 0.0  ;;  %v11556_v62 = vld [vmem:[#allocation19_spill] sm:$0xff]  ;;  %v11590_v51 = vld [vmem:[#allocation21_spill] sm:$0xff] }
 0x40b   : > { %v4396_v19 = vpop.f32.mrf.mxu1  ;;  %5144 = vmatpush1.msra.mxu0 %v4739_v8  ;;  %v4361_v33 = vadd.f32 %v9804_v12, %v3912_v52  ;;  %v11554_v8 = vld [vmem:[#allocation4_spill] sm:$0xff]  ;;  %v3954_v40 = vadd.f32 %v9455_v57, %v11556_v62  ;;  %v4357_v5 = vadd.f32 %v9793_v48, %v3908_v15  ;;  %v9888_v52 = vpop.f32.mrf.mxu0  ;;  %v4727_v36 = vmax.f32 %v4367_v54, 0.0 }
 0x40c   : > { %5119 = vmatmul.mubr.f32.gmra.mxu1 %v4939_v50  ;;  %v9870_v9 = vadd.f32 %v4396_v19, %v3948_v49  ;;  %5145 = vmatprep.subr.mxu0 %v4736_v60  ;;  %v4948_v50 = vld [vmem:[%s6547_s18 + $0x78] sm:$0xff]  ;;  %v3902_v56 = vadd.f32 %v11555_v10, %v11554_v8  ;;  %v11557_v49 = vld [vmem:[#allocation83_spill] sm:$0xff]  ;;  %v11559_v12 = vld [vmem:[#allocation104_spill] sm:$0xff]  ;;  %11560 = vst [vmem:[#allocation46_spill] sm:$0xff] %v9888_v52 }
 0x40d   : > { %5124 = vmatprep.mubr.f32.mxu1 %v4944_v30  ;;  %v9876_v32 = vpop.f32.mrf.mxu1  ;;  %5146 = vmatpush1.msra.mxu0 %v4735_v45  ;;  %v4728_v30 = vmax.f32 %v4369_v63, 0.0  ;;  %v11558_v60 = vld [vmem:[#allocation71_spill] sm:$0xff]  ;;  %v3900_v18 = vadd.f32 %v11559_v12, %v11554_v8  ;;  %v4355_v45 = vadd.f32 %v9789_v43, %v3906_v26  ;;  %v3956_v57 = vadd.f32 %v9465_v16, %v11556_v62  ;;  %v11562_v8 = vld [vmem:[#allocation36_spill] sm:$0xff]  ;;  %v4952_v16 = vld [vmem:[%s6547_s18 + $0x98] sm:$0xf]  ;;  %v9913_v12 = vpop.f32.mrf.mxu0 }
 0x40e   : > { %5147 = vmatprep.subr.mxu0 %v4732_v17  ;;  %v3896_v19 = vadd.f32 %v11558_v60, %v11557_v49  ;;  %v4351_v48 = vadd.f32 %v9784_v14, %v3902_v56  ;;  %v4724_v63 = vmax.f32 %v4363_v28, 0.0  ;;  %v4947_v17 = vld [vmem:[%s6547_s18 + $0x70] sm:$0xff]  ;;  %v3890_v10 = vadd.f32 %v11562_v8, %v11561_v27  ;;  %v11564_v62 = vld [vmem:[#allocation42_spill] sm:$0xff]  ;;  %11568 = vst [vmem:[#allocation105_spill] sm:$0xff] %v9913_v12 }
 0x40f   : > { %v4402_v34 = vpop.f32.mrf.mxu1  ;;  %5148 = vmatpush1.msra.mxu0 %v4731_v42  ;;  %v11563_v43 = vld [vmem:[#allocation72_spill] sm:$0xff]  ;;  %v4349_v26 = vadd.f32 %v9780_v58, %v3900_v18  ;;  %v3960_v14 = vadd.f32 %v9475_v37, %v11564_v62  ;;  %v4720_v56 = vmax.f32 %v4357_v5, 0.0  ;;  %v4719_v18 = vmax.f32 %v4355_v45, 0.0 }
 0x410   : > { %5125 = vmatmul.mubr.f32.gmra.mxu1 %v4943_v38  ;;  %v9894_v15 = vadd.f32 %v4402_v34, %v3954_v40  ;;  %5149 = vmatprep.subr.mxu0 %v4728_v30  ;;  %v3894_v54 = vadd.f32 %v11563_v43, %v11557_v49  ;;  %v4723_v38 = vmax.f32 %v4361_v33, 0.0  ;;  %v4345_v28 = vadd.f32 %v9768_v41, %v3896_v19  ;;  %v11565_v40 = vld [vmem:[#allocation7_spill] sm:$0xff]  ;;  %v11566_v30 = vld [vmem:[#allocation53_spill] sm:$0xff]  ;;  %v11567_v49 = vld [vmem:[#allocation70_spill] sm:$0xff] }
 0x411   : > { %5130 = vmatprep.mubr.f32.mxu1 %v4948_v50  ;;  %v4404_v42 = vpop.f32.mrf.mxu1  ;;  %5150 = vmatpush1.msra.mxu0 %v4727_v36  ;;  %v3884_v60 = vadd.f32 %v11566_v30, %v11565_v40  ;;  %v3888_v58 = vadd.f32 %v11567_v49, %v11561_v27  ;;  %v3962_v37 = vadd.f32 %v9481_v31, %v11564_v62  ;;  %v4716_v5 = vmax.f32 %v4351_v48, 0.0  ;;  %v4951_v34 = vld [vmem:[%s6547_s18 + $0x90] sm:$0xf] }
 0x412   : > { %v9906_v50 = vadd.f32 %v4404_v42, %v3956_v57  ;;  %5151 = vmatprep.subr.mxu0 %v4724_v63  ;;  %v4343_v33 = vadd.f32 %v9763_v21, %v3894_v54  ;;  %v4339_v41 = vadd.f32 %v9750_v59, %v3890_v10  ;;  %v11569_v57 = vld [vmem:[#allocation81_spill] sm:$0xff]  ;;  %v11570_v63 = vld [vmem:[#allocation48_spill] sm:$0xff]  ;;  %v11573_v54 = vld [vmem:[#allocation110_spill] sm:$0xff]  ;;  %v4712_v10 = vmax.f32 %v4345_v28, 0.0 }
 0x413   : > { %5152 = vmatpush1.msra.mxu0 %v4723_v38  ;;  %v3878_v21 = vadd.f32 %v11570_v63, %v11569_v57  ;;  %v11571_v27 = vld [vmem:[#allocation68_spill] sm:$0xff]  ;;  %v4337_v8 = vadd.f32 %v9744_v46, %v3888_v58  ;;  %v4333_v48 = vadd.f32 %v9737_v0, %v3884_v60  ;;  %v11574_v42 = vld [vmem:[#allocation65_spill] sm:$0xff]  ;;  %v4692_v63 = vmax.f32 %v9695_v25, 0.0 }
 0x414   : > { %v4408_v36 = vpop.f32.mrf.mxu1  ;;  %5131 = vmatmul.mubr.f32.gmra.mxu1 %v4947_v17  ;;  %5153 = vmatprep.subr.mxu0 %v4720_v56  ;;  %v3882_v45 = vadd.f32 %v11571_v27, %v11565_v40  ;;  %v4715_v17 = vmax.f32 %v4349_v26, 0.0  ;;  %v11572_v31 = vld [vmem:[#allocation8_spill] sm:$0xff]  ;;  %v9934_v56 = vpop.f32.mrf.mxu0  ;;  %v11576_v26 = vld [vmem:[#allocation118_spill] sm:$0xff]  ;;  %v4708_v28 = vmax.f32 %v4339_v41, 0.0  ;;  %v4683_v25 = vmax.f32 %v9630_v4, 0.0 }
 0x415   : > { %v9918_v19 = vadd.f32 %v4408_v36, %v3960_v14  ;;  %5136 = vmatprep.mubr.f32.mxu1 %v4952_v16  ;;  %5154 = vmatpush1.msra.mxu0 %v4719_v18  ;;  %v3966_v59 = vadd.f32 %v11573_v54, %v11572_v31  ;;  %v3876_v16 = vadd.f32 %v11574_v42, %v11569_v57  ;;  %v4711_v14 = vmax.f32 %v4343_v33, 0.0 }
 0x416   : > { %v4410_v43 = vpop.f32.mrf.mxu1  ;;  %5155 = vmatprep.subr.mxu0 %v4716_v5  ;;  %v4331_v62 = vadd.f32 %v9731_v20, %v3882_v45  ;;  %11575 = vst [vmem:[#allocation80_spill] sm:$0xff] %v9934_v56  ;;  %v3968_v40 = vadd.f32 %v11576_v26, %v11572_v31  ;;  %v4327_v0 = vadd.f32 %v9718_v7, %v3878_v21  ;;  %v4707_v20 = vmax.f32 %v4337_v8, 0.0  ;;  %v9945_v36 = vpop.f32.mrf.mxu0  ;;  %v11592_v56 = vld [vmem:[#allocation93_spill] sm:$0xff] }
 0x417   : > { %v9929_v38 = vadd.f32 %v4410_v43, %v3962_v37  ;;  %5156 = vmatpush1.msra.mxu0 %v4715_v17  ;;  %v4325_v60 = vadd.f32 %v9714_v2, %v3876_v16  ;;  %v4704_v58 = vmax.f32 %v4333_v48, 0.0  ;;  %11577 = vst [vmem:[#allocation63_spill] sm:$0xff] %v9945_v36  ;;  %v4696_v2 = vmax.f32 %v9710_v53, 0.0  ;;  %v11591_v36 = vld [vmem:[#allocation62_spill] sm:$0xff] }
 0x418   : > { %v4414_v46 = vpop.f32.mrf.mxu1  ;;  %5137 = vmatmul.mubr.f32.gmra.mxu1 %v4951_v34  ;;  %5157 = vmatprep.subr.mxu0 %v4712_v10  ;;  %v4703_v18 = vmax.f32 %v4331_v62, 0.0  ;;  %v4700_v7 = vmax.f32 %v4327_v0, 0.0  ;;  %v9953_v34 = vpop.f32.mrf.mxu0  ;;  %v4691_v21 = vmax.f32 %v9682_v39, 0.0  ;;  %v4688_v45 = vmax.f32 %v9669_v11, 0.0 }
 0x419   : > { %v9939_v30 = vadd.f32 %v4414_v46, %v3966_v59  ;;  %5302 = vmatprep.mubr.f32.mxu1 %v9825_v47  ;;  %5158 = vmatpush1.msra.mxu0 %v4711_v14  ;;  %v4699_v41 = vmax.f32 %v4325_v60, 0.0  ;;  %v4695_v47 = vmax.f32 %v9706_v23, 0.0  ;;  %11578 = vst [vmem:[#allocation100_spill] sm:$0xff] %v9953_v34  ;;  %v4687_v53 = vmax.f32 %v9656_v6, 0.0 }
 0x41a   : > { %v4416_v49 = vpop.f32.mrf.mxu1  ;;  %5159 = vmatprep.subr.mxu0 %v4708_v28  ;;  %v9963_v8 = vpop.f32.mrf.mxu0  ;;  %v4684_v17 = vmax.f32 %v9643_v35, 0.0  ;;  %v4680_v39 = vmax.f32 %v9618_v61, 0.0  ;;  %v4679_v11 = vmax.f32 %v9607_v55, 0.0 }
 0x41b   : > { %v9943_v33 = vadd.f32 %v4416_v49, %v3968_v40  ;;  %5160 = vmatpush1.msra.mxu0 %v4707_v20  ;;  %11579 = vst [vmem:[#allocation43_spill] sm:$0xff] %v9963_v8  ;;  %v11583_v49 = vld [vmem:[#allocation31_spill] sm:$0xff]  ;;  %v4016_v8 = vadd.f32 %v11592_v56, %v11591_v36 }
 0x41c   : > { %v9947_v37 = vpop.f32.mrf.mxu1  ;;  %5161 = vmatprep.subr.mxu0 %v4704_v58  ;;  %v9973_v31 = vpop.f32.mrf.mxu0  ;;  %v4032_v58 = vadd.f32 %v9614_v1, %v11583_v49  ;;  %v4038_v1 = vadd.f32 %v9638_v22, %v11590_v51  ;;  %v11597_v22 = vld [vmem:[#allocation102_spill] sm:$0xff] }
 0x41d   : > { %5162 = vmatpush1.msra.mxu0 %v4703_v18  ;;  %11580 = vst [vmem:[#allocation6_spill] sm:$0xff] %v9973_v31 }
 0x41e   : > { %v9949_v5 = vpop.f32.mrf.mxu1  ;;  %5163 = vmatprep.subr.mxu0 %v4700_v7  ;;  %v9979_v35 = vpop.f32.mrf.mxu0 }
 0x41f   : > { %5164 = vmatpush1.msra.mxu0 %v4699_v41  ;;  %11581 = vst [vmem:[#allocation5_spill] sm:$0xff] %v9979_v35  ;;  %v11585_v41 = vld [vmem:[#allocation69_spill] sm:$0xff] }
 0x420   : > { %v9955_v57 = vpop.f32.mrf.mxu1  ;;  %5165 = vmatprep.subr.mxu0 %v4696_v2  ;;  %v9985_v48 = vpop.f32.mrf.mxu0  ;;  %v11586_v2 = vld [vmem:[#allocation76_spill] sm:$0xff] }
 0x421   : > { %5166 = vmatpush1.msra.mxu0 %v4695_v47  ;;  %11582 = vst [vmem:[#allocation115_spill] sm:$0xff] %v9985_v48  ;;  %v4028_v47 = vadd.f32 %v11586_v2, %v11585_v41  ;;  %v11593_v2 = vld [vmem:[#allocation89_spill] sm:$0xff] }
 0x422   : > { %v9959_v27 = vpop.f32.mrf.mxu1  ;;  %5167 = vmatprep.subr.mxu0 %v4692_v63  ;;  %v9991_v10 = vpop.f32.mrf.mxu0  ;;  %v4034_v63 = vadd.f32 %v9624_v29, %v11583_v49 }
 0x423   : > { %5168 = vmatpush1.msra.mxu0 %v4691_v21  ;;  %v11587_v21 = vld [vmem:[#allocation12_spill] sm:$0xff] }
 0x424   : > { %v9965_v23 = vpop.f32.mrf.mxu1  ;;  %5169 = vmatprep.subr.mxu0 %v4688_v45  ;;  %v9993_v62 = vpop.f32.mrf.mxu0  ;;  %v4026_v45 = vadd.f32 %v11587_v21, %v11585_v41 }
 0x425   : > { %5170 = vmatpush1.msra.mxu0 %v4687_v53 }
 0x426   : > { %v9969_v43 = vpop.f32.mrf.mxu1  ;;  %5171 = vmatprep.subr.mxu0 %v4684_v17  ;;  %v9995_v26 = vpop.f32.mrf.mxu0 }
 0x427   : > { %5172 = vmatpush1.msra.mxu0 %v4683_v25  ;;  %v11588_v25 = vld [vmem:[#allocation66_spill] sm:$0xff] }
 0x428   : > { %v9975_v6 = vpop.f32.mrf.mxu1  ;;  %5173 = vmatprep.subr.mxu0 %v4680_v39  ;;  %v9997_v28 = vpop.f32.mrf.mxu0  ;;  %v11589_v39 = vld [vmem:[#allocation2_spill] sm:$0xff]  ;;  %v4020_v34 = vadd.f32 %v11593_v2, %v11588_v25  ;;  %v11600_v2 = vld [vmem:[#allocation97_spill] sm:$0xff] }
 0x429   : > { %5174 = vmatpush1.msra.mxu0 %v4679_v11  ;;  %v4022_v11 = vadd.f32 %v11589_v39, %v11588_v25 }
 0x42a   : > { %v9977_v54 = vpop.f32.mrf.mxu1  ;;  %v10001_v18 = vpop.f32.mrf.mxu0 }
 0x42b   : > { %11584 = vst [vmem:[#allocation112_spill] sm:$0xff] %v10001_v18 }
 0x42c   : > { %v9981_v4 = vpop.f32.mrf.mxu1  ;;  %v10017_v29 = vpop.f32.mrf.mxu0 }
 0x42d   : > { %11594 = vst [vmem:[#allocation137_spill] sm:$0xff] %v10017_v29  ;;  %v11601_v29 = vld [vmem:[#allocation28_spill] sm:$0xff] }
 0x42e   : > { %v9983_v59 = vpop.f32.mrf.mxu1 }
 0x430   : > { %v9987_v61 = vpop.f32.mrf.mxu1 }
 0x432   : > { %v9989_v55 = vpop.f32.mrf.mxu1 }
 0x434   : > { %v4456_v42 = vpop.f32.mrf.mxu1 }
 0x436   : > { %v4458_v16 = vpop.f32.mrf.mxu1 }
 0x438   : > { %v4462_v14 = vpop.f32.mrf.mxu1 }
 0x43a   : > { %v4464_v46 = vpop.f32.mrf.mxu1 }
 0x43c   : > { %v4468_v40 = vpop.f32.mrf.mxu1 }
 0x43e   : > { %v4470_v0 = vpop.f32.mrf.mxu1 }
 0x43f   : > { %v4471_v21 = vadd.f32 %v4470_v0, %v4022_v11  ;;  %v11604_v11 = vld [vmem:[#allocation23_spill] sm:$0xff] }
 0x440   : > { %v4474_v60 = vpop.f32.mrf.mxu1 }
 0x441   : > { %v4475_v49 = vadd.f32 %v4474_v60, %v4026_v45  ;;  %v4044_v60 = vadd.f32 %v11601_v29, %v11600_v2  ;;  %v4465_v45 = vadd.f32 %v4464_v46, %v4016_v8 }
 0x442   : > { %v4476_v20 = vpop.f32.mrf.mxu1 }
 0x443   : > { %v4477_v12 = vadd.f32 %v4476_v20, %v4028_v47  ;;  %v11598_v20 = vld [vmem:[#allocation52_spill] sm:$0xff] }
 0x444   : > { %v4480_v7 = vpop.f32.mrf.mxu1  ;;  %v4010_v47 = vadd.f32 %v11598_v20, %v11597_v22  ;;  %v11608_v20 = vld [vmem:[#allocation10_spill] sm:$0xff] }
 0x445   : > { %v4481_v53 = vadd.f32 %v4480_v7, %v4032_v58  ;;  %v11595_v58 = vld [vmem:[#allocation99_spill] sm:$0xff]  ;;  %v4800_v18 = vmax.f32 %v4477_v12, 0.0  ;;  %v4796_v12 = vmax.f32 %v4471_v21, 0.0 }
 0x446   : > { %v4482_v17 = vpop.f32.mrf.mxu1  ;;  %v4040_v7 = vadd.f32 %v11595_v58, %v11590_v51  ;;  %v11602_v51 = vld [vmem:[#allocation106_spill] sm:$0xff]  ;;  %v4459_v8 = vadd.f32 %v4458_v16, %v4010_v47  ;;  %v4792_v16 = vmax.f32 %v4465_v45, 0.0 }
 0x447   : > { %v4483_v52 = vadd.f32 %v4482_v17, %v4034_v63  ;;  %v11599_v63 = vld [vmem:[#allocation95_spill] sm:$0xff]  ;;  %v4469_v17 = vadd.f32 %v4468_v40, %v4020_v34  ;;  %v4803_v31 = vmax.f32 %v4481_v53, 0.0  ;;  %v4799_v34 = vmax.f32 %v4475_v49, 0.0  ;;  %v11605_v53 = vld [vmem:[#allocation90_spill] sm:$0xff]  ;;  %v11609_v49 = vld [vmem:[#allocation29_spill] sm:$0xff] }
 0x448   : > { %v4486_v41 = vpop.f32.mrf.mxu1  ;;  %v4014_v56 = vadd.f32 %v11599_v63, %v11591_v36  ;;  %v4046_v29 = vadd.f32 %v11605_v53, %v11600_v2  ;;  %v11606_v58 = vld [vmem:[#allocation34_spill] sm:$0xff]  ;;  %v11615_v53 = vld [vmem:[#allocation107_spill] sm:$0xff] }
 0x449   : > { %v4804_v39 = vmax.f32 %v4483_v52, 0.0  ;;  %v10021_v35 = vadd.f32 %v4486_v41, %v4038_v1  ;;  %v11603_v52 = vld [vmem:[#allocation16_spill] sm:$0xff]  ;;  %v4008_v1 = vadd.f32 %v11604_v11, %v11597_v22  ;;  %v10035_v41 = vpop.f32.mrf.mxu0  ;;  %v4002_v22 = vadd.f32 %v11608_v20, %v11602_v51  ;;  %v11612_v47 = vld [vmem:[#allocation14_spill] sm:$0xff] }
 0x44a   : > { %v4488_v25 = vpop.f32.mrf.mxu1  ;;  %v4004_v0 = vadd.f32 %v11603_v52, %v11602_v51  ;;  %v4463_v36 = vadd.f32 %v4462_v14, %v4014_v56  ;;  %v11613_v52 = vld [vmem:[#allocation58_spill] sm:$0xff] }
 0x44b   : > { %11596 = vst [vmem:[#allocation87_spill] sm:$0xff] %v10021_v35  ;;  %v10029_v48 = vadd.f32 %v4488_v25, %v4040_v7  ;;  %5175 = vmatprep.subr.mxu0 %v4804_v39  ;;  %v11607_v7 = vld [vmem:[#allocation9_spill] sm:$0xff]  ;;  %v4457_v63 = vadd.f32 %v4456_v42, %v4008_v1  ;;  %v4795_v25 = vmax.f32 %v4469_v17, 0.0  ;;  %v3996_v11 = vadd.f32 %v11613_v52, %v11606_v58  ;;  %v10054_v51 = vpop.f32.mrf.mxu0 }
 0x44c   : > { %v4492_v40 = vpop.f32.mrf.mxu1  ;;  %5176 = vmatpush2.msra.mxu0 %v4803_v31  ;;  %v3998_v39 = vadd.f32 %v11607_v7, %v11606_v58  ;;  %v11610_v31 = vld [vmem:[#allocation74_spill] sm:$0xff]  ;;  %v4453_v2 = vadd.f32 %v9989_v55, %v4004_v0  ;;  %v4451_v42 = vadd.f32 %v9987_v61, %v4002_v22  ;;  %v4791_v17 = vmax.f32 %v4463_v36, 0.0  ;;  %v11617_v58 = vld [vmem:[#allocation13_spill] sm:$0xff]  ;;  %v11618_v22 = vld [vmem:[#allocation119_spill] sm:$0xff] }
 0x44d   : > { %v10039_v46 = vadd.f32 %v4492_v40, %v4044_v60  ;;  %5177 = vmatprep.subr.mxu0 %v4800_v18  ;;  %v4050_v56 = vadd.f32 %v11610_v31, %v11609_v49  ;;  %v11611_v18 = vld [vmem:[#allocation44_spill] sm:$0xff]  ;;  %v4788_v0 = vmax.f32 %v4459_v8, 0.0  ;;  %v4445_v61 = vadd.f32 %v9981_v4, %v3996_v11  ;;  %v11621_v31 = vld [vmem:[#allocation37_spill] sm:$0xff] }
 0x44e   : > { %v4494_v14 = vpop.f32.mrf.mxu1  ;;  %5178 = vmatpush2.msra.mxu0 %v4799_v34  ;;  %v3992_v60 = vadd.f32 %v11612_v47, %v11611_v18  ;;  %v11614_v34 = vld [vmem:[#allocation128_spill] sm:$0xff]  ;;  %v4447_v45 = vadd.f32 %v9983_v59, %v3998_v39  ;;  %v3990_v7 = vadd.f32 %v11617_v58, %v11611_v18  ;;  %v4787_v36 = vmax.f32 %v4457_v63, 0.0  ;;  %v10076_v47 = vpop.f32.mrf.mxu0  ;;  %v11623_v11 = vld [vmem:[#allocation77_spill] sm:$0xff] }
 0x44f   : > { %v10048_v21 = vadd.f32 %v4494_v14, %v4046_v29  ;;  %5179 = vmatprep.subr.mxu0 %v4796_v12  ;;  %v4052_v55 = vadd.f32 %v11614_v34, %v11609_v49  ;;  %v11616_v29 = vld [vmem:[#allocation3_spill] sm:$0xff]  ;;  %v4784_v8 = vmax.f32 %v4453_v2, 0.0  ;;  %v11620_v49 = vld [vmem:[#allocation98_spill] sm:$0xff]  ;;  %v4783_v63 = vmax.f32 %v4451_v42, 0.0  ;;  %v11627_v58 = vld [vmem:[#allocation117_spill] sm:$0xff] }
 0x450   : > { %v4498_v1 = vpop.f32.mrf.mxu1  ;;  %5180 = vmatpush2.msra.mxu0 %v4795_v25  ;;  %v3986_v12 = vadd.f32 %v11616_v29, %v11615_v53  ;;  %v11619_v25 = vld [vmem:[#allocation55_spill] sm:$0xff]  ;;  %v4441_v59 = vadd.f32 %v9977_v54, %v3992_v60  ;;  %v4439_v4 = vadd.f32 %v9975_v6, %v3990_v7  ;;  %v4058_v54 = vadd.f32 %v11623_v11, %v11618_v22 }
 0x451   : > { %v10060_v40 = vadd.f32 %v4498_v1, %v4050_v56  ;;  %5181 = vmatprep.subr.mxu0 %v4792_v16  ;;  %v4056_v14 = vadd.f32 %v11619_v25, %v11618_v22  ;;  %v3980_v56 = vadd.f32 %v11621_v31, %v11620_v49  ;;  %v11622_v16 = vld [vmem:[#allocation18_spill] sm:$0xff]  ;;  %v4780_v60 = vmax.f32 %v4447_v45, 0.0  ;;  %v11624_v1 = vld [vmem:[#allocation91_spill] sm:$0xff]  ;;  %v10096_v25 = vpop.f32.mrf.mxu0 }
 0x452   : > { %v4500_v20 = vpop.f32.mrf.mxu1  ;;  %5182 = vmatpush2.msra.mxu0 %v4791_v17  ;;  %v3984_v18 = vadd.f32 %v11622_v16, %v11615_v53  ;;  %v4435_v2 = vadd.f32 %v9969_v43, %v3986_v12  ;;  %v11625_v34 = vld [vmem:[#allocation27_spill] sm:$0xff]  ;;  %v4779_v42 = vmax.f32 %v4445_v61, 0.0  ;;  %v4776_v45 = vmax.f32 %v4441_v59, 0.0 }
 0x453   : > { %v10070_v39 = vadd.f32 %v4500_v20, %v4052_v55  ;;  %5183 = vmatprep.subr.mxu0 %v4788_v0  ;;  %v3974_v55 = vadd.f32 %v11625_v34, %v11624_v1  ;;  %v11626_v0 = vld [vmem:[#allocation120_spill] sm:$0xff]  ;;  %v11628_v7 = vld [vmem:[#allocation123_spill] sm:$0xff]  ;;  %v4429_v43 = vadd.f32 %v9959_v27, %v3980_v56 }
 0x454   : > { %v4504_v52 = vpop.f32.mrf.mxu1  ;;  %5184 = vmatpush2.msra.mxu0 %v4787_v36  ;;  %v3978_v53 = vadd.f32 %v11626_v0, %v11620_v49  ;;  %v4433_v6 = vadd.f32 %v9965_v23, %v3984_v18  ;;  %v4062_v36 = vadd.f32 %v11628_v7, %v11627_v58  ;;  %v11629_v20 = vld [vmem:[#allocation32_spill] sm:$0xff]  ;;  %v4775_v23 = vmax.f32 %v4439_v4, 0.0 }
 0x455   : > { %v10082_v17 = vadd.f32 %v4504_v52, %v4056_v14  ;;  %5185 = vmatprep.subr.mxu0 %v4784_v8  ;;  %v3972_v22 = vadd.f32 %v11629_v20, %v11624_v1  ;;  %v11630_v8 = vld [vmem:[#allocation57_spill] sm:$0xff]  ;;  %v4423_v31 = vadd.f32 %v9949_v5, %v3974_v55  ;;  %v4772_v27 = vmax.f32 %v4435_v2, 0.0  ;;  %v6432_v20 = vld [vmem:[%s6547_s18] sm:$0xff] }
 0x456   : > { %v4506_v29 = vpop.f32.mrf.mxu1  ;;  %5186 = vmatpush2.msra.mxu0 %v4783_v63  ;;  %v4427_v14 = vadd.f32 %v9955_v57, %v3978_v53  ;;  %v4064_v49 = vadd.f32 %v11630_v8, %v11627_v58  ;;  %v4771_v16 = vmax.f32 %v4433_v6, 0.0  ;;  %v4768_v63 = vmax.f32 %v4429_v43, 0.0  ;;  %v10107_v57 = vpop.f32.mrf.mxu0  ;;  %v11632_v53 = vld [vmem:[#allocation113_spill] sm:$0xff] }
 0x457   : > { %v10092_v12 = vadd.f32 %v4506_v29, %v4058_v54  ;;  %5187 = vmatprep.subr.mxu0 %v4780_v60  ;;  %v4421_v56 = vadd.f32 %v9947_v37, %v3972_v22  ;;  %v4764_v5 = vmax.f32 %v4423_v31, 0.0  ;;  %v11631_v37 = vld [vmem:[#allocation24_spill] sm:$0xff]  ;;  %v4760_v1 = vmax.f32 %v9943_v33, 0.0 }
 0x458   : > { %v4510_v61 = vpop.f32.mrf.mxu1  ;;  %5188 = vmatpush2.msra.mxu0 %v4779_v42  ;;  %v4767_v4 = vmax.f32 %v4427_v14, 0.0  ;;  %v3950_v60 = vadd.f32 %v11631_v37, %v11548_v13  ;;  %v10116_v34 = vpop.f32.mrf.mxu0  ;;  %v4759_v55 = vmax.f32 %v9939_v30, 0.0  ;;  %v3944_v6 = vadd.f32 %v11632_v53, %v11540_v44  ;;  %v11634_v14 = vld [vmem:[#allocation126_spill] sm:$0xff]  ;;  %v11643_v37 = vld [vmem:[#allocation56_spill] sm:$0xff] }
 0x459   : > { %v10102_v59 = vadd.f32 %v4510_v61, %v4062_v36  ;;  %5189 = vmatprep.subr.mxu0 %v4776_v45  ;;  %v4763_v54 = vmax.f32 %v4421_v56, 0.0  ;;  %v4756_v29 = vmax.f32 %v9929_v38, 0.0  ;;  %v4755_v13 = vmax.f32 %v9918_v19, 0.0 }
 0x45a   : > { %v4512_v18 = vpop.f32.mrf.mxu1  ;;  %5190 = vmatpush2.msra.mxu0 %v4775_v23  ;;  %v4399_v42 = vadd.f32 %v9876_v32, %v3950_v60  ;;  %v4393_v33 = vadd.f32 %v9856_v3, %v3944_v6  ;;  %v4752_v30 = vmax.f32 %v9906_v50, 0.0  ;;  %v4751_v7 = vmax.f32 %v9894_v15, 0.0  ;;  %v10131_v36 = vpop.f32.mrf.mxu0 }
 0x45b   : > { %v10105_v52 = vadd.f32 %v4512_v18, %v4064_v49  ;;  %5191 = vmatprep.subr.mxu0 %v4772_v27  ;;  %v4747_v19 = vmax.f32 %v9870_v9, 0.0  ;;  %v4743_v3 = vmax.f32 %v9851_v24, 0.0  ;;  %v11635_v24 = vld [vmem:[#allocation127_spill] sm:$0xff]  ;;  %v11637_v49 = vld [vmem:[#allocation124_spill] sm:$0xff]  ;;  %v11638_v27 = vld [vmem:[#allocation94_spill] sm:$0xff] }
 0x45c   : > { %v10109_v11 = vpop.f32.mrf.mxu1  ;;  %5192 = vmatpush2.msra.mxu0 %v4771_v16  ;;  %v4748_v32 = vmax.f32 %v4399_v42, 0.0  ;;  %v4744_v43 = vmax.f32 %v4393_v33, 0.0  ;;  %v10139_v50 = vpop.f32.mrf.mxu0  ;;  %v11640_v18 = vld [vmem:[#allocation122_spill] sm:$0xff]  ;;  %v11647_v33 = vld [vmem:[#allocation88_spill] sm:$0xff] }
 0x45d   : > { %5193 = vmatprep.subr.mxu0 %v4768_v63 }
 0x45e   : > { %v10111_v2 = vpop.f32.mrf.mxu1  ;;  %5194 = vmatpush2.msra.mxu0 %v4767_v4  ;;  %v10146_v22 = vpop.f32.mrf.mxu0  ;;  %v11641_v4 = vld [vmem:[#allocation78_spill] sm:$0xff] }
 0x45f   : > { %5195 = vmatprep.subr.mxu0 %v4764_v5  ;;  %11633 = vst [vmem:[#allocation135_spill] sm:$0xff] %v10146_v22 }
 0x460   : > { %v10119_v0 = vpop.f32.mrf.mxu1  ;;  %5196 = vmatpush2.msra.mxu0 %v4763_v54  ;;  %v10154_v61 = vpop.f32.mrf.mxu0 }
 0x461   : > { %5197 = vmatprep.subr.mxu0 %v4760_v1  ;;  %11636 = vst [vmem:[#allocation114_spill] sm:$0xff] %v10154_v61  ;;  %v11644_v1 = vld [vmem:[#allocation61_spill] sm:$0xff]  ;;  %v11654_v61 = vld [vmem:[#allocation103_spill] sm:$0xff] }
 0x462   : > { %v10126_v58 = vpop.f32.mrf.mxu1  ;;  %5198 = vmatpush2.msra.mxu0 %v4759_v55  ;;  %v10162_v56 = vpop.f32.mrf.mxu0 }
 0x463   : > { %5199 = vmatprep.subr.mxu0 %v4756_v29  ;;  %11639 = vst [vmem:[#allocation134_spill] sm:$0xff] %v10162_v56  ;;  %v11655_v56 = vld [vmem:[#allocation6_spill] sm:$0xff] }
 0x464   : > { %v10133_v44 = vpop.f32.mrf.mxu1  ;;  %5200 = vmatpush2.msra.mxu0 %v4755_v13  ;;  %v10166_v5 = vpop.f32.mrf.mxu0 }
 0x465   : > { %5201 = vmatprep.subr.mxu0 %v4752_v30  ;;  %11642 = vst [vmem:[#allocation86_spill] sm:$0xff] %v10166_v5  ;;  %v4128_v30 = vadd.f32 %v9995_v26, %v11647_v33  ;;  %v4112_v5 = vadd.f32 %v11655_v56, %v11654_v61 }
 0x466   : > { %v10136_v38 = vpop.f32.mrf.mxu1  ;;  %5202 = vmatpush2.msra.mxu0 %v4751_v7  ;;  %v10170_v55 = vpop.f32.mrf.mxu0 }
 0x467   : > { %5203 = vmatprep.subr.mxu0 %v4748_v32  ;;  %11645 = vst [vmem:[#allocation133_spill] sm:$0xff] %v10170_v55 }
 0x468   : > { %v10141_v15 = vpop.f32.mrf.mxu1  ;;  %5204 = vmatpush2.msra.mxu0 %v4747_v19  ;;  %v10172_v42 = vpop.f32.mrf.mxu0  ;;  %v11649_v19 = vld [vmem:[#allocation38_spill] sm:$0xff] }
 0x469   : > { %5205 = vmatprep.subr.mxu0 %v4744_v43  ;;  %11646 = vst [vmem:[#allocation131_spill] sm:$0xff] %v10172_v42  ;;  %v4124_v43 = vadd.f32 %v9993_v62, %v11649_v19  ;;  %v11656_v62 = vld [vmem:[#allocation5_spill] sm:$0xff] }
 0x46a   : > { %v10143_v45 = vpop.f32.mrf.mxu1  ;;  %5206 = vmatpush2.msra.mxu0 %v4743_v3  ;;  %v10176_v7 = vpop.f32.mrf.mxu0  ;;  %v4130_v3 = vadd.f32 %v9997_v28, %v11647_v33 }
 0x46b   : > { %5208 = vmatmul.mubr.f32.vlgmr.msra.gmra.mxu0 %v6432_v20  ;;  %11648 = vst [vmem:[#allocation85_spill] sm:$0xff] %v10176_v7  ;;  %v4122_v20 = vadd.f32 %v9991_v10, %v11649_v19 }
 0x46c   : > { %v10148_v9 = vpop.f32.mrf.mxu1  ;;  %5213 = vmatprep.mubr.f32.mxu0 %v11634_v14  ;;  %v10192_v28 = vpop.f32.mrf.mxu0 }
 0x46d   : > { %11657 = vst [vmem:[#allocation130_spill] sm:$0xff] %v10192_v28 }
 0x46e   : > { %v10151_v23 = vpop.f32.mrf.mxu1 }
 0x46f   : > { %5214 = vmatmul.mubr.f32.gmra.mxu0 %v11635_v24 }
 0x470   : > { %v10156_v8 = vpop.f32.mrf.mxu1  ;;  %5219 = vmatprep.mubr.f32.mxu0 %v11637_v49  ;;  %v11650_v49 = vld [vmem:[#allocation49_spill] sm:$0xff] }
 0x471   : > { %v4116_v55 = vadd.f32 %v11656_v62, %v11650_v49  ;;  %v11663_v62 = vld [vmem:[#allocation132_spill] sm:$0xff] }
 0x472   : > { %v10159_v31 = vpop.f32.mrf.mxu1 }
 0x473   : > { %5220 = vmatmul.mubr.f32.gmra.mxu0 %v11638_v27  ;;  %v11651_v27 = vld [vmem:[#allocation115_spill] sm:$0xff] }
 0x474   : > { %v4552_v16 = vpop.f32.mrf.mxu1  ;;  %5225 = vmatprep.mubr.f32.mxu0 %v11640_v18  ;;  %v4118_v18 = vadd.f32 %v11651_v27, %v11650_v49 }
 0x476   : > { %v4554_v63 = vpop.f32.mrf.mxu1 }
 0x477   : > { %5226 = vmatmul.mubr.f32.gmra.mxu0 %v11641_v4  ;;  %v11652_v4 = vld [vmem:[#allocation136_spill] sm:$0xff] }
 0x478   : > { %v4558_v54 = vpop.f32.mrf.mxu1  ;;  %5231 = vmatprep.mubr.f32.mxu0 %v11643_v37  ;;  %v11653_v37 = vld [vmem:[#allocation112_spill] sm:$0xff] }
 0x479   : > { %v4134_v26 = vadd.f32 %v11653_v37, %v11652_v4  ;;  %v11660_v37 = vld [vmem:[#allocation96_spill] sm:$0xff] }
 0x47a   : > { %v4560_v60 = vpop.f32.mrf.mxu1 }
 0x47b   : > { %5232 = vmatmul.mubr.f32.gmra.mxu0 %v11644_v1 }
 0x47c   : > { %v4564_v53 = vpop.f32.mrf.mxu1 }
 0x47e   : > { %v4566_v6 = vpop.f32.mrf.mxu1 }
 0x47f   : > { %v4567_v19 = vadd.f32 %v4566_v6, %v4118_v18  ;;  %v11666_v6 = vld [vmem:[#allocation80_spill] sm:$0xff] }
 0x480   : > { %v4570_v29 = vpop.f32.mrf.mxu1 }
 0x481   : > { %v4571_v33 = vadd.f32 %v4570_v29, %v4122_v20  ;;  %v4140_v29 = vadd.f32 %v10035_v41, %v11663_v62  ;;  %v4561_v20 = vadd.f32 %v4560_v60, %v4112_v5  ;;  %v4142_v41 = vadd.f32 %v10054_v51, %v11663_v62 }
 0x482   : > { %v4572_v13 = vpop.f32.mrf.mxu1  ;;  %v4860_v60 = vmax.f32 %v4567_v19, 0.0 }
 0x483   : > { %v4573_v1 = vadd.f32 %v4572_v13, %v4124_v43  ;;  %v11661_v13 = vld [vmem:[#allocation100_spill] sm:$0xff] }
 0x484   : > { %v4576_v32 = vpop.f32.mrf.mxu1  ;;  %v4106_v43 = vadd.f32 %v11661_v13, %v11660_v37 }
 0x485   : > { %v4577_v14 = vadd.f32 %v4576_v32, %v4128_v30  ;;  %v11658_v30 = vld [vmem:[#allocation137_spill] sm:$0xff]  ;;  %v4864_v28 = vmax.f32 %v4573_v1, 0.0  ;;  %v11668_v1 = vld [vmem:[#allocation47_spill] sm:$0xff] }
 0x486   : > { %v4578_v24 = vpop.f32.mrf.mxu1  ;;  %v4136_v32 = vadd.f32 %v11658_v30, %v11652_v4  ;;  %v11667_v4 = vld [vmem:[#allocation63_spill] sm:$0xff]  ;;  %v4555_v5 = vadd.f32 %v4554_v63, %v4106_v43  ;;  %v11669_v30 = vld [vmem:[#allocation46_spill] sm:$0xff]  ;;  %v4856_v63 = vmax.f32 %v4561_v20, 0.0  ;;  %v11673_v43 = vld [vmem:[#allocation45_spill] sm:$0xff] }
 0x487   : > { %v4579_v22 = vadd.f32 %v4578_v24, %v4130_v3  ;;  %v11662_v3 = vld [vmem:[#allocation43_spill] sm:$0xff]  ;;  %v4565_v24 = vadd.f32 %v4564_v53, %v4116_v55  ;;  %v4867_v7 = vmax.f32 %v4577_v14, 0.0  ;;  %v4863_v55 = vmax.f32 %v4571_v33, 0.0 }
 0x488   : > { %v4582_v10 = vpop.f32.mrf.mxu1  ;;  %v4110_v56 = vadd.f32 %v11662_v3, %v11654_v61  ;;  %v11671_v33 = vld [vmem:[#allocation51_spill] sm:$0xff]  ;;  %v4852_v20 = vmax.f32 %v4555_v5, 0.0 }
 0x489   : > { %v4868_v27 = vmax.f32 %v4579_v22, 0.0  ;;  %v10196_v42 = vadd.f32 %v4582_v10, %v4134_v26  ;;  %v11665_v22 = vld [vmem:[#allocation25_spill] sm:$0xff]  ;;  %v4104_v26 = vadd.f32 %v11667_v4, %v11660_v37  ;;  %v10210_v10 = vpop.f32.mrf.mxu0  ;;  %v4859_v3 = vmax.f32 %v4565_v24, 0.0  ;;  %v11676_v4 = vld [vmem:[#allocation60_spill] sm:$0xff] }
 0x48a   : > { %v4584_v49 = vpop.f32.mrf.mxu1  ;;  %v4100_v18 = vadd.f32 %v11666_v6, %v11665_v22  ;;  %v4559_v61 = vadd.f32 %v4558_v54, %v4110_v56 }
 0x48b   : > { %11659 = vst [vmem:[#allocation22_spill] sm:$0xff] %v10196_v42  ;;  %v10204_v35 = vadd.f32 %v4584_v49, %v4136_v32  ;;  %5238 = vmatprep.subr.mxu1 %v4868_v27  ;;  %v4094_v32 = vadd.f32 %v11669_v30, %v11668_v1  ;;  %v11670_v27 = vld [vmem:[#allocation105_spill] sm:$0xff]  ;;  %v4553_v13 = vadd.f32 %v4552_v16, %v4104_v26  ;;  %v11674_v49 = vld [vmem:[#allocation64_spill] sm:$0xff]  ;;  %v11679_v30 = vld [vmem:[#allocation111_spill] sm:$0xff] }
 0x48c   : > { %v4588_v53 = vpop.f32.mrf.mxu1  ;;  %5239 = vmatpush1.msra.mxu1 %v4867_v7  ;;  %v4098_v37 = vadd.f32 %v11670_v27, %v11665_v22  ;;  %v4146_v7 = vadd.f32 %v10076_v47, %v11671_v33  ;;  %v4549_v51 = vadd.f32 %v10159_v31, %v4100_v18  ;;  %v4092_v62 = vadd.f32 %v11674_v49, %v11668_v1  ;;  %v11675_v18 = vld [vmem:[#allocation20_spill] sm:$0xff] }
 0x48d   : > { %11664 = vst [vmem:[#allocation54_spill] sm:$0xff] %v10204_v35  ;;  %v10214_v14 = vadd.f32 %v4588_v53, %v4140_v29  ;;  %5240 = vmatprep.subr.mxu1 %v4864_v28  ;;  %v11672_v28 = vld [vmem:[#allocation15_spill] sm:$0xff]  ;;  %v10229_v29 = vpop.f32.mrf.mxu0  ;;  %v4855_v24 = vmax.f32 %v4559_v61, 0.0  ;;  %v4148_v47 = vadd.f32 %v10096_v25, %v11671_v33  ;;  %v4543_v31 = vadd.f32 %v10151_v23, %v4094_v32 }
 0x48e   : > { %v4590_v54 = vpop.f32.mrf.mxu1  ;;  %5241 = vmatpush1.msra.mxu1 %v4863_v55  ;;  %v4088_v56 = vadd.f32 %v11673_v43, %v11672_v28  ;;  %v4547_v16 = vadd.f32 %v10156_v8, %v4098_v37  ;;  %v4082_v26 = vadd.f32 %v11676_v4, %v11675_v18  ;;  %v11677_v55 = vld [vmem:[#allocation109_spill] sm:$0xff]  ;;  %v4541_v8 = vadd.f32 %v10148_v9, %v4092_v62  ;;  %v11680_v32 = vld [vmem:[#allocation39_spill] sm:$0xff] }
 0x48f   : > { %v10223_v19 = vadd.f32 %v4590_v54, %v4142_v41  ;;  %5242 = vmatprep.subr.mxu1 %v4860_v60  ;;  %v4086_v53 = vadd.f32 %v11677_v55, %v11672_v28  ;;  %v4851_v61 = vmax.f32 %v4553_v13, 0.0  ;;  %v11678_v60 = vld [vmem:[#allocation26_spill] sm:$0xff]  ;;  %v4848_v5 = vmax.f32 %v4549_v51, 0.0  ;;  %v11681_v37 = vld [vmem:[#allocation79_spill] sm:$0xff]  ;;  %v10251_v54 = vpop.f32.mrf.mxu0  ;;  %v11683_v28 = vld [vmem:[#allocation17_spill] sm:$0xff] }
 0x490   : > { %v4594_v22 = vpop.f32.mrf.mxu1  ;;  %5243 = vmatpush1.msra.mxu1 %v4859_v3  ;;  %v4152_v25 = vadd.f32 %v10107_v57, %v11678_v60  ;;  %v4537_v23 = vadd.f32 %v10143_v45, %v4088_v56  ;;  %v4076_v27 = vadd.f32 %v11680_v32, %v11679_v30  ;;  %v4080_v3 = vadd.f32 %v11681_v37, %v11675_v18  ;;  %v11684_v56 = vld [vmem:[#allocation40_spill] sm:$0xff] }
 0x491   : > { %v10235_v6 = vadd.f32 %v4594_v22, %v4146_v7  ;;  %5244 = vmatprep.subr.mxu1 %v4856_v63  ;;  %v4535_v9 = vadd.f32 %v10141_v15, %v4086_v53  ;;  %v4847_v13 = vmax.f32 %v4547_v16, 0.0  ;;  %v4154_v57 = vadd.f32 %v10116_v34, %v11678_v60  ;;  %v11682_v63 = vld [vmem:[#allocation116_spill] sm:$0xff]  ;;  %v10271_v18 = vpop.f32.mrf.mxu0 }
 0x492   : > { %v4596_v41 = vpop.f32.mrf.mxu1  ;;  %5245 = vmatpush1.msra.mxu1 %v4855_v24  ;;  %v4531_v45 = vadd.f32 %v10136_v38, %v4082_v26  ;;  %v4844_v7 = vmax.f32 %v4543_v31, 0.0  ;;  %v4070_v43 = vadd.f32 %v11683_v28, %v11682_v63  ;;  %v4074_v49 = vadd.f32 %v11684_v56, %v11679_v30  ;;  %v11685_v24 = vld [vmem:[#allocation108_spill] sm:$0xff]  ;;  %v11686_v31 = vld [vmem:[#allocation35_spill] sm:$0xff] }
 0x493   : > { %v10245_v1 = vadd.f32 %v4596_v41, %v4148_v47  ;;  %5246 = vmatprep.subr.mxu1 %v4852_v20  ;;  %v4529_v15 = vadd.f32 %v10133_v44, %v4080_v3  ;;  %v4843_v62 = vmax.f32 %v4541_v8, 0.0  ;;  %v4158_v34 = vadd.f32 %v10131_v36, %v11685_v24 }
 0x494   : > { %v4600_v33 = vpop.f32.mrf.mxu1  ;;  %5247 = vmatpush1.msra.mxu1 %v4851_v61  ;;  %v4525_v38 = vadd.f32 %v10126_v58, %v4076_v27  ;;  %v4840_v22 = vmax.f32 %v4537_v23, 0.0  ;;  %v4068_v20 = vadd.f32 %v11686_v31, %v11682_v63  ;;  %v4523_v4 = vadd.f32 %v10119_v0, %v4074_v49  ;;  %v10282_v0 = vpop.f32.mrf.mxu0 }
 0x495   : > { %v10257_v51 = vadd.f32 %v4600_v33, %v4152_v25  ;;  %5248 = vmatprep.subr.mxu1 %v4848_v5  ;;  %v4839_v44 = vmax.f32 %v4535_v9, 0.0  ;;  %v4160_v55 = vadd.f32 %v10139_v50, %v11685_v24  ;;  %v4519_v36 = vadd.f32 %v10111_v2, %v4070_v43 }
 0x496   : > { %v4602_v16 = vpop.f32.mrf.mxu1  ;;  %5249 = vmatpush1.msra.mxu1 %v4847_v13  ;;  %v4836_v58 = vmax.f32 %v4531_v45, 0.0  ;;  %v4517_v8 = vadd.f32 %v10109_v11, %v4068_v20  ;;  %v4835_v61 = vmax.f32 %v4529_v15, 0.0  ;;  %v4832_v60 = vmax.f32 %v4525_v38, 0.0  ;;  %v10289_v32 = vpop.f32.mrf.mxu0 }
 0x497   : > { %v10267_v47 = vadd.f32 %v4602_v16, %v4154_v57  ;;  %5250 = vmatprep.subr.mxu1 %v4844_v7  ;;  %v4831_v23 = vmax.f32 %v4523_v4, 0.0  ;;  %v4828_v2 = vmax.f32 %v4519_v36, 0.0  ;;  %v4824_v11 = vmax.f32 %v10105_v52, 0.0 }
 0x498   : > { %v4606_v26 = vpop.f32.mrf.mxu1  ;;  %5251 = vmatpush1.msra.mxu1 %v4843_v62  ;;  %v4827_v50 = vmax.f32 %v4517_v8, 0.0  ;;  %v4823_v27 = vmax.f32 %v10102_v59, 0.0  ;;  %v4820_v3 = vmax.f32 %v10092_v12, 0.0  ;;  %v4819_v9 = vmax.f32 %v10082_v17, 0.0  ;;  %v4205_v52 = vpop.f32.mrf.mxu0 }
 0x499   : > { %v10277_v53 = vadd.f32 %v4606_v26, %v4158_v34  ;;  %5252 = vmatprep.subr.mxu1 %v4840_v22  ;;  %v4816_v33 = vmax.f32 %v10070_v39, 0.0  ;;  %v4815_v57 = vmax.f32 %v10060_v40, 0.0  ;;  %v4812_v59 = vmax.f32 %v10048_v21, 0.0  ;;  %v11687_v39 = vld [vmem:[#allocation87_spill] sm:$0xff] }
 0x49a   : > { %v4608_v41 = vpop.f32.mrf.mxu1  ;;  %5253 = vmatpush1.msra.mxu1 %v4839_v44  ;;  %v4811_v12 = vmax.f32 %v10039_v46, 0.0  ;;  %v4808_v17 = vmax.f32 %v10029_v48, 0.0  ;;  %v4207_v63 = vpop.f32.mrf.mxu0  ;;  %v4807_v28 = vmax.f32 %v11687_v39, 0.0 }
 0x49b   : > { %v10280_v25 = vadd.f32 %v4608_v41, %v4160_v55  ;;  %5254 = vmatprep.subr.mxu1 %v4836_v58  ;;  %v11688_v58 = vld [vmem:[#allocation50_spill] sm:$0xff]  ;;  %v11689_v41 = vld [vmem:[#allocation33_spill] sm:$0xff] }
 0x49c   : > { %v10284_v5 = vpop.f32.mrf.mxu1  ;;  %5255 = vmatpush1.msra.mxu1 %v4835_v61  ;;  %v4211_v21 = vpop.f32.mrf.mxu0 }
 0x49d   : > { %5256 = vmatprep.subr.mxu1 %v4832_v60 }
 0x49e   : > { %v10286_v30 = vpop.f32.mrf.mxu1  ;;  %5257 = vmatpush1.msra.mxu1 %v4831_v23  ;;  %v4213_v49 = vpop.f32.mrf.mxu0 }
 0x49f   : > { %5258 = vmatprep.subr.mxu1 %v4828_v2 }
 0x4a0   : > { %v10292_v37 = vpop.f32.mrf.mxu1  ;;  %5259 = vmatpush1.msra.mxu1 %v4827_v50  ;;  %v4217_v62 = vpop.f32.mrf.mxu0 }
 0x4a1   : > { %5260 = vmatprep.subr.mxu1 %v4824_v11  ;;  %v4218_v2 = vadd.f32 %v4217_v62, %v11689_v41 }
 0x4a2   : > { %v10296_v13 = vpop.f32.mrf.mxu1  ;;  %5261 = vmatpush1.msra.mxu1 %v4823_v27  ;;  %v4219_v34 = vpop.f32.mrf.mxu0 }
 0x4a3   : > { %5262 = vmatprep.subr.mxu1 %v4820_v3  ;;  %v4220_v60 = vadd.f32 %v4219_v34, %v11689_v41  ;;  %v11690_v3 = vld [vmem:[#allocation121_spill] sm:$0xff] }
 0x4a4   : > { %v10300_v45 = vpop.f32.mrf.mxu1  ;;  %5263 = vmatpush1.msra.mxu1 %v4819_v9  ;;  %v4223_v31 = vpop.f32.mrf.mxu0  ;;  %v4214_v9 = vadd.f32 %v4213_v49, %v11690_v3 }
 0x4a5   : > { %5264 = vmatprep.subr.mxu1 %v4816_v33  ;;  %v4224_v8 = vadd.f32 %v4223_v31, %v11688_v58 }
 0x4a6   : > { %v10304_v7 = vpop.f32.mrf.mxu1  ;;  %5265 = vmatpush1.msra.mxu1 %v4815_v57  ;;  %v4225_v44 = vpop.f32.mrf.mxu0 }
 0x4a7   : > { %5266 = vmatprep.subr.mxu1 %v4812_v59  ;;  %v4226_v23 = vadd.f32 %v4225_v44, %v11688_v58  ;;  %v4212_v59 = vadd.f32 %v4211_v21, %v11690_v3  ;;  %v11692_v44 = vld [vmem:[#allocation129_spill] sm:$0xff] }
 0x4a8   : > { %v10308_v43 = vpop.f32.mrf.mxu1  ;;  %5267 = vmatpush1.msra.mxu1 %v4811_v12  ;;  %v5019_v36 = vpop.f32.mrf.mxu0  ;;  %v4202_v62 = vadd.f32 %v10289_v32, %v11692_v44 }
 0x4a9   : > { %5268 = vmatprep.subr.mxu1 %v4808_v17 }
 0x4aa   : > { %v10310_v40 = vpop.f32.mrf.mxu1  ;;  %5269 = vmatpush1.msra.mxu1 %v4807_v28  ;;  %v5021_v27 = vpop.f32.mrf.mxu0  ;;  %v11691_v28 = vld [vmem:[#allocation125_spill] sm:$0xff] }
 0x4ab   : > { %v4208_v31 = vadd.f32 %v4207_v63, %v11691_v28  ;;  %v4206_v58 = vadd.f32 %v4205_v52, %v11691_v28  ;;  %v4200_v63 = vadd.f32 %v10282_v0, %v11692_v44  ;;  %v11693_v52 = vld [vmem:[#allocation92_spill] sm:$0xff]  ;;  %v11698_v44 = vld [vmem:[#allocation11_spill] sm:$0xff] }
 0x4ac   : > { %v10312_v56 = vpop.f32.mrf.mxu1  ;;  %v5025_v39 = vpop.f32.mrf.mxu0 }
 0x4ae   : > { %v10314_v46 = vpop.f32.mrf.mxu1 }
 0x4b0   : > { %v10316_v15 = vpop.f32.mrf.mxu1 }
 0x4b2   : > { %v10318_v48 = vpop.f32.mrf.mxu1 }
 0x4b4   : > { %v4648_v16 = vpop.f32.mrf.mxu1 }
 0x4b6   : > { %v4650_v24 = vpop.f32.mrf.mxu1 }
 0x4b8   : > { %v4654_v38 = vpop.f32.mrf.mxu1 }
 0x4ba   : > { %v4656_v22 = vpop.f32.mrf.mxu1 }
 0x4bc   : > { %v4660_v20 = vpop.f32.mrf.mxu1 }
 0x4be   : > { %v4662_v4 = vpop.f32.mrf.mxu1 }
 0x4bf   : > { %v4663_v42 = vadd.f32 %v4662_v4, %v4214_v9  ;;  %v4655_v4 = vadd.f32 %v4654_v38, %v4206_v58 }
 0x4c0   : > { %v4666_v26 = vpop.f32.mrf.mxu1 }
 0x4c1   : > { %v4667_v12 = vadd.f32 %v4666_v26, %v4218_v2 }
 0x4c2   : > { %v4668_v55 = vpop.f32.mrf.mxu1 }
 0x4c3   : > { %v4669_v33 = vadd.f32 %v4668_v55, %v4220_v60  ;;  %v4657_v55 = vadd.f32 %v4656_v22, %v4208_v31  ;;  %v5027_v60 = vpop.f32.mrf.mxu0  ;;  %v4924_v22 = vmax.f32 %v4663_v42, 0.0 }
 0x4c4   : > { %v4672_v61 = vpop.f32.mrf.mxu1 }
 0x4c5   : > { %v4673_v50 = vadd.f32 %v4672_v61, %v4224_v8  ;;  %v4661_v8 = vadd.f32 %v4660_v20, %v4212_v59  ;;  %v4928_v41 = vmax.f32 %v4669_v33, 0.0  ;;  %v4196_v20 = vadd.f32 %v10271_v18, %v11693_v52  ;;  %v5031_v38 = vpop.f32.mrf.mxu0  ;;  %v11696_v59 = vld [vmem:[#allocation130_spill] sm:$0xff] }
 0x4c6   : > { %v4674_v11 = vpop.f32.mrf.mxu1  ;;  %v4920_v18 = vmax.f32 %v4657_v55, 0.0 }
 0x4c7   : > { %v4675_v57 = vadd.f32 %v4674_v11, %v4226_v23  ;;  %v4931_v61 = vmax.f32 %v4673_v50, 0.0  ;;  %v4651_v23 = vadd.f32 %v4650_v24, %v4202_v62  ;;  %v4649_v50 = vadd.f32 %v4648_v16, %v4200_v63  ;;  %v11699_v62 = vld [vmem:[#allocation131_spill] sm:$0xff] }
 0x4c8   : > { %v5114_v17 = vpop.f32.mrf.mxu1  ;;  %v4923_v11 = vmax.f32 %v4661_v8, 0.0  ;;  %v4645_v9 = vadd.f32 %v10318_v48, %v4196_v20  ;;  %v4919_v16 = vmax.f32 %v4655_v4, 0.0  ;;  %v4178_v58 = vadd.f32 %v11699_v62, %v11698_v44  ;;  %v6435_v62 = vld [vmem:[%s6547_s18 + $0x30] sm:$0xff] }
 0x4c9   : > { %v4932_v34 = vmax.f32 %v4675_v57, 0.0  ;;  %v5115_v35 = vadd.f32 %v5114_v17, %v5019_v36  ;;  %v4927_v36 = vmax.f32 %v4667_v12, 0.0  ;;  %v11695_v57 = vld [vmem:[#allocation59_spill] sm:$0xff]  ;;  %v4916_v48 = vmax.f32 %v4651_v23, 0.0 }
 0x4ca   : > { %v5116_v49 = vpop.f32.mrf.mxu1  ;;  %v4184_v12 = vadd.f32 %v11696_v59, %v11695_v57  ;;  %v4915_v31 = vmax.f32 %v4649_v50, 0.0  ;;  %v4627_v4 = vadd.f32 %v10304_v7, %v4178_v58  ;;  %v6436_v58 = vld [vmem:[%s6547_s18 + $0x58] sm:$0xff] }
 0x4cb   : > { %5270 = vmatprep.subr.mxu1 %v4932_v34  ;;  %v5384_v21 = vrot.slane %v5115_v35, 4  ;;  %5337 = vrot.lane.b32.xlu0 %v5115_v35, %s6452_s16  ;;  %v5117_v26 = vadd.f32 %v5116_v49, %v5021_v27  ;;  %v4194_v35 = vadd.f32 %v10251_v54, %v11693_v52  ;;  %v11694_v27 = vld [vmem:[#allocation30_spill] sm:$0xff]  ;;  %v11700_v49 = vld [vmem:[#allocation133_spill] sm:$0xff] }
 0x4cc   : > { %5271 = vmatpush2.msra.mxu1 %v4931_v61  ;;  %v5120_v32 = vpop.f32.mrf.mxu1  ;;  %v4190_v3 = vadd.f32 %v10229_v29, %v11694_v27  ;;  %v4188_v24 = vadd.f32 %v10210_v10, %v11694_v27  ;;  %v4633_v8 = vadd.f32 %v10310_v40, %v4184_v12  ;;  %v4176_v55 = vadd.f32 %v11700_v49, %v11698_v44  ;;  %v6434_v44 = vld [vmem:[%s6547_s18 + $0x38] sm:$0xff] }
 0x4cd   : > { %5272 = vmatprep.subr.mxu1 %v4928_v41  ;;  %v5385_v2 = vrot.slane %v5117_v26, 4  ;;  %5339 = vrot.lane.b32.xlu1 %v5117_v26, %s6452_s16  ;;  %v5121_v42 = vadd.f32 %v5120_v32, %v5025_v39  ;;  %v4643_v54 = vadd.f32 %v10316_v15, %v4194_v35  ;;  %v11697_v39 = vld [vmem:[#allocation85_spill] sm:$0xff]  ;;  %v5033_v15 = vpop.f32.mrf.mxu0  ;;  %v11702_v26 = vld [vmem:[#allocation86_spill] sm:$0xff] }
 0x4ce   : > { %5273 = vmatpush2.msra.mxu1 %v4927_v36  ;;  %v5122_v0 = vpop.f32.mrf.mxu1  ;;  %v4639_v29 = vadd.f32 %v10314_v46, %v4190_v3  ;;  %v4182_v28 = vadd.f32 %v11697_v39, %v11695_v57  ;;  %v4637_v10 = vadd.f32 %v10312_v56, %v4188_v24  ;;  %v4912_v46 = vmax.f32 %v4645_v9, 0.0  ;;  %v11703_v32 = vld [vmem:[#allocation134_spill] sm:$0xff]  ;;  %v6440_v49 = vld [vmem:[%s6547_s18 + $0x98] sm:$0xf] }
 0x4cf   : > { %5274 = vmatprep.subr.mxu1 %v4924_v22  ;;  %5388 = vrot.lane.b32.xlu0 %v5384_v21, %s6453_s19  ;;  %v5123_v17 = vadd.f32 %v5122_v0, %v5027_v60  ;;  %v5488_v61 = vrot.slane %v5121_v42, 4  ;;  %v4911_v41 = vmax.f32 %v4643_v54, 0.0  ;;  %v11701_v21 = vld [vmem:[#allocation67_spill] sm:$0xff]  ;;  %v4625_v52 = vadd.f32 %v10300_v45, %v4176_v55  ;;  %v11704_v22 = vld [vmem:[#allocation41_spill] sm:$0xff]  ;;  %v6441_v55 = vld [vmem:[%s6547_s18 + $0x90] sm:$0xf] }
 0x4d0   : > { %5275 = vmatpush2.msra.mxu1 %v4923_v11  ;;  %v5126_v33 = vpop.f32.mrf.mxu1  ;;  %v4631_v56 = vadd.f32 %v10308_v43, %v4182_v28  ;;  %v4172_v63 = vadd.f32 %v11702_v26, %v11701_v21  ;;  %v4908_v36 = vmax.f32 %v4639_v29, 0.0  ;;  %v4170_v60 = vadd.f32 %v11703_v32, %v11701_v21  ;;  %v5037_v43 = vpop.f32.mrf.mxu0  ;;  %v11706_v0 = vld [vmem:[#allocation135_spill] sm:$0xff] }
 0x4d1   : > { %5276 = vmatprep.subr.mxu1 %v4920_v18  ;;  %5390 = vrot.lane.b32.xlu1 %v5385_v2, %s6453_s19  ;;  %v5489_v40 = vrot.slane %v5123_v17, 4  ;;  %v4907_v20 = vmax.f32 %v4637_v10, 0.0  ;;  %v11705_v2 = vld [vmem:[#allocation114_spill] sm:$0xff]  ;;  %v4904_v7 = vmax.f32 %v4633_v8, 0.0  ;;  %v10370_v11 = vadd.f32 %v5126_v33, %v5031_v38  ;;  %v6437_v8 = vld [vmem:[%s6547_s18 + $0x50] sm:$0xff] }
 0x4d2   : > { %5277 = vmatpush2.msra.mxu1 %v4919_v16  ;;  %v5128_v34 = vpop.f32.mrf.mxu1  ;;  %v4166_v35 = vadd.f32 %v11705_v2, %v11704_v22  ;;  %v4621_v50 = vadd.f32 %v10296_v13, %v4172_v63  ;;  %v4164_v27 = vadd.f32 %v11706_v0, %v11704_v22  ;;  %v4619_v45 = vadd.f32 %v10292_v37, %v4170_v60  ;;  %v5039_v38 = vpop.f32.mrf.mxu0 }
 0x4d3   : > { %5278 = vmatprep.subr.mxu1 %v4916_v48  ;;  %5440 = vrot.lane.b32.xlu0 %v5121_v42, %s6454_s22  ;;  %v4903_v3 = vmax.f32 %v4631_v56, 0.0  ;;  %v4900_v18 = vmax.f32 %v4627_v4, 0.0  ;;  %v10376_v42 = vadd.f32 %v5128_v34, %v5033_v15  ;;  %v4899_v24 = vmax.f32 %v4625_v52, 0.0 }
 0x4d4   : > { %5279 = vmatpush2.msra.mxu1 %v4915_v31  ;;  %v5132_v23 = vpop.f32.mrf.mxu1  ;;  %v4615_v9 = vadd.f32 %v10286_v30, %v4166_v35  ;;  %v4613_v13 = vadd.f32 %v10284_v5, %v4164_v27  ;;  %v4896_v16 = vmax.f32 %v4621_v50, 0.0  ;;  %v4895_v30 = vmax.f32 %v4619_v45, 0.0  ;;  %v5043_v59 = vpop.f32.mrf.mxu0 }
 0x4d5   : > { %5280 = vmatprep.subr.mxu1 %v4912_v46  ;;  %5442 = vrot.lane.b32.xlu1 %v5123_v17, %s6454_s22  ;;  %v5133_v37 = vadd.f32 %v5132_v23, %v5037_v43  ;;  %v4888_v29 = vmax.f32 %v10280_v25, 0.0  ;;  %v4887_v48 = vmax.f32 %v10277_v53, 0.0  ;;  %v4884_v17 = vmax.f32 %v10267_v47, 0.0  ;;  %v6438_v46 = vld [vmem:[%s6547_s18 + $0x78] sm:$0xff] }
 0x4d6   : > { %5281 = vmatpush2.msra.mxu1 %v4911_v41  ;;  %v5134_v54 = vpop.f32.mrf.mxu1  ;;  %v4892_v33 = vmax.f32 %v4615_v9, 0.0  ;;  %v4891_v5 = vmax.f32 %v4613_v13, 0.0  ;;  %v4883_v39 = vmax.f32 %v10257_v51, 0.0  ;;  %v5045_v28 = vpop.f32.mrf.mxu0  ;;  %v4880_v31 = vmax.f32 %v10245_v1, 0.0  ;;  %v11707_v1 = vld [vmem:[#allocation54_spill] sm:$0xff] }
 0x4d7   : > { %5282 = vmatprep.subr.mxu1 %v4908_v36  ;;  %5492 = vrot.lane.b32.xlu0 %v5488_v61, %s6455_s25  ;;  %v5135_v57 = vadd.f32 %v5134_v54, %v5039_v38  ;;  %v4879_v53 = vmax.f32 %v10235_v6, 0.0  ;;  %v4876_v47 = vmax.f32 %v10223_v19, 0.0  ;;  %v4875_v51 = vmax.f32 %v10214_v14, 0.0  ;;  %v11708_v6 = vld [vmem:[#allocation22_spill] sm:$0xff]  ;;  %v6433_v14 = vld [vmem:[%s6547_s18 + $0x10] sm:$0xff] }
 0x4d8   : > { %5283 = vmatpush2.msra.mxu1 %v4907_v20  ;;  %v5138_v12 = vpop.f32.mrf.mxu1  ;;  %v4872_v34 = vmax.f32 %v11707_v1, 0.0  ;;  %v4871_v19 = vmax.f32 %v11708_v6, 0.0  ;;  %v6439_v61 = vld [vmem:[%s6547_s18 + $0x70] sm:$0xff] }
 0x4d9   : > { %5284 = vmatprep.subr.mxu1 %v4904_v7  ;;  %5494 = vrot.lane.b32.xlu1 %v5489_v40, %s6455_s25  ;;  %v5139_v25 = vadd.f32 %v5138_v12, %v5043_v59  ;;  %v10452_v1 = vld [vmem:[%s10655_s2] ss:$8 sm:$0xf] }
 0x4da   : > { %5285 = vmatpush2.msra.mxu1 %v4903_v3  ;;  %v5140_v10 = vpop.f32.mrf.mxu1 }
 0x4db   : > { %5286 = vmatprep.subr.mxu1 %v4900_v18  ;;  %5575 = vrot.lane.b32.xlu0 %v10370_v11, %s6456_s13  ;;  %v5141_v15 = vadd.f32 %v5140_v10, %v5045_v28 }
 0x4dc   : > { %5287 = vmatpush2.msra.mxu1 %v4899_v24 }
 0x4dd   : > { %5288 = vmatprep.subr.mxu1 %v4896_v16  ;;  %5577 = vrot.lane.b32.xlu1 %v10376_v42, %s6456_s13 }
 0x4de   : > { %5289 = vmatpush2.msra.mxu1 %v4895_v30 }
 0x4df   : > { %5290 = vmatprep.subr.mxu1 %v4892_v33  ;;  %5639 = vrot.lane.b32.xlu0 %v5133_v37, %s6457_s20 }
 0x4e0   : > { %5291 = vmatpush2.msra.mxu1 %v4891_v5  ;;  %v5799_v5 = vld [vmem:[%s6542_s14] sm:$0xf] }
 0x4e1   : > { %5292 = vmatprep.subr.mxu1 %v4888_v29  ;;  %5641 = vrot.lane.b32.xlu1 %v5135_v57, %s6457_s20 }
 0x4e2   : > { %5293 = vmatpush2.msra.mxu1 %v4887_v48 }
 0x4e3   : > { %5294 = vmatprep.subr.mxu1 %v4884_v17  ;;  %5687 = vrot.lane.b32.xlu0 %v5133_v37, %s6458_s12 }
 0x4e4   : > { %5295 = vmatpush2.msra.mxu1 %v4883_v39 }
 0x4e5   : > { %5296 = vmatprep.subr.mxu1 %v4880_v31  ;;  %5689 = vrot.lane.b32.xlu1 %v5135_v57, %s6458_s12  ;;  %v5356_v31 = vlaneseq }
 0x4e6   : > { %5297 = vmatpush2.msra.mxu1 %v4879_v53 }
 0x4e7   : > { %5298 = vmatprep.subr.mxu1 %v4876_v47  ;;  %5751 = vrot.lane.b32.xlu0 %v5139_v25, %s6459_s21  ;;  %v10440_v53 = vshrl.u32 %v5356_v31, 7 }
 0x4e8   : > { %5299 = vmatpush2.msra.mxu1 %v4875_v51 }
 0x4e9   : > { %5300 = vmatprep.subr.mxu1 %v4872_v34  ;;  %5753 = vrot.lane.b32.xlu1 %v5141_v15, %s6459_s21  ;;  %v10445_v15 = vsub.s32 0, %v10440_v53  ;;  %v10457_v34 = vld [vmem:[%s10655_s2 + $0x1] ss:$8 sm:$0xf] }
 0x4ea   : > { %5301 = vmatpush2.msra.mxu1 %v4871_v19 }
 0x4eb   : > { %5303 = vmatmul.mubr.f32.vlgmr.msra.gmra.mxu1 %v6433_v14  ;;  %v5359_v19 = vrot.slane %v10452_v1, %v10445_v15  ;;  %v5411_v14 = vrot.slane %v10457_v34, %v10445_v15 }
 0x4ec   : > { %5308 = vmatprep.mubr.f32.mxu1 %v6434_v44 }
 0x4ef   : > { %5309 = vmatmul.mubr.f32.gmra.mxu1 %v6435_v62 }
 0x4f0   : > { %5314 = vmatprep.mubr.f32.mxu1 %v6436_v58  ;;  %v10470_v58 = vld [vmem:[%s10655_s2 + $0x2] ss:$8 sm:$0xf] }
 0x4f3   : > { %5315 = vmatmul.mubr.f32.gmra.mxu1 %v6437_v8 }
 0x4f4   : > { %5320 = vmatprep.mubr.f32.mxu1 %v6438_v46  ;;  %v10475_v46 = vsub.s32 1, %v10440_v53 }
 0x4f7   : > { %5321 = vmatmul.mubr.f32.gmra.mxu1 %v6439_v61 }
 0x4f8   : > { %5326 = vmatprep.mubr.f32.mxu1 %v6440_v49 }
 0x4fb   : > { %5327 = vmatmul.mubr.f32.gmra.mxu1 %v6441_v55  ;;  %v5463_v55 = vrot.slane %v10470_v58, %v10445_v15 }
 0x52b   : > { %v5209_v56 = vpop.f32.mrf.mxu0 }
 0x52d   : > { %v5211_v21 = vpop.f32.mrf.mxu0 }
 0x52f   : > { %v5215_v4 = vpop.f32.mrf.mxu0 }
 0x531   : > { %v5217_v60 = vpop.f32.mrf.mxu0 }
 0x533   : > { %v5221_v23 = vpop.f32.mrf.mxu0 }
 0x535   : > { %v5223_v35 = vpop.f32.mrf.mxu0 }
 0x537   : > { %v5227_v45 = vpop.f32.mrf.mxu0 }
 0x539   : > { %v5229_v13 = vpop.f32.mrf.mxu0 }
 0x53b   : > { %v5233_v54 = vpop.f32.mrf.mxu0 }
 0x53d   : > { %v5235_v30 = vpop.f32.mrf.mxu0  ;;  %v5338_v59 = vpop.permute.xlu0 %5337 }
 0x53e   : > { %v5353_v44 = vsel %vm5345_vm2, 0.0, %v5338_v59 }
 0x53f   : > { %v10432_v12 = vpop.permute.xlu1 %5339  ;;  %v5376_v61 = vmul.f32 %v5359_v19, %v5353_v44 }
 0x541   : > { %v5389_v29 = vpop.permute.xlu0 %5388 }
 0x542   : > { %v5404_v62 = vsel %vm5396_vm3, 0.0, %v5389_v29 }
 0x543   : > { %v10434_v48 = vpop.permute.xlu1 %5390  ;;  %v5428_v49 = vmul.f32 %v5411_v14, %v5404_v62  ;;  %v10544_v62 = vld [vmem:[%s10655_s2 + $0x20] ss:$8 sm:$0xf] }
 0x545   : > { %v5441_v17 = vpop.permute.xlu0 %5440 }
 0x547   : > { %v10436_v39 = vpop.permute.xlu1 %5442 }
 0x549   : > { %v5493_v28 = vpop.permute.xlu0 %5492 }
 0x54b   : > { %v10438_v10 = vpop.permute.xlu1 %5494 }
 0x54d   : > { %v5576_v25 = vpop.permute.xlu0 %5575 }
 0x54f   : > { %v10442_v47 = vpop.permute.xlu1 %5577 }
 0x551   : > { %v10447_v51 = vpop.permute.xlu0 %5639 }
 0x553   : > { %v10459_v6 = vpop.permute.xlu1 %5641 }
 0x555   : > { %v10472_v8 = vpop.permute.xlu0 %5687 }
 0x5ab   : > { %v5304_v41 = vpop.f32.mrf.mxu1 }
 0x5ac   : > { %v5305_v26 = vadd.f32 %v5304_v41, %v5209_v56  ;;  %v10482_v56 = vld [vmem:[%s10655_s2 + $0x3] ss:$8 sm:$0xf]  ;;  %v10484_v41 = vpop.permute.xlu1 %5689 }
 0x5ad   : > { %v5306_v63 = vpop.f32.mrf.mxu1 }
 0x5ae   : > { %5341 = vrot.lane.b32.xlu0 %v5305_v26, %s6452_s16  ;;  %v5307_v36 = vadd.f32 %v5306_v63, %v5211_v21  ;;  %v5386_v32 = vrot.slane %v5305_v26, 4  ;;  %v5456_v21 = vsel %vm5448_vm4, 0.0, %v5441_v17  ;;  %v5363_v26 = vrot.slane %v10452_v1, %v10475_v46 }
 0x5af   : > { %v5310_v40 = vpop.f32.mrf.mxu1  ;;  %v5415_v63 = vrot.slane %v10457_v34, %v10475_v46 }
 0x5b0   : > { %5343 = vrot.lane.b32.xlu1 %v5307_v36, %s6452_s16  ;;  %v5387_v20 = vrot.slane %v5307_v36, 4  ;;  %v5311_v43 = vadd.f32 %v5310_v40, %v5215_v4  ;;  %v5515_v4 = vrot.slane %v10482_v56, %v10445_v15  ;;  %v10496_v36 = vld [vmem:[%s10655_s2 + $0x4] ss:$8 sm:$0xf]  ;;  %v5346_v40 = vsel %vm5345_vm2, %v5338_v59, %v10432_v12 }
 0x5b1   : > { %v5312_v52 = vpop.f32.mrf.mxu1 }
 0x5b2   : > { %5392 = vrot.lane.b32.xlu0 %v5386_v32, %s6453_s19  ;;  %v5313_v2 = vadd.f32 %v5312_v52, %v5217_v60  ;;  %v5490_v7 = vrot.slane %v5311_v43, 4  ;;  %v5432_v32 = vadd.f32 %v5428_v49, %v5376_v61  ;;  %v5397_v60 = vsel %vm5396_vm3, %v5389_v29, %v10434_v48  ;;  %v10530_v29 = vld [vmem:[%s10655_s2 + $0x6] ss:$8 sm:$0xf] }
 0x5b3   : > { %v5316_v22 = vpop.f32.mrf.mxu1  ;;  %v5480_v52 = vmul.f32 %v5463_v55, %v5456_v21  ;;  %v5662_v44 = vrot.slane %v10530_v29, %v10445_v15  ;;  %v10547_v49 = vsub.s32 2, %v10440_v53  ;;  %v5648_v55 = vsel %vm5647_vm7, %v10447_v51, %v10459_v6 }
 0x5b4   : > { %5394 = vrot.lane.b32.xlu1 %v5387_v20, %s6453_s19  ;;  %v5491_v0 = vrot.slane %v5313_v2, 4  ;;  %v10416_v27 = vadd.f32 %v5316_v22, %v5221_v23  ;;  %v10502_v20 = vpop.permute.xlu0 %5751  ;;  %v10508_v23 = vld [vmem:[%s10655_s2 + $0x5] ss:$8 sm:$0xf]  ;;  %v10510_v22 = vpop.permute.xlu1 %5753 }
 0x5b5   : > { %v5318_v50 = vpop.f32.mrf.mxu1 }
 0x5b6   : > { %5444 = vrot.lane.b32.xlu0 %v5311_v43, %s6454_s22  ;;  %v10419_v9 = vadd.f32 %v5318_v50, %v5223_v35  ;;  %v5508_v43 = vsel %vm5500_vm5, 0.0, %v5493_v28  ;;  %v5377_v35 = vmul.f32 %v5363_v26, %v5346_v40  ;;  %v5429_v50 = vmul.f32 %v5415_v63, %v5397_v60 }
 0x5b7   : > { %v5322_v3 = vpop.f32.mrf.mxu1  ;;  %v10554_v26 = vsub.s32 3, %v10440_v53  ;;  %v5367_v60 = vrot.slane %v10452_v1, %v10547_v49 }
 0x5b8   : > { %5446 = vrot.lane.b32.xlu1 %v5313_v2, %s6454_s22  ;;  %v5323_v18 = vadd.f32 %v5322_v3, %v5227_v45  ;;  %v5546_v2 = vrot.slane %v10496_v36, %v10445_v15  ;;  %v5449_v45 = vsel %vm5448_vm4, %v5441_v17, %v10436_v39  ;;  %v5532_v3 = vmul.f32 %v5515_v4, %v5508_v43 }
 0x5b9   : > { %v5324_v24 = vpop.f32.mrf.mxu1  ;;  %v5550_v17 = vrot.slane %v10496_v36, %v10475_v46  ;;  %v5679_v43 = vmul.f32 %v5662_v44, %v5648_v55  ;;  %v5423_v51 = vrot.slane %v10457_v34, %v10554_v26 }
 0x5ba   : > { %5496 = vrot.lane.b32.xlu0 %v5490_v7, %s6455_s25  ;;  %v5325_v38 = vadd.f32 %v5324_v24, %v5229_v13  ;;  %v5467_v7 = vrot.slane %v10470_v58, %v10475_v46  ;;  %v5584_v24 = vsel %vm5583_vm6, %v5576_v25, %v10442_v47 }
 0x5bb   : > { %v5328_v16 = vpop.f32.mrf.mxu1  ;;  %v5564_v21 = vmul.f32 %v5550_v17, %v10376_v42  ;;  %v5419_v42 = vrot.slane %v10457_v34, %v10547_v49  ;;  %v5475_v34 = vrot.slane %v10470_v58, %v10554_v26 }
 0x5bc   : > { %5498 = vrot.lane.b32.xlu1 %v5491_v0, %s6455_s25  ;;  %v5329_v37 = vadd.f32 %v5328_v16, %v5233_v54  ;;  %v5484_v0 = vadd.f32 %v5480_v52, %v5432_v32  ;;  %v5433_v54 = vadd.f32 %v5429_v50, %v5377_v35  ;;  %v5481_v16 = vmul.f32 %v5467_v7, %v5449_v45 }
 0x5bd   : > { %v5330_v33 = vpop.f32.mrf.mxu1  ;;  %v5774_v32 = vrot.slane %v10544_v62, %v10445_v15  ;;  %v5696_v35 = vsel %vm5695_vm8, %v10472_v8, %v10484_v41  ;;  %v5371_v50 = vrot.slane %v10452_v1, %v10554_v26  ;;  %v5523_v8 = vrot.slane %v10482_v56, %v10547_v49 }
 0x5be   : > { %5579 = vrot.lane.b32.xlu0 %v10416_v27, %s6456_s13  ;;  %v5331_v57 = vadd.f32 %v5330_v33, %v5235_v30  ;;  %v5563_v30 = vmul.f32 %v5546_v2, %v10370_v11  ;;  %v5536_v33 = vadd.f32 %v5532_v3, %v5484_v0  ;;  %v5485_v25 = vadd.f32 %v5481_v16, %v5433_v54  ;;  %v10537_v11 = vld [vmem:[%s10655_s2 + $0x7] ss:$8 sm:$0xf] }
 0x5bf   : > { %v5710_v40 = vrot.slane %v10537_v11, %v10445_v15  ;;  %v5471_v3 = vrot.slane %v10470_v58, %v10547_v49 }
 0x5c0   : > { %5581 = vrot.lane.b32.xlu1 %v10419_v9, %s6456_s13 }
 0x5c2   : > { %5643 = vrot.lane.b32.xlu0 %v5323_v18, %s6457_s20 }
 0x5c4   : > { %5645 = vrot.lane.b32.xlu1 %v5325_v38, %s6457_s20 }
 0x5c6   : > { %5691 = vrot.lane.b32.xlu0 %v5323_v18, %s6458_s12  ;;  %v5598_v18 = vrot.slane %v10508_v23, %v10445_v15 }
 0x5c8   : > { %5693 = vrot.lane.b32.xlu1 %v5325_v38, %s6458_s12 }
 0x5ca   : > { %5755 = vrot.lane.b32.xlu0 %v5329_v37, %s6459_s21  ;;  %v5519_v37 = vrot.slane %v10482_v56, %v10475_v46 }
 0x5cc   : > { %5757 = vrot.lane.b32.xlu1 %v5331_v57, %s6459_s21  ;;  %v5501_v57 = vsel %vm5500_vm5, %v5493_v28, %v10438_v10  ;;  %v5567_v28 = vadd.f32 %v5563_v30, %v5536_v33  ;;  %v5606_v30 = vrot.slane %v10508_v23, %v10547_v49 }
 0x5cd   : > { %v5533_v19 = vmul.f32 %v5519_v37, %v5501_v57  ;;  %v5602_v37 = vrot.slane %v10508_v23, %v10475_v46 }
 0x5ce   : > { %5802 = vperm.xlu0 %6158, %v5799_v5   ;;  %v5615_v5 = vmul.f32 %v5598_v18, %v5584_v24 }
 0x5cf   : > { %v5537_v4 = vadd.f32 %v5533_v19, %v5485_v25  ;;  %v5558_v25 = vrot.slane %v10496_v36, %v10554_v26 }
 0x5d0   : > { %v5623_v14 = vrot.slane %v5615_v5, 4 }
 0x5d1   : > { %v5568_v55 = vadd.f32 %v5564_v21, %v5537_v4 }
 0x5d2   : > { %v5631_v52 = vadd.f32 %v5623_v14, %v5567_v28 }
 0x620   : > { %v5342_v13 = vpop.permute.xlu0 %5341 }
 0x621   : > { %v5347_v45 = vsel %vm5345_vm2, %v10432_v12, %v5342_v13  ;;  %v5527_v12 = vrot.slane %v10482_v56, %v10554_v26 }
 0x622   : > { %v5344_v38 = vpop.permute.xlu1 %5343  ;;  %v5378_v33 = vmul.f32 %v5367_v60, %v5347_v45  ;;  %v5727_v60 = vmul.f32 %v5710_v40, %v5696_v35  ;;  %v5666_v45 = vrot.slane %v10530_v29, %v10475_v46  ;;  %v5718_v40 = vrot.slane %v10537_v11, %v10547_v49 }
 0x623   : > { %v5348_v1 = vsel %vm5345_vm2, %v5342_v13, %v5344_v38  ;;  %v5610_v38 = vrot.slane %v10508_v23, %v10554_v26 }
 0x624   : > { %v5393_v59 = vpop.permute.xlu0 %5392  ;;  %v5379_v56 = vmul.f32 %v5371_v50, %v5348_v1 }
 0x625   : > { %v5398_v7 = vsel %vm5396_vm3, %v10434_v48, %v5393_v59 }
 0x626   : > { %v5395_v31 = vpop.permute.xlu1 %5394  ;;  %v5430_v54 = vmul.f32 %v5419_v42, %v5398_v7 }
 0x627   : > { %v5399_v0 = vsel %vm5396_vm3, %v5393_v59, %v5395_v31  ;;  %v5554_v31 = vrot.slane %v10496_v36, %v10547_v49 }
 0x628   : > { %v5445_v61 = vpop.permute.xlu0 %5444  ;;  %v5431_v16 = vmul.f32 %v5423_v51, %v5399_v0  ;;  %v5434_v28 = vadd.f32 %v5430_v54, %v5378_v33  ;;  %v5566_v0 = vmul.f32 %v5558_v25, %v10419_v9  ;;  %v5674_v9 = vrot.slane %v10530_v29, %v10554_v26 }
 0x629   : > { %v5450_v48 = vsel %vm5448_vm4, %v10436_v39, %v5445_v61  ;;  %v5565_v36 = vmul.f32 %v5554_v31, %v10416_v27  ;;  %v5670_v27 = vrot.slane %v10530_v29, %v10547_v49  ;;  %v5760_v33 = vsel %vm5759_vm9, %v10502_v20, %v10510_v22 }
 0x62a   : > { %v5447_v63 = vpop.permute.xlu1 %5446  ;;  %v5482_v57 = vmul.f32 %v5471_v3, %v5450_v48  ;;  %v5435_v23 = vadd.f32 %v5431_v16, %v5379_v56  ;;  %v5714_v3 = vrot.slane %v10537_v11, %v10475_v46  ;;  %v5778_v31 = vrot.slane %v10544_v62, %v10475_v46 }
 0x62b   : > { %v5451_v24 = vsel %vm5448_vm4, %v5445_v61, %v5447_v63  ;;  %v5683_v63 = vadd.f32 %v5679_v43, %v5631_v52  ;;  %v5722_v52 = vrot.slane %v10537_v11, %v10554_v26  ;;  %v5782_v25 = vrot.slane %v10544_v62, %v10547_v49 }
 0x62c   : > { %v5497_v2 = vpop.permute.xlu0 %5496  ;;  %v5483_v5 = vmul.f32 %v5475_v34, %v5451_v24  ;;  %v5486_v42 = vadd.f32 %v5482_v57, %v5434_v28  ;;  %v5791_v46 = vmul.f32 %v5774_v32, %v5760_v33 }
 0x62d   : > { %v5502_v13 = vsel %vm5500_vm5, %v10438_v10, %v5497_v2 }
 0x62e   : > { %v5499_v18 = vpop.permute.xlu1 %5498  ;;  %v5534_v14 = vmul.f32 %v5523_v8, %v5502_v13  ;;  %v5487_v51 = vadd.f32 %v5483_v5, %v5435_v23 }
 0x62f   : > { %v5503_v39 = vsel %vm5500_vm5, %v5497_v2, %v5499_v18 }
 0x630   : > { %v5580_v58 = vpop.permute.xlu0 %5579  ;;  %v5535_v44 = vmul.f32 %v5527_v12, %v5503_v39  ;;  %v5538_v34 = vadd.f32 %v5534_v14, %v5486_v42 }
 0x631   : > { %v5585_v59 = vsel %vm5583_vm6, %v10442_v47, %v5580_v58 }
 0x632   : > { %v5582_v17 = vpop.permute.xlu1 %5581  ;;  %v5616_v47 = vmul.f32 %v5602_v37, %v5585_v59  ;;  %v5539_v21 = vadd.f32 %v5535_v44, %v5487_v51  ;;  %v5569_v37 = vadd.f32 %v5565_v36, %v5538_v34 }
 0x633   : > { %v5586_v10 = vsel %vm5583_vm6, %v5580_v58, %v5582_v17  ;;  %v5591_v19 = vsel %vm5583_vm6, %v5582_v17, 0.0 }
 0x634   : > { %v5644_v61 = vpop.permute.xlu0 %5643  ;;  %v5617_v2 = vmul.f32 %v5606_v30, %v5586_v10  ;;  %v5618_v50 = vmul.f32 %v5610_v38, %v5591_v19  ;;  %v5624_v43 = vrot.slane %v5616_v47, 4  ;;  %v5570_v29 = vadd.f32 %v5566_v0, %v5539_v21 }
 0x635   : > { %v5649_v1 = vsel %vm5647_vm7, %v10459_v6, %v5644_v61  ;;  %v5786_v10 = vrot.slane %v10544_v62, %v10554_v26  ;;  %v6460_v26 = vmov 1983009808  }
 0x636   : > { %v5646_v7 = vpop.permute.xlu1 %5645  ;;  %v5625_v8 = vrot.slane %v5617_v2, 4  ;;  %v5626_v18 = vrot.slane %v5618_v50, 4  ;;  %v5632_v6 = vadd.f32 %v5624_v43, %v5568_v55  ;;  %v5680_v13 = vmul.f32 %v5666_v45, %v5649_v1 }
 0x637   : > { %v5650_v48 = vsel %vm5647_vm7, %v5644_v61, %v5646_v7  ;;  %v5655_v11 = vsel %vm5647_vm7, %v5646_v7, 0.0  ;;  %v5845_v42 = vunpack.c.l.s4 %v6460_v26 }
 0x638   : > { %v5692_v4 = vpop.permute.xlu0 %5691  ;;  %v5633_v38 = vadd.f32 %v5625_v8, %v5569_v37  ;;  %v5634_v56 = vadd.f32 %v5626_v18, %v5570_v29  ;;  %v5681_v57 = vmul.f32 %v5670_v27, %v5650_v48  ;;  %v5682_v5 = vmul.f32 %v5674_v9, %v5655_v11 }
 0x639   : > { %v5697_v35 = vsel %vm5695_vm8, %v10484_v41, %v5692_v4  ;;  %v5735_v41 = vrot.slane %v5727_v60, 4  ;;  %v5684_v23 = vadd.f32 %v5680_v13, %v5632_v6  ;;  %v5846_v7 = vunpack.c.0.s8 %v5845_v42 }
 0x63a   : > { %v5694_v24 = vpop.permute.xlu1 %5693  ;;  %v5728_v12 = vmul.f32 %v5714_v3, %v5697_v35  ;;  %v5685_v55 = vadd.f32 %v5681_v57, %v5633_v38  ;;  %v5686_v60 = vadd.f32 %v5682_v5, %v5634_v56  ;;  %v5837_v57 = vld [vmem:[%s10662_s9] sm:$0xff] }
 0x63b   : > { %v5698_v54 = vsel %vm5695_vm8, %v5692_v4, %v5694_v24  ;;  %v5703_v16 = vsel %vm5695_vm8, %v5694_v24, 0.0  ;;  %v5743_v61 = vadd.f32 %v5735_v41, %v5683_v63  ;;  %v5849_v15 = vsub.s32 %v5846_v7, %v10440_v53 }
 0x63c   : > { %v5729_v58 = vmul.f32 %v5718_v40, %v5698_v54  ;;  %v5730_v30 = vmul.f32 %v5722_v52, %v5703_v16  ;;  %v5756_v39 = vpop.permute.xlu0 %5755  ;;  %v5736_v17 = vrot.slane %v5728_v12, 4 }
 0x63d   : > { %v5761_v28 = vsel %vm5759_vm9, %v10510_v22, %v5756_v39  ;;  %v5795_v36 = vadd.f32 %v5791_v46, %v5743_v61 }
 0x63e   : > { %v5758_v59 = vpop.permute.xlu1 %5757  ;;  %v5737_v19 = vrot.slane %v5729_v58, 4  ;;  %v5738_v20 = vrot.slane %v5730_v30, 4  ;;  %v5744_v49 = vadd.f32 %v5736_v17, %v5684_v23  ;;  %v5792_v47 = vmul.f32 %v5778_v31, %v5761_v28 }
 0x63f   : > { %v5762_v14 = vsel %vm5759_vm9, %v5756_v39, %v5758_v59  ;;  %v5767_v44 = vsel %vm5759_vm9, %v5758_v59, 0.0 }
 0x640   : > { %v5745_v51 = vadd.f32 %v5737_v19, %v5685_v55  ;;  %v5746_v2 = vadd.f32 %v5738_v20, %v5686_v60  ;;  %v5793_v50 = vmul.f32 %v5782_v25, %v5762_v14  ;;  %v5794_v22 = vmul.f32 %v5786_v10, %v5767_v44 }
 0x641   : > { %v5796_v0 = vadd.f32 %v5792_v47, %v5744_v49 }
 0x642   : > { %v5797_v45 = vadd.f32 %v5793_v50, %v5745_v51  ;;  %v5798_v3 = vadd.f32 %v5794_v22, %v5746_v2 }
 0x649   : > { %v5803_v63 = vpop.permute.xlu0 %5802 }
 0x64a   : > { %v5805_v34 = vadd.f32 %v5803_v63, %v5795_v36  ;;  %v5806_v21 = vadd.f32 %v5803_v63, %v5796_v0  ;;  %v5807_v4 = vadd.f32 %v5803_v63, %v5797_v45  ;;  %v5808_v40 = vadd.f32 %v5803_v63, %v5798_v3 }
 0x64c   : > { %v5809_v62 = vadd.f32 2.0, %v5805_v34  ;;  %v5810_v32 = vadd.f32 2.0, %v5806_v21  ;;  %v5811_v52 = vadd.f32 2.0, %v5807_v4  ;;  %v5812_v43 = vadd.f32 2.0, %v5808_v40 }
 0x64d   : > { %v5842_v27 = vcombine.low %v5805_v34, %v5806_v21  ;;  %v5843_v9 = vcombine.low %v5807_v4, %v5808_v40 }
 0x64e   : > { %v6128_v35 = vmul.f32 -1.442695, %v5809_v62  ;;  %v6129_v8 = vmul.f32 -1.442695, %v5810_v32  ;;  %v6130_v18 = vmul.f32 -1.442695, %v5811_v52 }
 0x64f   : > { %v6131_v1 = vmul.f32 -1.442695, %v5812_v43  ;;  %v5850_v48 = vrot.slane %v5842_v27, %v5849_v15  ;;  %v5857_v24 = vrot.slane %v5843_v9, %v5849_v15 }
 0x650   : > { %6160 = vpow2.f32 %v6128_v35 }
 0x651   : > { %6162 = vpow2.f32 %v6129_v8  ;;  %v5858_v11 = vcombine.high %v5850_v48, %v5857_v24 }
 0x652   : > { %6164 = vpow2.f32 %v6130_v18 }
 0x653   : > { %6166 = vpow2.f32 %v6131_v1  ;;  %v5860_v59 = vadd.f32 %v5858_v11, %v5837_v57 }
 0x65d   : > { %v6161_v12 = vpop.eup %6160 }
 0x65e   : > { %v6163_v54 = vpop.eup %6162  ;;  %v5825_v53 = vadd.f32 1.0, %v6161_v12 }
 0x65f   : > { %v6165_v16 = vpop.eup %6164  ;;  %v5826_v37 = vadd.f32 1.0, %v6163_v54 }
 0x660   : > { %v6167_v29 = vpop.eup %6166  ;;  %v5827_v58 = vadd.f32 1.0, %v6165_v16  ;;  %6168 = vrcp.f32 %v5825_v53 }
 0x661   : > { %v5828_v30 = vadd.f32 1.0, %v6167_v29  ;;  %6170 = vrcp.f32 %v5826_v37 }
 0x662   : > { %6172 = vrcp.f32 %v5827_v58 }
 0x663   : > { %6174 = vrcp.f32 %v5828_v30 }
 0x66d   : > { %v6169_v41 = vpop.eup %6168 }
 0x66e   : > { %v6171_v33 = vpop.eup %6170 }
 0x66f   : > { %v6173_v6 = vpop.eup %6172  ;;  %v5865_v13 = vcombine.low %v6169_v41, %v6171_v33 }
 0x670   : > { %v6175_v39 = vpop.eup %6174 }
 0x671   : > { %v5866_v38 = vcombine.low %v6173_v6, %v6175_v39  ;;  %v5873_v56 = vrot.slane %v5865_v13, %v5849_v15 }
 0x673   : > { %v5880_v5 = vrot.slane %v5866_v38, %v5849_v15 }
 0x675   : > { %v5881_v17 = vcombine.low %v5873_v56, %v5880_v5 }
 0x677   : > { %v5883_v31 = vmul.f32 %v5881_v17, %v5860_v59 }
 0x679   : > { %5884 = vst [vmem:[%s10662_s9] sm:$0xff] %v5883_v31 }
 0x67a PF: > { %s19_s30 = sadd.s32 1, %s6448_s30  }
 0x67b   : > { %p16_p5 = scmp.ge.s32.totalorder %s19_s30, 4  }
 0x67d   :  { %18 = sbr.rel (!%p16_p5) target bundleno = 1 (0x1), region = 109 }

</bundles_post_ra>
